<compile_context>
chip_gen: v7x
topology: tpu7x:2x2x1
jax: 0.10.0
libtpu: 0.0.40
codegen_flags: <defaults>
</compile_context>

<pallas_src>
import jax
import jax.numpy as jnp
from jax import lax
from jax.experimental import pallas as pl
from jax.experimental.pallas import tpu as pltpu

F32 = jnp.float32
BF16 = jnp.bfloat16
_VMEM_LIMIT = 48 * 1024 * 1024


# ----------------------------- in-kernel helpers -----------------------------

def _zero_pad_borders(buf, H, W, C):
    K = 3 * C
    buf[0:1, :, :] = jnp.zeros((1, W, K), F32)
    buf[H + 1:H + 2, :, :] = jnp.zeros((1, W, K), F32)
    buf[1:H + 1, 0:1, 0:C] = jnp.zeros((H, 1, C), F32)
    buf[1:H + 1, W - 1:W, 2 * C:3 * C] = jnp.zeros((H, 1, C), F32)


def _scatter_dx(buf, h0, ch, W, C, y):
    # y: (ch, W, C) f32 -> dx-concatenated rows of the zero-padded buffer.
    buf[h0 + 1:h0 + 1 + ch, :, C:2 * C] = y                       # dx = 1 (centre)
    buf[h0 + 1:h0 + 1 + ch, 1:W, 0:C] = y[:, 0:W - 1, :]          # dx = 0 (shift right)
    buf[h0 + 1:h0 + 1 + ch, 0:W - 1, 2 * C:3 * C] = y[:, 1:W, :]  # dx = 2 (shift left)


def _conv3x3_bias_relu(buf_in, w_ref, b_row, h0, ch, W, K, Cout):
    acc = jnp.zeros((ch * W, Cout), F32)
    for dy in range(3):
        lhs = buf_in[h0 + dy:h0 + dy + ch, :, :].reshape(ch * W, K).astype(BF16)
        acc = acc + jnp.dot(lhs, w_ref[dy, :, :], preferred_element_type=F32)
    return jnp.maximum(acc + b_row, 0.0)


def _two_conv_passes(buf1, buf2, w1_ref, b1_ref, w2_ref, b2_ref, o_ref,
                     H, W, Cin, Cmid, Cout, CH):
    b1row = b1_ref[...]
    for h0 in range(0, H, CH):
        ch = min(CH, H - h0)
        y1 = _conv3x3_bias_relu(buf1, w1_ref, b1row, h0, ch, W, 3 * Cin, Cmid)
        _scatter_dx(buf2, h0, ch, W, Cmid, y1.reshape(ch, W, Cmid))
    b2row = b2_ref[...]
    for h0 in range(0, H, CH):
        ch = min(CH, H - h0)
        y2 = _conv3x3_bias_relu(buf2, w2_ref, b2row, h0, ch, W, 3 * Cmid, Cout)
        o_ref[0, h0 * W:(h0 + ch) * W, :] = y2.astype(o_ref.dtype)


# --------------------------------- kernels -----------------------------------

def _double_conv_kernel(x_ref, w1_ref, b1_ref, w2_ref, b2_ref, o_ref, buf1, buf2):
    # x_ref: (1, H, W, Cin) bf16
    H, W, Cin = x_ref.shape[1], x_ref.shape[2], x_ref.shape[3]
    Cmid, Cout = w1_ref.shape[2], w2_ref.shape[2]
    CH = max(1, min(H, 512 // W))
    _zero_pad_borders(buf1, H, W, Cin)
    _zero_pad_borders(buf2, H, W, Cmid)
    for h0 in range(0, H, CH):
        ch = min(CH, H - h0)
        xs = x_ref[0, h0:h0 + ch, :, :].astype(F32)
        _scatter_dx(buf1, h0, ch, W, Cin, xs)
    _two_conv_passes(buf1, buf2, w1_ref, b1_ref, w2_ref, b2_ref, o_ref,
                     H, W, Cin, Cmid, Cout, CH)


def _down_double_conv_kernel(x_ref, w1_ref, b1_ref, w2_ref, b2_ref, o_ref, buf1, buf2):
    # x_ref: (1, Hp, 2, 2, Wp, Cin) bf16   (2x2 pool-window parities as leading axes)
    Hp, Wp, Cin = x_ref.shape[1], x_ref.shape[4], x_ref.shape[5]
    Cmid, Cout = w1_ref.shape[2], w2_ref.shape[2]
    CH = max(1, min(Hp, 512 // Wp))
    _zero_pad_borders(buf1, Hp, Wp, Cin)
    _zero_pad_borders(buf2, Hp, Wp, Cmid)
    for h0 in range(0, Hp, CH):
        ch = min(CH, Hp - h0)
        p00 = x_ref[0, h0:h0 + ch, 0, 0, :, :]
        p01 = x_ref[0, h0:h0 + ch, 0, 1, :, :]
        p10 = x_ref[0, h0:h0 + ch, 1, 0, :, :]
        p11 = x_ref[0, h0:h0 + ch, 1, 1, :, :]
        pooled = jnp.maximum(jnp.maximum(p00, p01), jnp.maximum(p10, p11)).astype(F32)
        _scatter_dx(buf1, h0, ch, Wp, Cin, pooled)
    _two_conv_passes(buf1, buf2, w1_ref, b1_ref, w2_ref, b2_ref, o_ref,
                     Hp, Wp, Cin, Cmid, Cout, CH)


def _pointwise_kernel(x_ref, w_ref, b_ref, o_ref):
    # x_ref: (1, N, Cin) bf16 ; w_ref: (Cin, Cout) bf16 ; b_ref: (1, Cout) f32
    N = x_ref.shape[1]
    b = b_ref[...]
    w = w_ref[...]
    CH = 1024
    for n0 in range(0, N, CH):
        cn = min(CH, N - n0)
        acc = jnp.dot(x_ref[0, n0:n0 + cn, :], w, preferred_element_type=F32)
        o_ref[0, n0:n0 + cn, :] = (acc + b).astype(o_ref.dtype)


# --------------------------------- wrappers -----------------------------------

def _compiler_params():
    return pltpu.CompilerParams(dimension_semantics=("parallel",),
                                vmem_limit_bytes=_VMEM_LIMIT)


def double_conv_nhwc(x_nhwc, p):
    w1k, b1k, w2k, b2k = p["krn"]
    B, H, W, Cin = x_nhwc.shape
    Cmid, Cout = w1k.shape[2], w2k.shape[2]
    out = pl.pallas_call(
        _double_conv_kernel,
        out_shape=jax.ShapeDtypeStruct((B, H * W, Cout), F32),
        grid_spec=pltpu.PrefetchScalarGridSpec(
            num_scalar_prefetch=0, grid=(B,),
            in_specs=[
                pl.BlockSpec((1, H, W, Cin), lambda b: (b, 0, 0, 0)),
                pl.BlockSpec((3, 3 * Cin, Cmid), lambda b: (0, 0, 0)),
                pl.BlockSpec((1, Cmid), lambda b: (0, 0)),
                pl.BlockSpec((3, 3 * Cmid, Cout), lambda b: (0, 0, 0)),
                pl.BlockSpec((1, Cout), lambda b: (0, 0)),
            ],
            out_specs=pl.BlockSpec((1, H * W, Cout), lambda b: (b, 0, 0)),
            scratch_shapes=[pltpu.VMEM((H + 2, W, 3 * Cin), F32),
                            pltpu.VMEM((H + 2, W, 3 * Cmid), F32)],
        ),
        compiler_params=_compiler_params(),
    )(x_nhwc.astype(BF16), w1k, b1k, w2k, b2k)
    return out.reshape(B, H, W, Cout)


def down_nhwc(x_nhwc, p):
    w1k, b1k, w2k, b2k = p["krn"]
    B, H, W, Cin = x_nhwc.shape
    Hp, Wp = H // 2, W // 2
    Cmid, Cout = w1k.shape[2], w2k.shape[2]
    x6 = x_nhwc.reshape(B, Hp, 2, Wp, 2, Cin).transpose(0, 1, 2, 4, 3, 5).astype(BF16)
    out = pl.pallas_call(
        _down_double_conv_kernel,
        out_shape=jax.ShapeDtypeStruct((B, Hp * Wp, Cout), F32),
        grid_spec=pltpu.PrefetchScalarGridSpec(
            num_scalar_prefetch=0, grid=(B,),
            in_specs=[
                pl.BlockSpec((1, Hp, 2, 2, Wp, Cin), lambda b: (b, 0, 0, 0, 0, 0)),
                pl.BlockSpec((3, 3 * Cin, Cmid), lambda b: (0, 0, 0)),
                pl.BlockSpec((1, Cmid), lambda b: (0, 0)),
                pl.BlockSpec((3, 3 * Cmid, Cout), lambda b: (0, 0, 0)),
                pl.BlockSpec((1, Cout), lambda b: (0, 0)),
            ],
            out_specs=pl.BlockSpec((1, Hp * Wp, Cout), lambda b: (b, 0, 0)),
            scratch_shapes=[pltpu.VMEM((Hp + 2, Wp, 3 * Cin), F32),
                            pltpu.VMEM((Hp + 2, Wp, 3 * Cmid), F32)],
        ),
        compiler_params=_compiler_params(),
    )(x6, w1k, b1k, w2k, b2k)
    return out.reshape(B, Hp, Wp, Cout)


def pointwise_matmul(x_flat, w_k, b_k):
    # x_flat: (B, N, Cin) f32 -> (B, N, Cout) f32
    B, N, Cin = x_flat.shape
    Cout = w_k.shape[1]
    return pl.pallas_call(
        _pointwise_kernel,
        out_shape=jax.ShapeDtypeStruct((B, N, Cout), F32),
        grid_spec=pltpu.PrefetchScalarGridSpec(
            num_scalar_prefetch=0, grid=(B,),
            in_specs=[
                pl.BlockSpec((1, N, Cin), lambda b: (b, 0, 0)),
                pl.BlockSpec((Cin, Cout), lambda b: (0, 0)),
                pl.BlockSpec((1, Cout), lambda b: (0, 0)),
            ],
            out_specs=pl.BlockSpec((1, N, Cout), lambda b: (b, 0, 0)),
        ),
        compiler_params=_compiler_params(),
    )(x_flat.astype(BF16), w_k, b_k)


def up_nhwc(x1_nhwc, x2_nhwc, p):
    # ConvTranspose2d(C, C, 2, stride=2) as a pointwise matmul C -> 4*C, then interleave.
    B, Hp, Wp, C = x1_nhwc.shape
    up = pointwise_matmul(x1_nhwc.reshape(B, Hp * Wp, C), p["up_w_k"], p["up_b_k"])
    up = up.reshape(B, Hp, Wp, 2, 2, C).transpose(0, 1, 3, 2, 4, 5)
    up = up.reshape(B, 2 * Hp, 2 * Wp, C)
    dh = x2_nhwc.shape[1] - up.shape[1]
    dw = x2_nhwc.shape[2] - up.shape[2]
    if dh or dw:
        up = jnp.pad(up, ((0, 0), (dh // 2, dh - dh // 2), (dw // 2, dw - dw // 2), (0, 0)))
    cat = jnp.concatenate([x2_nhwc, up], axis=-1)   # torch.cat([x2, x1], dim=1)
    return double_conv_nhwc(cat, p["dc"])


def outconv_nhwc(x_nhwc, w_k, b_k):
    B, H, W, Cin = x_nhwc.shape
    out = pointwise_matmul(x_nhwc.reshape(B, H * W, Cin), w_k, b_k)
    return out.reshape(B, H, W, -1)


@jax.jit
def unet_forward(x_nchw, params):
    x = jnp.transpose(x_nchw, (0, 2, 3, 1))            # NCHW -> NHWC
    h = double_conv_nhwc(x, params["inc"])
    feats = [h]
    for dp in params["downs"]:
        feats.append(down_nhwc(feats[-1], dp))
    feats.reverse()
    h = feats[0]
    skips = feats[1:]
    for i, up_p in enumerate(params["ups"]):
        h = up_nhwc(h, skips[i], up_p)
    out = outconv_nhwc(h, params["outc_w_k"], params["outc_b_k"])
    return jnp.transpose(out, (0, 3, 1, 2))            # back to NCHW


# --------------------------- parameters (deterministic) ---------------------------

def _fold_bn(w_hwio, b, gamma, beta, mean, var, eps=1e-5):
    scale = gamma / jnp.sqrt(var + eps)
    return w_hwio * scale[None, None, None, :], (b - mean) * scale + beta


def _init_conv_bn(key, cin, cout):
    k = jax.random.split(key, 6)
    w = jax.random.normal(k[0], (3, 3, cin, cout), F32) / jnp.sqrt(9.0 * cin)
    b = 0.05 * jax.random.normal(k[1], (cout,), F32)
    g = 1.0 + 0.1 * jax.random.normal(k[2], (cout,), F32)
    be = 0.1 * jax.random.normal(k[3], (cout,), F32)
    m = 0.1 * jax.random.normal(k[4], (cout,), F32)
    v = 1.0 + 0.1 * jnp.abs(jax.random.normal(k[5], (cout,), F32))
    return _fold_bn(w, b, g, be, m, v)


def _make_double_conv(key, cin, cout):
    k1, k2 = jax.random.split(key)
    w1f, b1f = _init_conv_bn(k1, cin, cout)
    w2f, b2f = _init_conv_bn(k2, cout, cout)
    krn = (w1f.reshape(3, 3 * cin, cout).astype(BF16), b1f.reshape(1, cout),
           w2f.reshape(3, 3 * cout, cout).astype(BF16), b2f.reshape(1, cout))
    return {"ref": (w1f, b1f, w2f, b2f), "krn": krn}


def init_unet_params(key, n_channels, n_classes, topology):
    first = topology[0]
    n_layers = len(topology)
    params = {}
    key, k = jax.random.split(key)
    params["inc"] = _make_double_conv(k, n_channels, first)
    up_topo = [first]
    downs = []
    for idx in range(n_layers):
        is_not_last = idx != n_layers - 1
        in_dim = topology[idx]
        out_dim = topology[idx + 1] if is_not_last else topology[idx]
        key, k = jax.random.split(key)
        downs.append(_make_double_conv(k, in_dim, out_dim))
        up_topo.append(out_dim)
    params["downs"] = downs
    ups = []
    for idx in reversed(range(n_layers)):
        in_dim = up_topo[idx] * 2
        out_dim = up_topo[idx - 1 if idx != 0 else idx]
        C = in_dim // 2
        key, k1, k2, k3 = jax.random.split(key, 4)
        up_w = jax.random.normal(k1, (C, C, 2, 2), F32) / jnp.sqrt(4.0 * C)   # (in, out, kh, kw)
        up_b = 0.05 * jax.random.normal(k2, (C,), F32)
        up_w_k = jnp.transpose(up_w, (0, 2, 3, 1)).reshape(C, 4 * C).astype(BF16)
        up_b_k = jnp.tile(up_b, (4,)).reshape(1, 4 * C)
        ups.append({"up_w": up_w, "up_b": up_b, "up_w_k": up_w_k, "up_b_k": up_b_k,
                    "dc": _make_double_conv(k3, in_dim, out_dim)})
    params["ups"] = ups
    key, k1, k2 = jax.random.split(key, 3)
    wo = jax.random.normal(k1, (first, n_classes), F32) / jnp.sqrt(float(first))
    bo = 0.05 * jax.random.normal(k2, (n_classes,), F32)
    params["outc_w"], params["outc_b"] = wo, bo
    params["outc_w_k"] = wo.astype(BF16)
    params["outc_b_k"] = bo.reshape(1, n_classes)
    return params


# ------------------------- pure-JAX reference (bf16-mirrored) -------------------------

def _cd(a):
    return a.astype(BF16).astype(F32)


def _conv3x3_ref(x, w, b):
    y = lax.conv_general_dilated(_cd(x), _cd(w), (1, 1), "SAME",
                                 dimension_numbers=("NCHW", "HWIO", "NCHW"))
    return y + b.reshape(1, -1, 1, 1)


def _double_conv_ref(x, p):
    w1, b1, w2, b2 = p["ref"]
    y = jnp.maximum(_conv3x3_ref(x, w1, b1), 0.0)
    return jnp.maximum(_conv3x3_ref(y, w2, b2), 0.0)


def _maxpool2_ref(x):
    return lax.reduce_window(x, -jnp.inf, lax.max, (1, 1, 2, 2), (1, 1, 2, 2), "VALID")


def _deconv2x2_ref(x, w, b):
    y = jnp.einsum("ncij,codk->noidjk", _cd(x), _cd(w))
    B, O, H, _, W, _ = y.shape
    return y.reshape(B, O, 2 * H, 2 * W) + b.reshape(1, -1, 1, 1)


def unet_ref(x_nchw, params):
    h = _double_conv_ref(x_nchw, params["inc"])
    feats = [h]
    for dp in params["downs"]:
        feats.append(_double_conv_ref(_maxpool2_ref(feats[-1]), dp))
    feats.reverse()
    h = feats[0]
    skips = feats[1:]
    for i, up_p in enumerate(params["ups"]):
        x2 = skips[i]
        y = _deconv2x2_ref(h, up_p["up_w"], up_p["up_b"])
        dh = x2.shape[2] - y.shape[2]
        dw = x2.shape[3] - y.shape[3]
        if dh or dw:
            y = jnp.pad(y, ((0, 0), (0, 0), (dh // 2, dh - dh // 2), (dw // 2, dw - dw // 2)))
        h = _double_conv_ref(jnp.concatenate([x2, y], axis=1), up_p["dc"])
    out = jnp.einsum("nchw,co->nohw", _cd(h), _cd(params["outc_w"]))
    return out + params["outc_b"].reshape(1, -1, 1, 1)


if __name__ == "__main__":
    B, n_channels, H, W = 2, 4, 16, 16
    n_classes = 2
    topology = [8, 16]          # -> inc(4->8), down1(8->16), down2(16->16), up2(32->8), up1(16->8), outc(8->2)

    key = jax.random.PRNGKey(0)
    kx, kp = jax.random.split(key)
    x = jax.random.normal(kx, (B, n_channels, H, W), F32)
    params = init_unet_params(kp, n_channels, n_classes, topology)

    out = unet_forward(x, params)
    out = jax.block_until_ready(out)

    ref = unet_ref(x, params)
    assert out.shape == (B, n_classes, H, W), out.shape
    # bf16 matmul inputs through ~12 conv layers -> tolerance covers rounding/accumulation-order diffs.
    assert bool(jnp.allclose(out, ref, atol=5e-2, rtol=5e-2)), "mismatch vs reference"

    print("KERNEL_OK")
</pallas_src>

<mosaic_0001>
module attributes {stable_mosaic.version = 11 : i64} {
  func.func @_double_conv_kernel(%arg0: i32, %arg1: memref<1x16x16x4xbf16, #tpu.memory_space<vmem>>, %arg2: memref<3x12x8xbf16, #tpu.memory_space<vmem>>, %arg3: memref<1x8xf32, #tpu.memory_space<vmem>>, %arg4: memref<3x24x8xbf16, #tpu.memory_space<vmem>>, %arg5: memref<1x8xf32, #tpu.memory_space<vmem>>, %arg6: memref<1x256x8xf32, #tpu.memory_space<vmem>>, %arg7: memref<18x16x12xf32, #tpu.memory_space<vmem>>, %arg8: memref<18x16x24xf32, #tpu.memory_space<vmem>>) attributes {dimension_semantics = [#tpu.dimension_semantics<parallel>], iteration_bounds = array<i64: 2>, scalar_prefetch = 0 : i64, scratch_operands = 2 : i64, tpu.core_type = #tpu.core_type<tc>, window_params = [{transform_indices = @transform_0, window_bounds = array<i64: 1, 16, 16, 4>}, {pipeline_mode = #tpu.pipeline_mode<synchronous>, transform_indices = @transform_1, window_bounds = array<i64: 3, 12, 8>}, {pipeline_mode = #tpu.pipeline_mode<synchronous>, transform_indices = @transform_2, window_bounds = array<i64: 1, 8>}, {pipeline_mode = #tpu.pipeline_mode<synchronous>, transform_indices = @transform_3, window_bounds = array<i64: 3, 24, 8>}, {pipeline_mode = #tpu.pipeline_mode<synchronous>, transform_indices = @transform_4, window_bounds = array<i64: 1, 8>}, {transform_indices = @transform_5, window_bounds = array<i64: 1, 256, 8>}]} {
    %cst = arith.constant 0.000000e+00 : f32
    %0 = vector.broadcast %cst : f32 to vector<1x16x12xf32>
    %c0 = arith.constant 0 : index
    %c0_0 = arith.constant 0 : index
    %c0_1 = arith.constant 0 : index
    %1 = vector.load %arg7[%c0, %c0_0, %c0_1] : memref<18x16x12xf32, #tpu.memory_space<vmem>>, vector<1x16x12xf32>
    tpu.vector_store %arg7[%c0, %c0_0, %c0_1], %0 {strides = array<i32>} : memref<18x16x12xf32, #tpu.memory_space<vmem>>, vector<1x16x12xf32>,
    %cst_2 = arith.constant 0.000000e+00 : f32
    %2 = vector.broadcast %cst_2 : f32 to vector<1x16x12xf32>
    %c17 = arith.constant 17 : index
    %c0_3 = arith.constant 0 : index
    %c0_4 = arith.constant 0 : index
    %3 = vector.load %arg7[%c17, %c0_3, %c0_4] : memref<18x16x12xf32, #tpu.memory_space<vmem>>, vector<1x16x12xf32>
    tpu.vector_store %arg7[%c17, %c0_3, %c0_4], %2 {strides = array<i32>} : memref<18x16x12xf32, #tpu.memory_space<vmem>>, vector<1x16x12xf32>,
    %cst_5 = arith.constant 0.000000e+00 : f32
    %4 = vector.broadcast %cst_5 : f32 to vector<16x1x4xf32>
    %c1 = arith.constant 1 : index
    %c0_6 = arith.constant 0 : index
    %c0_7 = arith.constant 0 : index
    %5 = vector.load %arg7[%c1, %c0_6, %c0_7] : memref<18x16x12xf32, #tpu.memory_space<vmem>>, vector<16x1x4xf32>
    tpu.vector_store %arg7[%c1, %c0_6, %c0_7], %4 {strides = array<i32>} : memref<18x16x12xf32, #tpu.memory_space<vmem>>, vector<16x1x4xf32>,
    %cst_8 = arith.constant 0.000000e+00 : f32
    %6 = vector.broadcast %cst_8 : f32 to vector<16x1x4xf32>
    %c1_9 = arith.constant 1 : index
    %c15 = arith.constant 15 : index
    %c8 = arith.constant 8 : index
    %7 = vector.load %arg7[%c1_9, %c15, %c8] : memref<18x16x12xf32, #tpu.memory_space<vmem>>, vector<16x1x4xf32>
    tpu.vector_store %arg7[%c1_9, %c15, %c8], %6 {strides = array<i32>} : memref<18x16x12xf32, #tpu.memory_space<vmem>>, vector<16x1x4xf32>,
    %cst_10 = arith.constant 0.000000e+00 : f32
    %8 = vector.broadcast %cst_10 : f32 to vector<1x16x24xf32>
    %c0_11 = arith.constant 0 : index
    %c0_12 = arith.constant 0 : index
    %c0_13 = arith.constant 0 : index
    %9 = vector.load %arg8[%c0_11, %c0_12, %c0_13] : memref<18x16x24xf32, #tpu.memory_space<vmem>>, vector<1x16x24xf32>
    tpu.vector_store %arg8[%c0_11, %c0_12, %c0_13], %8 {strides = array<i32>} : memref<18x16x24xf32, #tpu.memory_space<vmem>>, vector<1x16x24xf32>,
    %cst_14 = arith.constant 0.000000e+00 : f32
    %10 = vector.broadcast %cst_14 : f32 to vector<1x16x24xf32>
    %c17_15 = arith.constant 17 : index
    %c0_16 = arith.constant 0 : index
    %c0_17 = arith.constant 0 : index
    %11 = vector.load %arg8[%c17_15, %c0_16, %c0_17] : memref<18x16x24xf32, #tpu.memory_space<vmem>>, vector<1x16x24xf32>
    tpu.vector_store %arg8[%c17_15, %c0_16, %c0_17], %10 {strides = array<i32>} : memref<18x16x24xf32, #tpu.memory_space<vmem>>, vector<1x16x24xf32>,
    %cst_18 = arith.constant 0.000000e+00 : f32
    %12 = vector.broadcast %cst_18 : f32 to vector<16x1x8xf32>
    %c1_19 = arith.constant 1 : index
    %c0_20 = arith.constant 0 : index
    %c0_21 = arith.constant 0 : index
    %13 = vector.load %arg8[%c1_19, %c0_20, %c0_21] : memref<18x16x24xf32, #tpu.memory_space<vmem>>, vector<16x1x8xf32>
    tpu.vector_store %arg8[%c1_19, %c0_20, %c0_21], %12 {strides = array<i32>} : memref<18x16x24xf32, #tpu.memory_space<vmem>>, vector<16x1x8xf32>,
    %cst_22 = arith.constant 0.000000e+00 : f32
    %14 = vector.broadcast %cst_22 : f32 to vector<16x1x8xf32>
    %c1_23 = arith.constant 1 : index
    %c15_24 = arith.constant 15 : index
    %c16 = arith.constant 16 : index
    %15 = vector.load %arg8[%c1_23, %c15_24, %c16] : memref<18x16x24xf32, #tpu.memory_space<vmem>>, vector<16x1x8xf32>
    tpu.vector_store %arg8[%c1_23, %c15_24, %c16], %14 {strides = array<i32>} : memref<18x16x24xf32, #tpu.memory_space<vmem>>, vector<16x1x8xf32>,
    %c0_25 = arith.constant 0 : index
    %c0_26 = arith.constant 0 : index
    %c0_27 = arith.constant 0 : index
    %c0_28 = arith.constant 0 : index
    %16 = vector.load %arg1[%c0_25, %c0_26, %c0_27, %c0_28] : memref<1x16x16x4xbf16, #tpu.memory_space<vmem>>, vector<1x16x16x4xbf16>
    %17 = vector.shape_cast %16 : vector<1x16x16x4xbf16> to vector<16x16x4xbf16>
    %18 = arith.extf %17 : vector<16x16x4xbf16> to vector<16x16x4xf32>
    %c1_29 = arith.constant 1 : index
    %c0_30 = arith.constant 0 : index
    %c4 = arith.constant 4 : index
    %19 = vector.load %arg7[%c1_29, %c0_30, %c4] : memref<18x16x12xf32, #tpu.memory_space<vmem>>, vector<16x16x4xf32>
    tpu.vector_store %arg7[%c1_29, %c0_30, %c4], %18 {strides = array<i32>} : memref<18x16x12xf32, #tpu.memory_space<vmem>>, vector<16x16x4xf32>,
    %20 = vector.extract_strided_slice %18 {offsets = [0, 0, 0], sizes = [16, 15, 4], strides = [1, 1, 1]} : vector<16x16x4xf32> to vector<16x15x4xf32>
    %c1_31 = arith.constant 1 : index
    %c1_32 = arith.constant 1 : index
    %c0_33 = arith.constant 0 : index
    %21 = vector.load %arg7[%c1_31, %c1_32, %c0_33] : memref<18x16x12xf32, #tpu.memory_space<vmem>>, vector<16x15x4xf32>
    tpu.vector_store %arg7[%c1_31, %c1_32, %c0_33], %20 {strides = array<i32>} : memref<18x16x12xf32, #tpu.memory_space<vmem>>, vector<16x15x4xf32>,
    %22 = vector.extract_strided_slice %18 {offsets = [0, 1, 0], sizes = [16, 15, 4], strides = [1, 1, 1]} : vector<16x16x4xf32> to vector<16x15x4xf32>
    %c1_34 = arith.constant 1 : index
    %c0_35 = arith.constant 0 : index
    %c8_36 = arith.constant 8 : index
    %23 = vector.load %arg7[%c1_34, %c0_35, %c8_36] : memref<18x16x12xf32, #tpu.memory_space<vmem>>, vector<16x15x4xf32>
    tpu.vector_store %arg7[%c1_34, %c0_35, %c8_36], %22 {strides = array<i32>} : memref<18x16x12xf32, #tpu.memory_space<vmem>>, vector<16x15x4xf32>,
    %c0_37 = arith.constant 0 : index
    %c0_38 = arith.constant 0 : index
    %24 = vector.load %arg3[%c0_37, %c0_38] : memref<1x8xf32, #tpu.memory_space<vmem>>, vector<1x8xf32>
    %cst_39 = arith.constant 0.000000e+00 : f32
    %25 = vector.broadcast %cst_39 : f32 to vector<256x8xf32>
    %c0_40 = arith.constant 0 : index
    %c0_41 = arith.constant 0 : index
    %c0_42 = arith.constant 0 : index
    %26 = vector.load %arg7[%c0_40, %c0_41, %c0_42] : memref<18x16x12xf32, #tpu.memory_space<vmem>>, vector<16x16x12xf32>
    %27 = vector.shape_cast %26 : vector<16x16x12xf32> to vector<256x12xf32>
    %28 = arith.truncf %27 : vector<256x12xf32> to vector<256x12xbf16>
    %c0_43 = arith.constant 0 : index
    %c0_44 = arith.constant 0 : index
    %c0_45 = arith.constant 0 : index
    %29 = vector.load %arg2[%c0_43, %c0_44, %c0_45] : memref<3x12x8xbf16, #tpu.memory_space<vmem>>, vector<1x12x8xbf16>
    %30 = vector.shape_cast %29 : vector<1x12x8xbf16> to vector<12x8xbf16>
    %cst_46 = arith.constant dense<0.000000e+00> : vector<256x8xf32>
    %31 = tpu.matmul %28, %30, %cst_46 {dimension_numbers = #tpu.dot_dimension_numbers<[1], [0], [0], [1], [0, 0, 1, 1], [], []>} : vector<256x12xbf16>, vector<12x8xbf16>, vector<256x8xf32> -> vector<256x8xf32>
    %32 = arith.addf %25, %31 : vector<256x8xf32>
    %c1_47 = arith.constant 1 : index
    %c0_48 = arith.constant 0 : index
    %c0_49 = arith.constant 0 : index
    %33 = vector.load %arg7[%c1_47, %c0_48, %c0_49] : memref<18x16x12xf32, #tpu.memory_space<vmem>>, vector<16x16x12xf32>
    %34 = vector.shape_cast %33 : vector<16x16x12xf32> to vector<256x12xf32>
    %35 = arith.truncf %34 : vector<256x12xf32> to vector<256x12xbf16>
    %c1_50 = arith.constant 1 : index
    %c0_51 = arith.constant 0 : index
    %c0_52 = arith.constant 0 : index
    %36 = vector.load %arg2[%c1_50, %c0_51, %c0_52] : memref<3x12x8xbf16, #tpu.memory_space<vmem>>, vector<1x12x8xbf16>
    %37 = vector.shape_cast %36 : vector<1x12x8xbf16> to vector<12x8xbf16>
    %cst_53 = arith.constant dense<0.000000e+00> : vector<256x8xf32>
    %38 = tpu.matmul %35, %37, %cst_53 {dimension_numbers = #tpu.dot_dimension_numbers<[1], [0], [0], [1], [0, 0, 1, 1], [], []>} : vector<256x12xbf16>, vector<12x8xbf16>, vector<256x8xf32> -> vector<256x8xf32>
    %39 = arith.addf %32, %38 : vector<256x8xf32>
    %c2 = arith.constant 2 : index
    %c0_54 = arith.constant 0 : index
    %c0_55 = arith.constant 0 : index
    %40 = vector.load %arg7[%c2, %c0_54, %c0_55] : memref<18x16x12xf32, #tpu.memory_space<vmem>>, vector<16x16x12xf32>
    %41 = vector.shape_cast %40 : vector<16x16x12xf32> to vector<256x12xf32>
    %42 = arith.truncf %41 : vector<256x12xf32> to vector<256x12xbf16>
    %c2_56 = arith.constant 2 : index
    %c0_57 = arith.constant 0 : index
    %c0_58 = arith.constant 0 : index
    %43 = vector.load %arg2[%c2_56, %c0_57, %c0_58] : memref<3x12x8xbf16, #tpu.memory_space<vmem>>, vector<1x12x8xbf16>
    %44 = vector.shape_cast %43 : vector<1x12x8xbf16> to vector<12x8xbf16>
    %cst_59 = arith.constant dense<0.000000e+00> : vector<256x8xf32>
    %45 = tpu.matmul %42, %44, %cst_59 {dimension_numbers = #tpu.dot_dimension_numbers<[1], [0], [0], [1], [0, 0, 1, 1], [], []>} : vector<256x12xbf16>, vector<12x8xbf16>, vector<256x8xf32> -> vector<256x8xf32>
    %46 = arith.addf %39, %45 : vector<256x8xf32>
    %47 = vector.broadcast %24 : vector<1x8xf32> to vector<256x8xf32>
    %48 = arith.addf %46, %47 : vector<256x8xf32>
    %cst_60 = arith.constant 0.000000e+00 : f32
    %49 = vector.broadcast %cst_60 : f32 to vector<256x8xf32>
    %50 = arith.maximumf %48, %49 : vector<256x8xf32>
    %51 = vector.shape_cast %50 : vector<256x8xf32> to vector<16x16x8xf32>
    %c1_61 = arith.constant 1 : index
    %c0_62 = arith.constant 0 : index
    %c8_63 = arith.constant 8 : index
    %52 = vector.load %arg8[%c1_61, %c0_62, %c8_63] : memref<18x16x24xf32, #tpu.memory_space<vmem>>, vector<16x16x8xf32>
    tpu.vector_store %arg8[%c1_61, %c0_62, %c8_63], %51 {strides = array<i32>} : memref<18x16x24xf32, #tpu.memory_space<vmem>>, vector<16x16x8xf32>,
    %53 = vector.extract_strided_slice %51 {offsets = [0, 0, 0], sizes = [16, 15, 8], strides = [1, 1, 1]} : vector<16x16x8xf32> to vector<16x15x8xf32>
    %c1_64 = arith.constant 1 : index
    %c1_65 = arith.constant 1 : index
    %c0_66 = arith.constant 0 : index
    %54 = vector.load %arg8[%c1_64, %c1_65, %c0_66] : memref<18x16x24xf32, #tpu.memory_space<vmem>>, vector<16x15x8xf32>
    tpu.vector_store %arg8[%c1_64, %c1_65, %c0_66], %53 {strides = array<i32>} : memref<18x16x24xf32, #tpu.memory_space<vmem>>, vector<16x15x8xf32>,
    %55 = vector.extract_strided_slice %51 {offsets = [0, 1, 0], sizes = [16, 15, 8], strides = [1, 1, 1]} : vector<16x16x8xf32> to vector<16x15x8xf32>
    %c1_67 = arith.constant 1 : index
    %c0_68 = arith.constant 0 : index
    %c16_69 = arith.constant 16 : index
    %56 = vector.load %arg8[%c1_67, %c0_68, %c16_69] : memref<18x16x24xf32, #tpu.memory_space<vmem>>, vector<16x15x8xf32>
    tpu.vector_store %arg8[%c1_67, %c0_68, %c16_69], %55 {strides = array<i32>} : memref<18x16x24xf32, #tpu.memory_space<vmem>>, vector<16x15x8xf32>,
    %c0_70 = arith.constant 0 : index
    %c0_71 = arith.constant 0 : index
    %57 = vector.load %arg5[%c0_70, %c0_71] : memref<1x8xf32, #tpu.memory_space<vmem>>, vector<1x8xf32>
    %cst_72 = arith.constant 0.000000e+00 : f32
    %58 = vector.broadcast %cst_72 : f32 to vector<256x8xf32>
    %c0_73 = arith.constant 0 : index
    %c0_74 = arith.constant 0 : index
    %c0_75 = arith.constant 0 : index
    %59 = vector.load %arg8[%c0_73, %c0_74, %c0_75] : memref<18x16x24xf32, #tpu.memory_space<vmem>>, vector<16x16x24xf32>
    %60 = vector.shape_cast %59 : vector<16x16x24xf32> to vector<256x24xf32>
    %61 = arith.truncf %60 : vector<256x24xf32> to vector<256x24xbf16>
    %c0_76 = arith.constant 0 : index
    %c0_77 = arith.constant 0 : index
    %c0_78 = arith.constant 0 : index
    %62 = vector.load %arg4[%c0_76, %c0_77, %c0_78] : memref<3x24x8xbf16, #tpu.memory_space<vmem>>, vector<1x24x8xbf16>
    %63 = vector.shape_cast %62 : vector<1x24x8xbf16> to vector<24x8xbf16>
    %cst_79 = arith.constant dense<0.000000e+00> : vector<256x8xf32>
    %64 = tpu.matmul %61, %63, %cst_79 {dimension_numbers = #tpu.dot_dimension_numbers<[1], [0], [0], [1], [0, 0, 1, 1], [], []>} : vector<256x24xbf16>, vector<24x8xbf16>, vector<256x8xf32> -> vector<256x8xf32>
    %65 = arith.addf %58, %64 : vector<256x8xf32>
    %c1_80 = arith.constant 1 : index
    %c0_81 = arith.constant 0 : index
    %c0_82 = arith.constant 0 : index
    %66 = vector.load %arg8[%c1_80, %c0_81, %c0_82] : memref<18x16x24xf32, #tpu.memory_space<vmem>>, vector<16x16x24xf32>
    %67 = vector.shape_cast %66 : vector<16x16x24xf32> to vector<256x24xf32>
    %68 = arith.truncf %67 : vector<256x24xf32> to vector<256x24xbf16>
    %c1_83 = arith.constant 1 : index
    %c0_84 = arith.constant 0 : index
    %c0_85 = arith.constant 0 : index
    %69 = vector.load %arg4[%c1_83, %c0_84, %c0_85] : memref<3x24x8xbf16, #tpu.memory_space<vmem>>, vector<1x24x8xbf16>
    %70 = vector.shape_cast %69 : vector<1x24x8xbf16> to vector<24x8xbf16>
    %cst_86 = arith.constant dense<0.000000e+00> : vector<256x8xf32>
    %71 = tpu.matmul %68, %70, %cst_86 {dimension_numbers = #tpu.dot_dimension_numbers<[1], [0], [0], [1], [0, 0, 1, 1], [], []>} : vector<256x24xbf16>, vector<24x8xbf16>, vector<256x8xf32> -> vector<256x8xf32>
    %72 = arith.addf %65, %71 : vector<256x8xf32>
    %c2_87 = arith.constant 2 : index
    %c0_88 = arith.constant 0 : index
    %c0_89 = arith.constant 0 : index
    %73 = vector.load %arg8[%c2_87, %c0_88, %c0_89] : memref<18x16x24xf32, #tpu.memory_space<vmem>>, vector<16x16x24xf32>
    %74 = vector.shape_cast %73 : vector<16x16x24xf32> to vector<256x24xf32>
    %75 = arith.truncf %74 : vector<256x24xf32> to vector<256x24xbf16>
    %c2_90 = arith.constant 2 : index
    %c0_91 = arith.constant 0 : index
    %c0_92 = arith.constant 0 : index
    %76 = vector.load %arg4[%c2_90, %c0_91, %c0_92] : memref<3x24x8xbf16, #tpu.memory_space<vmem>>, vector<1x24x8xbf16>
    %77 = vector.shape_cast %76 : vector<1x24x8xbf16> to vector<24x8xbf16>
    %cst_93 = arith.constant dense<0.000000e+00> : vector<256x8xf32>
    %78 = tpu.matmul %75, %77, %cst_93 {dimension_numbers = #tpu.dot_dimension_numbers<[1], [0], [0], [1], [0, 0, 1, 1], [], []>} : vector<256x24xbf16>, vector<24x8xbf16>, vector<256x8xf32> -> vector<256x8xf32>
    %79 = arith.addf %72, %78 : vector<256x8xf32>
    %80 = vector.broadcast %57 : vector<1x8xf32> to vector<256x8xf32>
    %81 = arith.addf %79, %80 : vector<256x8xf32>
    %cst_94 = arith.constant 0.000000e+00 : f32
    %82 = vector.broadcast %cst_94 : f32 to vector<256x8xf32>
    %83 = arith.maximumf %81, %82 : vector<256x8xf32>
    %c0_95 = arith.constant 0 : index
    %c0_96 = arith.constant 0 : index
    %c0_97 = arith.constant 0 : index
    %84 = vector.load %arg6[%c0_95, %c0_96, %c0_97] : memref<1x256x8xf32, #tpu.memory_space<vmem>>, vector<1x256x8xf32>
    %85 = vector.shape_cast %84 : vector<1x256x8xf32> to vector<256x8xf32>
    %86 = vector.shape_cast %83 : vector<256x8xf32> to vector<1x256x8xf32>
    tpu.vector_store %arg6[%c0_95, %c0_96, %c0_97], %86 {strides = array<i32>} : memref<1x256x8xf32, #tpu.memory_space<vmem>>, vector<1x256x8xf32>,
    return
  }
  func.func @transform_0(%arg0: i32) -> (i32, i32, i32, i32) {
    %c0_i32 = arith.constant 0 : i32
    %c0_i32_0 = arith.constant 0 : i32
    %c0_i32_1 = arith.constant 0 : i32
    %c0_i32_2 = arith.constant 0 : i32
    return %arg0, %c0_i32, %c0_i32_0, %c0_i32_1 : i32, i32, i32, i32
  }
  func.func @transform_1(%arg0: i32) -> (i32, i32, i32) {
    %c0_i32 = arith.constant 0 : i32
    %c0_i32_0 = arith.constant 0 : i32
    %c0_i32_1 = arith.constant 0 : i32
    %c0_i32_2 = arith.constant 0 : i32
    return %c0_i32, %c0_i32_0, %c0_i32_1 : i32, i32, i32
  }
  func.func @transform_2(%arg0: i32) -> (i32, i32) {
    %c0_i32 = arith.constant 0 : i32
    %c0_i32_0 = arith.constant 0 : i32
    %c0_i32_1 = arith.constant 0 : i32
    return %c0_i32, %c0_i32_0 : i32, i32
  }
  func.func @transform_3(%arg0: i32) -> (i32, i32, i32) {
    %c0_i32 = arith.constant 0 : i32
    %c0_i32_0 = arith.constant 0 : i32
    %c0_i32_1 = arith.constant 0 : i32
    %c0_i32_2 = arith.constant 0 : i32
    return %c0_i32, %c0_i32_0, %c0_i32_1 : i32, i32, i32
  }
  func.func @transform_4(%arg0: i32) -> (i32, i32) {
    %c0_i32 = arith.constant 0 : i32
    %c0_i32_0 = arith.constant 0 : i32
    %c0_i32_1 = arith.constant 0 : i32
    return %c0_i32, %c0_i32_0 : i32, i32
  }
  func.func @transform_5(%arg0: i32) -> (i32, i32, i32) {
    %c0_i32 = arith.constant 0 : i32
    %c0_i32_0 = arith.constant 0 : i32
    %c0_i32_1 = arith.constant 0 : i32
    return %arg0, %c0_i32, %c0_i32_0 : i32, i32, i32
  }
}

module attributes {stable_mosaic.version = 11 : i64} {
  func.func @_down_double_conv_kernel(%arg0: i32, %arg1: memref<1x4x2x2x4x16xbf16, #tpu.memory_space<vmem>>, %arg2: memref<3x48x16xbf16, #tpu.memory_space<vmem>>, %arg3: memref<1x16xf32, #tpu.memory_space<vmem>>, %arg4: memref<3x48x16xbf16, #tpu.memory_space<vmem>>, %arg5: memref<1x16xf32, #tpu.memory_space<vmem>>, %arg6: memref<1x16x16xf32, #tpu.memory_space<vmem>>, %arg7: memref<6x4x48xf32, #tpu.memory_space<vmem>>, %arg8: memref<6x4x48xf32, #tpu.memory_space<vmem>>) attributes {dimension_semantics = [#tpu.dimension_semantics<parallel>], iteration_bounds = array<i64: 2>, scalar_prefetch = 0 : i64, scratch_operands = 2 : i64, tpu.core_type = #tpu.core_type<tc>, window_params = [{transform_indices = @transform_0, window_bounds = array<i64: 1, 4, 2, 2, 4, 16>}, {pipeline_mode = #tpu.pipeline_mode<synchronous>, transform_indices = @transform_1, window_bounds = array<i64: 3, 48, 16>}, {pipeline_mode = #tpu.pipeline_mode<synchronous>, transform_indices = @transform_2, window_bounds = array<i64: 1, 16>}, {pipeline_mode = #tpu.pipeline_mode<synchronous>, transform_indices = @transform_3, window_bounds = array<i64: 3, 48, 16>}, {pipeline_mode = #tpu.pipeline_mode<synchronous>, transform_indices = @transform_4, window_bounds = array<i64: 1, 16>}, {transform_indices = @transform_5, window_bounds = array<i64: 1, 16, 16>}]} {
    %cst = arith.constant 0.000000e+00 : f32
    %0 = vector.broadcast %cst : f32 to vector<1x4x48xf32>
    %c0 = arith.constant 0 : index
    %c0_0 = arith.constant 0 : index
    %c0_1 = arith.constant 0 : index
    %1 = vector.load %arg7[%c0, %c0_0, %c0_1] : memref<6x4x48xf32, #tpu.memory_space<vmem>>, vector<1x4x48xf32>
    tpu.vector_store %arg7[%c0, %c0_0, %c0_1], %0 {strides = array<i32>} : memref<6x4x48xf32, #tpu.memory_space<vmem>>, vector<1x4x48xf32>,
    %cst_2 = arith.constant 0.000000e+00 : f32
    %2 = vector.broadcast %cst_2 : f32 to vector<1x4x48xf32>
    %c5 = arith.constant 5 : index
    %c0_3 = arith.constant 0 : index
    %c0_4 = arith.constant 0 : index
    %3 = vector.load %arg7[%c5, %c0_3, %c0_4] : memref<6x4x48xf32, #tpu.memory_space<vmem>>, vector<1x4x48xf32>
    tpu.vector_store %arg7[%c5, %c0_3, %c0_4], %2 {strides = array<i32>} : memref<6x4x48xf32, #tpu.memory_space<vmem>>, vector<1x4x48xf32>,
    %cst_5 = arith.constant 0.000000e+00 : f32
    %4 = vector.broadcast %cst_5 : f32 to vector<4x1x16xf32>
    %c1 = arith.constant 1 : index
    %c0_6 = arith.constant 0 : index
    %c0_7 = arith.constant 0 : index
    %5 = vector.load %arg7[%c1, %c0_6, %c0_7] : memref<6x4x48xf32, #tpu.memory_space<vmem>>, vector<4x1x16xf32>
    tpu.vector_store %arg7[%c1, %c0_6, %c0_7], %4 {strides = array<i32>} : memref<6x4x48xf32, #tpu.memory_space<vmem>>, vector<4x1x16xf32>,
    %cst_8 = arith.constant 0.000000e+00 : f32
    %6 = vector.broadcast %cst_8 : f32 to vector<4x1x16xf32>
    %c1_9 = arith.constant 1 : index
    %c3 = arith.constant 3 : index
    %c32 = arith.constant 32 : index
    %7 = vector.load %arg7[%c1_9, %c3, %c32] : memref<6x4x48xf32, #tpu.memory_space<vmem>>, vector<4x1x16xf32>
    tpu.vector_store %arg7[%c1_9, %c3, %c32], %6 {strides = array<i32>} : memref<6x4x48xf32, #tpu.memory_space<vmem>>, vector<4x1x16xf32>,
    %cst_10 = arith.constant 0.000000e+00 : f32
    %8 = vector.broadcast %cst_10 : f32 to vector<1x4x48xf32>
    %c0_11 = arith.constant 0 : index
    %c0_12 = arith.constant 0 : index
    %c0_13 = arith.constant 0 : index
    %9 = vector.load %arg8[%c0_11, %c0_12, %c0_13] : memref<6x4x48xf32, #tpu.memory_space<vmem>>, vector<1x4x48xf32>
    tpu.vector_store %arg8[%c0_11, %c0_12, %c0_13], %8 {strides = array<i32>} : memref<6x4x48xf32, #tpu.memory_space<vmem>>, vector<1x4x48xf32>,
    %cst_14 = arith.constant 0.000000e+00 : f32
    %10 = vector.broadcast %cst_14 : f32 to vector<1x4x48xf32>
    %c5_15 = arith.constant 5 : index
    %c0_16 = arith.constant 0 : index
    %c0_17 = arith.constant 0 : index
    %11 = vector.load %arg8[%c5_15, %c0_16, %c0_17] : memref<6x4x48xf32, #tpu.memory_space<vmem>>, vector<1x4x48xf32>
    tpu.vector_store %arg8[%c5_15, %c0_16, %c0_17], %10 {strides = array<i32>} : memref<6x4x48xf32, #tpu.memory_space<vmem>>, vector<1x4x48xf32>,
    %cst_18 = arith.constant 0.000000e+00 : f32
    %12 = vector.broadcast %cst_18 : f32 to vector<4x1x16xf32>
    %c1_19 = arith.constant 1 : index
    %c0_20 = arith.constant 0 : index
    %c0_21 = arith.constant 0 : index
    %13 = vector.load %arg8[%c1_19, %c0_20, %c0_21] : memref<6x4x48xf32, #tpu.memory_space<vmem>>, vector<4x1x16xf32>
    tpu.vector_store %arg8[%c1_19, %c0_20, %c0_21], %12 {strides = array<i32>} : memref<6x4x48xf32, #tpu.memory_space<vmem>>, vector<4x1x16xf32>,
    %cst_22 = arith.constant 0.000000e+00 : f32
    %14 = vector.broadcast %cst_22 : f32 to vector<4x1x16xf32>
    %c1_23 = arith.constant 1 : index
    %c3_24 = arith.constant 3 : index
    %c32_25 = arith.constant 32 : index
    %15 = vector.load %arg8[%c1_23, %c3_24, %c32_25] : memref<6x4x48xf32, #tpu.memory_space<vmem>>, vector<4x1x16xf32>
    tpu.vector_store %arg8[%c1_23, %c3_24, %c32_25], %14 {strides = array<i32>} : memref<6x4x48xf32, #tpu.memory_space<vmem>>, vector<4x1x16xf32>,
    %c0_26 = arith.constant 0 : index
    %c0_27 = arith.constant 0 : index
    %c0_28 = arith.constant 0 : index
    %c0_29 = arith.constant 0 : index
    %c0_30 = arith.constant 0 : index
    %c0_31 = arith.constant 0 : index
    %16 = vector.load %arg1[%c0_26, %c0_27, %c0_28, %c0_29, %c0_30, %c0_31] : memref<1x4x2x2x4x16xbf16, #tpu.memory_space<vmem>>, vector<1x4x1x1x4x16xbf16>
    %17 = vector.shape_cast %16 : vector<1x4x1x1x4x16xbf16> to vector<4x4x16xbf16>
    %c0_32 = arith.constant 0 : index
    %c0_33 = arith.constant 0 : index
    %c0_34 = arith.constant 0 : index
    %c1_35 = arith.constant 1 : index
    %c0_36 = arith.constant 0 : index
    %c0_37 = arith.constant 0 : index
    %18 = vector.load %arg1[%c0_32, %c0_33, %c0_34, %c1_35, %c0_36, %c0_37] : memref<1x4x2x2x4x16xbf16, #tpu.memory_space<vmem>>, vector<1x4x1x1x4x16xbf16>
    %19 = vector.shape_cast %18 : vector<1x4x1x1x4x16xbf16> to vector<4x4x16xbf16>
    %c0_38 = arith.constant 0 : index
    %c0_39 = arith.constant 0 : index
    %c1_40 = arith.constant 1 : index
    %c0_41 = arith.constant 0 : index
    %c0_42 = arith.constant 0 : index
    %c0_43 = arith.constant 0 : index
    %20 = vector.load %arg1[%c0_38, %c0_39, %c1_40, %c0_41, %c0_42, %c0_43] : memref<1x4x2x2x4x16xbf16, #tpu.memory_space<vmem>>, vector<1x4x1x1x4x16xbf16>
    %21 = vector.shape_cast %20 : vector<1x4x1x1x4x16xbf16> to vector<4x4x16xbf16>
    %c0_44 = arith.constant 0 : index
    %c0_45 = arith.constant 0 : index
    %c1_46 = arith.constant 1 : index
    %c1_47 = arith.constant 1 : index
    %c0_48 = arith.constant 0 : index
    %c0_49 = arith.constant 0 : index
    %22 = vector.load %arg1[%c0_44, %c0_45, %c1_46, %c1_47, %c0_48, %c0_49] : memref<1x4x2x2x4x16xbf16, #tpu.memory_space<vmem>>, vector<1x4x1x1x4x16xbf16>
    %23 = vector.shape_cast %22 : vector<1x4x1x1x4x16xbf16> to vector<4x4x16xbf16>
    %24 = arith.maximumf %17, %19 : vector<4x4x16xbf16>
    %25 = arith.maximumf %21, %23 : vector<4x4x16xbf16>
    %26 = arith.maximumf %24, %25 : vector<4x4x16xbf16>
    %27 = arith.extf %26 : vector<4x4x16xbf16> to vector<4x4x16xf32>
    %c1_50 = arith.constant 1 : index
    %c0_51 = arith.constant 0 : index
    %c16 = arith.constant 16 : index
    %28 = vector.load %arg7[%c1_50, %c0_51, %c16] : memref<6x4x48xf32, #tpu.memory_space<vmem>>, vector<4x4x16xf32>
    tpu.vector_store %arg7[%c1_50, %c0_51, %c16], %27 {strides = array<i32>} : memref<6x4x48xf32, #tpu.memory_space<vmem>>, vector<4x4x16xf32>,
    %29 = vector.extract_strided_slice %27 {offsets = [0, 0, 0], sizes = [4, 3, 16], strides = [1, 1, 1]} : vector<4x4x16xf32> to vector<4x3x16xf32>
    %c1_52 = arith.constant 1 : index
    %c1_53 = arith.constant 1 : index
    %c0_54 = arith.constant 0 : index
    %30 = vector.load %arg7[%c1_52, %c1_53, %c0_54] : memref<6x4x48xf32, #tpu.memory_space<vmem>>, vector<4x3x16xf32>
    tpu.vector_store %arg7[%c1_52, %c1_53, %c0_54], %29 {strides = array<i32>} : memref<6x4x48xf32, #tpu.memory_space<vmem>>, vector<4x3x16xf32>,
    %31 = vector.extract_strided_slice %27 {offsets = [0, 1, 0], sizes = [4, 3, 16], strides = [1, 1, 1]} : vector<4x4x16xf32> to vector<4x3x16xf32>
    %c1_55 = arith.constant 1 : index
    %c0_56 = arith.constant 0 : index
    %c32_57 = arith.constant 32 : index
    %32 = vector.load %arg7[%c1_55, %c0_56, %c32_57] : memref<6x4x48xf32, #tpu.memory_space<vmem>>, vector<4x3x16xf32>
    tpu.vector_store %arg7[%c1_55, %c0_56, %c32_57], %31 {strides = array<i32>} : memref<6x4x48xf32, #tpu.memory_space<vmem>>, vector<4x3x16xf32>,
    %c0_58 = arith.constant 0 : index
    %c0_59 = arith.constant 0 : index
    %33 = vector.load %arg3[%c0_58, %c0_59] : memref<1x16xf32, #tpu.memory_space<vmem>>, vector<1x16xf32>
    %cst_60 = arith.constant 0.000000e+00 : f32
    %34 = vector.broadcast %cst_60 : f32 to vector<16x16xf32>
    %c0_61 = arith.constant 0 : index
    %c0_62 = arith.constant 0 : index
    %c0_63 = arith.constant 0 : index
    %35 = vector.load %arg7[%c0_61, %c0_62, %c0_63] : memref<6x4x48xf32, #tpu.memory_space<vmem>>, vector<4x4x48xf32>
    %36 = vector.shape_cast %35 : vector<4x4x48xf32> to vector<16x48xf32>
    %37 = arith.truncf %36 : vector<16x48xf32> to vector<16x48xbf16>
    %c0_64 = arith.constant 0 : index
    %c0_65 = arith.constant 0 : index
    %c0_66 = arith.constant 0 : index
    %38 = vector.load %arg2[%c0_64, %c0_65, %c0_66] : memref<3x48x16xbf16, #tpu.memory_space<vmem>>, vector<1x48x16xbf16>
    %39 = vector.shape_cast %38 : vector<1x48x16xbf16> to vector<48x16xbf16>
    %cst_67 = arith.constant dense<0.000000e+00> : vector<16x16xf32>
    %40 = tpu.matmul %37, %39, %cst_67 {dimension_numbers = #tpu.dot_dimension_numbers<[1], [0], [0], [1], [0, 0, 1, 1], [], []>} : vector<16x48xbf16>, vector<48x16xbf16>, vector<16x16xf32> -> vector<16x16xf32>
    %41 = arith.addf %34, %40 : vector<16x16xf32>
    %c1_68 = arith.constant 1 : index
    %c0_69 = arith.constant 0 : index
    %c0_70 = arith.constant 0 : index
    %42 = vector.load %arg7[%c1_68, %c0_69, %c0_70] : memref<6x4x48xf32, #tpu.memory_space<vmem>>, vector<4x4x48xf32>
    %43 = vector.shape_cast %42 : vector<4x4x48xf32> to vector<16x48xf32>
    %44 = arith.truncf %43 : vector<16x48xf32> to vector<16x48xbf16>
    %c1_71 = arith.constant 1 : index
    %c0_72 = arith.constant 0 : index
    %c0_73 = arith.constant 0 : index
    %45 = vector.load %arg2[%c1_71, %c0_72, %c0_73] : memref<3x48x16xbf16, #tpu.memory_space<vmem>>, vector<1x48x16xbf16>
    %46 = vector.shape_cast %45 : vector<1x48x16xbf16> to vector<48x16xbf16>
    %cst_74 = arith.constant dense<0.000000e+00> : vector<16x16xf32>
    %47 = tpu.matmul %44, %46, %cst_74 {dimension_numbers = #tpu.dot_dimension_numbers<[1], [0], [0], [1], [0, 0, 1, 1], [], []>} : vector<16x48xbf16>, vector<48x16xbf16>, vector<16x16xf32> -> vector<16x16xf32>
    %48 = arith.addf %41, %47 : vector<16x16xf32>
    %c2 = arith.constant 2 : index
    %c0_75 = arith.constant 0 : index
    %c0_76 = arith.constant 0 : index
    %49 = vector.load %arg7[%c2, %c0_75, %c0_76] : memref<6x4x48xf32, #tpu.memory_space<vmem>>, vector<4x4x48xf32>
    %50 = vector.shape_cast %49 : vector<4x4x48xf32> to vector<16x48xf32>
    %51 = arith.truncf %50 : vector<16x48xf32> to vector<16x48xbf16>
    %c2_77 = arith.constant 2 : index
    %c0_78 = arith.constant 0 : index
    %c0_79 = arith.constant 0 : index
    %52 = vector.load %arg2[%c2_77, %c0_78, %c0_79] : memref<3x48x16xbf16, #tpu.memory_space<vmem>>, vector<1x48x16xbf16>
    %53 = vector.shape_cast %52 : vector<1x48x16xbf16> to vector<48x16xbf16>
    %cst_80 = arith.constant dense<0.000000e+00> : vector<16x16xf32>
    %54 = tpu.matmul %51, %53, %cst_80 {dimension_numbers = #tpu.dot_dimension_numbers<[1], [0], [0], [1], [0, 0, 1, 1], [], []>} : vector<16x48xbf16>, vector<48x16xbf16>, vector<16x16xf32> -> vector<16x16xf32>
    %55 = arith.addf %48, %54 : vector<16x16xf32>
    %56 = vector.broadcast %33 : vector<1x16xf32> to vector<16x16xf32>
    %57 = arith.addf %55, %56 : vector<16x16xf32>
    %cst_81 = arith.constant 0.000000e+00 : f32
    %58 = vector.broadcast %cst_81 : f32 to vector<16x16xf32>
    %59 = arith.maximumf %57, %58 : vector<16x16xf32>
    %60 = vector.shape_cast %59 : vector<16x16xf32> to vector<4x4x16xf32>
    %c1_82 = arith.constant 1 : index
    %c0_83 = arith.constant 0 : index
    %c16_84 = arith.constant 16 : index
    %61 = vector.load %arg8[%c1_82, %c0_83, %c16_84] : memref<6x4x48xf32, #tpu.memory_space<vmem>>, vector<4x4x16xf32>
    tpu.vector_store %arg8[%c1_82, %c0_83, %c16_84], %60 {strides = array<i32>} : memref<6x4x48xf32, #tpu.memory_space<vmem>>, vector<4x4x16xf32>,
    %62 = vector.extract_strided_slice %60 {offsets = [0, 0, 0], sizes = [4, 3, 16], strides = [1, 1, 1]} : vector<4x4x16xf32> to vector<4x3x16xf32>
    %c1_85 = arith.constant 1 : index
    %c1_86 = arith.constant 1 : index
    %c0_87 = arith.constant 0 : index
    %63 = vector.load %arg8[%c1_85, %c1_86, %c0_87] : memref<6x4x48xf32, #tpu.memory_space<vmem>>, vector<4x3x16xf32>
    tpu.vector_store %arg8[%c1_85, %c1_86, %c0_87], %62 {strides = array<i32>} : memref<6x4x48xf32, #tpu.memory_space<vmem>>, vector<4x3x16xf32>,
    %64 = vector.extract_strided_slice %60 {offsets = [0, 1, 0], sizes = [4, 3, 16], strides = [1, 1, 1]} : vector<4x4x16xf32> to vector<4x3x16xf32>
    %c1_88 = arith.constant 1 : index
    %c0_89 = arith.constant 0 : index
    %c32_90 = arith.constant 32 : index
    %65 = vector.load %arg8[%c1_88, %c0_89, %c32_90] : memref<6x4x48xf32, #tpu.memory_space<vmem>>, vector<4x3x16xf32>
    tpu.vector_store %arg8[%c1_88, %c0_89, %c32_90], %64 {strides = array<i32>} : memref<6x4x48xf32, #tpu.memory_space<vmem>>, vector<4x3x16xf32>,
    %c0_91 = arith.constant 0 : index
    %c0_92 = arith.constant 0 : index
    %66 = vector.load %arg5[%c0_91, %c0_92] : memref<1x16xf32, #tpu.memory_space<vmem>>, vector<1x16xf32>
    %cst_93 = arith.constant 0.000000e+00 : f32
    %67 = vector.broadcast %cst_93 : f32 to vector<16x16xf32>
    %c0_94 = arith.constant 0 : index
    %c0_95 = arith.constant 0 : index
    %c0_96 = arith.constant 0 : index
    %68 = vector.load %arg8[%c0_94, %c0_95, %c0_96] : memref<6x4x48xf32, #tpu.memory_space<vmem>>, vector<4x4x48xf32>
    %69 = vector.shape_cast %68 : vector<4x4x48xf32> to vector<16x48xf32>
    %70 = arith.truncf %69 : vector<16x48xf32> to vector<16x48xbf16>
    %c0_97 = arith.constant 0 : index
    %c0_98 = arith.constant 0 : index
    %c0_99 = arith.constant 0 : index
    %71 = vector.load %arg4[%c0_97, %c0_98, %c0_99] : memref<3x48x16xbf16, #tpu.memory_space<vmem>>, vector<1x48x16xbf16>
    %72 = vector.shape_cast %71 : vector<1x48x16xbf16> to vector<48x16xbf16>
    %cst_100 = arith.constant dense<0.000000e+00> : vector<16x16xf32>
    %73 = tpu.matmul %70, %72, %cst_100 {dimension_numbers = #tpu.dot_dimension_numbers<[1], [0], [0], [1], [0, 0, 1, 1], [], []>} : vector<16x48xbf16>, vector<48x16xbf16>, vector<16x16xf32> -> vector<16x16xf32>
    %74 = arith.addf %67, %73 : vector<16x16xf32>
    %c1_101 = arith.constant 1 : index
    %c0_102 = arith.constant 0 : index
    %c0_103 = arith.constant 0 : index
    %75 = vector.load %arg8[%c1_101, %c0_102, %c0_103] : memref<6x4x48xf32, #tpu.memory_space<vmem>>, vector<4x4x48xf32>
    %76 = vector.shape_cast %75 : vector<4x4x48xf32> to vector<16x48xf32>
    %77 = arith.truncf %76 : vector<16x48xf32> to vector<16x48xbf16>
    %c1_104 = arith.constant 1 : index
    %c0_105 = arith.constant 0 : index
    %c0_106 = arith.constant 0 : index
    %78 = vector.load %arg4[%c1_104, %c0_105, %c0_106] : memref<3x48x16xbf16, #tpu.memory_space<vmem>>, vector<1x48x16xbf16>
    %79 = vector.shape_cast %78 : vector<1x48x16xbf16> to vector<48x16xbf16>
    %cst_107 = arith.constant dense<0.000000e+00> : vector<16x16xf32>
    %80 = tpu.matmul %77, %79, %cst_107 {dimension_numbers = #tpu.dot_dimension_numbers<[1], [0], [0], [1], [0, 0, 1, 1], [], []>} : vector<16x48xbf16>, vector<48x16xbf16>, vector<16x16xf32> -> vector<16x16xf32>
    %81 = arith.addf %74, %80 : vector<16x16xf32>
    %c2_108 = arith.constant 2 : index
    %c0_109 = arith.constant 0 : index
    %c0_110 = arith.constant 0 : index
    %82 = vector.load %arg8[%c2_108, %c0_109, %c0_110] : memref<6x4x48xf32, #tpu.memory_space<vmem>>, vector<4x4x48xf32>
    %83 = vector.shape_cast %82 : vector<4x4x48xf32> to vector<16x48xf32>
    %84 = arith.truncf %83 : vector<16x48xf32> to vector<16x48xbf16>
    %c2_111 = arith.constant 2 : index
    %c0_112 = arith.constant 0 : index
    %c0_113 = arith.constant 0 : index
    %85 = vector.load %arg4[%c2_111, %c0_112, %c0_113] : memref<3x48x16xbf16, #tpu.memory_space<vmem>>, vector<1x48x16xbf16>
    %86 = vector.shape_cast %85 : vector<1x48x16xbf16> to vector<48x16xbf16>
    %cst_114 = arith.constant dense<0.000000e+00> : vector<16x16xf32>
    %87 = tpu.matmul %84, %86, %cst_114 {dimension_numbers = #tpu.dot_dimension_numbers<[1], [0], [0], [1], [0, 0, 1, 1], [], []>} : vector<16x48xbf16>, vector<48x16xbf16>, vector<16x16xf32> -> vector<16x16xf32>
    %88 = arith.addf %81, %87 : vector<16x16xf32>
    %89 = vector.broadcast %66 : vector<1x16xf32> to vector<16x16xf32>
    %90 = arith.addf %88, %89 : vector<16x16xf32>
    %cst_115 = arith.constant 0.000000e+00 : f32
    %91 = vector.broadcast %cst_115 : f32 to vector<16x16xf32>
    %92 = arith.maximumf %90, %91 : vector<16x16xf32>
    %c0_116 = arith.constant 0 : index
    %c0_117 = arith.constant 0 : index
    %c0_118 = arith.constant 0 : index
    %93 = vector.load %arg6[%c0_116, %c0_117, %c0_118] : memref<1x16x16xf32, #tpu.memory_space<vmem>>, vector<1x16x16xf32>
    %94 = vector.shape_cast %93 : vector<1x16x16xf32> to vector<16x16xf32>
    %95 = vector.shape_cast %92 : vector<16x16xf32> to vector<1x16x16xf32>
    tpu.vector_store %arg6[%c0_116, %c0_117, %c0_118], %95 {strides = array<i32>} : memref<1x16x16xf32, #tpu.memory_space<vmem>>, vector<1x16x16xf32>,
    return
  }
  func.func @transform_0(%arg0: i32) -> (i32, i32, i32, i32, i32, i32) {
    %c0_i32 = arith.constant 0 : i32
    %c0_i32_0 = arith.constant 0 : i32
    %c0_i32_1 = arith.constant 0 : i32
    %c0_i32_2 = arith.constant 0 : i32
    %c0_i32_3 = arith.constant 0 : i32
    %c0_i32_4 = arith.constant 0 : i32
    return %arg0, %c0_i32, %c0_i32_0, %c0_i32_1, %c0_i32_2, %c0_i32_3 : i32, i32, i32, i32, i32, i32
  }
  func.func @transform_1(%arg0: i32) -> (i32, i32, i32) {
    %c0_i32 = arith.constant 0 : i32
    %c0_i32_0 = arith.constant 0 : i32
    %c0_i32_1 = arith.constant 0 : i32
    %c0_i32_2 = arith.constant 0 : i32
    return %c0_i32, %c0_i32_0, %c0_i32_1 : i32, i32, i32
  }
  func.func @transform_2(%arg0: i32) -> (i32, i32) {
    %c0_i32 = arith.constant 0 : i32
    %c0_i32_0 = arith.constant 0 : i32
    %c0_i32_1 = arith.constant 0 : i32
    return %c0_i32, %c0_i32_0 : i32, i32
  }
  func.func @transform_3(%arg0: i32) -> (i32, i32, i32) {
    %c0_i32 = arith.constant 0 : i32
    %c0_i32_0 = arith.constant 0 : i32
    %c0_i32_1 = arith.constant 0 : i32
    %c0_i32_2 = arith.constant 0 : i32
    return %c0_i32, %c0_i32_0, %c0_i32_1 : i32, i32, i32
  }
  func.func @transform_4(%arg0: i32) -> (i32, i32) {
    %c0_i32 = arith.constant 0 : i32
    %c0_i32_0 = arith.constant 0 : i32
    %c0_i32_1 = arith.constant 0 : i32
    return %c0_i32, %c0_i32_0 : i32, i32
  }
  func.func @transform_5(%arg0: i32) -> (i32, i32, i32) {
    %c0_i32 = arith.constant 0 : i32
    %c0_i32_0 = arith.constant 0 : i32
    %c0_i32_1 = arith.constant 0 : i32
    return %arg0, %c0_i32, %c0_i32_0 : i32, i32, i32
  }
}

module attributes {stable_mosaic.version = 11 : i64} {
  func.func @_down_double_conv_kernel(%arg0: i32, %arg1: memref<1x8x2x2x8x8xbf16, #tpu.memory_space<vmem>>, %arg2: memref<3x24x16xbf16, #tpu.memory_space<vmem>>, %arg3: memref<1x16xf32, #tpu.memory_space<vmem>>, %arg4: memref<3x48x16xbf16, #tpu.memory_space<vmem>>, %arg5: memref<1x16xf32, #tpu.memory_space<vmem>>, %arg6: memref<1x64x16xf32, #tpu.memory_space<vmem>>, %arg7: memref<10x8x24xf32, #tpu.memory_space<vmem>>, %arg8: memref<10x8x48xf32, #tpu.memory_space<vmem>>) attributes {dimension_semantics = [#tpu.dimension_semantics<parallel>], iteration_bounds = array<i64: 2>, scalar_prefetch = 0 : i64, scratch_operands = 2 : i64, tpu.core_type = #tpu.core_type<tc>, window_params = [{transform_indices = @transform_0, window_bounds = array<i64: 1, 8, 2, 2, 8, 8>}, {pipeline_mode = #tpu.pipeline_mode<synchronous>, transform_indices = @transform_1, window_bounds = array<i64: 3, 24, 16>}, {pipeline_mode = #tpu.pipeline_mode<synchronous>, transform_indices = @transform_2, window_bounds = array<i64: 1, 16>}, {pipeline_mode = #tpu.pipeline_mode<synchronous>, transform_indices = @transform_3, window_bounds = array<i64: 3, 48, 16>}, {pipeline_mode = #tpu.pipeline_mode<synchronous>, transform_indices = @transform_4, window_bounds = array<i64: 1, 16>}, {transform_indices = @transform_5, window_bounds = array<i64: 1, 64, 16>}]} {
    %cst = arith.constant 0.000000e+00 : f32
    %0 = vector.broadcast %cst : f32 to vector<1x8x24xf32>
    %c0 = arith.constant 0 : index
    %c0_0 = arith.constant 0 : index
    %c0_1 = arith.constant 0 : index
    %1 = vector.load %arg7[%c0, %c0_0, %c0_1] : memref<10x8x24xf32, #tpu.memory_space<vmem>>, vector<1x8x24xf32>
    tpu.vector_store %arg7[%c0, %c0_0, %c0_1], %0 {strides = array<i32>} : memref<10x8x24xf32, #tpu.memory_space<vmem>>, vector<1x8x24xf32>,
    %cst_2 = arith.constant 0.000000e+00 : f32
    %2 = vector.broadcast %cst_2 : f32 to vector<1x8x24xf32>
    %c9 = arith.constant 9 : index
    %c0_3 = arith.constant 0 : index
    %c0_4 = arith.constant 0 : index
    %3 = vector.load %arg7[%c9, %c0_3, %c0_4] : memref<10x8x24xf32, #tpu.memory_space<vmem>>, vector<1x8x24xf32>
    tpu.vector_store %arg7[%c9, %c0_3, %c0_4], %2 {strides = array<i32>} : memref<10x8x24xf32, #tpu.memory_space<vmem>>, vector<1x8x24xf32>,
    %cst_5 = arith.constant 0.000000e+00 : f32
    %4 = vector.broadcast %cst_5 : f32 to vector<8x1x8xf32>
    %c1 = arith.constant 1 : index
    %c0_6 = arith.constant 0 : index
    %c0_7 = arith.constant 0 : index
    %5 = vector.load %arg7[%c1, %c0_6, %c0_7] : memref<10x8x24xf32, #tpu.memory_space<vmem>>, vector<8x1x8xf32>
    tpu.vector_store %arg7[%c1, %c0_6, %c0_7], %4 {strides = array<i32>} : memref<10x8x24xf32, #tpu.memory_space<vmem>>, vector<8x1x8xf32>,
    %cst_8 = arith.constant 0.000000e+00 : f32
    %6 = vector.broadcast %cst_8 : f32 to vector<8x1x8xf32>
    %c1_9 = arith.constant 1 : index
    %c7 = arith.constant 7 : index
    %c16 = arith.constant 16 : index
    %7 = vector.load %arg7[%c1_9, %c7, %c16] : memref<10x8x24xf32, #tpu.memory_space<vmem>>, vector<8x1x8xf32>
    tpu.vector_store %arg7[%c1_9, %c7, %c16], %6 {strides = array<i32>} : memref<10x8x24xf32, #tpu.memory_space<vmem>>, vector<8x1x8xf32>,
    %cst_10 = arith.constant 0.000000e+00 : f32
    %8 = vector.broadcast %cst_10 : f32 to vector<1x8x48xf32>
    %c0_11 = arith.constant 0 : index
    %c0_12 = arith.constant 0 : index
    %c0_13 = arith.constant 0 : index
    %9 = vector.load %arg8[%c0_11, %c0_12, %c0_13] : memref<10x8x48xf32, #tpu.memory_space<vmem>>, vector<1x8x48xf32>
    tpu.vector_store %arg8[%c0_11, %c0_12, %c0_13], %8 {strides = array<i32>} : memref<10x8x48xf32, #tpu.memory_space<vmem>>, vector<1x8x48xf32>,
    %cst_14 = arith.constant 0.000000e+00 : f32
    %10 = vector.broadcast %cst_14 : f32 to vector<1x8x48xf32>
    %c9_15 = arith.constant 9 : index
    %c0_16 = arith.constant 0 : index
    %c0_17 = arith.constant 0 : index
    %11 = vector.load %arg8[%c9_15, %c0_16, %c0_17] : memref<10x8x48xf32, #tpu.memory_space<vmem>>, vector<1x8x48xf32>
    tpu.vector_store %arg8[%c9_15, %c0_16, %c0_17], %10 {strides = array<i32>} : memref<10x8x48xf32, #tpu.memory_space<vmem>>, vector<1x8x48xf32>,
    %cst_18 = arith.constant 0.000000e+00 : f32
    %12 = vector.broadcast %cst_18 : f32 to vector<8x1x16xf32>
    %c1_19 = arith.constant 1 : index
    %c0_20 = arith.constant 0 : index
    %c0_21 = arith.constant 0 : index
    %13 = vector.load %arg8[%c1_19, %c0_20, %c0_21] : memref<10x8x48xf32, #tpu.memory_space<vmem>>, vector<8x1x16xf32>
    tpu.vector_store %arg8[%c1_19, %c0_20, %c0_21], %12 {strides = array<i32>} : memref<10x8x48xf32, #tpu.memory_space<vmem>>, vector<8x1x16xf32>,
    %cst_22 = arith.constant 0.000000e+00 : f32
    %14 = vector.broadcast %cst_22 : f32 to vector<8x1x16xf32>
    %c1_23 = arith.constant 1 : index
    %c7_24 = arith.constant 7 : index
    %c32 = arith.constant 32 : index
    %15 = vector.load %arg8[%c1_23, %c7_24, %c32] : memref<10x8x48xf32, #tpu.memory_space<vmem>>, vector<8x1x16xf32>
    tpu.vector_store %arg8[%c1_23, %c7_24, %c32], %14 {strides = array<i32>} : memref<10x8x48xf32, #tpu.memory_space<vmem>>, vector<8x1x16xf32>,
    %c0_25 = arith.constant 0 : index
    %c0_26 = arith.constant 0 : index
    %c0_27 = arith.constant 0 : index
    %c0_28 = arith.constant 0 : index
    %c0_29 = arith.constant 0 : index
    %c0_30 = arith.constant 0 : index
    %16 = vector.load %arg1[%c0_25, %c0_26, %c0_27, %c0_28, %c0_29, %c0_30] : memref<1x8x2x2x8x8xbf16, #tpu.memory_space<vmem>>, vector<1x8x1x1x8x8xbf16>
    %17 = vector.shape_cast %16 : vector<1x8x1x1x8x8xbf16> to vector<8x8x8xbf16>
    %c0_31 = arith.constant 0 : index
    %c0_32 = arith.constant 0 : index
    %c0_33 = arith.constant 0 : index
    %c1_34 = arith.constant 1 : index
    %c0_35 = arith.constant 0 : index
    %c0_36 = arith.constant 0 : index
    %18 = vector.load %arg1[%c0_31, %c0_32, %c0_33, %c1_34, %c0_35, %c0_36] : memref<1x8x2x2x8x8xbf16, #tpu.memory_space<vmem>>, vector<1x8x1x1x8x8xbf16>
    %19 = vector.shape_cast %18 : vector<1x8x1x1x8x8xbf16> to vector<8x8x8xbf16>
    %c0_37 = arith.constant 0 : index
    %c0_38 = arith.constant 0 : index
    %c1_39 = arith.constant 1 : index
    %c0_40 = arith.constant 0 : index
    %c0_41 = arith.constant 0 : index
    %c0_42 = arith.constant 0 : index
    %20 = vector.load %arg1[%c0_37, %c0_38, %c1_39, %c0_40, %c0_41, %c0_42] : memref<1x8x2x2x8x8xbf16, #tpu.memory_space<vmem>>, vector<1x8x1x1x8x8xbf16>
    %21 = vector.shape_cast %20 : vector<1x8x1x1x8x8xbf16> to vector<8x8x8xbf16>
    %c0_43 = arith.constant 0 : index
    %c0_44 = arith.constant 0 : index
    %c1_45 = arith.constant 1 : index
    %c1_46 = arith.constant 1 : index
    %c0_47 = arith.constant 0 : index
    %c0_48 = arith.constant 0 : index
    %22 = vector.load %arg1[%c0_43, %c0_44, %c1_45, %c1_46, %c0_47, %c0_48] : memref<1x8x2x2x8x8xbf16, #tpu.memory_space<vmem>>, vector<1x8x1x1x8x8xbf16>
    %23 = vector.shape_cast %22 : vector<1x8x1x1x8x8xbf16> to vector<8x8x8xbf16>
    %24 = arith.maximumf %17, %19 : vector<8x8x8xbf16>
    %25 = arith.maximumf %21, %23 : vector<8x8x8xbf16>
    %26 = arith.maximumf %24, %25 : vector<8x8x8xbf16>
    %27 = arith.extf %26 : vector<8x8x8xbf16> to vector<8x8x8xf32>
    %c1_49 = arith.constant 1 : index
    %c0_50 = arith.constant 0 : index
    %c8 = arith.constant 8 : index
    %28 = vector.load %arg7[%c1_49, %c0_50, %c8] : memref<10x8x24xf32, #tpu.memory_space<vmem>>, vector<8x8x8xf32>
    tpu.vector_store %arg7[%c1_49, %c0_50, %c8], %27 {strides = array<i32>} : memref<10x8x24xf32, #tpu.memory_space<vmem>>, vector<8x8x8xf32>,
    %29 = vector.extract_strided_slice %27 {offsets = [0, 0, 0], sizes = [8, 7, 8], strides = [1, 1, 1]} : vector<8x8x8xf32> to vector<8x7x8xf32>
    %c1_51 = arith.constant 1 : index
    %c1_52 = arith.constant 1 : index
    %c0_53 = arith.constant 0 : index
    %30 = vector.load %arg7[%c1_51, %c1_52, %c0_53] : memref<10x8x24xf32, #tpu.memory_space<vmem>>, vector<8x7x8xf32>
    tpu.vector_store %arg7[%c1_51, %c1_52, %c0_53], %29 {strides = array<i32>} : memref<10x8x24xf32, #tpu.memory_space<vmem>>, vector<8x7x8xf32>,
    %31 = vector.extract_strided_slice %27 {offsets = [0, 1, 0], sizes = [8, 7, 8], strides = [1, 1, 1]} : vector<8x8x8xf32> to vector<8x7x8xf32>
    %c1_54 = arith.constant 1 : index
    %c0_55 = arith.constant 0 : index
    %c16_56 = arith.constant 16 : index
    %32 = vector.load %arg7[%c1_54, %c0_55, %c16_56] : memref<10x8x24xf32, #tpu.memory_space<vmem>>, vector<8x7x8xf32>
    tpu.vector_store %arg7[%c1_54, %c0_55, %c16_56], %31 {strides = array<i32>} : memref<10x8x24xf32, #tpu.memory_space<vmem>>, vector<8x7x8xf32>,
    %c0_57 = arith.constant 0 : index
    %c0_58 = arith.constant 0 : index
    %33 = vector.load %arg3[%c0_57, %c0_58] : memref<1x16xf32, #tpu.memory_space<vmem>>, vector<1x16xf32>
    %cst_59 = arith.constant 0.000000e+00 : f32
    %34 = vector.broadcast %cst_59 : f32 to vector<64x16xf32>
    %c0_60 = arith.constant 0 : index
    %c0_61 = arith.constant 0 : index
    %c0_62 = arith.constant 0 : index
    %35 = vector.load %arg7[%c0_60, %c0_61, %c0_62] : memref<10x8x24xf32, #tpu.memory_space<vmem>>, vector<8x8x24xf32>
    %36 = vector.shape_cast %35 : vector<8x8x24xf32> to vector<64x24xf32>
    %37 = arith.truncf %36 : vector<64x24xf32> to vector<64x24xbf16>
    %c0_63 = arith.constant 0 : index
    %c0_64 = arith.constant 0 : index
    %c0_65 = arith.constant 0 : index
    %38 = vector.load %arg2[%c0_63, %c0_64, %c0_65] : memref<3x24x16xbf16, #tpu.memory_space<vmem>>, vector<1x24x16xbf16>
    %39 = vector.shape_cast %38 : vector<1x24x16xbf16> to vector<24x16xbf16>
    %cst_66 = arith.constant dense<0.000000e+00> : vector<64x16xf32>
    %40 = tpu.matmul %37, %39, %cst_66 {dimension_numbers = #tpu.dot_dimension_numbers<[1], [0], [0], [1], [0, 0, 1, 1], [], []>} : vector<64x24xbf16>, vector<24x16xbf16>, vector<64x16xf32> -> vector<64x16xf32>
    %41 = arith.addf %34, %40 : vector<64x16xf32>
    %c1_67 = arith.constant 1 : index
    %c0_68 = arith.constant 0 : index
    %c0_69 = arith.constant 0 : index
    %42 = vector.load %arg7[%c1_67, %c0_68, %c0_69] : memref<10x8x24xf32, #tpu.memory_space<vmem>>, vector<8x8x24xf32>
    %43 = vector.shape_cast %42 : vector<8x8x24xf32> to vector<64x24xf32>
    %44 = arith.truncf %43 : vector<64x24xf32> to vector<64x24xbf16>
    %c1_70 = arith.constant 1 : index
    %c0_71 = arith.constant 0 : index
    %c0_72 = arith.constant 0 : index
    %45 = vector.load %arg2[%c1_70, %c0_71, %c0_72] : memref<3x24x16xbf16, #tpu.memory_space<vmem>>, vector<1x24x16xbf16>
    %46 = vector.shape_cast %45 : vector<1x24x16xbf16> to vector<24x16xbf16>
    %cst_73 = arith.constant dense<0.000000e+00> : vector<64x16xf32>
    %47 = tpu.matmul %44, %46, %cst_73 {dimension_numbers = #tpu.dot_dimension_numbers<[1], [0], [0], [1], [0, 0, 1, 1], [], []>} : vector<64x24xbf16>, vector<24x16xbf16>, vector<64x16xf32> -> vector<64x16xf32>
    %48 = arith.addf %41, %47 : vector<64x16xf32>
    %c2 = arith.constant 2 : index
    %c0_74 = arith.constant 0 : index
    %c0_75 = arith.constant 0 : index
    %49 = vector.load %arg7[%c2, %c0_74, %c0_75] : memref<10x8x24xf32, #tpu.memory_space<vmem>>, vector<8x8x24xf32>
    %50 = vector.shape_cast %49 : vector<8x8x24xf32> to vector<64x24xf32>
    %51 = arith.truncf %50 : vector<64x24xf32> to vector<64x24xbf16>
    %c2_76 = arith.constant 2 : index
    %c0_77 = arith.constant 0 : index
    %c0_78 = arith.constant 0 : index
    %52 = vector.load %arg2[%c2_76, %c0_77, %c0_78] : memref<3x24x16xbf16, #tpu.memory_space<vmem>>, vector<1x24x16xbf16>
    %53 = vector.shape_cast %52 : vector<1x24x16xbf16> to vector<24x16xbf16>
    %cst_79 = arith.constant dense<0.000000e+00> : vector<64x16xf32>
    %54 = tpu.matmul %51, %53, %cst_79 {dimension_numbers = #tpu.dot_dimension_numbers<[1], [0], [0], [1], [0, 0, 1, 1], [], []>} : vector<64x24xbf16>, vector<24x16xbf16>, vector<64x16xf32> -> vector<64x16xf32>
    %55 = arith.addf %48, %54 : vector<64x16xf32>
    %56 = vector.broadcast %33 : vector<1x16xf32> to vector<64x16xf32>
    %57 = arith.addf %55, %56 : vector<64x16xf32>
    %cst_80 = arith.constant 0.000000e+00 : f32
    %58 = vector.broadcast %cst_80 : f32 to vector<64x16xf32>
    %59 = arith.maximumf %57, %58 : vector<64x16xf32>
    %60 = vector.shape_cast %59 : vector<64x16xf32> to vector<8x8x16xf32>
    %c1_81 = arith.constant 1 : index
    %c0_82 = arith.constant 0 : index
    %c16_83 = arith.constant 16 : index
    %61 = vector.load %arg8[%c1_81, %c0_82, %c16_83] : memref<10x8x48xf32, #tpu.memory_space<vmem>>, vector<8x8x16xf32>
    tpu.vector_store %arg8[%c1_81, %c0_82, %c16_83], %60 {strides = array<i32>} : memref<10x8x48xf32, #tpu.memory_space<vmem>>, vector<8x8x16xf32>,
    %62 = vector.extract_strided_slice %60 {offsets = [0, 0, 0], sizes = [8, 7, 16], strides = [1, 1, 1]} : vector<8x8x16xf32> to vector<8x7x16xf32>
    %c1_84 = arith.constant 1 : index
    %c1_85 = arith.constant 1 : index
    %c0_86 = arith.constant 0 : index
    %63 = vector.load %arg8[%c1_84, %c1_85, %c0_86] : memref<10x8x48xf32, #tpu.memory_space<vmem>>, vector<8x7x16xf32>
    tpu.vector_store %arg8[%c1_84, %c1_85, %c0_86], %62 {strides = array<i32>} : memref<10x8x48xf32, #tpu.memory_space<vmem>>, vector<8x7x16xf32>,
    %64 = vector.extract_strided_slice %60 {offsets = [0, 1, 0], sizes = [8, 7, 16], strides = [1, 1, 1]} : vector<8x8x16xf32> to vector<8x7x16xf32>
    %c1_87 = arith.constant 1 : index
    %c0_88 = arith.constant 0 : index
    %c32_89 = arith.constant 32 : index
    %65 = vector.load %arg8[%c1_87, %c0_88, %c32_89] : memref<10x8x48xf32, #tpu.memory_space<vmem>>, vector<8x7x16xf32>
    tpu.vector_store %arg8[%c1_87, %c0_88, %c32_89], %64 {strides = array<i32>} : memref<10x8x48xf32, #tpu.memory_space<vmem>>, vector<8x7x16xf32>,
    %c0_90 = arith.constant 0 : index
    %c0_91 = arith.constant 0 : index
    %66 = vector.load %arg5[%c0_90, %c0_91] : memref<1x16xf32, #tpu.memory_space<vmem>>, vector<1x16xf32>
    %cst_92 = arith.constant 0.000000e+00 : f32
    %67 = vector.broadcast %cst_92 : f32 to vector<64x16xf32>
    %c0_93 = arith.constant 0 : index
    %c0_94 = arith.constant 0 : index
    %c0_95 = arith.constant 0 : index
    %68 = vector.load %arg8[%c0_93, %c0_94, %c0_95] : memref<10x8x48xf32, #tpu.memory_space<vmem>>, vector<8x8x48xf32>
    %69 = vector.shape_cast %68 : vector<8x8x48xf32> to vector<64x48xf32>
    %70 = arith.truncf %69 : vector<64x48xf32> to vector<64x48xbf16>
    %c0_96 = arith.constant 0 : index
    %c0_97 = arith.constant 0 : index
    %c0_98 = arith.constant 0 : index
    %71 = vector.load %arg4[%c0_96, %c0_97, %c0_98] : memref<3x48x16xbf16, #tpu.memory_space<vmem>>, vector<1x48x16xbf16>
    %72 = vector.shape_cast %71 : vector<1x48x16xbf16> to vector<48x16xbf16>
    %cst_99 = arith.constant dense<0.000000e+00> : vector<64x16xf32>
    %73 = tpu.matmul %70, %72, %cst_99 {dimension_numbers = #tpu.dot_dimension_numbers<[1], [0], [0], [1], [0, 0, 1, 1], [], []>} : vector<64x48xbf16>, vector<48x16xbf16>, vector<64x16xf32> -> vector<64x16xf32>
    %74 = arith.addf %67, %73 : vector<64x16xf32>
    %c1_100 = arith.constant 1 : index
    %c0_101 = arith.constant 0 : index
    %c0_102 = arith.constant 0 : index
    %75 = vector.load %arg8[%c1_100, %c0_101, %c0_102] : memref<10x8x48xf32, #tpu.memory_space<vmem>>, vector<8x8x48xf32>
    %76 = vector.shape_cast %75 : vector<8x8x48xf32> to vector<64x48xf32>
    %77 = arith.truncf %76 : vector<64x48xf32> to vector<64x48xbf16>
    %c1_103 = arith.constant 1 : index
    %c0_104 = arith.constant 0 : index
    %c0_105 = arith.constant 0 : index
    %78 = vector.load %arg4[%c1_103, %c0_104, %c0_105] : memref<3x48x16xbf16, #tpu.memory_space<vmem>>, vector<1x48x16xbf16>
    %79 = vector.shape_cast %78 : vector<1x48x16xbf16> to vector<48x16xbf16>
    %cst_106 = arith.constant dense<0.000000e+00> : vector<64x16xf32>
    %80 = tpu.matmul %77, %79, %cst_106 {dimension_numbers = #tpu.dot_dimension_numbers<[1], [0], [0], [1], [0, 0, 1, 1], [], []>} : vector<64x48xbf16>, vector<48x16xbf16>, vector<64x16xf32> -> vector<64x16xf32>
    %81 = arith.addf %74, %80 : vector<64x16xf32>
    %c2_107 = arith.constant 2 : index
    %c0_108 = arith.constant 0 : index
    %c0_109 = arith.constant 0 : index
    %82 = vector.load %arg8[%c2_107, %c0_108, %c0_109] : memref<10x8x48xf32, #tpu.memory_space<vmem>>, vector<8x8x48xf32>
    %83 = vector.shape_cast %82 : vector<8x8x48xf32> to vector<64x48xf32>
    %84 = arith.truncf %83 : vector<64x48xf32> to vector<64x48xbf16>
    %c2_110 = arith.constant 2 : index
    %c0_111 = arith.constant 0 : index
    %c0_112 = arith.constant 0 : index
    %85 = vector.load %arg4[%c2_110, %c0_111, %c0_112] : memref<3x48x16xbf16, #tpu.memory_space<vmem>>, vector<1x48x16xbf16>
    %86 = vector.shape_cast %85 : vector<1x48x16xbf16> to vector<48x16xbf16>
    %cst_113 = arith.constant dense<0.000000e+00> : vector<64x16xf32>
    %87 = tpu.matmul %84, %86, %cst_113 {dimension_numbers = #tpu.dot_dimension_numbers<[1], [0], [0], [1], [0, 0, 1, 1], [], []>} : vector<64x48xbf16>, vector<48x16xbf16>, vector<64x16xf32> -> vector<64x16xf32>
    %88 = arith.addf %81, %87 : vector<64x16xf32>
    %89 = vector.broadcast %66 : vector<1x16xf32> to vector<64x16xf32>
    %90 = arith.addf %88, %89 : vector<64x16xf32>
    %cst_114 = arith.constant 0.000000e+00 : f32
    %91 = vector.broadcast %cst_114 : f32 to vector<64x16xf32>
    %92 = arith.maximumf %90, %91 : vector<64x16xf32>
    %c0_115 = arith.constant 0 : index
    %c0_116 = arith.constant 0 : index
    %c0_117 = arith.constant 0 : index
    %93 = vector.load %arg6[%c0_115, %c0_116, %c0_117] : memref<1x64x16xf32, #tpu.memory_space<vmem>>, vector<1x64x16xf32>
    %94 = vector.shape_cast %93 : vector<1x64x16xf32> to vector<64x16xf32>
    %95 = vector.shape_cast %92 : vector<64x16xf32> to vector<1x64x16xf32>
    tpu.vector_store %arg6[%c0_115, %c0_116, %c0_117], %95 {strides = array<i32>} : memref<1x64x16xf32, #tpu.memory_space<vmem>>, vector<1x64x16xf32>,
    return
  }
  func.func @transform_0(%arg0: i32) -> (i32, i32, i32, i32, i32, i32) {
    %c0_i32 = arith.constant 0 : i32
    %c0_i32_0 = arith.constant 0 : i32
    %c0_i32_1 = arith.constant 0 : i32
    %c0_i32_2 = arith.constant 0 : i32
    %c0_i32_3 = arith.constant 0 : i32
    %c0_i32_4 = arith.constant 0 : i32
    return %arg0, %c0_i32, %c0_i32_0, %c0_i32_1, %c0_i32_2, %c0_i32_3 : i32, i32, i32, i32, i32, i32
  }
  func.func @transform_1(%arg0: i32) -> (i32, i32, i32) {
    %c0_i32 = arith.constant 0 : i32
    %c0_i32_0 = arith.constant 0 : i32
    %c0_i32_1 = arith.constant 0 : i32
    %c0_i32_2 = arith.constant 0 : i32
    return %c0_i32, %c0_i32_0, %c0_i32_1 : i32, i32, i32
  }
  func.func @transform_2(%arg0: i32) -> (i32, i32) {
    %c0_i32 = arith.constant 0 : i32
    %c0_i32_0 = arith.constant 0 : i32
    %c0_i32_1 = arith.constant 0 : i32
    return %c0_i32, %c0_i32_0 : i32, i32
  }
  func.func @transform_3(%arg0: i32) -> (i32, i32, i32) {
    %c0_i32 = arith.constant 0 : i32
    %c0_i32_0 = arith.constant 0 : i32
    %c0_i32_1 = arith.constant 0 : i32
    %c0_i32_2 = arith.constant 0 : i32
    return %c0_i32, %c0_i32_0, %c0_i32_1 : i32, i32, i32
  }
  func.func @transform_4(%arg0: i32) -> (i32, i32) {
    %c0_i32 = arith.constant 0 : i32
    %c0_i32_0 = arith.constant 0 : i32
    %c0_i32_1 = arith.constant 0 : i32
    return %c0_i32, %c0_i32_0 : i32, i32
  }
  func.func @transform_5(%arg0: i32) -> (i32, i32, i32) {
    %c0_i32 = arith.constant 0 : i32
    %c0_i32_0 = arith.constant 0 : i32
    %c0_i32_1 = arith.constant 0 : i32
    return %arg0, %c0_i32, %c0_i32_0 : i32, i32, i32
  }
}

module attributes {stable_mosaic.version = 11 : i64} {
  func.func @_pointwise_kernel(%arg0: i32, %arg1: memref<1x16x16xbf16, #tpu.memory_space<vmem>>, %arg2: memref<16x64xbf16, #tpu.memory_space<vmem>>, %arg3: memref<1x64xf32, #tpu.memory_space<vmem>>, %arg4: memref<1x16x64xf32, #tpu.memory_space<vmem>>) attributes {dimension_semantics = [#tpu.dimension_semantics<parallel>], iteration_bounds = array<i64: 2>, scalar_prefetch = 0 : i64, scratch_operands = 0 : i64, tpu.core_type = #tpu.core_type<tc>, window_params = [{transform_indices = @transform_0, window_bounds = array<i64: 1, 16, 16>}, {pipeline_mode = #tpu.pipeline_mode<synchronous>, transform_indices = @transform_1, window_bounds = array<i64: 16, 64>}, {pipeline_mode = #tpu.pipeline_mode<synchronous>, transform_indices = @transform_2, window_bounds = array<i64: 1, 64>}, {transform_indices = @transform_3, window_bounds = array<i64: 1, 16, 64>}]} {
    %c0 = arith.constant 0 : index
    %c0_0 = arith.constant 0 : index
    %0 = vector.load %arg3[%c0, %c0_0] : memref<1x64xf32, #tpu.memory_space<vmem>>, vector<1x64xf32>
    %c0_1 = arith.constant 0 : index
    %c0_2 = arith.constant 0 : index
    %1 = vector.load %arg2[%c0_1, %c0_2] : memref<16x64xbf16, #tpu.memory_space<vmem>>, vector<16x64xbf16>
    %c0_3 = arith.constant 0 : index
    %c0_4 = arith.constant 0 : index
    %c0_5 = arith.constant 0 : index
    %2 = vector.load %arg1[%c0_3, %c0_4, %c0_5] : memref<1x16x16xbf16, #tpu.memory_space<vmem>>, vector<1x16x16xbf16>
    %3 = vector.shape_cast %2 : vector<1x16x16xbf16> to vector<16x16xbf16>
    %cst = arith.constant dense<0.000000e+00> : vector<16x64xf32>
    %4 = tpu.matmul %3, %1, %cst {dimension_numbers = #tpu.dot_dimension_numbers<[1], [0], [0], [1], [0, 0, 1, 1], [], []>} : vector<16x16xbf16>, vector<16x64xbf16>, vector<16x64xf32> -> vector<16x64xf32>
    %5 = vector.broadcast %0 : vector<1x64xf32> to vector<16x64xf32>
    %6 = arith.addf %4, %5 : vector<16x64xf32>
    %c0_6 = arith.constant 0 : index
    %c0_7 = arith.constant 0 : index
    %c0_8 = arith.constant 0 : index
    %7 = vector.load %arg4[%c0_6, %c0_7, %c0_8] : memref<1x16x64xf32, #tpu.memory_space<vmem>>, vector<1x16x64xf32>
    %8 = vector.shape_cast %7 : vector<1x16x64xf32> to vector<16x64xf32>
    %9 = vector.shape_cast %6 : vector<16x64xf32> to vector<1x16x64xf32>
    tpu.vector_store %arg4[%c0_6, %c0_7, %c0_8], %9 {strides = array<i32>} : memref<1x16x64xf32, #tpu.memory_space<vmem>>, vector<1x16x64xf32>,
    return
  }
  func.func @transform_0(%arg0: i32) -> (i32, i32, i32) {
    %c0_i32 = arith.constant 0 : i32
    %c0_i32_0 = arith.constant 0 : i32
    %c0_i32_1 = arith.constant 0 : i32
    return %arg0, %c0_i32, %c0_i32_0 : i32, i32, i32
  }
  func.func @transform_1(%arg0: i32) -> (i32, i32) {
    %c0_i32 = arith.constant 0 : i32
    %c0_i32_0 = arith.constant 0 : i32
    %c0_i32_1 = arith.constant 0 : i32
    return %c0_i32, %c0_i32_0 : i32, i32
  }
  func.func @transform_2(%arg0: i32) -> (i32, i32) {
    %c0_i32 = arith.constant 0 : i32
    %c0_i32_0 = arith.constant 0 : i32
    %c0_i32_1 = arith.constant 0 : i32
    return %c0_i32, %c0_i32_0 : i32, i32
  }
  func.func @transform_3(%arg0: i32) -> (i32, i32, i32) {
    %c0_i32 = arith.constant 0 : i32
    %c0_i32_0 = arith.constant 0 : i32
    %c0_i32_1 = arith.constant 0 : i32
    return %arg0, %c0_i32, %c0_i32_0 : i32, i32, i32
  }
}

module attributes {stable_mosaic.version = 11 : i64} {
  func.func @_pointwise_kernel(%arg0: i32, %arg1: memref<1x64x8xbf16, #tpu.memory_space<vmem>>, %arg2: memref<8x32xbf16, #tpu.memory_space<vmem>>, %arg3: memref<1x32xf32, #tpu.memory_space<vmem>>, %arg4: memref<1x64x32xf32, #tpu.memory_space<vmem>>) attributes {dimension_semantics = [#tpu.dimension_semantics<parallel>], iteration_bounds = array<i64: 2>, scalar_prefetch = 0 : i64, scratch_operands = 0 : i64, tpu.core_type = #tpu.core_type<tc>, window_params = [{transform_indices = @transform_0, window_bounds = array<i64: 1, 64, 8>}, {pipeline_mode = #tpu.pipeline_mode<synchronous>, transform_indices = @transform_1, window_bounds = array<i64: 8, 32>}, {pipeline_mode = #tpu.pipeline_mode<synchronous>, transform_indices = @transform_2, window_bounds = array<i64: 1, 32>}, {transform_indices = @transform_3, window_bounds = array<i64: 1, 64, 32>}]} {
    %c0 = arith.constant 0 : index
    %c0_0 = arith.constant 0 : index
    %0 = vector.load %arg3[%c0, %c0_0] : memref<1x32xf32, #tpu.memory_space<vmem>>, vector<1x32xf32>
    %c0_1 = arith.constant 0 : index
    %c0_2 = arith.constant 0 : index
    %1 = vector.load %arg2[%c0_1, %c0_2] : memref<8x32xbf16, #tpu.memory_space<vmem>>, vector<8x32xbf16>
    %c0_3 = arith.constant 0 : index
    %c0_4 = arith.constant 0 : index
    %c0_5 = arith.constant 0 : index
    %2 = vector.load %arg1[%c0_3, %c0_4, %c0_5] : memref<1x64x8xbf16, #tpu.memory_space<vmem>>, vector<1x64x8xbf16>
    %3 = vector.shape_cast %2 : vector<1x64x8xbf16> to vector<64x8xbf16>
    %cst = arith.constant dense<0.000000e+00> : vector<64x32xf32>
    %4 = tpu.matmul %3, %1, %cst {dimension_numbers = #tpu.dot_dimension_numbers<[1], [0], [0], [1], [0, 0, 1, 1], [], []>} : vector<64x8xbf16>, vector<8x32xbf16>, vector<64x32xf32> -> vector<64x32xf32>
    %5 = vector.broadcast %0 : vector<1x32xf32> to vector<64x32xf32>
    %6 = arith.addf %4, %5 : vector<64x32xf32>
    %c0_6 = arith.constant 0 : index
    %c0_7 = arith.constant 0 : index
    %c0_8 = arith.constant 0 : index
    %7 = vector.load %arg4[%c0_6, %c0_7, %c0_8] : memref<1x64x32xf32, #tpu.memory_space<vmem>>, vector<1x64x32xf32>
    %8 = vector.shape_cast %7 : vector<1x64x32xf32> to vector<64x32xf32>
    %9 = vector.shape_cast %6 : vector<64x32xf32> to vector<1x64x32xf32>
    tpu.vector_store %arg4[%c0_6, %c0_7, %c0_8], %9 {strides = array<i32>} : memref<1x64x32xf32, #tpu.memory_space<vmem>>, vector<1x64x32xf32>,
    return
  }
  func.func @transform_0(%arg0: i32) -> (i32, i32, i32) {
    %c0_i32 = arith.constant 0 : i32
    %c0_i32_0 = arith.constant 0 : i32
    %c0_i32_1 = arith.constant 0 : i32
    return %arg0, %c0_i32, %c0_i32_0 : i32, i32, i32
  }
  func.func @transform_1(%arg0: i32) -> (i32, i32) {
    %c0_i32 = arith.constant 0 : i32
    %c0_i32_0 = arith.constant 0 : i32
    %c0_i32_1 = arith.constant 0 : i32
    return %c0_i32, %c0_i32_0 : i32, i32
  }
  func.func @transform_2(%arg0: i32) -> (i32, i32) {
    %c0_i32 = arith.constant 0 : i32
    %c0_i32_0 = arith.constant 0 : i32
    %c0_i32_1 = arith.constant 0 : i32
    return %c0_i32, %c0_i32_0 : i32, i32
  }
  func.func @transform_3(%arg0: i32) -> (i32, i32, i32) {
    %c0_i32 = arith.constant 0 : i32
    %c0_i32_0 = arith.constant 0 : i32
    %c0_i32_1 = arith.constant 0 : i32
    return %arg0, %c0_i32, %c0_i32_0 : i32, i32, i32
  }
}

module attributes {stable_mosaic.version = 11 : i64} {
  func.func @_double_conv_kernel(%arg0: i32, %arg1: memref<1x8x8x32xbf16, #tpu.memory_space<vmem>>, %arg2: memref<3x96x8xbf16, #tpu.memory_space<vmem>>, %arg3: memref<1x8xf32, #tpu.memory_space<vmem>>, %arg4: memref<3x24x8xbf16, #tpu.memory_space<vmem>>, %arg5: memref<1x8xf32, #tpu.memory_space<vmem>>, %arg6: memref<1x64x8xf32, #tpu.memory_space<vmem>>, %arg7: memref<10x8x96xf32, #tpu.memory_space<vmem>>, %arg8: memref<10x8x24xf32, #tpu.memory_space<vmem>>) attributes {dimension_semantics = [#tpu.dimension_semantics<parallel>], iteration_bounds = array<i64: 2>, scalar_prefetch = 0 : i64, scratch_operands = 2 : i64, tpu.core_type = #tpu.core_type<tc>, window_params = [{transform_indices = @transform_0, window_bounds = array<i64: 1, 8, 8, 32>}, {pipeline_mode = #tpu.pipeline_mode<synchronous>, transform_indices = @transform_1, window_bounds = array<i64: 3, 96, 8>}, {pipeline_mode = #tpu.pipeline_mode<synchronous>, transform_indices = @transform_2, window_bounds = array<i64: 1, 8>}, {pipeline_mode = #tpu.pipeline_mode<synchronous>, transform_indices = @transform_3, window_bounds = array<i64: 3, 24, 8>}, {pipeline_mode = #tpu.pipeline_mode<synchronous>, transform_indices = @transform_4, window_bounds = array<i64: 1, 8>}, {transform_indices = @transform_5, window_bounds = array<i64: 1, 64, 8>}]} {
    %cst = arith.constant 0.000000e+00 : f32
    %0 = vector.broadcast %cst : f32 to vector<1x8x96xf32>
    %c0 = arith.constant 0 : index
    %c0_0 = arith.constant 0 : index
    %c0_1 = arith.constant 0 : index
    %1 = vector.load %arg7[%c0, %c0_0, %c0_1] : memref<10x8x96xf32, #tpu.memory_space<vmem>>, vector<1x8x96xf32>
    tpu.vector_store %arg7[%c0, %c0_0, %c0_1], %0 {strides = array<i32>} : memref<10x8x96xf32, #tpu.memory_space<vmem>>, vector<1x8x96xf32>,
    %cst_2 = arith.constant 0.000000e+00 : f32
    %2 = vector.broadcast %cst_2 : f32 to vector<1x8x96xf32>
    %c9 = arith.constant 9 : index
    %c0_3 = arith.constant 0 : index
    %c0_4 = arith.constant 0 : index
    %3 = vector.load %arg7[%c9, %c0_3, %c0_4] : memref<10x8x96xf32, #tpu.memory_space<vmem>>, vector<1x8x96xf32>
    tpu.vector_store %arg7[%c9, %c0_3, %c0_4], %2 {strides = array<i32>} : memref<10x8x96xf32, #tpu.memory_space<vmem>>, vector<1x8x96xf32>,
    %cst_5 = arith.constant 0.000000e+00 : f32
    %4 = vector.broadcast %cst_5 : f32 to vector<8x1x32xf32>
    %c1 = arith.constant 1 : index
    %c0_6 = arith.constant 0 : index
    %c0_7 = arith.constant 0 : index
    %5 = vector.load %arg7[%c1, %c0_6, %c0_7] : memref<10x8x96xf32, #tpu.memory_space<vmem>>, vector<8x1x32xf32>
    tpu.vector_store %arg7[%c1, %c0_6, %c0_7], %4 {strides = array<i32>} : memref<10x8x96xf32, #tpu.memory_space<vmem>>, vector<8x1x32xf32>,
    %cst_8 = arith.constant 0.000000e+00 : f32
    %6 = vector.broadcast %cst_8 : f32 to vector<8x1x32xf32>
    %c1_9 = arith.constant 1 : index
    %c7 = arith.constant 7 : index
    %c64 = arith.constant 64 : index
    %7 = vector.load %arg7[%c1_9, %c7, %c64] : memref<10x8x96xf32, #tpu.memory_space<vmem>>, vector<8x1x32xf32>
    tpu.vector_store %arg7[%c1_9, %c7, %c64], %6 {strides = array<i32>} : memref<10x8x96xf32, #tpu.memory_space<vmem>>, vector<8x1x32xf32>,
    %cst_10 = arith.constant 0.000000e+00 : f32
    %8 = vector.broadcast %cst_10 : f32 to vector<1x8x24xf32>
    %c0_11 = arith.constant 0 : index
    %c0_12 = arith.constant 0 : index
    %c0_13 = arith.constant 0 : index
    %9 = vector.load %arg8[%c0_11, %c0_12, %c0_13] : memref<10x8x24xf32, #tpu.memory_space<vmem>>, vector<1x8x24xf32>
    tpu.vector_store %arg8[%c0_11, %c0_12, %c0_13], %8 {strides = array<i32>} : memref<10x8x24xf32, #tpu.memory_space<vmem>>, vector<1x8x24xf32>,
    %cst_14 = arith.constant 0.000000e+00 : f32
    %10 = vector.broadcast %cst_14 : f32 to vector<1x8x24xf32>
    %c9_15 = arith.constant 9 : index
    %c0_16 = arith.constant 0 : index
    %c0_17 = arith.constant 0 : index
    %11 = vector.load %arg8[%c9_15, %c0_16, %c0_17] : memref<10x8x24xf32, #tpu.memory_space<vmem>>, vector<1x8x24xf32>
    tpu.vector_store %arg8[%c9_15, %c0_16, %c0_17], %10 {strides = array<i32>} : memref<10x8x24xf32, #tpu.memory_space<vmem>>, vector<1x8x24xf32>,
    %cst_18 = arith.constant 0.000000e+00 : f32
    %12 = vector.broadcast %cst_18 : f32 to vector<8x1x8xf32>
    %c1_19 = arith.constant 1 : index
    %c0_20 = arith.constant 0 : index
    %c0_21 = arith.constant 0 : index
    %13 = vector.load %arg8[%c1_19, %c0_20, %c0_21] : memref<10x8x24xf32, #tpu.memory_space<vmem>>, vector<8x1x8xf32>
    tpu.vector_store %arg8[%c1_19, %c0_20, %c0_21], %12 {strides = array<i32>} : memref<10x8x24xf32, #tpu.memory_space<vmem>>, vector<8x1x8xf32>,
    %cst_22 = arith.constant 0.000000e+00 : f32
    %14 = vector.broadcast %cst_22 : f32 to vector<8x1x8xf32>
    %c1_23 = arith.constant 1 : index
    %c7_24 = arith.constant 7 : index
    %c16 = arith.constant 16 : index
    %15 = vector.load %arg8[%c1_23, %c7_24, %c16] : memref<10x8x24xf32, #tpu.memory_space<vmem>>, vector<8x1x8xf32>
    tpu.vector_store %arg8[%c1_23, %c7_24, %c16], %14 {strides = array<i32>} : memref<10x8x24xf32, #tpu.memory_space<vmem>>, vector<8x1x8xf32>,
    %c0_25 = arith.constant 0 : index
    %c0_26 = arith.constant 0 : index
    %c0_27 = arith.constant 0 : index
    %c0_28 = arith.constant 0 : index
    %16 = vector.load %arg1[%c0_25, %c0_26, %c0_27, %c0_28] : memref<1x8x8x32xbf16, #tpu.memory_space<vmem>>, vector<1x8x8x32xbf16>
    %17 = vector.shape_cast %16 : vector<1x8x8x32xbf16> to vector<8x8x32xbf16>
    %18 = arith.extf %17 : vector<8x8x32xbf16> to vector<8x8x32xf32>
    %c1_29 = arith.constant 1 : index
    %c0_30 = arith.constant 0 : index
    %c32 = arith.constant 32 : index
    %19 = vector.load %arg7[%c1_29, %c0_30, %c32] : memref<10x8x96xf32, #tpu.memory_space<vmem>>, vector<8x8x32xf32>
    tpu.vector_store %arg7[%c1_29, %c0_30, %c32], %18 {strides = array<i32>} : memref<10x8x96xf32, #tpu.memory_space<vmem>>, vector<8x8x32xf32>,
    %20 = vector.extract_strided_slice %18 {offsets = [0, 0, 0], sizes = [8, 7, 32], strides = [1, 1, 1]} : vector<8x8x32xf32> to vector<8x7x32xf32>
    %c1_31 = arith.constant 1 : index
    %c1_32 = arith.constant 1 : index
    %c0_33 = arith.constant 0 : index
    %21 = vector.load %arg7[%c1_31, %c1_32, %c0_33] : memref<10x8x96xf32, #tpu.memory_space<vmem>>, vector<8x7x32xf32>
    tpu.vector_store %arg7[%c1_31, %c1_32, %c0_33], %20 {strides = array<i32>} : memref<10x8x96xf32, #tpu.memory_space<vmem>>, vector<8x7x32xf32>,
    %22 = vector.extract_strided_slice %18 {offsets = [0, 1, 0], sizes = [8, 7, 32], strides = [1, 1, 1]} : vector<8x8x32xf32> to vector<8x7x32xf32>
    %c1_34 = arith.constant 1 : index
    %c0_35 = arith.constant 0 : index
    %c64_36 = arith.constant 64 : index
    %23 = vector.load %arg7[%c1_34, %c0_35, %c64_36] : memref<10x8x96xf32, #tpu.memory_space<vmem>>, vector<8x7x32xf32>
    tpu.vector_store %arg7[%c1_34, %c0_35, %c64_36], %22 {strides = array<i32>} : memref<10x8x96xf32, #tpu.memory_space<vmem>>, vector<8x7x32xf32>,
    %c0_37 = arith.constant 0 : index
    %c0_38 = arith.constant 0 : index
    %24 = vector.load %arg3[%c0_37, %c0_38] : memref<1x8xf32, #tpu.memory_space<vmem>>, vector<1x8xf32>
    %cst_39 = arith.constant 0.000000e+00 : f32
    %25 = vector.broadcast %cst_39 : f32 to vector<64x8xf32>
    %c0_40 = arith.constant 0 : index
    %c0_41 = arith.constant 0 : index
    %c0_42 = arith.constant 0 : index
    %26 = vector.load %arg7[%c0_40, %c0_41, %c0_42] : memref<10x8x96xf32, #tpu.memory_space<vmem>>, vector<8x8x96xf32>
    %27 = vector.shape_cast %26 : vector<8x8x96xf32> to vector<64x96xf32>
    %28 = arith.truncf %27 : vector<64x96xf32> to vector<64x96xbf16>
    %c0_43 = arith.constant 0 : index
    %c0_44 = arith.constant 0 : index
    %c0_45 = arith.constant 0 : index
    %29 = vector.load %arg2[%c0_43, %c0_44, %c0_45] : memref<3x96x8xbf16, #tpu.memory_space<vmem>>, vector<1x96x8xbf16>
    %30 = vector.shape_cast %29 : vector<1x96x8xbf16> to vector<96x8xbf16>
    %cst_46 = arith.constant dense<0.000000e+00> : vector<64x8xf32>
    %31 = tpu.matmul %28, %30, %cst_46 {dimension_numbers = #tpu.dot_dimension_numbers<[1], [0], [0], [1], [0, 0, 1, 1], [], []>} : vector<64x96xbf16>, vector<96x8xbf16>, vector<64x8xf32> -> vector<64x8xf32>
    %32 = arith.addf %25, %31 : vector<64x8xf32>
    %c1_47 = arith.constant 1 : index
    %c0_48 = arith.constant 0 : index
    %c0_49 = arith.constant 0 : index
    %33 = vector.load %arg7[%c1_47, %c0_48, %c0_49] : memref<10x8x96xf32, #tpu.memory_space<vmem>>, vector<8x8x96xf32>
    %34 = vector.shape_cast %33 : vector<8x8x96xf32> to vector<64x96xf32>
    %35 = arith.truncf %34 : vector<64x96xf32> to vector<64x96xbf16>
    %c1_50 = arith.constant 1 : index
    %c0_51 = arith.constant 0 : index
    %c0_52 = arith.constant 0 : index
    %36 = vector.load %arg2[%c1_50, %c0_51, %c0_52] : memref<3x96x8xbf16, #tpu.memory_space<vmem>>, vector<1x96x8xbf16>
    %37 = vector.shape_cast %36 : vector<1x96x8xbf16> to vector<96x8xbf16>
    %cst_53 = arith.constant dense<0.000000e+00> : vector<64x8xf32>
    %38 = tpu.matmul %35, %37, %cst_53 {dimension_numbers = #tpu.dot_dimension_numbers<[1], [0], [0], [1], [0, 0, 1, 1], [], []>} : vector<64x96xbf16>, vector<96x8xbf16>, vector<64x8xf32> -> vector<64x8xf32>
    %39 = arith.addf %32, %38 : vector<64x8xf32>
    %c2 = arith.constant 2 : index
    %c0_54 = arith.constant 0 : index
    %c0_55 = arith.constant 0 : index
    %40 = vector.load %arg7[%c2, %c0_54, %c0_55] : memref<10x8x96xf32, #tpu.memory_space<vmem>>, vector<8x8x96xf32>
    %41 = vector.shape_cast %40 : vector<8x8x96xf32> to vector<64x96xf32>
    %42 = arith.truncf %41 : vector<64x96xf32> to vector<64x96xbf16>
    %c2_56 = arith.constant 2 : index
    %c0_57 = arith.constant 0 : index
    %c0_58 = arith.constant 0 : index
    %43 = vector.load %arg2[%c2_56, %c0_57, %c0_58] : memref<3x96x8xbf16, #tpu.memory_space<vmem>>, vector<1x96x8xbf16>
    %44 = vector.shape_cast %43 : vector<1x96x8xbf16> to vector<96x8xbf16>
    %cst_59 = arith.constant dense<0.000000e+00> : vector<64x8xf32>
    %45 = tpu.matmul %42, %44, %cst_59 {dimension_numbers = #tpu.dot_dimension_numbers<[1], [0], [0], [1], [0, 0, 1, 1], [], []>} : vector<64x96xbf16>, vector<96x8xbf16>, vector<64x8xf32> -> vector<64x8xf32>
    %46 = arith.addf %39, %45 : vector<64x8xf32>
    %47 = vector.broadcast %24 : vector<1x8xf32> to vector<64x8xf32>
    %48 = arith.addf %46, %47 : vector<64x8xf32>
    %cst_60 = arith.constant 0.000000e+00 : f32
    %49 = vector.broadcast %cst_60 : f32 to vector<64x8xf32>
    %50 = arith.maximumf %48, %49 : vector<64x8xf32>
    %51 = vector.shape_cast %50 : vector<64x8xf32> to vector<8x8x8xf32>
    %c1_61 = arith.constant 1 : index
    %c0_62 = arith.constant 0 : index
    %c8 = arith.constant 8 : index
    %52 = vector.load %arg8[%c1_61, %c0_62, %c8] : memref<10x8x24xf32, #tpu.memory_space<vmem>>, vector<8x8x8xf32>
    tpu.vector_store %arg8[%c1_61, %c0_62, %c8], %51 {strides = array<i32>} : memref<10x8x24xf32, #tpu.memory_space<vmem>>, vector<8x8x8xf32>,
    %53 = vector.extract_strided_slice %51 {offsets = [0, 0, 0], sizes = [8, 7, 8], strides = [1, 1, 1]} : vector<8x8x8xf32> to vector<8x7x8xf32>
    %c1_63 = arith.constant 1 : index
    %c1_64 = arith.constant 1 : index
    %c0_65 = arith.constant 0 : index
    %54 = vector.load %arg8[%c1_63, %c1_64, %c0_65] : memref<10x8x24xf32, #tpu.memory_space<vmem>>, vector<8x7x8xf32>
    tpu.vector_store %arg8[%c1_63, %c1_64, %c0_65], %53 {strides = array<i32>} : memref<10x8x24xf32, #tpu.memory_space<vmem>>, vector<8x7x8xf32>,
    %55 = vector.extract_strided_slice %51 {offsets = [0, 1, 0], sizes = [8, 7, 8], strides = [1, 1, 1]} : vector<8x8x8xf32> to vector<8x7x8xf32>
    %c1_66 = arith.constant 1 : index
    %c0_67 = arith.constant 0 : index
    %c16_68 = arith.constant 16 : index
    %56 = vector.load %arg8[%c1_66, %c0_67, %c16_68] : memref<10x8x24xf32, #tpu.memory_space<vmem>>, vector<8x7x8xf32>
    tpu.vector_store %arg8[%c1_66, %c0_67, %c16_68], %55 {strides = array<i32>} : memref<10x8x24xf32, #tpu.memory_space<vmem>>, vector<8x7x8xf32>,
    %c0_69 = arith.constant 0 : index
    %c0_70 = arith.constant 0 : index
    %57 = vector.load %arg5[%c0_69, %c0_70] : memref<1x8xf32, #tpu.memory_space<vmem>>, vector<1x8xf32>
    %cst_71 = arith.constant 0.000000e+00 : f32
    %58 = vector.broadcast %cst_71 : f32 to vector<64x8xf32>
    %c0_72 = arith.constant 0 : index
    %c0_73 = arith.constant 0 : index
    %c0_74 = arith.constant 0 : index
    %59 = vector.load %arg8[%c0_72, %c0_73, %c0_74] : memref<10x8x24xf32, #tpu.memory_space<vmem>>, vector<8x8x24xf32>
    %60 = vector.shape_cast %59 : vector<8x8x24xf32> to vector<64x24xf32>
    %61 = arith.truncf %60 : vector<64x24xf32> to vector<64x24xbf16>
    %c0_75 = arith.constant 0 : index
    %c0_76 = arith.constant 0 : index
    %c0_77 = arith.constant 0 : index
    %62 = vector.load %arg4[%c0_75, %c0_76, %c0_77] : memref<3x24x8xbf16, #tpu.memory_space<vmem>>, vector<1x24x8xbf16>
    %63 = vector.shape_cast %62 : vector<1x24x8xbf16> to vector<24x8xbf16>
    %cst_78 = arith.constant dense<0.000000e+00> : vector<64x8xf32>
    %64 = tpu.matmul %61, %63, %cst_78 {dimension_numbers = #tpu.dot_dimension_numbers<[1], [0], [0], [1], [0, 0, 1, 1], [], []>} : vector<64x24xbf16>, vector<24x8xbf16>, vector<64x8xf32> -> vector<64x8xf32>
    %65 = arith.addf %58, %64 : vector<64x8xf32>
    %c1_79 = arith.constant 1 : index
    %c0_80 = arith.constant 0 : index
    %c0_81 = arith.constant 0 : index
    %66 = vector.load %arg8[%c1_79, %c0_80, %c0_81] : memref<10x8x24xf32, #tpu.memory_space<vmem>>, vector<8x8x24xf32>
    %67 = vector.shape_cast %66 : vector<8x8x24xf32> to vector<64x24xf32>
    %68 = arith.truncf %67 : vector<64x24xf32> to vector<64x24xbf16>
    %c1_82 = arith.constant 1 : index
    %c0_83 = arith.constant 0 : index
    %c0_84 = arith.constant 0 : index
    %69 = vector.load %arg4[%c1_82, %c0_83, %c0_84] : memref<3x24x8xbf16, #tpu.memory_space<vmem>>, vector<1x24x8xbf16>
    %70 = vector.shape_cast %69 : vector<1x24x8xbf16> to vector<24x8xbf16>
    %cst_85 = arith.constant dense<0.000000e+00> : vector<64x8xf32>
    %71 = tpu.matmul %68, %70, %cst_85 {dimension_numbers = #tpu.dot_dimension_numbers<[1], [0], [0], [1], [0, 0, 1, 1], [], []>} : vector<64x24xbf16>, vector<24x8xbf16>, vector<64x8xf32> -> vector<64x8xf32>
    %72 = arith.addf %65, %71 : vector<64x8xf32>
    %c2_86 = arith.constant 2 : index
    %c0_87 = arith.constant 0 : index
    %c0_88 = arith.constant 0 : index
    %73 = vector.load %arg8[%c2_86, %c0_87, %c0_88] : memref<10x8x24xf32, #tpu.memory_space<vmem>>, vector<8x8x24xf32>
    %74 = vector.shape_cast %73 : vector<8x8x24xf32> to vector<64x24xf32>
    %75 = arith.truncf %74 : vector<64x24xf32> to vector<64x24xbf16>
    %c2_89 = arith.constant 2 : index
    %c0_90 = arith.constant 0 : index
    %c0_91 = arith.constant 0 : index
    %76 = vector.load %arg4[%c2_89, %c0_90, %c0_91] : memref<3x24x8xbf16, #tpu.memory_space<vmem>>, vector<1x24x8xbf16>
    %77 = vector.shape_cast %76 : vector<1x24x8xbf16> to vector<24x8xbf16>
    %cst_92 = arith.constant dense<0.000000e+00> : vector<64x8xf32>
    %78 = tpu.matmul %75, %77, %cst_92 {dimension_numbers = #tpu.dot_dimension_numbers<[1], [0], [0], [1], [0, 0, 1, 1], [], []>} : vector<64x24xbf16>, vector<24x8xbf16>, vector<64x8xf32> -> vector<64x8xf32>
    %79 = arith.addf %72, %78 : vector<64x8xf32>
    %80 = vector.broadcast %57 : vector<1x8xf32> to vector<64x8xf32>
    %81 = arith.addf %79, %80 : vector<64x8xf32>
    %cst_93 = arith.constant 0.000000e+00 : f32
    %82 = vector.broadcast %cst_93 : f32 to vector<64x8xf32>
    %83 = arith.maximumf %81, %82 : vector<64x8xf32>
    %c0_94 = arith.constant 0 : index
    %c0_95 = arith.constant 0 : index
    %c0_96 = arith.constant 0 : index
    %84 = vector.load %arg6[%c0_94, %c0_95, %c0_96] : memref<1x64x8xf32, #tpu.memory_space<vmem>>, vector<1x64x8xf32>
    %85 = vector.shape_cast %84 : vector<1x64x8xf32> to vector<64x8xf32>
    %86 = vector.shape_cast %83 : vector<64x8xf32> to vector<1x64x8xf32>
    tpu.vector_store %arg6[%c0_94, %c0_95, %c0_96], %86 {strides = array<i32>} : memref<1x64x8xf32, #tpu.memory_space<vmem>>, vector<1x64x8xf32>,
    return
  }
  func.func @transform_0(%arg0: i32) -> (i32, i32, i32, i32) {
    %c0_i32 = arith.constant 0 : i32
    %c0_i32_0 = arith.constant 0 : i32
    %c0_i32_1 = arith.constant 0 : i32
    %c0_i32_2 = arith.constant 0 : i32
    return %arg0, %c0_i32, %c0_i32_0, %c0_i32_1 : i32, i32, i32, i32
  }
  func.func @transform_1(%arg0: i32) -> (i32, i32, i32) {
    %c0_i32 = arith.constant 0 : i32
    %c0_i32_0 = arith.constant 0 : i32
    %c0_i32_1 = arith.constant 0 : i32
    %c0_i32_2 = arith.constant 0 : i32
    return %c0_i32, %c0_i32_0, %c0_i32_1 : i32, i32, i32
  }
  func.func @transform_2(%arg0: i32) -> (i32, i32) {
    %c0_i32 = arith.constant 0 : i32
    %c0_i32_0 = arith.constant 0 : i32
    %c0_i32_1 = arith.constant 0 : i32
    return %c0_i32, %c0_i32_0 : i32, i32
  }
  func.func @transform_3(%arg0: i32) -> (i32, i32, i32) {
    %c0_i32 = arith.constant 0 : i32
    %c0_i32_0 = arith.constant 0 : i32
    %c0_i32_1 = arith.constant 0 : i32
    %c0_i32_2 = arith.constant 0 : i32
    return %c0_i32, %c0_i32_0, %c0_i32_1 : i32, i32, i32
  }
  func.func @transform_4(%arg0: i32) -> (i32, i32) {
    %c0_i32 = arith.constant 0 : i32
    %c0_i32_0 = arith.constant 0 : i32
    %c0_i32_1 = arith.constant 0 : i32
    return %c0_i32, %c0_i32_0 : i32, i32
  }
  func.func @transform_5(%arg0: i32) -> (i32, i32, i32) {
    %c0_i32 = arith.constant 0 : i32
    %c0_i32_0 = arith.constant 0 : i32
    %c0_i32_1 = arith.constant 0 : i32
    return %arg0, %c0_i32, %c0_i32_0 : i32, i32, i32
  }
}

module attributes {stable_mosaic.version = 11 : i64} {
  func.func @_pointwise_kernel(%arg0: i32, %arg1: memref<1x256x8xbf16, #tpu.memory_space<vmem>>, %arg2: memref<8x2xbf16, #tpu.memory_space<vmem>>, %arg3: memref<1x2xf32, #tpu.memory_space<vmem>>, %arg4: memref<1x256x2xf32, #tpu.memory_space<vmem>>) attributes {dimension_semantics = [#tpu.dimension_semantics<parallel>], iteration_bounds = array<i64: 2>, scalar_prefetch = 0 : i64, scratch_operands = 0 : i64, tpu.core_type = #tpu.core_type<tc>, window_params = [{transform_indices = @transform_0, window_bounds = array<i64: 1, 256, 8>}, {pipeline_mode = #tpu.pipeline_mode<synchronous>, transform_indices = @transform_1, window_bounds = array<i64: 8, 2>}, {pipeline_mode = #tpu.pipeline_mode<synchronous>, transform_indices = @transform_2, window_bounds = array<i64: 1, 2>}, {transform_indices = @transform_3, window_bounds = array<i64: 1, 256, 2>}]} {
    %c0 = arith.constant 0 : index
    %c0_0 = arith.constant 0 : index
    %0 = vector.load %arg3[%c0, %c0_0] : memref<1x2xf32, #tpu.memory_space<vmem>>, vector<1x2xf32>
    %c0_1 = arith.constant 0 : index
    %c0_2 = arith.constant 0 : index
    %1 = vector.load %arg2[%c0_1, %c0_2] : memref<8x2xbf16, #tpu.memory_space<vmem>>, vector<8x2xbf16>
    %c0_3 = arith.constant 0 : index
    %c0_4 = arith.constant 0 : index
    %c0_5 = arith.constant 0 : index
    %2 = vector.load %arg1[%c0_3, %c0_4, %c0_5] : memref<1x256x8xbf16, #tpu.memory_space<vmem>>, vector<1x256x8xbf16>
    %3 = vector.shape_cast %2 : vector<1x256x8xbf16> to vector<256x8xbf16>
    %cst = arith.constant dense<0.000000e+00> : vector<256x2xf32>
    %4 = tpu.matmul %3, %1, %cst {dimension_numbers = #tpu.dot_dimension_numbers<[1], [0], [0], [1], [0, 0, 1, 1], [], []>} : vector<256x8xbf16>, vector<8x2xbf16>, vector<256x2xf32> -> vector<256x2xf32>
    %5 = vector.broadcast %0 : vector<1x2xf32> to vector<256x2xf32>
    %6 = arith.addf %4, %5 : vector<256x2xf32>
    %c0_6 = arith.constant 0 : index
    %c0_7 = arith.constant 0 : index
    %c0_8 = arith.constant 0 : index
    %7 = vector.load %arg4[%c0_6, %c0_7, %c0_8] : memref<1x256x2xf32, #tpu.memory_space<vmem>>, vector<1x256x2xf32>
    %8 = vector.shape_cast %7 : vector<1x256x2xf32> to vector<256x2xf32>
    %9 = vector.shape_cast %6 : vector<256x2xf32> to vector<1x256x2xf32>
    tpu.vector_store %arg4[%c0_6, %c0_7, %c0_8], %9 {strides = array<i32>} : memref<1x256x2xf32, #tpu.memory_space<vmem>>, vector<1x256x2xf32>,
    return
  }
  func.func @transform_0(%arg0: i32) -> (i32, i32, i32) {
    %c0_i32 = arith.constant 0 : i32
    %c0_i32_0 = arith.constant 0 : i32
    %c0_i32_1 = arith.constant 0 : i32
    return %arg0, %c0_i32, %c0_i32_0 : i32, i32, i32
  }
  func.func @transform_1(%arg0: i32) -> (i32, i32) {
    %c0_i32 = arith.constant 0 : i32
    %c0_i32_0 = arith.constant 0 : i32
    %c0_i32_1 = arith.constant 0 : i32
    return %c0_i32, %c0_i32_0 : i32, i32
  }
  func.func @transform_2(%arg0: i32) -> (i32, i32) {
    %c0_i32 = arith.constant 0 : i32
    %c0_i32_0 = arith.constant 0 : i32
    %c0_i32_1 = arith.constant 0 : i32
    return %c0_i32, %c0_i32_0 : i32, i32
  }
  func.func @transform_3(%arg0: i32) -> (i32, i32, i32) {
    %c0_i32 = arith.constant 0 : i32
    %c0_i32_0 = arith.constant 0 : i32
    %c0_i32_1 = arith.constant 0 : i32
    return %arg0, %c0_i32, %c0_i32_0 : i32, i32, i32
  }
}

module attributes {stable_mosaic.version = 11 : i64} {
  func.func @_double_conv_kernel(%arg0: i32, %arg1: memref<1x16x16x16xbf16, #tpu.memory_space<vmem>>, %arg2: memref<3x48x8xbf16, #tpu.memory_space<vmem>>, %arg3: memref<1x8xf32, #tpu.memory_space<vmem>>, %arg4: memref<3x24x8xbf16, #tpu.memory_space<vmem>>, %arg5: memref<1x8xf32, #tpu.memory_space<vmem>>, %arg6: memref<1x256x8xf32, #tpu.memory_space<vmem>>, %arg7: memref<18x16x48xf32, #tpu.memory_space<vmem>>, %arg8: memref<18x16x24xf32, #tpu.memory_space<vmem>>) attributes {dimension_semantics = [#tpu.dimension_semantics<parallel>], iteration_bounds = array<i64: 2>, scalar_prefetch = 0 : i64, scratch_operands = 2 : i64, tpu.core_type = #tpu.core_type<tc>, window_params = [{transform_indices = @transform_0, window_bounds = array<i64: 1, 16, 16, 16>}, {pipeline_mode = #tpu.pipeline_mode<synchronous>, transform_indices = @transform_1, window_bounds = array<i64: 3, 48, 8>}, {pipeline_mode = #tpu.pipeline_mode<synchronous>, transform_indices = @transform_2, window_bounds = array<i64: 1, 8>}, {pipeline_mode = #tpu.pipeline_mode<synchronous>, transform_indices = @transform_3, window_bounds = array<i64: 3, 24, 8>}, {pipeline_mode = #tpu.pipeline_mode<synchronous>, transform_indices = @transform_4, window_bounds = array<i64: 1, 8>}, {transform_indices = @transform_5, window_bounds = array<i64: 1, 256, 8>}]} {
    %cst = arith.constant 0.000000e+00 : f32
    %0 = vector.broadcast %cst : f32 to vector<1x16x48xf32>
    %c0 = arith.constant 0 : index
    %c0_0 = arith.constant 0 : index
    %c0_1 = arith.constant 0 : index
    %1 = vector.load %arg7[%c0, %c0_0, %c0_1] : memref<18x16x48xf32, #tpu.memory_space<vmem>>, vector<1x16x48xf32>
    tpu.vector_store %arg7[%c0, %c0_0, %c0_1], %0 {strides = array<i32>} : memref<18x16x48xf32, #tpu.memory_space<vmem>>, vector<1x16x48xf32>,
    %cst_2 = arith.constant 0.000000e+00 : f32
    %2 = vector.broadcast %cst_2 : f32 to vector<1x16x48xf32>
    %c17 = arith.constant 17 : index
    %c0_3 = arith.constant 0 : index
    %c0_4 = arith.constant 0 : index
    %3 = vector.load %arg7[%c17, %c0_3, %c0_4] : memref<18x16x48xf32, #tpu.memory_space<vmem>>, vector<1x16x48xf32>
    tpu.vector_store %arg7[%c17, %c0_3, %c0_4], %2 {strides = array<i32>} : memref<18x16x48xf32, #tpu.memory_space<vmem>>, vector<1x16x48xf32>,
    %cst_5 = arith.constant 0.000000e+00 : f32
    %4 = vector.broadcast %cst_5 : f32 to vector<16x1x16xf32>
    %c1 = arith.constant 1 : index
    %c0_6 = arith.constant 0 : index
    %c0_7 = arith.constant 0 : index
    %5 = vector.load %arg7[%c1, %c0_6, %c0_7] : memref<18x16x48xf32, #tpu.memory_space<vmem>>, vector<16x1x16xf32>
    tpu.vector_store %arg7[%c1, %c0_6, %c0_7], %4 {strides = array<i32>} : memref<18x16x48xf32, #tpu.memory_space<vmem>>, vector<16x1x16xf32>,
    %cst_8 = arith.constant 0.000000e+00 : f32
    %6 = vector.broadcast %cst_8 : f32 to vector<16x1x16xf32>
    %c1_9 = arith.constant 1 : index
    %c15 = arith.constant 15 : index
    %c32 = arith.constant 32 : index
    %7 = vector.load %arg7[%c1_9, %c15, %c32] : memref<18x16x48xf32, #tpu.memory_space<vmem>>, vector<16x1x16xf32>
    tpu.vector_store %arg7[%c1_9, %c15, %c32], %6 {strides = array<i32>} : memref<18x16x48xf32, #tpu.memory_space<vmem>>, vector<16x1x16xf32>,
    %cst_10 = arith.constant 0.000000e+00 : f32
    %8 = vector.broadcast %cst_10 : f32 to vector<1x16x24xf32>
    %c0_11 = arith.constant 0 : index
    %c0_12 = arith.constant 0 : index
    %c0_13 = arith.constant 0 : index
    %9 = vector.load %arg8[%c0_11, %c0_12, %c0_13] : memref<18x16x24xf32, #tpu.memory_space<vmem>>, vector<1x16x24xf32>
    tpu.vector_store %arg8[%c0_11, %c0_12, %c0_13], %8 {strides = array<i32>} : memref<18x16x24xf32, #tpu.memory_space<vmem>>, vector<1x16x24xf32>,
    %cst_14 = arith.constant 0.000000e+00 : f32
    %10 = vector.broadcast %cst_14 : f32 to vector<1x16x24xf32>
    %c17_15 = arith.constant 17 : index
    %c0_16 = arith.constant 0 : index
    %c0_17 = arith.constant 0 : index
    %11 = vector.load %arg8[%c17_15, %c0_16, %c0_17] : memref<18x16x24xf32, #tpu.memory_space<vmem>>, vector<1x16x24xf32>
    tpu.vector_store %arg8[%c17_15, %c0_16, %c0_17], %10 {strides = array<i32>} : memref<18x16x24xf32, #tpu.memory_space<vmem>>, vector<1x16x24xf32>,
    %cst_18 = arith.constant 0.000000e+00 : f32
    %12 = vector.broadcast %cst_18 : f32 to vector<16x1x8xf32>
    %c1_19 = arith.constant 1 : index
    %c0_20 = arith.constant 0 : index
    %c0_21 = arith.constant 0 : index
    %13 = vector.load %arg8[%c1_19, %c0_20, %c0_21] : memref<18x16x24xf32, #tpu.memory_space<vmem>>, vector<16x1x8xf32>
    tpu.vector_store %arg8[%c1_19, %c0_20, %c0_21], %12 {strides = array<i32>} : memref<18x16x24xf32, #tpu.memory_space<vmem>>, vector<16x1x8xf32>,
    %cst_22 = arith.constant 0.000000e+00 : f32
    %14 = vector.broadcast %cst_22 : f32 to vector<16x1x8xf32>
    %c1_23 = arith.constant 1 : index
    %c15_24 = arith.constant 15 : index
    %c16 = arith.constant 16 : index
    %15 = vector.load %arg8[%c1_23, %c15_24, %c16] : memref<18x16x24xf32, #tpu.memory_space<vmem>>, vector<16x1x8xf32>
    tpu.vector_store %arg8[%c1_23, %c15_24, %c16], %14 {strides = array<i32>} : memref<18x16x24xf32, #tpu.memory_space<vmem>>, vector<16x1x8xf32>,
    %c0_25 = arith.constant 0 : index
    %c0_26 = arith.constant 0 : index
    %c0_27 = arith.constant 0 : index
    %c0_28 = arith.constant 0 : index
    %16 = vector.load %arg1[%c0_25, %c0_26, %c0_27, %c0_28] : memref<1x16x16x16xbf16, #tpu.memory_space<vmem>>, vector<1x16x16x16xbf16>
    %17 = vector.shape_cast %16 : vector<1x16x16x16xbf16> to vector<16x16x16xbf16>
    %18 = arith.extf %17 : vector<16x16x16xbf16> to vector<16x16x16xf32>
    %c1_29 = arith.constant 1 : index
    %c0_30 = arith.constant 0 : index
    %c16_31 = arith.constant 16 : index
    %19 = vector.load %arg7[%c1_29, %c0_30, %c16_31] : memref<18x16x48xf32, #tpu.memory_space<vmem>>, vector<16x16x16xf32>
    tpu.vector_store %arg7[%c1_29, %c0_30, %c16_31], %18 {strides = array<i32>} : memref<18x16x48xf32, #tpu.memory_space<vmem>>, vector<16x16x16xf32>,
    %20 = vector.extract_strided_slice %18 {offsets = [0, 0, 0], sizes = [16, 15, 16], strides = [1, 1, 1]} : vector<16x16x16xf32> to vector<16x15x16xf32>
    %c1_32 = arith.constant 1 : index
    %c1_33 = arith.constant 1 : index
    %c0_34 = arith.constant 0 : index
    %21 = vector.load %arg7[%c1_32, %c1_33, %c0_34] : memref<18x16x48xf32, #tpu.memory_space<vmem>>, vector<16x15x16xf32>
    tpu.vector_store %arg7[%c1_32, %c1_33, %c0_34], %20 {strides = array<i32>} : memref<18x16x48xf32, #tpu.memory_space<vmem>>, vector<16x15x16xf32>,
    %22 = vector.extract_strided_slice %18 {offsets = [0, 1, 0], sizes = [16, 15, 16], strides = [1, 1, 1]} : vector<16x16x16xf32> to vector<16x15x16xf32>
    %c1_35 = arith.constant 1 : index
    %c0_36 = arith.constant 0 : index
    %c32_37 = arith.constant 32 : index
    %23 = vector.load %arg7[%c1_35, %c0_36, %c32_37] : memref<18x16x48xf32, #tpu.memory_space<vmem>>, vector<16x15x16xf32>
    tpu.vector_store %arg7[%c1_35, %c0_36, %c32_37], %22 {strides = array<i32>} : memref<18x16x48xf32, #tpu.memory_space<vmem>>, vector<16x15x16xf32>,
    %c0_38 = arith.constant 0 : index
    %c0_39 = arith.constant 0 : index
    %24 = vector.load %arg3[%c0_38, %c0_39] : memref<1x8xf32, #tpu.memory_space<vmem>>, vector<1x8xf32>
    %cst_40 = arith.constant 0.000000e+00 : f32
    %25 = vector.broadcast %cst_40 : f32 to vector<256x8xf32>
    %c0_41 = arith.constant 0 : index
    %c0_42 = arith.constant 0 : index
    %c0_43 = arith.constant 0 : index
    %26 = vector.load %arg7[%c0_41, %c0_42, %c0_43] : memref<18x16x48xf32, #tpu.memory_space<vmem>>, vector<16x16x48xf32>
    %27 = vector.shape_cast %26 : vector<16x16x48xf32> to vector<256x48xf32>
    %28 = arith.truncf %27 : vector<256x48xf32> to vector<256x48xbf16>
    %c0_44 = arith.constant 0 : index
    %c0_45 = arith.constant 0 : index
    %c0_46 = arith.constant 0 : index
    %29 = vector.load %arg2[%c0_44, %c0_45, %c0_46] : memref<3x48x8xbf16, #tpu.memory_space<vmem>>, vector<1x48x8xbf16>
    %30 = vector.shape_cast %29 : vector<1x48x8xbf16> to vector<48x8xbf16>
    %cst_47 = arith.constant dense<0.000000e+00> : vector<256x8xf32>
    %31 = tpu.matmul %28, %30, %cst_47 {dimension_numbers = #tpu.dot_dimension_numbers<[1], [0], [0], [1], [0, 0, 1, 1], [], []>} : vector<256x48xbf16>, vector<48x8xbf16>, vector<256x8xf32> -> vector<256x8xf32>
    %32 = arith.addf %25, %31 : vector<256x8xf32>
    %c1_48 = arith.constant 1 : index
    %c0_49 = arith.constant 0 : index
    %c0_50 = arith.constant 0 : index
    %33 = vector.load %arg7[%c1_48, %c0_49, %c0_50] : memref<18x16x48xf32, #tpu.memory_space<vmem>>, vector<16x16x48xf32>
    %34 = vector.shape_cast %33 : vector<16x16x48xf32> to vector<256x48xf32>
    %35 = arith.truncf %34 : vector<256x48xf32> to vector<256x48xbf16>
    %c1_51 = arith.constant 1 : index
    %c0_52 = arith.constant 0 : index
    %c0_53 = arith.constant 0 : index
    %36 = vector.load %arg2[%c1_51, %c0_52, %c0_53] : memref<3x48x8xbf16, #tpu.memory_space<vmem>>, vector<1x48x8xbf16>
    %37 = vector.shape_cast %36 : vector<1x48x8xbf16> to vector<48x8xbf16>
    %cst_54 = arith.constant dense<0.000000e+00> : vector<256x8xf32>
    %38 = tpu.matmul %35, %37, %cst_54 {dimension_numbers = #tpu.dot_dimension_numbers<[1], [0], [0], [1], [0, 0, 1, 1], [], []>} : vector<256x48xbf16>, vector<48x8xbf16>, vector<256x8xf32> -> vector<256x8xf32>
    %39 = arith.addf %32, %38 : vector<256x8xf32>
    %c2 = arith.constant 2 : index
    %c0_55 = arith.constant 0 : index
    %c0_56 = arith.constant 0 : index
    %40 = vector.load %arg7[%c2, %c0_55, %c0_56] : memref<18x16x48xf32, #tpu.memory_space<vmem>>, vector<16x16x48xf32>
    %41 = vector.shape_cast %40 : vector<16x16x48xf32> to vector<256x48xf32>
    %42 = arith.truncf %41 : vector<256x48xf32> to vector<256x48xbf16>
    %c2_57 = arith.constant 2 : index
    %c0_58 = arith.constant 0 : index
    %c0_59 = arith.constant 0 : index
    %43 = vector.load %arg2[%c2_57, %c0_58, %c0_59] : memref<3x48x8xbf16, #tpu.memory_space<vmem>>, vector<1x48x8xbf16>
    %44 = vector.shape_cast %43 : vector<1x48x8xbf16> to vector<48x8xbf16>
    %cst_60 = arith.constant dense<0.000000e+00> : vector<256x8xf32>
    %45 = tpu.matmul %42, %44, %cst_60 {dimension_numbers = #tpu.dot_dimension_numbers<[1], [0], [0], [1], [0, 0, 1, 1], [], []>} : vector<256x48xbf16>, vector<48x8xbf16>, vector<256x8xf32> -> vector<256x8xf32>
    %46 = arith.addf %39, %45 : vector<256x8xf32>
    %47 = vector.broadcast %24 : vector<1x8xf32> to vector<256x8xf32>
    %48 = arith.addf %46, %47 : vector<256x8xf32>
    %cst_61 = arith.constant 0.000000e+00 : f32
    %49 = vector.broadcast %cst_61 : f32 to vector<256x8xf32>
    %50 = arith.maximumf %48, %49 : vector<256x8xf32>
    %51 = vector.shape_cast %50 : vector<256x8xf32> to vector<16x16x8xf32>
    %c1_62 = arith.constant 1 : index
    %c0_63 = arith.constant 0 : index
    %c8 = arith.constant 8 : index
    %52 = vector.load %arg8[%c1_62, %c0_63, %c8] : memref<18x16x24xf32, #tpu.memory_space<vmem>>, vector<16x16x8xf32>
    tpu.vector_store %arg8[%c1_62, %c0_63, %c8], %51 {strides = array<i32>} : memref<18x16x24xf32, #tpu.memory_space<vmem>>, vector<16x16x8xf32>,
    %53 = vector.extract_strided_slice %51 {offsets = [0, 0, 0], sizes = [16, 15, 8], strides = [1, 1, 1]} : vector<16x16x8xf32> to vector<16x15x8xf32>
    %c1_64 = arith.constant 1 : index
    %c1_65 = arith.constant 1 : index
    %c0_66 = arith.constant 0 : index
    %54 = vector.load %arg8[%c1_64, %c1_65, %c0_66] : memref<18x16x24xf32, #tpu.memory_space<vmem>>, vector<16x15x8xf32>
    tpu.vector_store %arg8[%c1_64, %c1_65, %c0_66], %53 {strides = array<i32>} : memref<18x16x24xf32, #tpu.memory_space<vmem>>, vector<16x15x8xf32>,
    %55 = vector.extract_strided_slice %51 {offsets = [0, 1, 0], sizes = [16, 15, 8], strides = [1, 1, 1]} : vector<16x16x8xf32> to vector<16x15x8xf32>
    %c1_67 = arith.constant 1 : index
    %c0_68 = arith.constant 0 : index
    %c16_69 = arith.constant 16 : index
    %56 = vector.load %arg8[%c1_67, %c0_68, %c16_69] : memref<18x16x24xf32, #tpu.memory_space<vmem>>, vector<16x15x8xf32>
    tpu.vector_store %arg8[%c1_67, %c0_68, %c16_69], %55 {strides = array<i32>} : memref<18x16x24xf32, #tpu.memory_space<vmem>>, vector<16x15x8xf32>,
    %c0_70 = arith.constant 0 : index
    %c0_71 = arith.constant 0 : index
    %57 = vector.load %arg5[%c0_70, %c0_71] : memref<1x8xf32, #tpu.memory_space<vmem>>, vector<1x8xf32>
    %cst_72 = arith.constant 0.000000e+00 : f32
    %58 = vector.broadcast %cst_72 : f32 to vector<256x8xf32>
    %c0_73 = arith.constant 0 : index
    %c0_74 = arith.constant 0 : index
    %c0_75 = arith.constant 0 : index
    %59 = vector.load %arg8[%c0_73, %c0_74, %c0_75] : memref<18x16x24xf32, #tpu.memory_space<vmem>>, vector<16x16x24xf32>
    %60 = vector.shape_cast %59 : vector<16x16x24xf32> to vector<256x24xf32>
    %61 = arith.truncf %60 : vector<256x24xf32> to vector<256x24xbf16>
    %c0_76 = arith.constant 0 : index
    %c0_77 = arith.constant 0 : index
    %c0_78 = arith.constant 0 : index
    %62 = vector.load %arg4[%c0_76, %c0_77, %c0_78] : memref<3x24x8xbf16, #tpu.memory_space<vmem>>, vector<1x24x8xbf16>
    %63 = vector.shape_cast %62 : vector<1x24x8xbf16> to vector<24x8xbf16>
    %cst_79 = arith.constant dense<0.000000e+00> : vector<256x8xf32>
    %64 = tpu.matmul %61, %63, %cst_79 {dimension_numbers = #tpu.dot_dimension_numbers<[1], [0], [0], [1], [0, 0, 1, 1], [], []>} : vector<256x24xbf16>, vector<24x8xbf16>, vector<256x8xf32> -> vector<256x8xf32>
    %65 = arith.addf %58, %64 : vector<256x8xf32>
    %c1_80 = arith.constant 1 : index
    %c0_81 = arith.constant 0 : index
    %c0_82 = arith.constant 0 : index
    %66 = vector.load %arg8[%c1_80, %c0_81, %c0_82] : memref<18x16x24xf32, #tpu.memory_space<vmem>>, vector<16x16x24xf32>
    %67 = vector.shape_cast %66 : vector<16x16x24xf32> to vector<256x24xf32>
    %68 = arith.truncf %67 : vector<256x24xf32> to vector<256x24xbf16>
    %c1_83 = arith.constant 1 : index
    %c0_84 = arith.constant 0 : index
    %c0_85 = arith.constant 0 : index
    %69 = vector.load %arg4[%c1_83, %c0_84, %c0_85] : memref<3x24x8xbf16, #tpu.memory_space<vmem>>, vector<1x24x8xbf16>
    %70 = vector.shape_cast %69 : vector<1x24x8xbf16> to vector<24x8xbf16>
    %cst_86 = arith.constant dense<0.000000e+00> : vector<256x8xf32>
    %71 = tpu.matmul %68, %70, %cst_86 {dimension_numbers = #tpu.dot_dimension_numbers<[1], [0], [0], [1], [0, 0, 1, 1], [], []>} : vector<256x24xbf16>, vector<24x8xbf16>, vector<256x8xf32> -> vector<256x8xf32>
    %72 = arith.addf %65, %71 : vector<256x8xf32>
    %c2_87 = arith.constant 2 : index
    %c0_88 = arith.constant 0 : index
    %c0_89 = arith.constant 0 : index
    %73 = vector.load %arg8[%c2_87, %c0_88, %c0_89] : memref<18x16x24xf32, #tpu.memory_space<vmem>>, vector<16x16x24xf32>
    %74 = vector.shape_cast %73 : vector<16x16x24xf32> to vector<256x24xf32>
    %75 = arith.truncf %74 : vector<256x24xf32> to vector<256x24xbf16>
    %c2_90 = arith.constant 2 : index
    %c0_91 = arith.constant 0 : index
    %c0_92 = arith.constant 0 : index
    %76 = vector.load %arg4[%c2_90, %c0_91, %c0_92] : memref<3x24x8xbf16, #tpu.memory_space<vmem>>, vector<1x24x8xbf16>
    %77 = vector.shape_cast %76 : vector<1x24x8xbf16> to vector<24x8xbf16>
    %cst_93 = arith.constant dense<0.000000e+00> : vector<256x8xf32>
    %78 = tpu.matmul %75, %77, %cst_93 {dimension_numbers = #tpu.dot_dimension_numbers<[1], [0], [0], [1], [0, 0, 1, 1], [], []>} : vector<256x24xbf16>, vector<24x8xbf16>, vector<256x8xf32> -> vector<256x8xf32>
    %79 = arith.addf %72, %78 : vector<256x8xf32>
    %80 = vector.broadcast %57 : vector<1x8xf32> to vector<256x8xf32>
    %81 = arith.addf %79, %80 : vector<256x8xf32>
    %cst_94 = arith.constant 0.000000e+00 : f32
    %82 = vector.broadcast %cst_94 : f32 to vector<256x8xf32>
    %83 = arith.maximumf %81, %82 : vector<256x8xf32>
    %c0_95 = arith.constant 0 : index
    %c0_96 = arith.constant 0 : index
    %c0_97 = arith.constant 0 : index
    %84 = vector.load %arg6[%c0_95, %c0_96, %c0_97] : memref<1x256x8xf32, #tpu.memory_space<vmem>>, vector<1x256x8xf32>
    %85 = vector.shape_cast %84 : vector<1x256x8xf32> to vector<256x8xf32>
    %86 = vector.shape_cast %83 : vector<256x8xf32> to vector<1x256x8xf32>
    tpu.vector_store %arg6[%c0_95, %c0_96, %c0_97], %86 {strides = array<i32>} : memref<1x256x8xf32, #tpu.memory_space<vmem>>, vector<1x256x8xf32>,
    return
  }
  func.func @transform_0(%arg0: i32) -> (i32, i32, i32, i32) {
    %c0_i32 = arith.constant 0 : i32
    %c0_i32_0 = arith.constant 0 : i32
    %c0_i32_1 = arith.constant 0 : i32
    %c0_i32_2 = arith.constant 0 : i32
    return %arg0, %c0_i32, %c0_i32_0, %c0_i32_1 : i32, i32, i32, i32
  }
  func.func @transform_1(%arg0: i32) -> (i32, i32, i32) {
    %c0_i32 = arith.constant 0 : i32
    %c0_i32_0 = arith.constant 0 : i32
    %c0_i32_1 = arith.constant 0 : i32
    %c0_i32_2 = arith.constant 0 : i32
    return %c0_i32, %c0_i32_0, %c0_i32_1 : i32, i32, i32
  }
  func.func @transform_2(%arg0: i32) -> (i32, i32) {
    %c0_i32 = arith.constant 0 : i32
    %c0_i32_0 = arith.constant 0 : i32
    %c0_i32_1 = arith.constant 0 : i32
    return %c0_i32, %c0_i32_0 : i32, i32
  }
  func.func @transform_3(%arg0: i32) -> (i32, i32, i32) {
    %c0_i32 = arith.constant 0 : i32
    %c0_i32_0 = arith.constant 0 : i32
    %c0_i32_1 = arith.constant 0 : i32
    %c0_i32_2 = arith.constant 0 : i32
    return %c0_i32, %c0_i32_0, %c0_i32_1 : i32, i32, i32
  }
  func.func @transform_4(%arg0: i32) -> (i32, i32) {
    %c0_i32 = arith.constant 0 : i32
    %c0_i32_0 = arith.constant 0 : i32
    %c0_i32_1 = arith.constant 0 : i32
    return %c0_i32, %c0_i32_0 : i32, i32
  }
  func.func @transform_5(%arg0: i32) -> (i32, i32, i32) {
    %c0_i32 = arith.constant 0 : i32
    %c0_i32_0 = arith.constant 0 : i32
    %c0_i32_1 = arith.constant 0 : i32
    return %arg0, %c0_i32, %c0_i32_0 : i32, i32, i32
  }
}

</mosaic_0001>

<bundles_post_ra>
// kernel: unet_forward.11
= control target key start
LH: loop header
LB: loop body
LE: loop exit
PB: predicated region body
PF: predicated region fallthrough
CT: control target
= control target key end

     0   :  { %s364_s12 = smov 0   ;;  %s387_s0 = inlined_call_operand.vmem [shape: bf16[2,16,16], index: 0, kind: input, shape index: {}]   ;;  %s388_s1 = inlined_call_operand.vmem [shape: bf16[16,64], index: 1, kind: input, shape index: {}]   ;;  %s389_s2 = inlined_call_operand.vmem [shape: f32[1,64], index: 2, kind: input, shape index: {}]   ;;  %s390_s3 = inlined_call_operand.vmem [shape: f32[2,16,64], index: 3, kind: output, shape index: {}]  }
   0x1 LB: > { %s297_s13 = sadd.s32 4294967295, %s340_s12   ;;  %p301_p0 = scmp.ge.s32.totalorder %s340_s12, 1  ;;  %s340_s12 = sphi %s364_s12, %s13_s12  }
   0x2   : > { %p137_p1 = scmp.lt.s32.totalorder %s340_s12, 3 }
   0x4   : > { %p138_p2 = pnand %p301_p0, %p137_p1 }
   0x5   : > { %v332_v0 = vld [vmem:[%s388_s1] sm:$0xff] (!%p138_p2)   ;;  %v342_v1 = vmov (!%p138_p2), 0.0   ;;  %p161_p3 = scmp.lt.s32.totalorder (!%p138_p2), %s297_s13, 1  ;;  %vm343_vm0 = vmmov (!%p138_p2), 0   ;;  %vm194_vm1 = vcmask (!%p138_p2), 130048   ;;  %vm239_vm2 = vcmask (!%p138_p2), 523264  }
   0x6   : > { %141 = sbr.rel (%p138_p2) target bundleno = 234 (0xea), region = 32  ;;  %316 = vmatprep.subr.bf16.mxu0 (!%p138_p2), %v342_v1  ;;  %318 = vmatprep.mubr.msk.bf16.mxu0 (!%p138_p2), %vm343_vm0, %v342_v1  ;;  %v306_v3 = vld [vmem:[%s389_s2] ss:$0 sm:$0xff] (!%p138_p2) }
   0x7   : > { %317 = vmatpush3.bf16.msra.mxu0 (!%p138_p2), %v332_v0 }
   0xd   : > { %s392_s13 = smov (!%p161_p3, %s297_s13), 1 }
   0xe   : > { %s312_s16 = sshll.u32 %s392_s13, 3  ;;  %s313_s20 = sshll.u32 %s392_s13, 4 }
   0xf   : > { %s165_s19 = scalar_lea.vmem %s387_s0, %s312_s16  ;;  %s170_s25 = scalar_lea.vmem %s390_s3, %s313_s20 }
  0x10   : > { %v333_v2 = vld [vmem:[%s165_s19] sm:$0xff]  }
  0x11   : > { %319 = vmatmul.mubr.msk.bf16.vlgmr.msra.gmra.mrb[0].mxu0 %vm194_vm1, %v333_v2 }
  0xe4   : > { %v232_v4 = vpop.f32.mrb[0].mxu0 }
  0xe5   : > { %v233_v5 = vadd.f32 %v306_v3, %v232_v4  ;;  %v320_v6 = vpop.f32.mrb[1].mxu0 }
  0xe6   : > { %v235_v7 = vpop.f32.mrb[2].mxu0 }
  0xe7   : > { %240 = vst.msk [vmem:[%s170_s25] sm:$0xff] %vm239_vm2, %v233_v5  ;;  %v236_v8 = vadd.f32 %v306_v3, %v235_v7  ;;  %v321_v9 = vpop.f32.mrb[3].mxu0 }
  0xe9   : > { %241 = vst.msk [vmem:[%s170_s25 + $0x8] sm:$0xff] %vm239_vm2, %v236_v8 }
  0xea PF: > { %s13_s12 = sadd.s32 1, %s340_s12  }
  0xeb   : > { %p10_p4 = scmp.ge.s32.totalorder %s13_s12, 4  }
  0xed   :  { %12 = sbr.rel (!%p10_p4) target bundleno = 1 (0x1), region = 62 }

// kernel: unet_forward.10
= control target key start
LH: loop header
LB: loop body
LE: loop exit
PB: predicated region body
PF: predicated region fallthrough
CT: control target
= control target key end

     0   :  { %s1213_s18 = smov 0   ;;  %s1400_s0 = inlined_call_operand.vmem [shape: bf16[2,4,2,2,4,16], index: 0, kind: input, shape index: {}]   ;;  %s1401_s1 = inlined_call_operand.vmem [shape: bf16[3,48,16], index: 1, kind: input, shape index: {}]   ;;  %s1402_s2 = inlined_call_operand.vmem [shape: f32[1,16], index: 2, kind: input, shape index: {}]   ;;  %s1403_s3 = inlined_call_operand.vmem [shape: bf16[3,48,16], index: 3, kind: input, shape index: {}]   ;;  %s1404_s4 = inlined_call_operand.vmem [shape: f32[1,16], index: 4, kind: input, shape index: {}]   ;;  %s1405_s5 = inlined_call_operand.vmem [shape: f32[2,16,16], index: 5, kind: output, shape index: {}]  }
   0x1 LB: > { %s950_s19 = sadd.s32 4294967295, %s1177_s18   ;;  %p954_p0 = scmp.ge.s32.totalorder %s1177_s18, 1  ;;  %s1177_s18 = sphi %s1213_s18, %s15_s18  }
   0x2   : > { %p187_p1 = scmp.lt.s32.totalorder %s1177_s18, 3 }
   0x4   : > { %p188_p2 = pnand %p954_p0, %p187_p1 }
   0x5   : > { %p1221_p3 = scmp.lt.s32.totalorder (!%p188_p2), %s950_s19, 1  ;;  %vm231_vm0 = vcmask (!%p188_p2), 122880   ;;  %vm236_vm1 = vcmask (!%p188_p2), 385280   ;;  %v1179_v0 = vmov (!%p188_p2), 0.0   ;;  %v1141_v26 = vld [vmem:[%s1401_s1 + $0x18] sm:$0xff] (!%p188_p2)   ;;  %v1142_v27 = vld [vmem:[%s1401_s1] sm:$0xff] (!%p188_p2)  }
   0x6   : > { %191 = sbr.rel (%p188_p2) target bundleno = 762 (0x2fa), region = 40  ;;  %232 = vst.msk [vmem:[#allocation2 + $0x4] sm:$0x1] (!%p188_p2), %vm231_vm0, %v1179_v0  ;;  %233 = vst.msk [vmem:[#allocation2 + $0x8] sm:$0x1] (!%p188_p2), %vm231_vm0, %v1179_v0  ;;  %1049 = vmatprep.subr.bf16.mxu0 (!%p188_p2), %v1179_v0  ;;  %1059 = vmatprep.subr.bf16.mxu1 (!%p188_p2), %v1179_v0  ;;  %v1143_v29 = vld [vmem:[%s1401_s1 + $0x20] sm:$0xff] (!%p188_p2)  }
   0x7   : > { %237 = vst.msk [vmem:[#allocation2 + $0x7] sm:$0x1] (!%p188_p2), %vm236_vm1, %v1179_v0  ;;  %238 = vst.msk [vmem:[#allocation2 + $0xb] sm:$0x1] (!%p188_p2), %vm236_vm1, %v1179_v0  ;;  %vm226_vm2 = vcmask (!%p188_p2), 388096   ;;  %1050 = vmatpush3.bf16.msra.mxu0 (!%p188_p2), %v1141_v26  ;;  %1060 = vmatpush3.bf16.msra.mxu1 (!%p188_p2), %v1142_v27  ;;  %v1144_v33 = vld [vmem:[%s1401_s1 + $0x8] sm:$0xff] (!%p188_p2)  }
   0x8   : > { %234 = vst.msk [vmem:[#allocation2 + $0xc] sm:$0x1] (!%p188_p2), %vm231_vm0, %v1179_v0  ;;  %235 = vst.msk [vmem:[#allocation2 + $0x10] sm:$0x1] (!%p188_p2), %vm231_vm0, %v1179_v0  ;;  %1051 = vmatprep.subr.bf16.mxu0 (!%p188_p2), %v1179_v0  ;;  %1061 = vmatprep.subr.bf16.mxu1 (!%p188_p2), %v1179_v0  ;;  %vm1180_vm3 = vmmov (!%p188_p2), 0   ;;  %v1145_v38 = vld [vmem:[%s1401_s1 + $0x28] sm:$0xff] (!%p188_p2)  }
   0x9   : > { %239 = vst.msk [vmem:[#allocation2 + $0xf] sm:$0x1] (!%p188_p2), %vm236_vm1, %v1179_v0  ;;  %240 = vst.msk [vmem:[#allocation2 + $0x13] sm:$0x1] (!%p188_p2), %vm236_vm1, %v1179_v0  ;;  %1055 = vmatprep.mubr.msk.bf16.mxu0 (!%p188_p2), %vm1180_vm3, %v1179_v0  ;;  %1065 = vmatprep.mubr.msk.bf16.mxu1 (!%p188_p2), %vm1180_vm3, %v1179_v0  ;;  %v1146_v39 = vld [vmem:[%s1401_s1 + $0x10] sm:$0xff] (!%p188_p2)   ;;  %s1181_s12 = smov (!%p188_p2), 16  }
   0xa   : > { %245 = vst.msk [vmem:[#allocation3 + $0x4] sm:$0x1] (!%p188_p2), %vm231_vm0, %v1179_v0  ;;  %246 = vst.msk [vmem:[#allocation3 + $0x8] sm:$0x1] (!%p188_p2), %vm231_vm0, %v1179_v0  ;;  %s1182_s13 = smov (!%p188_p2), 32   ;;  %vm304_vm4 = vcmask (!%p188_p2), 257152  }
   0xb   : > { %247 = vst.msk [vmem:[#allocation3 + $0xc] sm:$0x1] (!%p188_p2), %vm231_vm0, %v1179_v0  ;;  %248 = vst.msk [vmem:[#allocation3 + $0x10] sm:$0x1] (!%p188_p2), %vm231_vm0, %v1179_v0  ;;  %1052 = vmatpush3.bf16.msra.mxu0 (!%p188_p2), %v1143_v29  ;;  %1062 = vmatpush3.bf16.msra.mxu1 (!%p188_p2), %v1144_v33  ;;  %vm309_vm5 = vcmask (!%p188_p2), 124928   ;;  %vm326_vm6 = vcmask (!%p188_p2), 388353  }
   0xc   : > { %249 = vst.msk [vmem:[#allocation3 + $0x7] sm:$0x1] (!%p188_p2), %vm236_vm1, %v1179_v0  ;;  %250 = vst.msk [vmem:[#allocation3 + $0xb] sm:$0x1] (!%p188_p2), %vm236_vm1, %v1179_v0  ;;  %1053 = vmatprep.subr.bf16.mxu0 (!%p188_p2), %v1179_v0  ;;  %1063 = vmatprep.subr.bf16.mxu1 (!%p188_p2), %v1179_v0  ;;  %v1151_v55 = vld [vmem:[%s1401_s1 + $0x30] sm:$0xff] (!%p188_p2)   ;;  %vm389_vm7 = vcmask (!%p188_p2), 392192  }
   0xd   : > { %251 = vst.msk [vmem:[#allocation3 + $0xf] sm:$0x1] %vm236_vm1, %v1179_v0  ;;  %252 = vst.msk [vmem:[#allocation3 + $0x13] sm:$0x1] %vm236_vm1, %v1179_v0  ;;  %s1408_s19 = smov (!%p1221_p3, %s950_s19), 1  ;;  %v1152_v60 = vld [vmem:[%s1401_s1 + $0x38] sm:$0xff]  }
   0xe   : > { %s1023_s21 = sshll.u32 %s1408_s19, 5  ;;  %227 = vst.msk [vmem:[#allocation2] sm:$0xf] %vm226_vm2, %v1179_v0  ;;  %229 = vst.msk [vmem:[#allocation2 + $0x14] sm:$0xf] %vm226_vm2, %v1179_v0  ;;  %v1153_v61 = vld [vmem:[%s1401_s1 + $0x40] sm:$0xff]  }
   0xf   : > { %s219_s24 = scalar_lea.vmem %s1400_s0, %s1023_s21  ;;  %241 = vst.msk [vmem:[#allocation3] sm:$0xf] %vm226_vm2, %v1179_v0  ;;  %243 = vst.msk [vmem:[#allocation3 + $0x14] sm:$0xf] %vm226_vm2, %v1179_v0  ;;  %1054 = vmatpush3.bf16.msra.mxu0 %v1145_v38  ;;  %1064 = vmatpush3.bf16.msra.mxu1 %v1146_v39  ;;  %v1159_v26 = vld [vmem:[%s1403_s3 + $0x20] sm:$0xff]   ;;  %v1161_v29 = vld [vmem:[%s1403_s3 + $0x28] sm:$0xff]  }
  0x10   : > { %v253_v1 = vld [vmem:[%s219_s24] sm:$0x3]  ;;  %v254_v2 = vld [vmem:[%s219_s24 + $0x8] sm:$0x3]  ;;  %v959_v3 = vld [vmem:[%s219_s24 + $0x2] sm:$0x3]  ;;  %1069 = vmatprep.subr.bf16.mxu0 %v1179_v0  ;;  %1079 = vmatprep.subr.bf16.mxu1 %v1179_v0 }
  0x11   : > { %v960_v4 = vld [vmem:[%s219_s24 + $0xa] sm:$0x3]  ;;  %v963_v5 = vld [vmem:[%s219_s24 + $0x4] sm:$0x3]  ;;  %v964_v6 = vld [vmem:[%s219_s24 + $0xc] sm:$0x3]  ;;  %v272_v7 = vmax.bf16 %v959_v3, %v253_v1 }
  0x12   : > { %v967_v8 = vld [vmem:[%s219_s24 + $0x6] sm:$0x3]  ;;  %v968_v9 = vld [vmem:[%s219_s24 + $0xe] sm:$0x3]  ;;  %v273_v10 = vmax.bf16 %v960_v4, %v254_v2  ;;  %v255_v11 = vld [vmem:[%s219_s24 + $0x10] sm:$0x3] }
  0x13   : > { %v276_v12 = vmax.bf16 %v967_v8, %v963_v5  ;;  %v277_v13 = vmax.bf16 %v968_v9, %v964_v6  ;;  %v256_v14 = vld [vmem:[%s219_s24 + $0x18] sm:$0x3]  ;;  %v961_v15 = vld [vmem:[%s219_s24 + $0x12] sm:$0x3]  ;;  %v962_v16 = vld [vmem:[%s219_s24 + $0x1a] sm:$0x3] }
  0x14   : > { %v965_v17 = vld [vmem:[%s219_s24 + $0x14] sm:$0x3]  ;;  %v966_v18 = vld [vmem:[%s219_s24 + $0x1c] sm:$0x3]  ;;  %v969_v19 = vld [vmem:[%s219_s24 + $0x16] sm:$0x3]  ;;  %v274_v20 = vmax.bf16 %v961_v15, %v255_v11  ;;  %v275_v21 = vmax.bf16 %v962_v16, %v256_v14 }
  0x15   : > { %v280_v22 = vmax.bf16 %v276_v12, %v272_v7  ;;  %v281_v23 = vmax.bf16 %v277_v13, %v273_v10  ;;  %v970_v24 = vld [vmem:[%s219_s24 + $0x1e] sm:$0x3]  ;;  %v278_v25 = vmax.bf16 %v969_v19, %v965_v17  ;;  %v995_v12 = vld [vmem:[%s1402_s2] ss:$0 sm:$0xff]  ;;  %s1024_s21 = sshll.u32 %s1408_s19, 4  ;;  %vm892_vm8 = vcmask 130048  }
  0x16   : > { %v279_v28 = vmax.bf16 %v970_v24, %v966_v18  ;;  %s224_s24 = scalar_lea.vmem %s1405_s5, %s1024_s21 }
  0x17   : > { %v284_v30 = vunpack.c.l.bf16 %v280_v22  ;;  %v285_v31 = vunpack.c.l.bf16 %v281_v23  ;;  %v282_v32 = vmax.bf16 %v278_v25, %v274_v20  ;;  %v1157_v22 = vld [vmem:[%s1403_s3 + $0x18] sm:$0xff]   ;;  %v1158_v25 = vld [vmem:[%s1403_s3 + $0x8] sm:$0xff]  }
  0x18   : > { %v283_v34 = vmax.bf16 %v279_v28, %v275_v21  ;;  %v1156_v21 = vld [vmem:[%s1403_s3] sm:$0xff]   ;;  %v1160_v28 = vld [vmem:[%s1403_s3 + $0x10] sm:$0xff]  }
  0x19   : > { %v1121_v35 = vpack.i.bf16 %v285_v31, %v284_v30  ;;  %v286_v36 = vunpack.c.l.bf16 %v282_v32 }
  0x1a   : > { %v287_v37 = vunpack.c.l.bf16 %v283_v34 }
  0x1b   : > { %1122 = vrot.lane.b32.xlu0 %v1121_v35, %s1181_s12  ;;  %1132 = vrot.lane.b32.xlu1 %v1121_v35, %s1182_s13 }
  0x1c   : > { %v1126_v40 = vpack.i.bf16 %v287_v37, %v286_v36 }
  0x1f   : > { %1127 = vrot.lane.b32.xlu0 %v1126_v40, %s1181_s12  ;;  %1137 = vrot.lane.b32.xlu1 %v1126_v40, %s1182_s13 }
  0x8d   : > { %v1123_v41 = vpop.permute.xlu0 %1122  ;;  %v1133_v42 = vpop.permute.xlu1 %1132 }
  0x8e   : > { %v1125_v43 = vunpack.i.h.bf16 %v1123_v41  ;;  %v1124_v44 = vunpack.i.l.bf16 %v1123_v41  ;;  %v1135_v45 = vunpack.i.h.bf16 %v1133_v42  ;;  %v1134_v46 = vunpack.i.l.bf16 %v1133_v42 }
  0x90   : > { %306 = vst.msk [vmem:[#allocation2 + $0x8] sm:$0xf] %vm304_vm4, %v1125_v43  ;;  %305 = vst.msk [vmem:[#allocation2 + $0x4] sm:$0xf] %vm304_vm4, %v1124_v44  ;;  %v1166_v44 = vld [vmem:[%s1403_s3 + $0x30] sm:$0xff]  }
  0x91   : > { %311 = vst.msk [vmem:[#allocation2 + $0x9] sm:$0x7] %vm309_vm5, %v285_v31  ;;  %310 = vst.msk [vmem:[#allocation2 + $0x5] sm:$0x7] %vm309_vm5, %v284_v30  ;;  %v1128_v47 = vpop.permute.xlu0 %1127  ;;  %v1138_v48 = vpop.permute.xlu1 %1137 }
  0x92   : > { %327 = vst.msk [vmem:[#allocation2 + $0x3] sm:$0xe] %vm326_vm6, %v1134_v46  ;;  %328 = vst.msk [vmem:[#allocation2 + $0x7] sm:$0xe] %vm326_vm6, %v1135_v45  ;;  %v1130_v49 = vunpack.i.h.bf16 %v1128_v47  ;;  %v1129_v50 = vunpack.i.l.bf16 %v1128_v47  ;;  %v1140_v51 = vunpack.i.h.bf16 %v1138_v48  ;;  %v1139_v52 = vunpack.i.l.bf16 %v1138_v48  ;;  %v1167_v46 = vld [vmem:[%s1403_s3 + $0x38] sm:$0xff]   ;;  %v1168_v47 = vld [vmem:[%s1403_s3 + $0x40] sm:$0xff]  }
  0x94   : > { %308 = vst.msk [vmem:[#allocation2 + $0x10] sm:$0xf] %vm304_vm4, %v1130_v49  ;;  %307 = vst.msk [vmem:[#allocation2 + $0xc] sm:$0xf] %vm304_vm4, %v1129_v50 }
  0x95   : > { %313 = vst.msk [vmem:[#allocation2 + $0x11] sm:$0x7] %vm309_vm5, %v287_v37  ;;  %312 = vst.msk [vmem:[#allocation2 + $0xd] sm:$0x7] %vm309_vm5, %v286_v36 }
  0x96   : > { %329 = vst.msk [vmem:[#allocation2 + $0xb] sm:$0xe] %vm326_vm6, %v1139_v52  ;;  %330 = vst.msk [vmem:[#allocation2 + $0xf] sm:$0xe] %vm326_vm6, %v1140_v51 }
  0x99   : > { %v1147_v53 = vld [vmem:[#allocation2 + $0x4] sm:$0xff]  }
  0x9a   : > { %v1149_v54 = vld [vmem:[#allocation2] sm:$0xff]  }
  0x9d   : > { %v1148_v56 = vld [vmem:[#allocation2 + $0xc] sm:$0xff]  }
  0x9e   : > { %v1150_v57 = vld [vmem:[#allocation2 + $0x8] sm:$0xff]   ;;  %v363_v58 = vpack.c.bf16 %v1148_v56, %v1147_v53  ;;  %v1155_v63 = vld [vmem:[#allocation2 + $0x10] sm:$0xff]  }
  0x9f   : > { %v344_v59 = vpack.c.bf16 %v1150_v57, %v1149_v54  ;;  %v1154_v62 = vld [vmem:[#allocation2 + $0x8] sm:$0xff]  }
  0xa0   : > { %1056 = vmatmul.mubr.msk.bf16.vlgmr.msra.gmra.mrb[0].mxu0 %vm389_vm7, %v363_v58  ;;  %v509_v1 = vpack.c.bf16 %v1155_v63, %v1154_v62 }
  0xa1   : > { %1066 = vmatmul.mubr.msk.bf16.vlgmr.msra.gmra.mrb[0].mxu1 %vm389_vm7, %v344_v59  ;;  %1070 = vmatpush3.bf16.msra.mxu0 %v1151_v55 }
  0xa2   : > { %1071 = vmatprep.subr.bf16.mxu0 %v1179_v0  ;;  %1075 = vmatprep.mubr.msk.bf16.mxu0 %vm1180_vm3, %v1179_v0 }
  0xa3   : > { %1085 = vmatprep.mubr.msk.bf16.mxu1 %vm1180_vm3, %v1179_v0  ;;  %1080 = vmatpush3.bf16.msra.mxu1 %v1157_v22 }
  0xa4   : > { %1081 = vmatprep.subr.bf16.mxu1 %v1179_v0 }
  0xa5   : > { %1072 = vmatpush3.bf16.msra.mxu0 %v1152_v60 }
  0xa6   : > { %1073 = vmatprep.subr.bf16.mxu0 %v1179_v0 }
  0xa7   : > { %1082 = vmatpush3.bf16.msra.mxu1 %v1159_v26 }
  0xa8   : > { %1083 = vmatprep.subr.bf16.mxu1 %v1179_v0 }
  0xa9   : > { %1074 = vmatpush3.bf16.msra.mxu0 %v1153_v61 }
  0xaa   : > { %1089 = vmatprep.subr.bf16.mxu0 %v1179_v0 }
  0xab   : > { %1084 = vmatpush3.bf16.msra.mxu1 %v1161_v29 }
  0xac   : > { %1076 = vmatmul.mubr.msk.bf16.vlgmr.msra.gmra.mrb[4].mxu0 %vm389_vm7, %v509_v1  ;;  %1099 = vmatprep.subr.bf16.mxu1 %v1179_v0 }
  0xad   : > { %1095 = vmatprep.mubr.msk.bf16.mxu0 %vm1180_vm3, %v1179_v0  ;;  %1090 = vmatpush3.bf16.msra.mxu0 %v1156_v21 }
  0xae   : > { %1091 = vmatprep.subr.bf16.mxu0 %v1179_v0 }
  0xb1   : > { %1092 = vmatpush3.bf16.msra.mxu0 %v1158_v25 }
  0xb2   : > { %1093 = vmatprep.subr.bf16.mxu0 %v1179_v0 }
  0xb5   : > { %1094 = vmatpush3.bf16.msra.mxu0 %v1160_v28 }
 0x173   : > { %v427_v2 = vpop.f32.mrb[0].mxu0 }
 0x174   : > { %v489_v3 = vpop.f32.mrb[0].mxu1  ;;  %v1057_v4 = vpop.f32.mrb[1].mxu0 }
 0x175   : > { %v490_v5 = vadd.f32 %v489_v3, %v427_v2  ;;  %v1067_v6 = vpop.f32.mrb[1].mxu1  ;;  %v430_v7 = vpop.f32.mrb[2].mxu0 }
 0x176   : > { %v492_v8 = vpop.f32.mrb[2].mxu1  ;;  %v1058_v9 = vpop.f32.mrb[3].mxu0 }
 0x177   : > { %v493_v10 = vadd.f32 %v492_v8, %v430_v7  ;;  %v1068_v11 = vpop.f32.mrb[3].mxu1 }
 0x17f   : > { %v572_v13 = vpop.f32.mrb[4].mxu0 }
 0x180   : > { %v579_v14 = vadd.f32 %v572_v13, %v490_v5  ;;  %v1077_v15 = vpop.f32.mrb[5].mxu0 }
 0x181   : > { %v575_v16 = vpop.f32.mrb[6].mxu0 }
 0x182   : > { %v587_v17 = vadd.f32 %v995_v12, %v579_v14  ;;  %v580_v18 = vadd.f32 %v575_v16, %v493_v10  ;;  %v1078_v19 = vpop.f32.mrb[7].mxu0 }
 0x184   : > { %v589_v20 = vmax.f32 %v587_v17, 0.0  ;;  %v588_v23 = vadd.f32 %v995_v12, %v580_v18 }
 0x186   : > { %597 = vrot.lane.b32.xlu0 %v589_v20, %s1181_s12  ;;  %v593_v24 = vcombine.high %v589_v20, %v589_v20  ;;  %v590_v27 = vmax.f32 %v588_v23, 0.0 }
 0x188   : > { %599 = vrot.lane.b32.xlu1 %v593_v24, %s1181_s12  ;;  %v594_v30 = vcombine.high %v590_v27, %v590_v27 }
 0x18a   : > { %617 = vrot.lane.b32.xlu0 %v589_v20, %s1182_s13 }
 0x18c   : > { %619 = vrot.lane.b32.xlu1 %v593_v24, %s1182_s13 }
 0x18e   : > { %601 = vrot.lane.b32.xlu0 %v590_v27, %s1181_s12 }
 0x190   : > { %603 = vrot.lane.b32.xlu1 %v594_v30, %s1181_s12 }
 0x192   : > { %621 = vrot.lane.b32.xlu0 %v590_v27, %s1182_s13 }
 0x194   : > { %623 = vrot.lane.b32.xlu1 %v594_v30, %s1182_s13 }
 0x1f8   : > { %v598_v31 = vpop.permute.xlu0 %597 }
 0x1f9   : > { %609 = vst.msk [vmem:[#allocation3 + $0x4] sm:$0xf] %vm304_vm4, %v598_v31 }
 0x1fa   : > { %613 = vst.msk [vmem:[#allocation3 + $0x5] sm:$0x7] %vm309_vm5, %v589_v20  ;;  %v600_v32 = vpop.permute.xlu1 %599 }
 0x1fb   : > { %610 = vst.msk [vmem:[#allocation3 + $0x8] sm:$0xf] %vm304_vm4, %v600_v32 }
 0x1fc   : > { %614 = vst.msk [vmem:[#allocation3 + $0x9] sm:$0x7] %vm309_vm5, %v593_v24  ;;  %v618_v33 = vpop.permute.xlu0 %617 }
 0x1fd   : > { %629 = vst.msk [vmem:[#allocation3 + $0x3] sm:$0xe] %vm326_vm6, %v618_v33 }
 0x1fe   : > { %v620_v34 = vpop.permute.xlu1 %619 }
 0x1ff   : > { %630 = vst.msk [vmem:[#allocation3 + $0x7] sm:$0xe] %vm326_vm6, %v620_v34 }
 0x200   : > { %v602_v35 = vpop.permute.xlu0 %601 }
 0x201   : > { %611 = vst.msk [vmem:[#allocation3 + $0xc] sm:$0xf] %vm304_vm4, %v602_v35 }
 0x202   : > { %615 = vst.msk [vmem:[#allocation3 + $0xd] sm:$0x7] %vm309_vm5, %v590_v27  ;;  %v604_v36 = vpop.permute.xlu1 %603 }
 0x203   : > { %612 = vst.msk [vmem:[#allocation3 + $0x10] sm:$0xf] %vm304_vm4, %v604_v36 }
 0x204   : > { %616 = vst.msk [vmem:[#allocation3 + $0x11] sm:$0x7] %vm309_vm5, %v594_v30  ;;  %v622_v37 = vpop.permute.xlu0 %621  ;;  %v1162_v39 = vld [vmem:[#allocation3] sm:$0xff]  }
 0x205   : > { %631 = vst.msk [vmem:[#allocation3 + $0xb] sm:$0xe] %vm326_vm6, %v622_v37 }
 0x206   : > { %v624_v38 = vpop.permute.xlu1 %623  ;;  %v1164_v41 = vld [vmem:[#allocation3 + $0x4] sm:$0xff]  }
 0x207   : > { %632 = vst.msk [vmem:[#allocation3 + $0xf] sm:$0xe] %vm326_vm6, %v624_v38 }
 0x20c   : > { %v1163_v40 = vld [vmem:[#allocation3 + $0x8] sm:$0xff]  }
 0x20d   : > { %v646_v42 = vpack.c.bf16 %v1163_v40, %v1162_v39  ;;  %v1169_v49 = vld [vmem:[#allocation3 + $0x8] sm:$0xff]  }
 0x20e   : > { %v1165_v43 = vld [vmem:[#allocation3 + $0xc] sm:$0xff]  }
 0x20f   : > { %1096 = vmatmul.mubr.msk.bf16.vlgmr.msra.gmra.mrb[8].mxu0 %vm389_vm7, %v646_v42  ;;  %v665_v45 = vpack.c.bf16 %v1165_v43, %v1164_v41  ;;  %v1170_v48 = vld [vmem:[#allocation3 + $0x10] sm:$0xff]  }
 0x210   : > { %v810_v50 = vpack.c.bf16 %v1170_v48, %v1169_v49 }
 0x211   : > { %1086 = vmatmul.mubr.msk.bf16.vlgmr.msra.gmra.mrb[4].mxu1 %vm389_vm7, %v665_v45 }
 0x212   : > { %1100 = vmatpush3.bf16.msra.mxu1 %v1166_v44  ;;  %1105 = vmatprep.mubr.msk.bf16.mxu1 %vm1180_vm3, %v1179_v0 }
 0x213   : > { %1101 = vmatprep.subr.bf16.mxu1 %v1179_v0 }
 0x216   : > { %1102 = vmatpush3.bf16.msra.mxu1 %v1167_v46 }
 0x217   : > { %1103 = vmatprep.subr.bf16.mxu1 %v1179_v0  ;;  %v1020_v0 = vld [vmem:[%s1404_s4] ss:$0 sm:$0xff] }
 0x21a   : > { %1104 = vmatpush3.bf16.msra.mxu1 %v1168_v47 }
 0x21d   : > { %1106 = vmatmul.mubr.msk.bf16.vlgmr.msra.gmra.mrb[8].mxu1 %vm389_vm7, %v810_v50 }
 0x2e2   : > { %v790_v51 = vpop.f32.mrb[8].mxu0 }
 0x2e3   : > { %v1097_v52 = vpop.f32.mrb[9].mxu0 }
 0x2e4   : > { %v728_v53 = vpop.f32.mrb[4].mxu1  ;;  %v793_v54 = vpop.f32.mrb[10].mxu0 }
 0x2e5   : > { %v791_v55 = vadd.f32 %v790_v51, %v728_v53  ;;  %v1087_v56 = vpop.f32.mrb[5].mxu1  ;;  %v1098_v57 = vpop.f32.mrb[11].mxu0 }
 0x2e6   : > { %v731_v58 = vpop.f32.mrb[6].mxu1 }
 0x2e7   : > { %v794_v59 = vadd.f32 %v793_v54, %v731_v58  ;;  %v1088_v60 = vpop.f32.mrb[7].mxu1 }
 0x2f0   : > { %v873_v61 = vpop.f32.mrb[8].mxu1 }
 0x2f1   : > { %v880_v62 = vadd.f32 %v873_v61, %v791_v55  ;;  %v1107_v63 = vpop.f32.mrb[9].mxu1 }
 0x2f2   : > { %v876_v1 = vpop.f32.mrb[10].mxu1 }
 0x2f3   : > { %v888_v2 = vadd.f32 %v1020_v0, %v880_v62  ;;  %v881_v3 = vadd.f32 %v876_v1, %v794_v59  ;;  %v1108_v4 = vpop.f32.mrb[11].mxu1 }
 0x2f5   : > { %v890_v5 = vmax.f32 %v888_v2, 0.0  ;;  %v889_v6 = vadd.f32 %v1020_v0, %v881_v3 }
 0x2f7   : > { %893 = vst.msk [vmem:[%s224_s24] sm:$0xff] %vm892_vm8, %v890_v5  ;;  %v891_v7 = vmax.f32 %v889_v6, 0.0 }
 0x2f9   : > { %894 = vst.msk [vmem:[%s224_s24 + $0x8] sm:$0xff] %vm892_vm8, %v891_v7 }
 0x2fa PF: > { %s15_s18 = sadd.s32 1, %s1177_s18  }
 0x2fb   : > { %p12_p4 = scmp.ge.s32.totalorder %s15_s18, 4  }
 0x2fd   :  { %14 = sbr.rel (!%p12_p4) target bundleno = 1 (0x1), region = 83 }

// kernel: unet_forward.9
= control target key start
LH: loop header
LB: loop body
LE: loop exit
PB: predicated region body
PF: predicated region fallthrough
CT: control target
= control target key end

     0   :  { %s1646_s18 = smov 0   ;;  %s1958_s0 = inlined_call_operand.vmem [shape: bf16[2,8,2,2,8,8], index: 0, kind: input, shape index: {}]   ;;  %s1959_s1 = inlined_call_operand.vmem [shape: bf16[3,24,16], index: 1, kind: input, shape index: {}]   ;;  %s1960_s2 = inlined_call_operand.vmem [shape: f32[1,16], index: 2, kind: input, shape index: {}]   ;;  %s1961_s3 = inlined_call_operand.vmem [shape: bf16[3,48,16], index: 3, kind: input, shape index: {}]   ;;  %s1962_s4 = inlined_call_operand.vmem [shape: f32[1,16], index: 4, kind: input, shape index: {}]   ;;  %s1963_s5 = inlined_call_operand.vmem [shape: f32[2,64,16], index: 5, kind: output, shape index: {}]  }
   0x1 LB: > { %s1289_s19 = sadd.s32 4294967295, %s1610_s18   ;;  %p1293_p0 = scmp.ge.s32.totalorder %s1610_s18, 1  ;;  %s1610_s18 = sphi %s1646_s18, %s15_s18  }
   0x2   : > { %p187_p1 = scmp.lt.s32.totalorder %s1610_s18, 3 }
   0x4   : > { %p188_p2 = pnand %p1293_p0, %p187_p1 }
   0x5   : > { %p1654_p3 = scmp.lt.s32.totalorder (!%p188_p2), %s1289_s19, 1  ;;  %vm231_vm0 = vcmask (!%p188_p2), 57344   ;;  %vm240_vm1 = vcmask (!%p188_p2), 188544   ;;  %v1612_v0 = vmov (!%p188_p2), 0.0   ;;  %v1589_v58 = vld [vmem:[%s1959_s1 + $0xc] sm:$0xff] (!%p188_p2)   ;;  %s1613_s27 = smov (!%p188_p2), 8  }
   0x6   : > { %191 = sbr.rel (%p188_p2) target bundleno = 815 (0x32f), region = 40  ;;  %232 = vst.msk [vmem:[#allocation2 + $0x8] sm:$0x1] (!%p188_p2), %vm231_vm0, %v1612_v0  ;;  %233 = vst.msk [vmem:[#allocation2 + $0x10] sm:$0x1] (!%p188_p2), %vm231_vm0, %v1612_v0  ;;  %s1614_s28 = smov (!%p188_p2), 16   ;;  %1424 = vmatprep.subr.bf16.mxu0 (!%p188_p2), %v1589_v58 }
   0x7   : > { %241 = vst.msk [vmem:[#allocation2 + $0xf] sm:$0x1] (!%p188_p2), %vm240_vm1, %v1612_v0  ;;  %242 = vst.msk [vmem:[#allocation2 + $0x17] sm:$0x1] (!%p188_p2), %vm240_vm1, %v1612_v0  ;;  %v1590_v61 = vld [vmem:[%s1959_s1 + $0x14] ss:$0 sps:$4 sm:$0xff] (!%p188_p2)   ;;  %1425 = vmatpush3.bf16.msra.mxu0 (!%p188_p2), %v1589_v58 }
   0x8   : > { %234 = vst.msk [vmem:[#allocation2 + $0x18] sm:$0x1] (!%p188_p2), %vm231_vm0, %v1612_v0  ;;  %235 = vst.msk [vmem:[#allocation2 + $0x20] sm:$0x1] (!%p188_p2), %vm231_vm0, %v1612_v0  ;;  %vm475_vm2 = vcmask (!%p188_p2), 1043456   ;;  %vm226_vm3 = vcmask (!%p188_p2), 195584  }
   0x9   : > { %236 = vst.msk [vmem:[#allocation2 + $0x28] sm:$0x1] (!%p188_p2), %vm231_vm0, %v1612_v0  ;;  %237 = vst.msk [vmem:[#allocation2 + $0x30] sm:$0x1] (!%p188_p2), %vm231_vm0, %v1612_v0  ;;  %1534 = vmatprep.subr.msk.bf16.mxu0 (!%p188_p2), %vm475_vm2, %v1590_v61  ;;  %vm371_vm4 = vcmask (!%p188_p2), 130112   ;;  %vm380_vm5 = vcmask (!%p188_p2), 63488  }
   0xa   : > { %238 = vst.msk [vmem:[#allocation2 + $0x38] sm:$0x1] (!%p188_p2), %vm231_vm0, %v1612_v0  ;;  %239 = vst.msk [vmem:[#allocation2 + $0x40] sm:$0x1] (!%p188_p2), %vm231_vm0, %v1612_v0  ;;  %vm413_vm6 = vcmask (!%p188_p2), 195713   ;;  %vm254_vm7 = vcmask (!%p188_p2), 122880  }
   0xb   : > { %243 = vst.msk [vmem:[#allocation2 + $0x1f] sm:$0x1] (!%p188_p2), %vm240_vm1, %v1612_v0  ;;  %244 = vst.msk [vmem:[#allocation2 + $0x27] sm:$0x1] (!%p188_p2), %vm240_vm1, %v1612_v0  ;;  %vm263_vm8 = vcmask (!%p188_p2), 385280   ;;  %vm249_vm9 = vcmask (!%p188_p2), 392192  }
   0xc   : > { %245 = vst.msk [vmem:[#allocation2 + $0x2f] sm:$0x1] (!%p188_p2), %vm240_vm1, %v1612_v0  ;;  %246 = vst.msk [vmem:[#allocation2 + $0x37] sm:$0x1] (!%p188_p2), %vm240_vm1, %v1612_v0  ;;  %v1346_v58 = vld [vmem:[%s1960_s2] ss:$0 sm:$0xff] (!%p188_p2) }
   0xd   : > { %247 = vst.msk [vmem:[#allocation2 + $0x3f] sm:$0x1] %vm240_vm1, %v1612_v0  ;;  %248 = vst.msk [vmem:[#allocation2 + $0x47] sm:$0x1] %vm240_vm1, %v1612_v0  ;;  %s1966_s19 = smov (!%p1654_p3, %s1289_s19), 1  ;;  %s1615_s22 = smov 32  }
   0xe   : > { %s1383_s21 = sshll.u32 %s1966_s19, 7  ;;  %227 = vst.msk [vmem:[#allocation2] sm:$0xff] %vm226_vm3, %v1612_v0  ;;  %229 = vst.msk [vmem:[#allocation2 + $0x48] sm:$0xff] %vm226_vm3, %v1612_v0  ;;  %vm801_vm10 = vcmask 261248   ;;  %vm810_vm11 = vcmask 129024   ;;  %vm843_vm12 = vcmask 392449  }
   0xf   : > { %s1690_s24 = scalar_lea.vmem %s1958_s0, %s1383_s21  ;;  %257 = vst.msk [vmem:[#allocation3 + $0x18] sm:$0x1] %vm254_vm7, %v1612_v0  ;;  %255 = vst.msk [vmem:[#allocation3 + $0x8] sm:$0x1] %vm254_vm7, %v1612_v0  ;;  %s1384_s14 = sshll.u32 %s1966_s19, 6  ;;  %vm1225_vm13 = vcmask 130048  }
  0x10   : > { %v272_v1 = vld [vmem:[%s1690_s24] sm:$0xf]  ;;  %v273_v2 = vld [vmem:[%s1690_s24 + $0x10] sm:$0xf]  ;;  %v1298_v3 = vld [vmem:[%s1690_s24 + $0x4] sm:$0xf]  ;;  %s224_s17 = scalar_lea.vmem %s1963_s5, %s1384_s14 }
  0x11   : > { %v1299_v4 = vld [vmem:[%s1690_s24 + $0x14] sm:$0xf]  ;;  %v1306_v5 = vld [vmem:[%s1690_s24 + $0x8] sm:$0xf]  ;;  %v1307_v6 = vld [vmem:[%s1690_s24 + $0x18] sm:$0xf]  ;;  %v307_v7 = vmax.bf16 %v1298_v3, %v272_v1 }
  0x12   : > { %v1314_v8 = vld [vmem:[%s1690_s24 + $0xc] sm:$0xf]  ;;  %v1315_v9 = vld [vmem:[%s1690_s24 + $0x1c] sm:$0xf]  ;;  %v308_v10 = vmax.bf16 %v1299_v4, %v273_v2  ;;  %v274_v11 = vld [vmem:[%s1690_s24 + $0x20] sm:$0xf] }
  0x13   : > { %v315_v12 = vmax.bf16 %v1314_v8, %v1306_v5  ;;  %v316_v13 = vmax.bf16 %v1315_v9, %v1307_v6  ;;  %v275_v14 = vld [vmem:[%s1690_s24 + $0x30] sm:$0xf]  ;;  %v1300_v15 = vld [vmem:[%s1690_s24 + $0x24] sm:$0xf]  ;;  %v1301_v16 = vld [vmem:[%s1690_s24 + $0x34] sm:$0xf] }
  0x14   : > { %v1308_v17 = vld [vmem:[%s1690_s24 + $0x28] sm:$0xf]  ;;  %v1309_v18 = vld [vmem:[%s1690_s24 + $0x38] sm:$0xf]  ;;  %v1316_v19 = vld [vmem:[%s1690_s24 + $0x2c] sm:$0xf]  ;;  %v309_v20 = vmax.bf16 %v1300_v15, %v274_v11  ;;  %v310_v21 = vmax.bf16 %v1301_v16, %v275_v14 }
  0x15   : > { %v1707_v22 = vmax.bf16 %v315_v12, %v307_v7  ;;  %v1709_v23 = vmax.bf16 %v316_v13, %v308_v10  ;;  %v1317_v24 = vld [vmem:[%s1690_s24 + $0x3c] sm:$0xf]  ;;  %v317_v25 = vmax.bf16 %v1316_v19, %v1308_v17  ;;  %v276_v26 = vld [vmem:[%s1690_s24 + $0x40] sm:$0xf]  ;;  %v277_v27 = vld [vmem:[%s1690_s24 + $0x50] sm:$0xf] }
  0x16   : > { %v318_v28 = vmax.bf16 %v1317_v24, %v1309_v18  ;;  %v1302_v29 = vld [vmem:[%s1690_s24 + $0x44] sm:$0xf]  ;;  %v1303_v30 = vld [vmem:[%s1690_s24 + $0x54] sm:$0xf]  ;;  %v1310_v31 = vld [vmem:[%s1690_s24 + $0x48] sm:$0xf] }
  0x17   : > { %v331_v32 = vunpack.c.l.bf16 %v1707_v22  ;;  %v332_v33 = vunpack.c.l.bf16 %v1709_v23  ;;  %v1719_v34 = vmax.bf16 %v317_v25, %v309_v20  ;;  %v1311_v35 = vld [vmem:[%s1690_s24 + $0x58] sm:$0xf]  ;;  %v1318_v36 = vld [vmem:[%s1690_s24 + $0x4c] sm:$0xf]  ;;  %v1319_v37 = vld [vmem:[%s1690_s24 + $0x5c] sm:$0xf]  ;;  %v311_v38 = vmax.bf16 %v1302_v29, %v276_v26 }
  0x18   : > { %v1724_v39 = vmax.bf16 %v318_v28, %v310_v21  ;;  %v312_v40 = vmax.bf16 %v1303_v30, %v277_v27  ;;  %v319_v41 = vmax.bf16 %v1318_v36, %v1310_v31  ;;  %v320_v42 = vmax.bf16 %v1319_v37, %v1311_v35  ;;  %v278_v43 = vld [vmem:[%s1690_s24 + $0x60] sm:$0xf]  ;;  %v279_v44 = vld [vmem:[%s1690_s24 + $0x70] sm:$0xf]  ;;  %v1304_v45 = vld [vmem:[%s1690_s24 + $0x64] sm:$0xf] }
  0x19   : > { %v1549_v46 = vpack.i.bf16 %v332_v33, %v331_v32  ;;  %v333_v47 = vunpack.c.l.bf16 %v1719_v34  ;;  %v1305_v48 = vld [vmem:[%s1690_s24 + $0x74] sm:$0xf]  ;;  %v1312_v49 = vld [vmem:[%s1690_s24 + $0x68] sm:$0xf]  ;;  %v1313_v50 = vld [vmem:[%s1690_s24 + $0x78] sm:$0xf]  ;;  %v313_v51 = vmax.bf16 %v1304_v45, %v278_v43 }
  0x1a   : > { %v334_v52 = vunpack.c.l.bf16 %v1724_v39  ;;  %v1738_v53 = vmax.bf16 %v319_v41, %v311_v38  ;;  %v1740_v54 = vmax.bf16 %v320_v42, %v312_v40  ;;  %v1320_v55 = vld [vmem:[%s1690_s24 + $0x6c] sm:$0xf]  ;;  %v1321_v56 = vld [vmem:[%s1690_s24 + $0x7c] sm:$0xf]  ;;  %v314_v57 = vmax.bf16 %v1305_v48, %v279_v44  ;;  %v1761_v5 = vld [vmem:[%s1959_s1] sm:$0xff]   ;;  %250 = vst.msk [vmem:[#allocation3] sm:$0xff] %vm249_vm9, %v1612_v0 }
  0x1b   : > { %1550 = vrot.lane.b32.xlu0 %v1549_v46, %s1613_s27  ;;  %1560 = vrot.lane.b32.xlu1 %v1549_v46, %s1614_s28  ;;  %v321_v59 = vmax.bf16 %v1320_v55, %v1312_v49  ;;  %v322_v60 = vmax.bf16 %v1321_v56, %v1313_v50  ;;  %v477_v4 = vsel %vm475_vm2, %v1590_v61, 0  ;;  %v1592_v40 = vld [vmem:[%s1959_s1 + $0x8] ss:$0 sps:$4 sm:$0xff]   ;;  %v1593_v42 = vld [vmem:[%s1959_s1 + $0x18] sm:$0xff]   ;;  %v423_v48 = vld [vmem:[#allocation2] sm:$0xff]  ;;  %252 = vst.msk [vmem:[#allocation3 + $0x48] sm:$0xff] %vm249_vm9, %v1612_v0 }
  0x1c   : > { %v1554_v62 = vpack.i.bf16 %v334_v52, %v333_v47  ;;  %v335_v63 = vunpack.c.l.bf16 %v1738_v53  ;;  %v336_v1 = vunpack.c.l.bf16 %v1740_v54  ;;  %1427 = vmatpush3.bf16.msra.mxu0 %v477_v4  ;;  %v566_v41 = vsel %vm475_vm2, %v1592_v40, 0  ;;  %v641_v56 = vld [vmem:[#allocation2 + $0x48] sm:$0xff]  ;;  %266 = vst.msk [vmem:[#allocation3 + $0x1f] sm:$0x1] %vm263_vm8, %v1612_v0  ;;  %264 = vst.msk [vmem:[#allocation3 + $0xf] sm:$0x1] %vm263_vm8, %v1612_v0 }
  0x1d   : > { %v329_v2 = vmax.bf16 %v321_v59, %v313_v51  ;;  %v330_v3 = vmax.bf16 %v322_v60, %v314_v57  ;;  %1436 = vmatprep.subr.bf16.mxu0 %v1761_v5  ;;  %256 = vst.msk [vmem:[#allocation3 + $0x10] sm:$0x1] %vm254_vm7, %v1612_v0  ;;  %258 = vst.msk [vmem:[#allocation3 + $0x20] sm:$0x1] %vm254_vm7, %v1612_v0 }
  0x1e   : > { %v1569_v6 = vpack.i.bf16 %v336_v1, %v335_v63  ;;  %259 = vst.msk [vmem:[#allocation3 + $0x28] sm:$0x1] %vm254_vm7, %v1612_v0  ;;  %260 = vst.msk [vmem:[#allocation3 + $0x30] sm:$0x1] %vm254_vm7, %v1612_v0 }
  0x1f   : > { %1555 = vrot.lane.b32.xlu0 %v1554_v62, %s1613_s27  ;;  %1565 = vrot.lane.b32.xlu1 %v1554_v62, %s1614_s28  ;;  %v337_v7 = vunpack.c.l.bf16 %v329_v2  ;;  %v338_v8 = vunpack.c.l.bf16 %v330_v3  ;;  %261 = vst.msk [vmem:[#allocation3 + $0x38] sm:$0x1] %vm254_vm7, %v1612_v0  ;;  %262 = vst.msk [vmem:[#allocation3 + $0x40] sm:$0x1] %vm254_vm7, %v1612_v0  ;;  %v1595_v3 = vld [vmem:[%s1961_s3 + $0x18] sm:$0xff]  }
  0x20   : > { %265 = vst.msk [vmem:[#allocation3 + $0x17] sm:$0x1] %vm263_vm8, %v1612_v0  ;;  %267 = vst.msk [vmem:[#allocation3 + $0x27] sm:$0x1] %vm263_vm8, %v1612_v0  ;;  %1460 = vmatprep.subr.bf16.mxu1 %v1595_v3 }
  0x21   : > { %v1574_v9 = vpack.i.bf16 %v338_v8, %v337_v7  ;;  %268 = vst.msk [vmem:[#allocation3 + $0x2f] sm:$0x1] %vm263_vm8, %v1612_v0  ;;  %269 = vst.msk [vmem:[#allocation3 + $0x37] sm:$0x1] %vm263_vm8, %v1612_v0  ;;  %1461 = vmatpush3.bf16.msra.mxu1 %v1595_v3 }
  0x22   : > { %270 = vst.msk [vmem:[#allocation3 + $0x3f] sm:$0x1] %vm263_vm8, %v1612_v0  ;;  %271 = vst.msk [vmem:[#allocation3 + $0x47] sm:$0x1] %vm263_vm8, %v1612_v0 }
  0x23   : > { %1570 = vrot.lane.b32.xlu0 %v1569_v6, %s1613_s27  ;;  %1575 = vrot.lane.b32.xlu1 %v1574_v9, %s1613_s27 }
  0x27   : > { %1580 = vrot.lane.b32.xlu0 %v1569_v6, %s1614_s28  ;;  %1585 = vrot.lane.b32.xlu1 %v1574_v9, %s1614_s28 }
  0x8d   : > { %v1551_v10 = vpop.permute.xlu0 %1550  ;;  %v1561_v11 = vpop.permute.xlu1 %1560 }
  0x8e   : > { %v1553_v12 = vunpack.i.h.bf16 %v1551_v10  ;;  %v1552_v13 = vunpack.i.l.bf16 %v1551_v10  ;;  %v1563_v14 = vunpack.i.h.bf16 %v1561_v11  ;;  %v1562_v15 = vunpack.i.l.bf16 %v1561_v11 }
  0x90   : > { %373 = vst.msk [vmem:[#allocation2 + $0x10] sm:$0xff] %vm371_vm4, %v1553_v12  ;;  %372 = vst.msk [vmem:[#allocation2 + $0x8] sm:$0xff] %vm371_vm4, %v1552_v13  ;;  %v1597_v12 = vld [vmem:[%s1961_s3 + $0x28] sm:$0xff]  }
  0x91   : > { %382 = vst.msk [vmem:[#allocation2 + $0x11] sm:$0x7f] %vm380_vm5, %v332_v33  ;;  %381 = vst.msk [vmem:[#allocation2 + $0x9] sm:$0x7f] %vm380_vm5, %v331_v32  ;;  %v1556_v16 = vpop.permute.xlu0 %1555  ;;  %v1566_v17 = vpop.permute.xlu1 %1565 }
  0x92   : > { %414 = vst.msk [vmem:[#allocation2 + $0x7] sm:$0xfe] %vm413_vm6, %v1562_v15  ;;  %415 = vst.msk [vmem:[#allocation2 + $0xf] sm:$0xfe] %vm413_vm6, %v1563_v14  ;;  %v1558_v18 = vunpack.i.h.bf16 %v1556_v16  ;;  %v1557_v19 = vunpack.i.l.bf16 %v1556_v16  ;;  %v1568_v20 = vunpack.i.h.bf16 %v1566_v17  ;;  %v1567_v21 = vunpack.i.l.bf16 %v1566_v17 }
  0x94   : > { %375 = vst.msk [vmem:[#allocation2 + $0x20] sm:$0xff] %vm371_vm4, %v1558_v18  ;;  %374 = vst.msk [vmem:[#allocation2 + $0x18] sm:$0xff] %vm371_vm4, %v1557_v19 }
  0x95   : > { %384 = vst.msk [vmem:[#allocation2 + $0x21] sm:$0x7f] %vm380_vm5, %v334_v52  ;;  %383 = vst.msk [vmem:[#allocation2 + $0x19] sm:$0x7f] %vm380_vm5, %v333_v47  ;;  %v1571_v22 = vpop.permute.xlu0 %1570  ;;  %v1576_v23 = vpop.permute.xlu1 %1575  ;;  %v1594_v52 = vld [vmem:[%s1959_s1 + $0x20] ss:$0 sps:$4 sm:$0xff]  }
  0x96   : > { %416 = vst.msk [vmem:[#allocation2 + $0x17] sm:$0xfe] %vm413_vm6, %v1567_v21  ;;  %417 = vst.msk [vmem:[#allocation2 + $0x1f] sm:$0xfe] %vm413_vm6, %v1568_v20  ;;  %v1573_v24 = vunpack.i.h.bf16 %v1571_v22  ;;  %v1572_v25 = vunpack.i.l.bf16 %v1571_v22  ;;  %v1578_v26 = vunpack.i.h.bf16 %v1576_v23  ;;  %v1577_v27 = vunpack.i.l.bf16 %v1576_v23  ;;  %v1598_v20 = vld [vmem:[%s1961_s3] sm:$0xff]  }
  0x97   : > { %v672_v54 = vsel %vm475_vm2, %v1594_v52, 0 }
  0x98   : > { %377 = vst.msk [vmem:[#allocation2 + $0x30] sm:$0xff] %vm371_vm4, %v1573_v24  ;;  %376 = vst.msk [vmem:[#allocation2 + $0x28] sm:$0xff] %vm371_vm4, %v1572_v25 }
  0x99   : > { %379 = vst.msk [vmem:[#allocation2 + $0x40] sm:$0xff] %vm371_vm4, %v1578_v26  ;;  %378 = vst.msk [vmem:[#allocation2 + $0x38] sm:$0xff] %vm371_vm4, %v1577_v27  ;;  %v1581_v28 = vpop.permute.xlu0 %1580  ;;  %v1586_v29 = vpop.permute.xlu1 %1585  ;;  %v438_v30 = vld [vmem:[#allocation2 + $0x8] sm:$0xff]  ;;  %v439_v31 = vld [vmem:[#allocation2 + $0x10] sm:$0xff] }
  0x9a   : > { %386 = vst.msk [vmem:[#allocation2 + $0x31] sm:$0x7f] %vm380_vm5, %v336_v1  ;;  %385 = vst.msk [vmem:[#allocation2 + $0x29] sm:$0x7f] %vm380_vm5, %v335_v63  ;;  %v1583_v32 = vunpack.i.h.bf16 %v1581_v28  ;;  %v1582_v33 = vunpack.i.l.bf16 %v1581_v28  ;;  %v1588_v34 = vunpack.i.h.bf16 %v1586_v29  ;;  %v1587_v35 = vunpack.i.l.bf16 %v1586_v29 }
  0x9b   : > { %388 = vst.msk [vmem:[#allocation2 + $0x41] sm:$0x7f] %vm380_vm5, %v338_v8  ;;  %387 = vst.msk [vmem:[#allocation2 + $0x39] sm:$0x7f] %vm380_vm5, %v337_v7  ;;  %v446_v36 = vpack.c.bf16 %v439_v31, %v438_v30  ;;  %v431_v50 = vpack.c.bf16 %v438_v30, %v423_v48  ;;  %v1596_v7 = vld [vmem:[%s1961_s3 + $0x20] sm:$0xff]  }
  0x9c   : > { %418 = vst.msk [vmem:[#allocation2 + $0x27] sm:$0xfe] %vm413_vm6, %v1582_v33  ;;  %419 = vst.msk [vmem:[#allocation2 + $0x2f] sm:$0xfe] %vm413_vm6, %v1583_v32  ;;  %1462 = vmatprep.subr.bf16.mxu1 %v1596_v7 }
  0x9d   : > { %420 = vst.msk [vmem:[#allocation2 + $0x37] sm:$0xfe] %vm413_vm6, %v1587_v35  ;;  %421 = vst.msk [vmem:[#allocation2 + $0x3f] sm:$0xfe] %vm413_vm6, %v1588_v34  ;;  %1428 = vmatprep.mubr.msk.bf16.mxu0 %vm226_vm3, %v446_v36  ;;  %v440_v37 = vld [vmem:[#allocation2 + $0x18] sm:$0xff]  ;;  %v441_v38 = vld [vmem:[#allocation2 + $0x20] sm:$0xff]  ;;  %1463 = vmatpush3.bf16.msra.mxu1 %v1596_v7 }
  0x9e   : > { %v447_v39 = vpack.c.bf16 %v441_v38, %v440_v37  ;;  %v432_v51 = vpack.c.bf16 %v440_v37, %v439_v31  ;;  %1464 = vmatprep.subr.bf16.mxu1 %v1597_v12 }
  0xa0   : > { %1429 = vmatmul.mubr.msk.bf16.vlgmr.msra.gmra.mrb[0].mxu0 %vm226_vm3, %v447_v39 }
  0xa1   : > { %1437 = vmatpush3.bf16.msra.mxu0 %v1761_v5  ;;  %1465 = vmatpush3.bf16.msra.mxu1 %v1597_v12 }
  0xa2   : > { %1535 = vmatprep.subr.msk.bf16.mxu0 %vm475_vm2, %v1592_v40  ;;  %1474 = vmatprep.subr.bf16.mxu1 %v1598_v20 }
  0xa3   : > { %v442_v43 = vld [vmem:[#allocation2 + $0x28] sm:$0xff]  ;;  %v443_v44 = vld [vmem:[#allocation2 + $0x30] sm:$0xff] }
  0xa4   : > { %v444_v45 = vld [vmem:[#allocation2 + $0x38] sm:$0xff]  ;;  %v448_v46 = vpack.c.bf16 %v443_v44, %v442_v43  ;;  %v445_v47 = vld [vmem:[#allocation2 + $0x40] sm:$0xff]  ;;  %v433_v53 = vpack.c.bf16 %v442_v43, %v441_v38 }
  0xa5   : > { %v449_v49 = vpack.c.bf16 %v445_v47, %v444_v45  ;;  %1439 = vmatpush3.bf16.msra.mxu0 %v566_v41  ;;  %v434_v55 = vpack.c.bf16 %v444_v45, %v443_v44  ;;  %v645_v57 = vpack.c.bf16 %v641_v56, %v445_v47  ;;  %v1600_v45 = vld [vmem:[%s1961_s3 + $0x10] sm:$0xff]  }
  0xa6   : > { %1432 = vmatprep.mubr.msk.bf16.mxu0 %vm226_vm3, %v448_v46  ;;  %1448 = vmatprep.subr.bf16.mxu0 %v1593_v42  ;;  %v1601_v47 = vld [vmem:[%s1961_s3 + $0x30] sm:$0xff]  }
  0xa8   : > { %1433 = vmatmul.mubr.msk.bf16.gmra.mrb[4].mxu0 %vm226_vm3, %v449_v49 }
  0xa9   : > { %1440 = vmatprep.mubr.msk.bf16.mxu0 %vm226_vm3, %v431_v50 }
  0xb0   : > { %1441 = vmatmul.mubr.msk.bf16.vlgmr.msra.gmra.mrb[0].mxu0 %vm226_vm3, %v432_v51 }
  0xb1   : > { %1449 = vmatpush3.bf16.msra.mxu0 %v1593_v42  ;;  %1444 = vmatprep.mubr.msk.bf16.mxu0 %vm226_vm3, %v433_v53  ;;  %v1599_v42 = vld [vmem:[%s1961_s3 + $0x8] sm:$0xff]  }
  0xb2   : > { %1536 = vmatprep.subr.msk.bf16.mxu0 %vm475_vm2, %v1594_v52 }
  0xb5   : > { %1451 = vmatpush3.bf16.msra.mxu0 %v672_v54 }
  0xb8   : > { %1445 = vmatmul.mubr.msk.bf16.gmra.mrb[4].mxu0 %vm226_vm3, %v434_v55 }
  0xb9   : > { %1452 = vmatprep.mubr.msk.bf16.mxu0 %vm226_vm3, %v432_v51  ;;  %v853_v51 = vld [vmem:[#allocation3] sm:$0xff] }
  0xc0   : > { %1453 = vmatmul.mubr.msk.bf16.vlgmr.msra.gmra.mrb[0].mxu0 %vm226_vm3, %v433_v53 }
  0xc1   : > { %1456 = vmatprep.mubr.msk.bf16.mxu0 %vm226_vm3, %v434_v55 }
  0xc8   : > { %1457 = vmatmul.mubr.msk.bf16.gmra.mrb[4].mxu0 %vm226_vm3, %v645_v57  ;;  %v1602_v57 = vld [vmem:[%s1961_s3 + $0x38] sm:$0xff]  }
 0x193   : > { %v1454_v59 = vpop.f32.mrb[0].mxu0 }
 0x194   : > { %v755_v60 = vadd.f32 %v1454_v59, %v1346_v58  ;;  %v708_v61 = vpop.f32.mrb[1].mxu0  ;;  %v1603_v59 = vld [vmem:[%s1961_s3 + $0x40] sm:$0xff]  }
 0x195   : > { %v1455_v62 = vpop.f32.mrb[2].mxu0  ;;  %v753_v5 = vadd.f32 %v1346_v58, %v708_v61  ;;  %v1088_v61 = vld [vmem:[#allocation3 + $0x48] sm:$0xff] }
 0x196   : > { %v763_v63 = vmax.f32 %v755_v60, 0.0  ;;  %v756_v1 = vadd.f32 %v1455_v62, %v1346_v58  ;;  %v711_v2 = vpop.f32.mrb[3].mxu0 }
 0x197   : > { %v754_v8 = vadd.f32 %v1346_v58, %v711_v2  ;;  %v761_v11 = vmax.f32 %v753_v5, 0.0 }
 0x198   : > { %v764_v4 = vmax.f32 %v756_v1, 0.0  ;;  %781 = vrot.lane.b32.xlu0 %v763_v63, %s1614_s28 }
 0x199   : > { %v762_v13 = vmax.f32 %v754_v8, 0.0 }
 0x19a   : > { %783 = vrot.lane.b32.xlu1 %v764_v4, %s1614_s28 }
 0x19b   : > { %v1458_v6 = vpop.f32.mrb[4].mxu0 }
 0x19c   : > { %823 = vrot.lane.b32.xlu0 %v763_v63, %s1615_s22  ;;  %v724_v9 = vpop.f32.mrb[5].mxu0  ;;  %v759_v14 = vadd.f32 %v1458_v6, %v1346_v58 }
 0x19d   : > { %v1459_v10 = vpop.f32.mrb[6].mxu0  ;;  %v757_v17 = vadd.f32 %v1346_v58, %v724_v9 }
 0x19e   : > { %825 = vrot.lane.b32.xlu1 %v764_v4, %s1615_s22  ;;  %v727_v0 = vpop.f32.mrb[7].mxu0  ;;  %v760_v15 = vadd.f32 %v1459_v10, %v1346_v58  ;;  %v767_v16 = vmax.f32 %v759_v14, 0.0 }
 0x19f   : > { %v758_v19 = vadd.f32 %v1346_v58, %v727_v0  ;;  %v765_v21 = vmax.f32 %v757_v17, 0.0 }
 0x1a0   : > { %777 = vrot.lane.b32.xlu0 %v761_v11, %s1614_s28  ;;  %v768_v18 = vmax.f32 %v760_v15, 0.0 }
 0x1a1   : > { %v766_v22 = vmax.f32 %v758_v19, 0.0 }
 0x1a2   : > { %779 = vrot.lane.b32.xlu1 %v762_v13, %s1614_s28 }
 0x1a4   : > { %819 = vrot.lane.b32.xlu0 %v761_v11, %s1615_s22 }
 0x1a6   : > { %821 = vrot.lane.b32.xlu1 %v762_v13, %s1615_s22 }
 0x1a8   : > { %789 = vrot.lane.b32.xlu0 %v767_v16, %s1614_s28 }
 0x1aa   : > { %791 = vrot.lane.b32.xlu1 %v768_v18, %s1614_s28 }
 0x1ac   : > { %785 = vrot.lane.b32.xlu0 %v765_v21, %s1614_s28 }
 0x1ae   : > { %787 = vrot.lane.b32.xlu1 %v766_v22, %s1614_s28 }
 0x1b0   : > { %827 = vrot.lane.b32.xlu0 %v765_v21, %s1615_s22 }
 0x1b2   : > { %829 = vrot.lane.b32.xlu1 %v766_v22, %s1615_s22 }
 0x1b4   : > { %831 = vrot.lane.b32.xlu0 %v767_v16, %s1615_s22 }
 0x1b6   : > { %833 = vrot.lane.b32.xlu1 %v768_v18, %s1615_s22 }
 0x20a   : > { %v782_v23 = vpop.permute.xlu0 %781 }
 0x20b   : > { %804 = vst.msk [vmem:[#allocation3 + $0x18] sm:$0xff] %vm801_vm10, %v782_v23 }
 0x20c   : > { %813 = vst.msk [vmem:[#allocation3 + $0x19] sm:$0x7f] %vm810_vm11, %v763_v63  ;;  %v784_v24 = vpop.permute.xlu1 %783  ;;  %v1380_v63 = vld [vmem:[%s1962_s4] ss:$0 sm:$0xff] }
 0x20d   : > { %805 = vst.msk [vmem:[#allocation3 + $0x20] sm:$0xff] %vm801_vm10, %v784_v24 }
 0x20e   : > { %814 = vst.msk [vmem:[#allocation3 + $0x21] sm:$0x7f] %vm810_vm11, %v764_v4  ;;  %v824_v25 = vpop.permute.xlu0 %823 }
 0x20f   : > { %846 = vst.msk [vmem:[#allocation3 + $0x17] sm:$0xfe] %vm843_vm12, %v824_v25 }
 0x210   : > { %v826_v26 = vpop.permute.xlu1 %825 }
 0x211   : > { %847 = vst.msk [vmem:[#allocation3 + $0x1f] sm:$0xfe] %vm843_vm12, %v826_v26 }
 0x212   : > { %v778_v27 = vpop.permute.xlu0 %777 }
 0x213   : > { %802 = vst.msk [vmem:[#allocation3 + $0x8] sm:$0xff] %vm801_vm10, %v778_v27 }
 0x214   : > { %811 = vst.msk [vmem:[#allocation3 + $0x9] sm:$0x7f] %vm810_vm11, %v761_v11  ;;  %v780_v28 = vpop.permute.xlu1 %779 }
 0x215   : > { %803 = vst.msk [vmem:[#allocation3 + $0x10] sm:$0xff] %vm801_vm10, %v780_v28 }
 0x216   : > { %812 = vst.msk [vmem:[#allocation3 + $0x11] sm:$0x7f] %vm810_vm11, %v762_v13  ;;  %v820_v29 = vpop.permute.xlu0 %819  ;;  %v873_v39 = vld [vmem:[#allocation3 + $0x18] sm:$0xff] }
 0x217   : > { %844 = vst.msk [vmem:[#allocation3 + $0x7] sm:$0xfe] %vm843_vm12, %v820_v29 }
 0x218   : > { %v822_v30 = vpop.permute.xlu1 %821  ;;  %v874_v34 = vld [vmem:[#allocation3 + $0x20] sm:$0xff] }
 0x219   : > { %845 = vst.msk [vmem:[#allocation3 + $0xf] sm:$0xfe] %vm843_vm12, %v822_v30  ;;  %v880_v41 = vpack.c.bf16 %v874_v34, %v873_v39 }
 0x21a   : > { %v790_v31 = vpop.permute.xlu0 %789 }
 0x21b   : > { %808 = vst.msk [vmem:[#allocation3 + $0x38] sm:$0xff] %vm801_vm10, %v790_v31 }
 0x21c   : > { %817 = vst.msk [vmem:[#allocation3 + $0x39] sm:$0x7f] %vm810_vm11, %v767_v16  ;;  %v792_v32 = vpop.permute.xlu1 %791 }
 0x21d   : > { %809 = vst.msk [vmem:[#allocation3 + $0x40] sm:$0xff] %vm801_vm10, %v792_v32 }
 0x21e   : > { %818 = vst.msk [vmem:[#allocation3 + $0x41] sm:$0x7f] %vm810_vm11, %v768_v18  ;;  %v786_v33 = vpop.permute.xlu0 %785  ;;  %v871_v36 = vld [vmem:[#allocation3 + $0x8] sm:$0xff] }
 0x21f   : > { %806 = vst.msk [vmem:[#allocation3 + $0x28] sm:$0xff] %vm801_vm10, %v786_v33  ;;  %v861_v55 = vpack.c.bf16 %v871_v36, %v853_v51 }
 0x220   : > { %815 = vst.msk [vmem:[#allocation3 + $0x29] sm:$0x7f] %vm810_vm11, %v765_v21  ;;  %v788_v35 = vpop.permute.xlu1 %787  ;;  %v872_v37 = vld [vmem:[#allocation3 + $0x10] sm:$0xff] }
 0x221   : > { %807 = vst.msk [vmem:[#allocation3 + $0x30] sm:$0xff] %vm801_vm10, %v788_v35  ;;  %v879_v38 = vpack.c.bf16 %v872_v37, %v871_v36  ;;  %v862_v56 = vpack.c.bf16 %v873_v39, %v872_v37 }
 0x222   : > { %816 = vst.msk [vmem:[#allocation3 + $0x31] sm:$0x7f] %vm810_vm11, %v766_v22  ;;  %v828_v40 = vpop.permute.xlu0 %827 }
 0x223   : > { %848 = vst.msk [vmem:[#allocation3 + $0x27] sm:$0xfe] %vm843_vm12, %v828_v40  ;;  %1466 = vmatprep.mubr.msk.bf16.mxu1 %vm249_vm9, %v879_v38 }
 0x224   : > { %1467 = vmatmul.mubr.msk.bf16.vlgmr.msra.gmra.mrb[0].mxu1 %vm249_vm9, %v880_v41  ;;  %v830_v43 = vpop.permute.xlu1 %829 }
 0x225   : > { %849 = vst.msk [vmem:[#allocation3 + $0x2f] sm:$0xfe] %vm843_vm12, %v830_v43  ;;  %1475 = vmatpush3.bf16.msra.mxu1 %v1598_v20 }
 0x226   : > { %v832_v44 = vpop.permute.xlu0 %831  ;;  %1476 = vmatprep.subr.bf16.mxu1 %v1599_v42 }
 0x227   : > { %850 = vst.msk [vmem:[#allocation3 + $0x37] sm:$0xfe] %vm843_vm12, %v832_v44 }
 0x228   : > { %v834_v46 = vpop.permute.xlu1 %833 }
 0x229   : > { %851 = vst.msk [vmem:[#allocation3 + $0x3f] sm:$0xfe] %vm843_vm12, %v834_v46  ;;  %1477 = vmatpush3.bf16.msra.mxu1 %v1599_v42 }
 0x22a   : > { %1478 = vmatprep.subr.bf16.mxu1 %v1600_v45  ;;  %v875_v48 = vld [vmem:[#allocation3 + $0x28] sm:$0xff] }
 0x22b   : > { %v863_v58 = vpack.c.bf16 %v875_v48, %v874_v34 }
 0x22c   : > { %v876_v49 = vld [vmem:[#allocation3 + $0x30] sm:$0xff] }
 0x22d   : > { %v881_v50 = vpack.c.bf16 %v876_v49, %v875_v48  ;;  %1479 = vmatpush3.bf16.msra.mxu1 %v1600_v45 }
 0x22e   : > { %1488 = vmatprep.subr.bf16.mxu1 %v1601_v47  ;;  %v877_v52 = vld [vmem:[#allocation3 + $0x38] sm:$0xff] }
 0x22f   : > { %1470 = vmatprep.mubr.msk.bf16.mxu1 %vm249_vm9, %v881_v50  ;;  %v864_v60 = vpack.c.bf16 %v877_v52, %v876_v49 }
 0x230   : > { %v878_v53 = vld [vmem:[#allocation3 + $0x40] sm:$0xff] }
 0x231   : > { %v882_v54 = vpack.c.bf16 %v878_v53, %v877_v52  ;;  %v1092_v62 = vpack.c.bf16 %v1088_v61, %v878_v53 }
 0x233   : > { %1471 = vmatmul.mubr.msk.bf16.gmra.mrb[4].mxu1 %vm249_vm9, %v882_v54 }
 0x234   : > { %1480 = vmatprep.mubr.msk.bf16.mxu1 %vm249_vm9, %v861_v55 }
 0x23b   : > { %1481 = vmatmul.mubr.msk.bf16.vlgmr.msra.gmra.mrb[0].mxu1 %vm249_vm9, %v862_v56 }
 0x23c   : > { %1489 = vmatpush3.bf16.msra.mxu1 %v1601_v47  ;;  %1484 = vmatprep.mubr.msk.bf16.mxu1 %vm249_vm9, %v863_v58 }
 0x23d   : > { %1490 = vmatprep.subr.bf16.mxu1 %v1602_v57 }
 0x240   : > { %1491 = vmatpush3.bf16.msra.mxu1 %v1602_v57 }
 0x241   : > { %1492 = vmatprep.subr.bf16.mxu1 %v1603_v59 }
 0x243   : > { %1485 = vmatmul.mubr.msk.bf16.gmra.mrb[4].mxu1 %vm249_vm9, %v864_v60 }
 0x244   : > { %1494 = vmatprep.mubr.msk.bf16.mxu1 %vm249_vm9, %v862_v56  ;;  %1493 = vmatpush3.bf16.msra.mxu1 %v1603_v59 }
 0x24b   : > { %1495 = vmatmul.mubr.msk.bf16.vlgmr.msra.gmra.mrb[0].mxu1 %vm249_vm9, %v863_v58 }
 0x24c   : > { %1498 = vmatprep.mubr.msk.bf16.mxu1 %vm249_vm9, %v864_v60 }
 0x253   : > { %1499 = vmatmul.mubr.msk.bf16.gmra.mrb[4].mxu1 %vm249_vm9, %v1092_v62 }
 0x31e   : > { %v1496_v1 = vpop.f32.mrb[0].mxu1 }
 0x31f   : > { %v1211_v2 = vadd.f32 %v1496_v1, %v1380_v63  ;;  %v1164_v3 = vpop.f32.mrb[1].mxu1 }
 0x320   : > { %v1209_v4 = vadd.f32 %v1380_v63, %v1164_v3  ;;  %v1497_v5 = vpop.f32.mrb[2].mxu1 }
 0x321   : > { %v1219_v6 = vmax.f32 %v1211_v2, 0.0  ;;  %v1212_v7 = vadd.f32 %v1497_v5, %v1380_v63  ;;  %v1167_v8 = vpop.f32.mrb[3].mxu1 }
 0x322   : > { %v1217_v9 = vmax.f32 %v1209_v4, 0.0  ;;  %v1210_v10 = vadd.f32 %v1380_v63, %v1167_v8 }
 0x323   : > { %1228 = vst.msk [vmem:[%s224_s17 + $0x10] sm:$0xff] %vm1225_vm13, %v1219_v6  ;;  %v1220_v11 = vmax.f32 %v1212_v7, 0.0 }
 0x324   : > { %1226 = vst.msk [vmem:[%s224_s17] sm:$0xff] %vm1225_vm13, %v1217_v9  ;;  %v1218_v0 = vmax.f32 %v1210_v10, 0.0 }
 0x325   : > { %1229 = vst.msk [vmem:[%s224_s17 + $0x18] sm:$0xff] %vm1225_vm13, %v1220_v11 }
 0x326   : > { %1227 = vst.msk [vmem:[%s224_s17 + $0x8] sm:$0xff] %vm1225_vm13, %v1218_v0  ;;  %v1500_v12 = vpop.f32.mrb[4].mxu1 }
 0x327   : > { %v1215_v13 = vadd.f32 %v1500_v12, %v1380_v63  ;;  %v1180_v14 = vpop.f32.mrb[5].mxu1 }
 0x328   : > { %v1213_v15 = vadd.f32 %v1380_v63, %v1180_v14  ;;  %v1501_v16 = vpop.f32.mrb[6].mxu1 }
 0x329   : > { %v1223_v17 = vmax.f32 %v1215_v13, 0.0  ;;  %v1216_v18 = vadd.f32 %v1501_v16, %v1380_v63  ;;  %v1183_v19 = vpop.f32.mrb[7].mxu1 }
 0x32a   : > { %v1221_v20 = vmax.f32 %v1213_v15, 0.0  ;;  %v1214_v21 = vadd.f32 %v1380_v63, %v1183_v19 }
 0x32b   : > { %1232 = vst.msk [vmem:[%s224_s17 + $0x30] sm:$0xff] %vm1225_vm13, %v1223_v17  ;;  %v1224_v22 = vmax.f32 %v1216_v18, 0.0 }
 0x32c   : > { %1230 = vst.msk [vmem:[%s224_s17 + $0x20] sm:$0xff] %vm1225_vm13, %v1221_v20  ;;  %v1222_v23 = vmax.f32 %v1214_v21, 0.0 }
 0x32d   : > { %1233 = vst.msk [vmem:[%s224_s17 + $0x38] sm:$0xff] %vm1225_vm13, %v1224_v22 }
 0x32e   : > { %1231 = vst.msk [vmem:[%s224_s17 + $0x28] sm:$0xff] %vm1225_vm13, %v1222_v23 }
 0x32f PF: > { %s15_s18 = sadd.s32 1, %s1610_s18  }
 0x330   : > { %p12_p4 = scmp.ge.s32.totalorder %s15_s18, 4  }
 0x332   :  { %14 = sbr.rel (!%p12_p4) target bundleno = 1 (0x1), region = 83 }

// kernel: unet_forward.8
= control target key start
LH: loop header
LB: loop body
LE: loop exit
PB: predicated region body
PF: predicated region fallthrough
CT: control target
= control target key end

     0   :  { %s3821_s18 = smov 0   ;;  %s5066_s0 = inlined_call_operand.vmem [shape: bf16[2,16,16,4], index: 0, kind: input, shape index: {}]   ;;  %s5067_s1 = inlined_call_operand.vmem [shape: bf16[3,12,8], index: 1, kind: input, shape index: {}]   ;;  %s5068_s2 = inlined_call_operand.vmem [shape: f32[1,8], index: 2, kind: input, shape index: {}]   ;;  %s5069_s3 = inlined_call_operand.vmem [shape: bf16[3,24,8], index: 3, kind: input, shape index: {}]   ;;  %s5070_s4 = inlined_call_operand.vmem [shape: f32[1,8], index: 4, kind: input, shape index: {}]   ;;  %s5071_s5 = inlined_call_operand.vmem [shape: f32[2,256,8], index: 5, kind: output, shape index: {}]  }
   0x1 LB: > { %s2940_s19 = sadd.s32 4294967295, %s3785_s18   ;;  %p2944_p0 = scmp.ge.s32.totalorder %s3785_s18, 1  ;;  %s3785_s18 = sphi %s3821_s18, %s15_s18  }
   0x2   : > { %p187_p1 = scmp.lt.s32.totalorder %s3785_s18, 3 }
   0x4   : > { %p188_p2 = pnand %p2944_p0, %p187_p1 }
   0x5   : > { %p3831_p3 = scmp.lt.s32.totalorder (!%p188_p2), %s2940_s19, 1  ;;  %vm233_vm0 = vcmask (!%p188_p2), 24576   ;;  %vm250_vm1 = vcmask (!%p188_p2), 90176   ;;  %v3787_v0 = vmov (!%p188_p2), 0.0   ;;  %s3788_s25 = smov (!%p188_p2), 4   ;;  %vm852_vm2 = vcmask (!%p188_p2), 1045504  }
   0x6   : > { %191 = sbr.rel (%p188_p2) target bundleno = 1100 (0x44c), region = 40  ;;  %234 = vst.msk [vmem:[#allocation2 + $0x10] sm:$0x1] (!%p188_p2), %vm233_vm0, %v3787_v0  ;;  %235 = vst.msk [vmem:[#allocation2 + $0x20] sm:$0x1] (!%p188_p2), %vm233_vm0, %v3787_v0  ;;  %s3789_s26 = smov (!%p188_p2), 8  }
   0x7   : > { %251 = vst.msk [vmem:[#allocation2 + $0x1f] sm:$0x1] (!%p188_p2), %vm250_vm1, %v3787_v0  ;;  %252 = vst.msk [vmem:[#allocation2 + $0x2f] sm:$0x1] (!%p188_p2), %vm250_vm1, %v3787_v0  ;;  %v3770_v23 = vld [vmem:[%s5067_s1 + $0x8] sm:$0x3f] (!%p188_p2)  }
   0x8   : > { %236 = vst.msk [vmem:[#allocation2 + $0x30] sm:$0x1] (!%p188_p2), %vm233_vm0, %v3787_v0  ;;  %237 = vst.msk [vmem:[#allocation2 + $0x40] sm:$0x1] (!%p188_p2), %vm233_vm0, %v3787_v0  ;;  %v3969_v24 = vld [vmem:[%s5067_s1] sm:$0x3f] (!%p188_p2)   ;;  %3592 = vmatprep.subr.msk.bf16.mxu0 (!%p188_p2), %vm852_vm2, %v3770_v23 }
   0x9   : > { %238 = vst.msk [vmem:[#allocation2 + $0x50] sm:$0x1] (!%p188_p2), %vm233_vm0, %v3787_v0  ;;  %239 = vst.msk [vmem:[#allocation2 + $0x60] sm:$0x1] (!%p188_p2), %vm233_vm0, %v3787_v0  ;;  %vm226_vm3 = vcmask (!%p188_p2), 97280   ;;  %v854_v29 = vsel (!%p188_p2), %vm852_vm2, %v3770_v23, 0 }
   0xa   : > { %240 = vst.msk [vmem:[#allocation2 + $0x70] sm:$0x1] (!%p188_p2), %vm233_vm0, %v3787_v0  ;;  %241 = vst.msk [vmem:[#allocation2 + $0x80] sm:$0x1] (!%p188_p2), %vm233_vm0, %v3787_v0  ;;  %3255 = vmatpush3.bf16.msra.mxu0 (!%p188_p2), %v854_v29  ;;  %vm500_vm4 = vcmask (!%p188_p2), 64544   ;;  %vm533_vm5 = vcmask (!%p188_p2), 31744  }
   0xb   : > { %242 = vst.msk [vmem:[#allocation2 + $0x90] sm:$0x1] (!%p188_p2), %vm233_vm0, %v3787_v0  ;;  %243 = vst.msk [vmem:[#allocation2 + $0xa0] sm:$0x1] (!%p188_p2), %vm233_vm0, %v3787_v0  ;;  %3593 = vmatprep.subr.msk.bf16.mxu0 (!%p188_p2), %vm852_vm2, %v3969_v24  ;;  %vm535_vm6 = vcmask (!%p188_p2), 30720   ;;  %vm663_vm7 = vcmask (!%p188_p2), 97345  }
   0xc   : > { %244 = vst.msk [vmem:[#allocation2 + $0xb0] sm:$0x1] (!%p188_p2), %vm233_vm0, %v3787_v0  ;;  %245 = vst.msk [vmem:[#allocation2 + $0xc0] sm:$0x1] (!%p188_p2), %vm233_vm0, %v3787_v0  ;;  %vm665_vm8 = vcmask (!%p188_p2), 97344   ;;  %vm274_vm9 = vcmask (!%p188_p2), 57344  }
   0xd   : > { %246 = vst.msk [vmem:[#allocation2 + $0xd0] sm:$0x1] %vm233_vm0, %v3787_v0  ;;  %247 = vst.msk [vmem:[#allocation2 + $0xe0] sm:$0x1] %vm233_vm0, %v3787_v0  ;;  %s5074_s19 = smov (!%p3831_p3, %s2940_s19), 1  ;;  %vm291_vm10 = vcmask 188544  }
   0xe   : > { %248 = vst.msk [vmem:[#allocation2 + $0xf0] sm:$0x1] %vm233_vm0, %v3787_v0  ;;  %249 = vst.msk [vmem:[#allocation2 + $0x100] sm:$0x1] %vm233_vm0, %v3787_v0  ;;  %s3068_s21 = sshll.u32 %s5074_s19, 7  ;;  %s3790_s12 = smov 16  }
   0xf   : > { %253 = vst.msk [vmem:[#allocation2 + $0x3f] sm:$0x1] %vm250_vm1, %v3787_v0  ;;  %254 = vst.msk [vmem:[#allocation2 + $0x4f] sm:$0x1] %vm250_vm1, %v3787_v0  ;;  %s3909_s24 = scalar_lea.vmem %s5066_s0, %s3068_s21  ;;  %vm2091_vm11 = vcmask 1043456   ;;  %vm267_vm12 = vcmask 195584  }
  0x10   : > { %255 = vst.msk [vmem:[#allocation2 + $0x5f] sm:$0x1] %vm250_vm1, %v3787_v0  ;;  %256 = vst.msk [vmem:[#allocation2 + $0x6f] sm:$0x1] %vm250_vm1, %v3787_v0  ;;  %v3912_v1 = vld [vmem:[%s3909_s24] sm:$0xff]   ;;  %v3915_v2 = vld [vmem:[%s3909_s24 + $0x8] sm:$0xff]  }
  0x11   : > { %257 = vst.msk [vmem:[#allocation2 + $0x7f] sm:$0x1] %vm250_vm1, %v3787_v0  ;;  %258 = vst.msk [vmem:[#allocation2 + $0x8f] sm:$0x1] %vm250_vm1, %v3787_v0  ;;  %v3072_v3 = vunpack.c.l.bf16 %v3912_v1  ;;  %v3073_v4 = vunpack.c.h.bf16 %v3912_v1  ;;  %v3076_v5 = vunpack.c.l.bf16 %v3915_v2  ;;  %v3077_v6 = vunpack.c.h.bf16 %v3915_v2  ;;  %v3922_v7 = vld [vmem:[%s3909_s24 + $0x10] sm:$0xff]   ;;  %v3925_v8 = vld [vmem:[%s3909_s24 + $0x18] sm:$0xff]  }
  0x12   : > { %259 = vst.msk [vmem:[#allocation2 + $0x9f] sm:$0x1] %vm250_vm1, %v3787_v0  ;;  %260 = vst.msk [vmem:[#allocation2 + $0xaf] sm:$0x1] %vm250_vm1, %v3787_v0  ;;  %v3080_v10 = vunpack.c.l.bf16 %v3922_v7  ;;  %v3081_v11 = vunpack.c.h.bf16 %v3922_v7  ;;  %v3084_v13 = vunpack.c.l.bf16 %v3925_v8  ;;  %v3085_v14 = vunpack.c.h.bf16 %v3925_v8  ;;  %v3952_v17 = vld [vmem:[%s3909_s24 + $0x20] sm:$0xff]   ;;  %v3955_v18 = vld [vmem:[%s3909_s24 + $0x28] sm:$0xff]  }
  0x13   : > { %261 = vst.msk [vmem:[#allocation2 + $0xbf] sm:$0x1] %vm250_vm1, %v3787_v0  ;;  %262 = vst.msk [vmem:[#allocation2 + $0xcf] sm:$0x1] %vm250_vm1, %v3787_v0  ;;  %v3610_v9 = vpack.i.bf16 %v3073_v4, %v3072_v3  ;;  %v3615_v12 = vpack.i.bf16 %v3077_v6, %v3076_v5  ;;  %v3088_v19 = vunpack.c.l.bf16 %v3952_v17  ;;  %v3089_v20 = vunpack.c.h.bf16 %v3952_v17  ;;  %v3982_v27 = vld [vmem:[%s3909_s24 + $0x30] sm:$0xff]   ;;  %v3985_v28 = vld [vmem:[%s3909_s24 + $0x38] sm:$0xff]  }
  0x14   : > { %263 = vst.msk [vmem:[#allocation2 + $0xdf] sm:$0x1] %vm250_vm1, %v3787_v0  ;;  %264 = vst.msk [vmem:[#allocation2 + $0xef] sm:$0x1] %vm250_vm1, %v3787_v0  ;;  %v3630_v15 = vpack.i.bf16 %v3081_v11, %v3080_v10  ;;  %v3635_v16 = vpack.i.bf16 %v3085_v14, %v3084_v13  ;;  %v3092_v21 = vunpack.c.l.bf16 %v3955_v18  ;;  %v3093_v22 = vunpack.c.h.bf16 %v3955_v18  ;;  %v4016_v36 = vld [vmem:[%s3909_s24 + $0x40] sm:$0xff]   ;;  %v4019_v37 = vld [vmem:[%s3909_s24 + $0x48] sm:$0xff]  }
  0x15   : > { %265 = vst.msk [vmem:[#allocation2 + $0xff] sm:$0x1] %vm250_vm1, %v3787_v0  ;;  %266 = vst.msk [vmem:[#allocation2 + $0x10f] sm:$0x1] %vm250_vm1, %v3787_v0  ;;  %3611 = vrot.lane.b32.xlu0 %v3610_v9, %s3788_s25  ;;  %3621 = vrot.lane.b32.xlu1 %v3610_v9, %s3789_s26  ;;  %v3650_v25 = vpack.i.bf16 %v3089_v20, %v3088_v19  ;;  %v3096_v30 = vunpack.c.l.bf16 %v3982_v27  ;;  %v3097_v31 = vunpack.c.h.bf16 %v3982_v27  ;;  %v3100_v32 = vunpack.c.l.bf16 %v3985_v28  ;;  %v4038_v44 = vld [vmem:[%s3909_s24 + $0x50] sm:$0xff]   ;;  %v4041_v45 = vld [vmem:[%s3909_s24 + $0x58] sm:$0xff]  }
  0x16   : > { %v3655_v26 = vpack.i.bf16 %v3093_v22, %v3092_v21  ;;  %227 = vst.msk [vmem:[#allocation2] sm:$0xff] %vm226_vm3, %v3787_v0  ;;  %228 = vst.msk [vmem:[#allocation2 + $0x8] sm:$0xff] %vm226_vm3, %v3787_v0  ;;  %v3101_v33 = vunpack.c.h.bf16 %v3985_v28  ;;  %v3104_v38 = vunpack.c.l.bf16 %v4016_v36  ;;  %v3105_v39 = vunpack.c.h.bf16 %v4016_v36  ;;  %v4060_v52 = vld [vmem:[%s3909_s24 + $0x60] sm:$0xff]   ;;  %v4063_v53 = vld [vmem:[%s3909_s24 + $0x68] sm:$0xff]   ;;  %s3069_s27 = sshll.u32 %s5074_s19, 8 }
  0x17   : > { %230 = vst.msk [vmem:[#allocation2 + $0x110] sm:$0xff] %vm226_vm3, %v3787_v0  ;;  %231 = vst.msk [vmem:[#allocation2 + $0x118] sm:$0xff] %vm226_vm3, %v3787_v0  ;;  %v3670_v34 = vpack.i.bf16 %v3097_v31, %v3096_v30  ;;  %v3108_v40 = vunpack.c.l.bf16 %v4019_v37  ;;  %v3109_v41 = vunpack.c.h.bf16 %v4019_v37  ;;  %v3112_v46 = vunpack.c.l.bf16 %v4038_v44  ;;  %v4082_v60 = vld [vmem:[%s3909_s24 + $0x70] sm:$0xff]   ;;  %v4085_v61 = vld [vmem:[%s3909_s24 + $0x78] sm:$0xff]   ;;  %s4966_s30 = scalar_lea.vmem %s5071_s5, %s3069_s27 }
  0x18   : > { %v3675_v35 = vpack.i.bf16 %v3101_v33, %v3100_v32  ;;  %v3690_v42 = vpack.i.bf16 %v3105_v39, %v3104_v38  ;;  %v3113_v47 = vunpack.c.h.bf16 %v4038_v44  ;;  %v3116_v48 = vunpack.c.l.bf16 %v4041_v45  ;;  %276 = vst.msk [vmem:[#allocation3 + $0x20] sm:$0x1] %vm274_vm9, %v3787_v0  ;;  %275 = vst.msk [vmem:[#allocation3 + $0x10] sm:$0x1] %vm274_vm9, %v3787_v0 }
  0x19   : > { %3616 = vrot.lane.b32.xlu0 %v3615_v12, %s3788_s25  ;;  %3626 = vrot.lane.b32.xlu1 %v3615_v12, %s3789_s26  ;;  %v3695_v43 = vpack.i.bf16 %v3109_v41, %v3108_v40  ;;  %v3117_v49 = vunpack.c.h.bf16 %v4041_v45  ;;  %v3120_v54 = vunpack.c.l.bf16 %v4060_v52  ;;  %v3121_v55 = vunpack.c.h.bf16 %v4060_v52  ;;  %277 = vst.msk [vmem:[#allocation3 + $0x30] sm:$0x1] %vm274_vm9, %v3787_v0  ;;  %278 = vst.msk [vmem:[#allocation3 + $0x40] sm:$0x1] %vm274_vm9, %v3787_v0 }
  0x1a   : > { %v3710_v50 = vpack.i.bf16 %v3113_v47, %v3112_v46  ;;  %v3124_v56 = vunpack.c.l.bf16 %v4063_v53  ;;  %v3125_v57 = vunpack.c.h.bf16 %v4063_v53  ;;  %v3128_v62 = vunpack.c.l.bf16 %v4082_v60  ;;  %279 = vst.msk [vmem:[#allocation3 + $0x50] sm:$0x1] %vm274_vm9, %v3787_v0  ;;  %280 = vst.msk [vmem:[#allocation3 + $0x60] sm:$0x1] %vm274_vm9, %v3787_v0 }
  0x1b   : > { %v3715_v51 = vpack.i.bf16 %v3117_v49, %v3116_v48  ;;  %v3730_v58 = vpack.i.bf16 %v3121_v55, %v3120_v54  ;;  %v3129_v63 = vunpack.c.h.bf16 %v4082_v60  ;;  %v3132_v9 = vunpack.c.l.bf16 %v4085_v61  ;;  %281 = vst.msk [vmem:[#allocation3 + $0x70] sm:$0x1] %vm274_vm9, %v3787_v0  ;;  %282 = vst.msk [vmem:[#allocation3 + $0x80] sm:$0x1] %vm274_vm9, %v3787_v0 }
  0x1c   : > { %v3735_v59 = vpack.i.bf16 %v3125_v57, %v3124_v56  ;;  %v3133_v12 = vunpack.c.h.bf16 %v4085_v61  ;;  %283 = vst.msk [vmem:[#allocation3 + $0x90] sm:$0x1] %vm274_vm9, %v3787_v0  ;;  %284 = vst.msk [vmem:[#allocation3 + $0xa0] sm:$0x1] %vm274_vm9, %v3787_v0  ;;  %vm1733_vm13 = vcmask 130112   ;;  %vm1766_vm14 = vcmask 64512  }
  0x1d   : > { %3631 = vrot.lane.b32.xlu0 %v3630_v15, %s3788_s25  ;;  %3636 = vrot.lane.b32.xlu1 %v3635_v16, %s3788_s25  ;;  %285 = vst.msk [vmem:[#allocation3 + $0xb0] sm:$0x1] %vm274_vm9, %v3787_v0  ;;  %286 = vst.msk [vmem:[#allocation3 + $0xc0] sm:$0x1] %vm274_vm9, %v3787_v0  ;;  %vm1768_vm15 = vcmask 63488   ;;  %vm1896_vm0 = vcmask 195713  }
  0x1e   : > { %287 = vst.msk [vmem:[#allocation3 + $0xd0] sm:$0x1] %vm274_vm9, %v3787_v0  ;;  %288 = vst.msk [vmem:[#allocation3 + $0xe0] sm:$0x1] %vm274_vm9, %v3787_v0  ;;  %vm1898_vm1 = vcmask 195712  }
  0x1f   : > { %289 = vst.msk [vmem:[#allocation3 + $0xf0] sm:$0x1] %vm274_vm9, %v3787_v0  ;;  %290 = vst.msk [vmem:[#allocation3 + $0x100] sm:$0x1] %vm274_vm9, %v3787_v0 }
  0x20   : > { %293 = vst.msk [vmem:[#allocation3 + $0x2f] sm:$0x1] %vm291_vm10, %v3787_v0  ;;  %292 = vst.msk [vmem:[#allocation3 + $0x1f] sm:$0x1] %vm291_vm10, %v3787_v0 }
  0x21   : > { %3641 = vrot.lane.b32.xlu0 %v3630_v15, %s3789_s26  ;;  %3646 = vrot.lane.b32.xlu1 %v3635_v16, %s3789_s26  ;;  %v3750_v15 = vpack.i.bf16 %v3129_v63, %v3128_v62  ;;  %v3755_v16 = vpack.i.bf16 %v3133_v12, %v3132_v9  ;;  %294 = vst.msk [vmem:[#allocation3 + $0x3f] sm:$0x1] %vm291_vm10, %v3787_v0  ;;  %295 = vst.msk [vmem:[#allocation3 + $0x4f] sm:$0x1] %vm291_vm10, %v3787_v0 }
  0x22   : > { %296 = vst.msk [vmem:[#allocation3 + $0x5f] sm:$0x1] %vm291_vm10, %v3787_v0  ;;  %297 = vst.msk [vmem:[#allocation3 + $0x6f] sm:$0x1] %vm291_vm10, %v3787_v0 }
  0x23   : > { %298 = vst.msk [vmem:[#allocation3 + $0x7f] sm:$0x1] %vm291_vm10, %v3787_v0  ;;  %299 = vst.msk [vmem:[#allocation3 + $0x8f] sm:$0x1] %vm291_vm10, %v3787_v0 }
  0x24   : > { %300 = vst.msk [vmem:[#allocation3 + $0x9f] sm:$0x1] %vm291_vm10, %v3787_v0  ;;  %301 = vst.msk [vmem:[#allocation3 + $0xaf] sm:$0x1] %vm291_vm10, %v3787_v0 }
  0x25   : > { %3651 = vrot.lane.b32.xlu0 %v3650_v25, %s3788_s25  ;;  %3656 = vrot.lane.b32.xlu1 %v3655_v26, %s3788_s25  ;;  %302 = vst.msk [vmem:[#allocation3 + $0xbf] sm:$0x1] %vm291_vm10, %v3787_v0  ;;  %303 = vst.msk [vmem:[#allocation3 + $0xcf] sm:$0x1] %vm291_vm10, %v3787_v0 }
  0x26   : > { %304 = vst.msk [vmem:[#allocation3 + $0xdf] sm:$0x1] %vm291_vm10, %v3787_v0  ;;  %305 = vst.msk [vmem:[#allocation3 + $0xef] sm:$0x1] %vm291_vm10, %v3787_v0 }
  0x27   : > { %306 = vst.msk [vmem:[#allocation3 + $0xff] sm:$0x1] %vm291_vm10, %v3787_v0  ;;  %307 = vst.msk [vmem:[#allocation3 + $0x10f] sm:$0x1] %vm291_vm10, %v3787_v0 }
  0x28   : > { %268 = vst.msk [vmem:[#allocation3] sm:$0xff] %vm267_vm12, %v3787_v0  ;;  %269 = vst.msk [vmem:[#allocation3 + $0x8] sm:$0xff] %vm267_vm12, %v3787_v0 }
  0x29   : > { %3661 = vrot.lane.b32.xlu0 %v3650_v25, %s3789_s26  ;;  %3666 = vrot.lane.b32.xlu1 %v3655_v26, %s3789_s26  ;;  %271 = vst.msk [vmem:[#allocation3 + $0x110] sm:$0xff] %vm267_vm12, %v3787_v0  ;;  %272 = vst.msk [vmem:[#allocation3 + $0x118] sm:$0xff] %vm267_vm12, %v3787_v0 }
  0x2d   : > { %3671 = vrot.lane.b32.xlu0 %v3670_v34, %s3788_s25  ;;  %3676 = vrot.lane.b32.xlu1 %v3675_v35, %s3788_s25 }
  0x31   : > { %3681 = vrot.lane.b32.xlu0 %v3670_v34, %s3789_s26  ;;  %3686 = vrot.lane.b32.xlu1 %v3675_v35, %s3789_s26 }
  0x35   : > { %3691 = vrot.lane.b32.xlu0 %v3690_v42, %s3788_s25  ;;  %3696 = vrot.lane.b32.xlu1 %v3695_v43, %s3788_s25 }
  0x39   : > { %3701 = vrot.lane.b32.xlu0 %v3690_v42, %s3789_s26  ;;  %3706 = vrot.lane.b32.xlu1 %v3695_v43, %s3789_s26 }
  0x3d   : > { %3711 = vrot.lane.b32.xlu0 %v3710_v50, %s3788_s25  ;;  %3716 = vrot.lane.b32.xlu1 %v3715_v51, %s3788_s25 }
  0x41   : > { %3721 = vrot.lane.b32.xlu0 %v3710_v50, %s3789_s26  ;;  %3726 = vrot.lane.b32.xlu1 %v3715_v51, %s3789_s26 }
  0x45   : > { %3731 = vrot.lane.b32.xlu0 %v3730_v58, %s3788_s25  ;;  %3736 = vrot.lane.b32.xlu1 %v3735_v59, %s3788_s25 }
  0x49   : > { %3741 = vrot.lane.b32.xlu0 %v3730_v58, %s3789_s26  ;;  %3746 = vrot.lane.b32.xlu1 %v3735_v59, %s3789_s26 }
  0x4d   : > { %3751 = vrot.lane.b32.xlu0 %v3750_v15, %s3788_s25  ;;  %3756 = vrot.lane.b32.xlu1 %v3755_v16, %s3788_s25 }
  0x51   : > { %3761 = vrot.lane.b32.xlu0 %v3750_v15, %s3789_s26  ;;  %3766 = vrot.lane.b32.xlu1 %v3755_v16, %s3789_s26 }
  0x87   : > { %v3612_v23 = vpop.permute.xlu0 %3611  ;;  %v3622_v25 = vpop.permute.xlu1 %3621 }
  0x88   : > { %v3614_v26 = vunpack.i.h.bf16 %v3612_v23  ;;  %v3613_v29 = vunpack.i.l.bf16 %v3612_v23  ;;  %v3624_v34 = vunpack.i.h.bf16 %v3622_v25  ;;  %v3623_v35 = vunpack.i.l.bf16 %v3622_v25 }
  0x8a   : > { %502 = vst.msk [vmem:[#allocation2 + $0x18] sm:$0xff] %vm500_vm4, %v3614_v26  ;;  %501 = vst.msk [vmem:[#allocation2 + $0x10] sm:$0xff] %vm500_vm4, %v3613_v29 }
  0x8b   : > { %536 = vst.msk [vmem:[#allocation2 + $0x19] sm:$0x7f] %vm535_vm6, %v3073_v4  ;;  %v3617_v42 = vpop.permute.xlu0 %3616  ;;  %v3627_v43 = vpop.permute.xlu1 %3626 }
  0x8c   : > { %534 = vst.msk [vmem:[#allocation2 + $0x11] sm:$0xff] %vm533_vm5, %v3072_v3  ;;  %v3619_v50 = vunpack.i.h.bf16 %v3617_v42  ;;  %v3618_v51 = vunpack.i.l.bf16 %v3617_v42  ;;  %v3629_v58 = vunpack.i.h.bf16 %v3627_v43  ;;  %v3628_v59 = vunpack.i.l.bf16 %v3627_v43 }
  0x8d   : > { %664 = vst.msk [vmem:[#allocation2 + $0xf] sm:$0xfe] %vm663_vm7, %v3623_v35 }
  0x8e   : > { %666 = vst.msk [vmem:[#allocation2 + $0x17] sm:$0xff] %vm665_vm8, %v3624_v34 }
  0x8f   : > { %504 = vst.msk [vmem:[#allocation2 + $0x28] sm:$0xff] %vm500_vm4, %v3619_v50  ;;  %503 = vst.msk [vmem:[#allocation2 + $0x20] sm:$0xff] %vm500_vm4, %v3618_v51  ;;  %v3632_v1 = vpop.permute.xlu0 %3631  ;;  %v3637_v3 = vpop.permute.xlu1 %3636 }
  0x90   : > { %538 = vst.msk [vmem:[#allocation2 + $0x29] sm:$0x7f] %vm535_vm6, %v3077_v6  ;;  %v3634_v4 = vunpack.i.h.bf16 %v3632_v1  ;;  %v3633_v15 = vunpack.i.l.bf16 %v3632_v1  ;;  %v3639_v16 = vunpack.i.h.bf16 %v3637_v3  ;;  %v3638_v23 = vunpack.i.l.bf16 %v3637_v3 }
  0x91   : > { %537 = vst.msk [vmem:[#allocation2 + $0x21] sm:$0xff] %vm533_vm5, %v3076_v5 }
  0x92   : > { %667 = vst.msk [vmem:[#allocation2 + $0x1f] sm:$0xfe] %vm663_vm7, %v3628_v59  ;;  %v4158_v59 = vld [vmem:[%s5067_s1 + $0x10] sm:$0x3f]  }
  0x93   : > { %668 = vst.msk [vmem:[#allocation2 + $0x27] sm:$0xff] %vm665_vm8, %v3629_v58  ;;  %v3642_v2 = vpop.permute.xlu0 %3641  ;;  %v3647_v5 = vpop.permute.xlu1 %3646  ;;  %v1071_v58 = vsel %vm852_vm2, %v3969_v24, 0 }
  0x94   : > { %506 = vst.msk [vmem:[#allocation2 + $0x38] sm:$0xff] %vm500_vm4, %v3634_v4  ;;  %505 = vst.msk [vmem:[#allocation2 + $0x30] sm:$0xff] %vm500_vm4, %v3633_v15  ;;  %v3644_v26 = vunpack.i.h.bf16 %v3642_v2  ;;  %v3643_v29 = vunpack.i.l.bf16 %v3642_v2  ;;  %v3649_v34 = vunpack.i.h.bf16 %v3647_v5 }
  0x95   : > { %508 = vst.msk [vmem:[#allocation2 + $0x48] sm:$0xff] %vm500_vm4, %v3639_v16  ;;  %507 = vst.msk [vmem:[#allocation2 + $0x40] sm:$0xff] %vm500_vm4, %v3638_v23  ;;  %v748_v6 = vld [vmem:[#allocation2 + $0x10] sm:$0xff]  ;;  %v749_v25 = vld [vmem:[#allocation2 + $0x18] sm:$0xff] }
  0x96   : > { %540 = vst.msk [vmem:[#allocation2 + $0x39] sm:$0x7f] %vm535_vm6, %v3081_v11  ;;  %542 = vst.msk [vmem:[#allocation2 + $0x49] sm:$0x7f] %vm535_vm6, %v3085_v14  ;;  %v3648_v11 = vunpack.i.l.bf16 %v3647_v5  ;;  %v4143_v35 = vpack.c.bf16 %v749_v25, %v748_v6 }
  0x97   : > { %539 = vst.msk [vmem:[#allocation2 + $0x31] sm:$0xff] %vm533_vm5, %v3080_v10  ;;  %541 = vst.msk [vmem:[#allocation2 + $0x41] sm:$0xff] %vm533_vm5, %v3084_v13  ;;  %v3652_v7 = vpop.permute.xlu0 %3651  ;;  %v3657_v8 = vpop.permute.xlu1 %3656 }
  0x98   : > { %669 = vst.msk [vmem:[#allocation2 + $0x2f] sm:$0xfe] %vm663_vm7, %v3643_v29  ;;  %671 = vst.msk [vmem:[#allocation2 + $0x3f] sm:$0xfe] %vm663_vm7, %v3648_v11  ;;  %3256 = vmatprep.mubr.msk.bf16.mxu0 %vm226_vm3, %v4143_v35  ;;  %v3654_v14 = vunpack.i.h.bf16 %v3652_v7  ;;  %v3653_v42 = vunpack.i.l.bf16 %v3652_v7  ;;  %v3659_v43 = vunpack.i.h.bf16 %v3657_v8  ;;  %v3658_v50 = vunpack.i.l.bf16 %v3657_v8 }
  0x99   : > { %670 = vst.msk [vmem:[#allocation2 + $0x37] sm:$0xff] %vm665_vm8, %v3644_v26  ;;  %672 = vst.msk [vmem:[#allocation2 + $0x47] sm:$0xff] %vm665_vm8, %v3649_v34 }
  0x9a   : > { %v750_v10 = vld [vmem:[#allocation2 + $0x20] sm:$0xff]  ;;  %v751_v13 = vld [vmem:[#allocation2 + $0x28] sm:$0xff]  ;;  %510 = vst.msk [vmem:[#allocation2 + $0x58] sm:$0xff] %vm500_vm4, %v3654_v14  ;;  %509 = vst.msk [vmem:[#allocation2 + $0x50] sm:$0xff] %vm500_vm4, %v3653_v42 }
  0x9b   : > { %v4151_v51 = vpack.c.bf16 %v751_v13, %v750_v10  ;;  %512 = vst.msk [vmem:[#allocation2 + $0x68] sm:$0xff] %vm500_vm4, %v3659_v43  ;;  %511 = vst.msk [vmem:[#allocation2 + $0x60] sm:$0xff] %vm500_vm4, %v3658_v50  ;;  %v3662_v24 = vpop.permute.xlu0 %3661  ;;  %v3667_v1 = vpop.permute.xlu1 %3666 }
  0x9c   : > { %544 = vst.msk [vmem:[#allocation2 + $0x59] sm:$0x7f] %vm535_vm6, %v3089_v20  ;;  %546 = vst.msk [vmem:[#allocation2 + $0x69] sm:$0x7f] %vm535_vm6, %v3093_v22  ;;  %v3664_v3 = vunpack.i.h.bf16 %v3662_v24  ;;  %v3663_v20 = vunpack.i.l.bf16 %v3662_v24  ;;  %v3669_v4 = vunpack.i.h.bf16 %v3667_v1  ;;  %v3668_v17 = vunpack.i.l.bf16 %v3667_v1 }
  0x9d   : > { %543 = vst.msk [vmem:[#allocation2 + $0x51] sm:$0xff] %vm533_vm5, %v3088_v19  ;;  %545 = vst.msk [vmem:[#allocation2 + $0x61] sm:$0xff] %vm533_vm5, %v3092_v21  ;;  %3257 = vmatmul.mubr.msk.bf16.vlgmr.msra.gmra.mrb[0].mxu0 %vm226_vm3, %v4151_v51 }
  0x9e   : > { %3289 = vmatpush3.bf16.msra.mxu0 %v1071_v58  ;;  %673 = vst.msk [vmem:[#allocation2 + $0x4f] sm:$0xfe] %vm663_vm7, %v3663_v20  ;;  %675 = vst.msk [vmem:[#allocation2 + $0x5f] sm:$0xfe] %vm663_vm7, %v3668_v17 }
  0x9f   : > { %3594 = vmatprep.subr.msk.bf16.mxu0 %vm852_vm2, %v4158_v59  ;;  %674 = vst.msk [vmem:[#allocation2 + $0x57] sm:$0xff] %vm665_vm8, %v3664_v3  ;;  %676 = vst.msk [vmem:[#allocation2 + $0x67] sm:$0xff] %vm665_vm8, %v3669_v4  ;;  %v3672_v22 = vpop.permute.xlu0 %3671  ;;  %v3677_v23 = vpop.permute.xlu1 %3676 }
  0xa0   : > { %v752_v15 = vld [vmem:[#allocation2 + $0x30] sm:$0xff]  ;;  %v753_v19 = vld [vmem:[#allocation2 + $0x38] sm:$0xff]  ;;  %v754_v16 = vld [vmem:[#allocation2 + $0x40] sm:$0xff]  ;;  %v3674_v5 = vunpack.i.h.bf16 %v3672_v22  ;;  %v3673_v6 = vunpack.i.l.bf16 %v3672_v22  ;;  %v3679_v25 = vunpack.i.h.bf16 %v3677_v23  ;;  %v3678_v26 = vunpack.i.l.bf16 %v3677_v23 }
  0xa1   : > { %v4184_v18 = vpack.c.bf16 %v753_v19, %v752_v15  ;;  %v755_v21 = vld [vmem:[#allocation2 + $0x48] sm:$0xff] }
  0xa2   : > { %v4186_v2 = vpack.c.bf16 %v755_v21, %v754_v16  ;;  %514 = vst.msk [vmem:[#allocation2 + $0x78] sm:$0xff] %vm500_vm4, %v3674_v5  ;;  %513 = vst.msk [vmem:[#allocation2 + $0x70] sm:$0xff] %vm500_vm4, %v3673_v6 }
  0xa3   : > { %3260 = vmatprep.mubr.msk.bf16.mxu0 %vm226_vm3, %v4184_v18  ;;  %516 = vst.msk [vmem:[#allocation2 + $0x88] sm:$0xff] %vm500_vm4, %v3679_v25  ;;  %515 = vst.msk [vmem:[#allocation2 + $0x80] sm:$0xff] %vm500_vm4, %v3678_v26  ;;  %v3682_v29 = vpop.permute.xlu0 %3681  ;;  %v3687_v34 = vpop.permute.xlu1 %3686 }
  0xa4   : > { %548 = vst.msk [vmem:[#allocation2 + $0x79] sm:$0x7f] %vm535_vm6, %v3097_v31  ;;  %550 = vst.msk [vmem:[#allocation2 + $0x89] sm:$0x7f] %vm535_vm6, %v3101_v33  ;;  %v3684_v11 = vunpack.i.h.bf16 %v3682_v29  ;;  %v3683_v7 = vunpack.i.l.bf16 %v3682_v29  ;;  %v3689_v31 = vunpack.i.h.bf16 %v3687_v34  ;;  %v3688_v8 = vunpack.i.l.bf16 %v3687_v34 }
  0xa5   : > { %547 = vst.msk [vmem:[#allocation2 + $0x71] sm:$0xff] %vm533_vm5, %v3096_v30  ;;  %549 = vst.msk [vmem:[#allocation2 + $0x81] sm:$0xff] %vm533_vm5, %v3100_v32  ;;  %3261 = vmatmul.mubr.msk.bf16.gmra.mrb[4].mxu0 %vm226_vm3, %v4186_v2 }
  0xa6   : > { %v756_v27 = vld [vmem:[#allocation2 + $0x50] sm:$0xff]  ;;  %v757_v10 = vld [vmem:[#allocation2 + $0x58] sm:$0xff]  ;;  %v758_v30 = vld [vmem:[#allocation2 + $0x60] sm:$0xff]  ;;  %677 = vst.msk [vmem:[#allocation2 + $0x6f] sm:$0xfe] %vm663_vm7, %v3683_v7 }
  0xa7   : > { %678 = vst.msk [vmem:[#allocation2 + $0x77] sm:$0xff] %vm665_vm8, %v3684_v11  ;;  %680 = vst.msk [vmem:[#allocation2 + $0x87] sm:$0xff] %vm665_vm8, %v3689_v31  ;;  %v4212_v28 = vpack.c.bf16 %v757_v10, %v756_v27  ;;  %v759_v32 = vld [vmem:[#allocation2 + $0x68] sm:$0xff]  ;;  %v3692_v33 = vpop.permute.xlu0 %3691  ;;  %v3697_v13 = vpop.permute.xlu1 %3696 }
  0xa8   : > { %679 = vst.msk [vmem:[#allocation2 + $0x7f] sm:$0xfe] %vm663_vm7, %v3688_v8  ;;  %v4214_v14 = vpack.c.bf16 %v759_v32, %v758_v30  ;;  %v3694_v42 = vunpack.i.h.bf16 %v3692_v33  ;;  %v3693_v43 = vunpack.i.l.bf16 %v3692_v33  ;;  %v3699_v50 = vunpack.i.h.bf16 %v3697_v13 }
  0xa9   : > { %v3698_v58 = vunpack.i.l.bf16 %v3697_v13  ;;  %3264 = vmatprep.mubr.msk.bf16.mxu0 %vm226_vm3, %v4212_v28 }
  0xaa   : > { %518 = vst.msk [vmem:[#allocation2 + $0x98] sm:$0xff] %vm500_vm4, %v3694_v42  ;;  %517 = vst.msk [vmem:[#allocation2 + $0x90] sm:$0xff] %vm500_vm4, %v3693_v43 }
  0xab   : > { %520 = vst.msk [vmem:[#allocation2 + $0xa8] sm:$0xff] %vm500_vm4, %v3699_v50  ;;  %519 = vst.msk [vmem:[#allocation2 + $0xa0] sm:$0xff] %vm500_vm4, %v3698_v58  ;;  %v3702_v24 = vpop.permute.xlu0 %3701  ;;  %v3707_v1 = vpop.permute.xlu1 %3706 }
  0xac   : > { %552 = vst.msk [vmem:[#allocation2 + $0x99] sm:$0x7f] %vm535_vm6, %v3105_v39  ;;  %554 = vst.msk [vmem:[#allocation2 + $0xa9] sm:$0x7f] %vm535_vm6, %v3109_v41  ;;  %v3704_v3 = vunpack.i.h.bf16 %v3702_v24  ;;  %v3703_v20 = vunpack.i.l.bf16 %v3702_v24  ;;  %v3709_v39 = vunpack.i.h.bf16 %v3707_v1  ;;  %v3708_v4 = vunpack.i.l.bf16 %v3707_v1 }
  0xad   : > { %551 = vst.msk [vmem:[#allocation2 + $0x91] sm:$0xff] %vm533_vm5, %v3104_v38  ;;  %553 = vst.msk [vmem:[#allocation2 + $0xa1] sm:$0xff] %vm533_vm5, %v3108_v40  ;;  %3265 = vmatmul.mubr.msk.bf16.gmra.mrb[8].mxu0 %vm226_vm3, %v4214_v14 }
  0xae   : > { %v760_v36 = vld [vmem:[#allocation2 + $0x70] sm:$0xff]  ;;  %v761_v17 = vld [vmem:[#allocation2 + $0x78] sm:$0xff]  ;;  %681 = vst.msk [vmem:[#allocation2 + $0x8f] sm:$0xfe] %vm663_vm7, %v3703_v20  ;;  %683 = vst.msk [vmem:[#allocation2 + $0x9f] sm:$0xfe] %vm663_vm7, %v3708_v4 }
  0xaf   : > { %v762_v38 = vld [vmem:[#allocation2 + $0x80] sm:$0xff]  ;;  %682 = vst.msk [vmem:[#allocation2 + $0x97] sm:$0xff] %vm665_vm8, %v3704_v3  ;;  %684 = vst.msk [vmem:[#allocation2 + $0xa7] sm:$0xff] %vm665_vm8, %v3709_v39  ;;  %v4240_v37 = vpack.c.bf16 %v761_v17, %v760_v36  ;;  %v763_v40 = vld [vmem:[#allocation2 + $0x88] sm:$0xff]  ;;  %v3712_v41 = vpop.permute.xlu0 %3711  ;;  %v3717_v15 = vpop.permute.xlu1 %3716 }
  0xb0   : > { %v4242_v19 = vpack.c.bf16 %v763_v40, %v762_v38  ;;  %v3714_v16 = vunpack.i.h.bf16 %v3712_v41  ;;  %v3713_v21 = vunpack.i.l.bf16 %v3712_v41  ;;  %v3719_v22 = vunpack.i.h.bf16 %v3717_v15  ;;  %v698_v41 = vld [vmem:[#allocation2] sm:$0xff] }
  0xb1   : > { %v3718_v23 = vunpack.i.l.bf16 %v3717_v15  ;;  %3268 = vmatprep.mubr.msk.bf16.mxu0 %vm226_vm3, %v4240_v37  ;;  %v699_v15 = vld [vmem:[#allocation2 + $0x8] sm:$0xff] }
  0xb2   : > { %522 = vst.msk [vmem:[#allocation2 + $0xb8] sm:$0xff] %vm500_vm4, %v3714_v16  ;;  %521 = vst.msk [vmem:[#allocation2 + $0xb0] sm:$0xff] %vm500_vm4, %v3713_v21 }
  0xb3   : > { %524 = vst.msk [vmem:[#allocation2 + $0xc8] sm:$0xff] %vm500_vm4, %v3719_v22  ;;  %523 = vst.msk [vmem:[#allocation2 + $0xc0] sm:$0xff] %vm500_vm4, %v3718_v23  ;;  %v3722_v5 = vpop.permute.xlu0 %3721  ;;  %v3727_v6 = vpop.permute.xlu1 %3726 }
  0xb4   : > { %556 = vst.msk [vmem:[#allocation2 + $0xb9] sm:$0x7f] %vm535_vm6, %v3113_v47  ;;  %558 = vst.msk [vmem:[#allocation2 + $0xc9] sm:$0x7f] %vm535_vm6, %v3117_v49  ;;  %v3724_v25 = vunpack.i.h.bf16 %v3722_v5  ;;  %v3723_v26 = vunpack.i.l.bf16 %v3722_v5  ;;  %v3729_v47 = vunpack.i.h.bf16 %v3727_v6  ;;  %v3728_v29 = vunpack.i.l.bf16 %v3727_v6 }
  0xb5   : > { %555 = vst.msk [vmem:[#allocation2 + $0xb1] sm:$0xff] %vm533_vm5, %v3112_v46  ;;  %557 = vst.msk [vmem:[#allocation2 + $0xc1] sm:$0xff] %vm533_vm5, %v3116_v48  ;;  %3269 = vmatmul.mubr.msk.bf16.gmra.mrb[12].mxu0 %vm226_vm3, %v4242_v19 }
  0xb6   : > { %v764_v44 = vld [vmem:[#allocation2 + $0x90] sm:$0xff]  ;;  %v765_v34 = vld [vmem:[#allocation2 + $0x98] sm:$0xff]  ;;  %v766_v46 = vld [vmem:[#allocation2 + $0xa0] sm:$0xff]  ;;  %685 = vst.msk [vmem:[#allocation2 + $0xaf] sm:$0xfe] %vm663_vm7, %v3723_v26  ;;  %v1340_v26 = vsel %vm852_vm2, %v4158_v59, 0 }
  0xb7   : > { %686 = vst.msk [vmem:[#allocation2 + $0xb7] sm:$0xff] %vm665_vm8, %v3724_v25  ;;  %688 = vst.msk [vmem:[#allocation2 + $0xc7] sm:$0xff] %vm665_vm8, %v3729_v47  ;;  %v4268_v45 = vpack.c.bf16 %v765_v34, %v764_v44  ;;  %v767_v48 = vld [vmem:[#allocation2 + $0xa8] sm:$0xff]  ;;  %v3732_v49 = vpop.permute.xlu0 %3731  ;;  %v3737_v11 = vpop.permute.xlu1 %3736  ;;  %v730_v25 = vpack.c.bf16 %v699_v15, %v698_v41 }
  0xb8   : > { %687 = vst.msk [vmem:[#allocation2 + $0xbf] sm:$0xfe] %vm663_vm7, %v3728_v29  ;;  %v4270_v7 = vpack.c.bf16 %v767_v48, %v766_v46  ;;  %v3734_v31 = vunpack.i.h.bf16 %v3732_v49  ;;  %v3733_v8 = vunpack.i.l.bf16 %v3732_v49  ;;  %v3739_v27 = vunpack.i.h.bf16 %v3737_v11  ;;  %v3773_v46 = vld [vmem:[%s5069_s3 + $0xc] sm:$0xff]  }
  0xb9   : > { %v3738_v10 = vunpack.i.l.bf16 %v3737_v11  ;;  %3272 = vmatprep.mubr.msk.bf16.mxu0 %vm226_vm3, %v4268_v45  ;;  %3356 = vmatprep.subr.bf16.mxu1 %v3773_v46 }
  0xba   : > { %526 = vst.msk [vmem:[#allocation2 + $0xd8] sm:$0xff] %vm500_vm4, %v3734_v31  ;;  %525 = vst.msk [vmem:[#allocation2 + $0xd0] sm:$0xff] %vm500_vm4, %v3733_v8  ;;  %3357 = vmatpush3.bf16.msra.mxu1 %v3773_v46  ;;  %v3774_v8 = vld [vmem:[%s5069_s3 + $0x14] ss:$0 sps:$4 sm:$0xff]  }
  0xbb   : > { %528 = vst.msk [vmem:[#allocation2 + $0xe8] sm:$0xff] %vm500_vm4, %v3739_v27  ;;  %527 = vst.msk [vmem:[#allocation2 + $0xe0] sm:$0xff] %vm500_vm4, %v3738_v10  ;;  %v3742_v30 = vpop.permute.xlu0 %3741  ;;  %v3747_v32 = vpop.permute.xlu1 %3746  ;;  %3595 = vmatprep.subr.msk.bf16.mxu1 %vm2091_vm11, %v3774_v8  ;;  %v2093_v10 = vsel %vm2091_vm11, %v3774_v8, 0 }
  0xbc   : > { %560 = vst.msk [vmem:[#allocation2 + $0xd9] sm:$0x7f] %vm535_vm6, %v3121_v55  ;;  %562 = vst.msk [vmem:[#allocation2 + $0xe9] sm:$0x7f] %vm535_vm6, %v3125_v57  ;;  %v3744_v33 = vunpack.i.h.bf16 %v3742_v30  ;;  %v3743_v13 = vunpack.i.l.bf16 %v3742_v30  ;;  %v3749_v55 = vunpack.i.h.bf16 %v3747_v32  ;;  %v3748_v42 = vunpack.i.l.bf16 %v3747_v32 }
  0xbd   : > { %559 = vst.msk [vmem:[#allocation2 + $0xd1] sm:$0xff] %vm533_vm5, %v3120_v54  ;;  %561 = vst.msk [vmem:[#allocation2 + $0xe1] sm:$0xff] %vm533_vm5, %v3124_v56  ;;  %3273 = vmatmul.mubr.msk.bf16.gmra.mrb[16].mxu0 %vm226_vm3, %v4270_v7 }
  0xbe   : > { %v768_v52 = vld [vmem:[#allocation2 + $0xb0] sm:$0xff]  ;;  %v769_v43 = vld [vmem:[#allocation2 + $0xb8] sm:$0xff]  ;;  %689 = vst.msk [vmem:[#allocation2 + $0xcf] sm:$0xfe] %vm663_vm7, %v3743_v13  ;;  %691 = vst.msk [vmem:[#allocation2 + $0xdf] sm:$0xfe] %vm663_vm7, %v3748_v42  ;;  %3359 = vmatpush3.bf16.msra.mxu1 %v2093_v10 }
  0xbf   : > { %v770_v54 = vld [vmem:[#allocation2 + $0xc0] sm:$0xff]  ;;  %690 = vst.msk [vmem:[#allocation2 + $0xd7] sm:$0xff] %vm665_vm8, %v3744_v33  ;;  %692 = vst.msk [vmem:[#allocation2 + $0xe7] sm:$0xff] %vm665_vm8, %v3749_v55  ;;  %v4296_v53 = vpack.c.bf16 %v769_v43, %v768_v52  ;;  %v771_v56 = vld [vmem:[#allocation2 + $0xc8] sm:$0xff]  ;;  %v3752_v57 = vpop.permute.xlu0 %3751  ;;  %v3757_v50 = vpop.permute.xlu1 %3756 }
  0xc0   : > { %v4298_v58 = vpack.c.bf16 %v771_v56, %v770_v54  ;;  %v3754_v24 = vunpack.i.h.bf16 %v3752_v57  ;;  %v3753_v1 = vunpack.i.l.bf16 %v3752_v57  ;;  %v3759_v3 = vunpack.i.h.bf16 %v3757_v50 }
  0xc1   : > { %v3758_v20 = vunpack.i.l.bf16 %v3757_v50  ;;  %3276 = vmatprep.mubr.msk.bf16.mxu0 %vm226_vm3, %v4296_v53 }
  0xc2   : > { %530 = vst.msk [vmem:[#allocation2 + $0xf8] sm:$0xff] %vm500_vm4, %v3754_v24  ;;  %529 = vst.msk [vmem:[#allocation2 + $0xf0] sm:$0xff] %vm500_vm4, %v3753_v1 }
  0xc3   : > { %532 = vst.msk [vmem:[#allocation2 + $0x108] sm:$0xff] %vm500_vm4, %v3759_v3  ;;  %531 = vst.msk [vmem:[#allocation2 + $0x100] sm:$0xff] %vm500_vm4, %v3758_v20  ;;  %v3762_v39 = vpop.permute.xlu0 %3761  ;;  %v3767_v4 = vpop.permute.xlu1 %3766 }
  0xc4   : > { %564 = vst.msk [vmem:[#allocation2 + $0xf9] sm:$0x7f] %vm535_vm6, %v3129_v63  ;;  %566 = vst.msk [vmem:[#allocation2 + $0x109] sm:$0x7f] %vm535_vm6, %v3133_v12  ;;  %v3764_v36 = vunpack.i.h.bf16 %v3762_v39  ;;  %v3763_v17 = vunpack.i.l.bf16 %v3762_v39  ;;  %v3769_v63 = vunpack.i.h.bf16 %v3767_v4  ;;  %v3768_v38 = vunpack.i.l.bf16 %v3767_v4 }
  0xc5   : > { %563 = vst.msk [vmem:[#allocation2 + $0xf1] sm:$0xff] %vm533_vm5, %v3128_v62  ;;  %565 = vst.msk [vmem:[#allocation2 + $0x101] sm:$0xff] %vm533_vm5, %v3132_v9  ;;  %3277 = vmatmul.mubr.msk.bf16.gmra.mrb[20].mxu0 %vm226_vm3, %v4298_v58 }
  0xc6   : > { %v772_v60 = vld [vmem:[#allocation2 + $0xd0] sm:$0xff]  ;;  %v773_v40 = vld [vmem:[#allocation2 + $0xd8] sm:$0xff]  ;;  %v774_v62 = vld [vmem:[#allocation2 + $0xe0] sm:$0xff]  ;;  %693 = vst.msk [vmem:[#allocation2 + $0xef] sm:$0xfe] %vm663_vm7, %v3763_v17 }
  0xc7   : > { %694 = vst.msk [vmem:[#allocation2 + $0xf7] sm:$0xff] %vm665_vm8, %v3764_v36  ;;  %696 = vst.msk [vmem:[#allocation2 + $0x107] sm:$0xff] %vm665_vm8, %v3769_v63  ;;  %v792_v61 = vpack.c.bf16 %v773_v40, %v772_v60  ;;  %v775_v9 = vld [vmem:[#allocation2 + $0xe8] sm:$0xff] }
  0xc8   : > { %695 = vst.msk [vmem:[#allocation2 + $0xff] sm:$0xfe] %vm663_vm7, %v3768_v38  ;;  %v793_v12 = vpack.c.bf16 %v775_v9, %v774_v62 }
  0xc9   : > { %3280 = vmatprep.mubr.msk.bf16.mxu0 %vm226_vm3, %v792_v61 }
  0xcd   : > { %3281 = vmatmul.mubr.msk.bf16.gmra.mrb[24].mxu0 %vm226_vm3, %v793_v12 }
  0xce   : > { %v776_v16 = vld [vmem:[#allocation2 + $0xf0] sm:$0xff]  ;;  %v777_v21 = vld [vmem:[#allocation2 + $0xf8] sm:$0xff]  ;;  %v779_v5 = vld [vmem:[#allocation2 + $0x108] sm:$0xff] }
  0xcf   : > { %v778_v22 = vld [vmem:[#allocation2 + $0x100] sm:$0xff]  ;;  %v794_v23 = vpack.c.bf16 %v777_v21, %v776_v16 }
  0xd0   : > { %v795_v6 = vpack.c.bf16 %v779_v5, %v778_v22 }
  0xd1   : > { %3284 = vmatprep.mubr.msk.bf16.mxu0 %vm226_vm3, %v794_v23 }
  0xd5   : > { %3285 = vmatmul.mubr.msk.bf16.gmra.mrb[28].mxu0 %vm226_vm3, %v795_v6 }
  0xd6   : > { %3290 = vmatprep.mubr.msk.bf16.mxu0 %vm226_vm3, %v730_v25 }
  0xdd   : > { %3291 = vmatmul.mubr.msk.bf16.vlgmr.msra.gmra.mrb[0].mxu0 %vm226_vm3, %v4143_v35  ;;  %v1265_v35 = vld [vmem:[#allocation2 + $0x110] sm:$0xff] }
  0xde   : > { %3323 = vmatpush3.bf16.msra.mxu0 %v1340_v26  ;;  %3294 = vmatprep.mubr.msk.bf16.mxu0 %vm226_vm3, %v4151_v51 }
  0xe5   : > { %3295 = vmatmul.mubr.msk.bf16.gmra.mrb[4].mxu0 %vm226_vm3, %v4184_v18 }
  0xe6   : > { %3298 = vmatprep.mubr.msk.bf16.mxu0 %vm226_vm3, %v4186_v2 }
  0xed   : > { %3299 = vmatmul.mubr.msk.bf16.gmra.mrb[8].mxu0 %vm226_vm3, %v4212_v28 }
  0xee   : > { %3302 = vmatprep.mubr.msk.bf16.mxu0 %vm226_vm3, %v4214_v14 }
  0xf5   : > { %3303 = vmatmul.mubr.msk.bf16.gmra.mrb[12].mxu0 %vm226_vm3, %v4240_v37 }
  0xf6   : > { %3306 = vmatprep.mubr.msk.bf16.mxu0 %vm226_vm3, %v4242_v19 }
  0xfd   : > { %3307 = vmatmul.mubr.msk.bf16.gmra.mrb[16].mxu0 %vm226_vm3, %v4268_v45 }
  0xfe   : > { %3310 = vmatprep.mubr.msk.bf16.mxu0 %vm226_vm3, %v4270_v7 }
 0x105   : > { %3311 = vmatmul.mubr.msk.bf16.gmra.mrb[20].mxu0 %vm226_vm3, %v4296_v53 }
 0x106   : > { %3314 = vmatprep.mubr.msk.bf16.mxu0 %vm226_vm3, %v4298_v58 }
 0x10d   : > { %3315 = vmatmul.mubr.msk.bf16.gmra.mrb[24].mxu0 %vm226_vm3, %v792_v61 }
 0x10e   : > { %3318 = vmatprep.mubr.msk.bf16.mxu0 %vm226_vm3, %v793_v12 }
 0x115   : > { %3319 = vmatmul.mubr.msk.bf16.gmra.mrb[28].mxu0 %vm226_vm3, %v794_v23 }
 0x116   : > { %3324 = vmatprep.mubr.msk.bf16.mxu0 %vm226_vm3, %v4151_v51  ;;  %v1266_v51 = vld [vmem:[#allocation2 + $0x118] sm:$0xff] }
 0x117   : > { %v1282_v59 = vpack.c.bf16 %v1266_v51, %v1265_v35 }
 0x11d   : > { %3325 = vmatmul.mubr.msk.bf16.vlgmr.msra.gmra.mrb[0].mxu0 %vm226_vm3, %v4184_v18  ;;  %v4452_v18 = vld [vmem:[%s5068_s2] ss:$0 sm:$0xff] }
 0x11e   : > { %3328 = vmatprep.mubr.msk.bf16.mxu0 %vm226_vm3, %v4186_v2 }
 0x125   : > { %3329 = vmatmul.mubr.msk.bf16.gmra.mrb[4].mxu0 %vm226_vm3, %v4212_v28 }
 0x126   : > { %3332 = vmatprep.mubr.msk.bf16.mxu0 %vm226_vm3, %v4214_v14 }
 0x12d   : > { %3333 = vmatmul.mubr.msk.bf16.gmra.mrb[8].mxu0 %vm226_vm3, %v4240_v37 }
 0x12e   : > { %3336 = vmatprep.mubr.msk.bf16.mxu0 %vm226_vm3, %v4242_v19 }
 0x135   : > { %3337 = vmatmul.mubr.msk.bf16.gmra.mrb[12].mxu0 %vm226_vm3, %v4268_v45 }
 0x136   : > { %3340 = vmatprep.mubr.msk.bf16.mxu0 %vm226_vm3, %v4270_v7 }
 0x13d   : > { %3341 = vmatmul.mubr.msk.bf16.gmra.mrb[16].mxu0 %vm226_vm3, %v4296_v53 }
 0x13e   : > { %3344 = vmatprep.mubr.msk.bf16.mxu0 %vm226_vm3, %v4298_v58 }
 0x145   : > { %3345 = vmatmul.mubr.msk.bf16.gmra.mrb[20].mxu0 %vm226_vm3, %v792_v61 }
 0x146   : > { %3348 = vmatprep.mubr.msk.bf16.mxu0 %vm226_vm3, %v793_v12 }
 0x14d   : > { %3349 = vmatmul.mubr.msk.bf16.gmra.mrb[24].mxu0 %vm226_vm3, %v794_v23 }
 0x14e   : > { %3352 = vmatprep.mubr.msk.bf16.mxu0 %vm226_vm3, %v795_v6 }
 0x155   : > { %3353 = vmatmul.mubr.msk.bf16.gmra.mrb[28].mxu0 %vm226_vm3, %v1282_v59 }
 0x1f0   : > { %v3326_v2 = vpop.f32.mrb[0].mxu0 }
 0x1f1   : > { %v1543_v28 = vadd.f32 %v3326_v2, %v4452_v18  ;;  %v1376_v14 = vpop.f32.mrb[1].mxu0 }
 0x1f2   : > { %v3327_v37 = vpop.f32.mrb[2].mxu0  ;;  %v1541_v34 = vadd.f32 %v4452_v18, %v1376_v14 }
 0x1f3   : > { %v4455_v19 = vmax.f32 %v1543_v28, 0.0  ;;  %v1544_v47 = vadd.f32 %v3327_v37, %v4452_v18  ;;  %v1379_v29 = vpop.f32.mrb[3].mxu0 }
 0x1f4   : > { %v1542_v48 = vadd.f32 %v4452_v18, %v1379_v29  ;;  %v4471_v7 = vmax.f32 %v1541_v34, 0.0 }
 0x1f5   : > { %v4458_v44 = vmax.f32 %v1544_v47, 0.0  ;;  %1641 = vrot.lane.b32.xlu0 %v4455_v19, %s3789_s26 }
 0x1f6   : > { %v4478_v27 = vmax.f32 %v1542_v48, 0.0 }
 0x1f7   : > { %1643 = vrot.lane.b32.xlu1 %v4458_v44, %s3789_s26 }
 0x1f8   : > { %v3330_v45 = vpop.f32.mrb[4].mxu0 }
 0x1f9   : > { %1804 = vrot.lane.b32.xlu0 %v4455_v19, %s3790_s12  ;;  %v1392_v49 = vpop.f32.mrb[5].mxu0  ;;  %v1547_v30 = vadd.f32 %v3330_v45, %v4452_v18 }
 0x1fa   : > { %v3331_v11 = vpop.f32.mrb[6].mxu0  ;;  %v1545_v0 = vadd.f32 %v4452_v18, %v1392_v49 }
 0x1fb   : > { %1806 = vrot.lane.b32.xlu1 %v4458_v44, %s3790_s12  ;;  %v1395_v31 = vpop.f32.mrb[7].mxu0  ;;  %v1548_v33 = vadd.f32 %v3331_v11, %v4452_v18  ;;  %v4498_v42 = vmax.f32 %v1547_v30, 0.0 }
 0x1fc   : > { %v1546_v53 = vadd.f32 %v4452_v18, %v1395_v31  ;;  %v4512_v50 = vmax.f32 %v1545_v0, 0.0 }
 0x1fd   : > { %1637 = vrot.lane.b32.xlu0 %v4471_v7, %s3789_s26  ;;  %v4502_v43 = vmax.f32 %v1548_v33, 0.0 }
 0x1fe   : > { %v4516_v24 = vmax.f32 %v1546_v53, 0.0 }
 0x1ff   : > { %1639 = vrot.lane.b32.xlu1 %v4478_v27, %s3789_s26 }
 0x200   : > { %v3334_v32 = vpop.f32.mrb[8].mxu0 }
 0x201   : > { %1800 = vrot.lane.b32.xlu0 %v4471_v7, %s3790_s12  ;;  %v1408_v13 = vpop.f32.mrb[9].mxu0  ;;  %v1551_v1 = vadd.f32 %v3334_v32, %v4452_v18 }
 0x202   : > { %v3335_v55 = vpop.f32.mrb[10].mxu0  ;;  %v1549_v61 = vadd.f32 %v4452_v18, %v1408_v13 }
 0x203   : > { %1802 = vrot.lane.b32.xlu1 %v4478_v27, %s3790_s12  ;;  %v1411_v52 = vpop.f32.mrb[11].mxu0  ;;  %v1552_v20 = vadd.f32 %v3335_v55, %v4452_v18  ;;  %v4530_v63 = vmax.f32 %v1551_v1, 0.0 }
 0x204   : > { %v1550_v12 = vadd.f32 %v4452_v18, %v1411_v52  ;;  %v4548_v22 = vmax.f32 %v1549_v61, 0.0 }
 0x205   : > { %1649 = vrot.lane.b32.xlu0 %v4498_v42, %s3789_s26  ;;  %v4536_v62 = vmax.f32 %v1552_v20, 0.0 }
 0x206   : > { %v4554_v25 = vmax.f32 %v1550_v12, 0.0 }
 0x207   : > { %1651 = vrot.lane.b32.xlu1 %v4502_v43, %s3789_s26 }
 0x208   : > { %v3338_v54 = vpop.f32.mrb[12].mxu0 }
 0x209   : > { %1812 = vrot.lane.b32.xlu0 %v4498_v42, %s3790_s12  ;;  %v1424_v56 = vpop.f32.mrb[13].mxu0  ;;  %v1555_v26 = vadd.f32 %v3338_v54, %v4452_v18 }
 0x20a   : > { %v3339_v57 = vpop.f32.mrb[14].mxu0  ;;  %v1553_v45 = vadd.f32 %v4452_v18, %v1424_v56 }
 0x20b   : > { %1814 = vrot.lane.b32.xlu1 %v4502_v43, %s3790_s12  ;;  %v1427_v58 = vpop.f32.mrb[15].mxu0  ;;  %v1556_v51 = vadd.f32 %v3339_v57, %v4452_v18  ;;  %v4566_v37 = vmax.f32 %v1555_v26, 0.0 }
 0x20c   : > { %v1554_v49 = vadd.f32 %v4452_v18, %v1427_v58  ;;  %v4584_v30 = vmax.f32 %v1553_v45, 0.0 }
 0x20d   : > { %1645 = vrot.lane.b32.xlu0 %v4512_v50, %s3789_s26  ;;  %v4572_v46 = vmax.f32 %v1556_v51, 0.0 }
 0x20e   : > { %v4590_v55 = vmax.f32 %v1554_v49, 0.0 }
 0x20f   : > { %1647 = vrot.lane.b32.xlu1 %v4516_v24, %s3789_s26 }
 0x210   : > { %v3342_v3 = vpop.f32.mrb[16].mxu0 }
 0x211   : > { %v1559_v39 = vadd.f32 %v3342_v3, %v4452_v18  ;;  %1808 = vrot.lane.b32.xlu0 %v4512_v50, %s3790_s12  ;;  %v1440_v4 = vpop.f32.mrb[17].mxu0 }
 0x212   : > { %v4528_v36 = vadd.f32 %v4452_v18, %v1440_v4  ;;  %v3343_v17 = vpop.f32.mrb[18].mxu0 }
 0x213   : > { %v1560_v38 = vadd.f32 %v3343_v17, %v4452_v18  ;;  %1810 = vrot.lane.b32.xlu1 %v4516_v24, %s3790_s12  ;;  %v1443_v60 = vpop.f32.mrb[19].mxu0  ;;  %v4598_v52 = vmax.f32 %v1559_v39, 0.0 }
 0x214   : > { %v1558_v40 = vadd.f32 %v4452_v18, %v1443_v60  ;;  %v4617_v54 = vmax.f32 %v4528_v36, 0.0 }
 0x215   : > { %1657 = vrot.lane.b32.xlu0 %v4530_v63, %s3789_s26  ;;  %v4602_v0 = vmax.f32 %v1560_v38, 0.0 }
 0x216   : > { %v4621_v53 = vmax.f32 %v1558_v40, 0.0 }
 0x217   : > { %1659 = vrot.lane.b32.xlu1 %v4536_v62, %s3789_s26 }
 0x218   : > { %v3346_v9 = vpop.f32.mrb[20].mxu0 }
 0x219   : > { %v1563_v41 = vadd.f32 %v3346_v9, %v4452_v18  ;;  %1820 = vrot.lane.b32.xlu0 %v4530_v63, %s3790_s12  ;;  %v1456_v15 = vpop.f32.mrb[21].mxu0 }
 0x21a   : > { %v1561_v16 = vadd.f32 %v4452_v18, %v1456_v15  ;;  %v3347_v21 = vpop.f32.mrb[22].mxu0 }
 0x21b   : > { %v1564_v23 = vadd.f32 %v3347_v21, %v4452_v18  ;;  %1822 = vrot.lane.b32.xlu1 %v4536_v62, %s3790_s12  ;;  %v1459_v5 = vpop.f32.mrb[23].mxu0  ;;  %v4629_v56 = vmax.f32 %v1563_v41, 0.0 }
 0x21c   : > { %v1562_v6 = vadd.f32 %v4452_v18, %v1459_v5  ;;  %v4641_v58 = vmax.f32 %v1561_v16, 0.0 }
 0x21d   : > { %1653 = vrot.lane.b32.xlu0 %v4548_v22, %s3789_s26  ;;  %v4633_v57 = vmax.f32 %v1564_v23, 0.0 }
 0x21e   : > { %v4645_v1 = vmax.f32 %v1562_v6, 0.0 }
 0x21f   : > { %1655 = vrot.lane.b32.xlu1 %v4554_v25, %s3789_s26 }
 0x220   : > { %v3350_v35 = vpop.f32.mrb[24].mxu0 }
 0x221   : > { %v1567_v59 = vadd.f32 %v3350_v35, %v4452_v18  ;;  %1816 = vrot.lane.b32.xlu0 %v4548_v22, %s3790_s12  ;;  %v1472_v2 = vpop.f32.mrb[25].mxu0 }
 0x222   : > { %v1565_v28 = vadd.f32 %v4452_v18, %v1472_v2  ;;  %v3351_v14 = vpop.f32.mrb[26].mxu0 }
 0x223   : > { %v1568_v47 = vadd.f32 %v3351_v14, %v4452_v18  ;;  %1818 = vrot.lane.b32.xlu1 %v4554_v25, %s3790_s12  ;;  %v1475_v29 = vpop.f32.mrb[27].mxu0  ;;  %v4653_v3 = vmax.f32 %v1567_v59, 0.0  ;;  %v4750_v14 = vld [vmem:[%s5069_s3 + $0x18] sm:$0xff]  }
 0x224   : > { %v1566_v34 = vadd.f32 %v4452_v18, %v1475_v29  ;;  %v4665_v39 = vmax.f32 %v1565_v28, 0.0 }
 0x225   : > { %1665 = vrot.lane.b32.xlu0 %v4566_v37, %s3789_s26  ;;  %v4657_v20 = vmax.f32 %v1568_v47, 0.0 }
 0x226   : > { %v4669_v4 = vmax.f32 %v1566_v34, 0.0 }
 0x227   : > { %1667 = vrot.lane.b32.xlu1 %v4572_v46, %s3789_s26 }
 0x228   : > { %v3354_v48 = vpop.f32.mrb[28].mxu0 }
 0x229   : > { %v1571_v11 = vadd.f32 %v3354_v48, %v4452_v18  ;;  %1828 = vrot.lane.b32.xlu0 %v4566_v37, %s3790_s12  ;;  %v1488_v31 = vpop.f32.mrb[29].mxu0 }
 0x22a   : > { %v1569_v8 = vadd.f32 %v4452_v18, %v1488_v31  ;;  %v3355_v10 = vpop.f32.mrb[30].mxu0 }
 0x22b   : > { %v1572_v32 = vadd.f32 %v3355_v10, %v4452_v18  ;;  %1830 = vrot.lane.b32.xlu1 %v4572_v46, %s3790_s12  ;;  %v1491_v33 = vpop.f32.mrb[31].mxu0  ;;  %v4677_v36 = vmax.f32 %v1571_v11, 0.0 }
 0x22c   : > { %v1570_v13 = vadd.f32 %v4452_v18, %v1491_v33  ;;  %v4609_v18 = vld [vmem:[%s5069_s3] sm:$0xff]   ;;  %v4685_v38 = vmax.f32 %v1569_v8, 0.0 }
 0x22d   : > { %1661 = vrot.lane.b32.xlu0 %v4584_v30, %s3789_s26  ;;  %3392 = vmatprep.subr.bf16.mxu1 %v4609_v18  ;;  %v4681_v17 = vmax.f32 %v1572_v32, 0.0 }
 0x22e   : > { %v4690_v40 = vmax.f32 %v1570_v13, 0.0 }
 0x22f   : > { %1663 = vrot.lane.b32.xlu1 %v4590_v55, %s3789_s26 }
 0x231   : > { %1824 = vrot.lane.b32.xlu0 %v4584_v30, %s3790_s12 }
 0x233   : > { %1826 = vrot.lane.b32.xlu1 %v4590_v55, %s3790_s12 }
 0x235   : > { %1673 = vrot.lane.b32.xlu0 %v4598_v52, %s3789_s26 }
 0x237   : > { %1675 = vrot.lane.b32.xlu1 %v4602_v0, %s3789_s26 }
 0x239   : > { %1836 = vrot.lane.b32.xlu0 %v4598_v52, %s3790_s12 }
 0x23b   : > { %1838 = vrot.lane.b32.xlu1 %v4602_v0, %s3790_s12 }
 0x23d   : > { %1669 = vrot.lane.b32.xlu0 %v4617_v54, %s3789_s26 }
 0x23f   : > { %1671 = vrot.lane.b32.xlu1 %v4621_v53, %s3789_s26 }
 0x241   : > { %1832 = vrot.lane.b32.xlu0 %v4617_v54, %s3790_s12 }
 0x243   : > { %1834 = vrot.lane.b32.xlu1 %v4621_v53, %s3790_s12 }
 0x245   : > { %1681 = vrot.lane.b32.xlu0 %v4629_v56, %s3789_s26 }
 0x247   : > { %1683 = vrot.lane.b32.xlu1 %v4633_v57, %s3789_s26 }
 0x249   : > { %1844 = vrot.lane.b32.xlu0 %v4629_v56, %s3790_s12 }
 0x24b   : > { %1846 = vrot.lane.b32.xlu1 %v4633_v57, %s3790_s12 }
 0x24d   : > { %1677 = vrot.lane.b32.xlu0 %v4641_v58, %s3789_s26 }
 0x24f   : > { %1679 = vrot.lane.b32.xlu1 %v4645_v1, %s3789_s26 }
 0x251   : > { %1840 = vrot.lane.b32.xlu0 %v4641_v58, %s3790_s12 }
 0x253   : > { %1842 = vrot.lane.b32.xlu1 %v4645_v1, %s3790_s12 }
 0x255   : > { %1689 = vrot.lane.b32.xlu0 %v4653_v3, %s3789_s26 }
 0x257   : > { %1691 = vrot.lane.b32.xlu1 %v4657_v20, %s3789_s26 }
 0x259   : > { %1852 = vrot.lane.b32.xlu0 %v4653_v3, %s3790_s12 }
 0x25b   : > { %1854 = vrot.lane.b32.xlu1 %v4657_v20, %s3790_s12 }
 0x25d   : > { %1685 = vrot.lane.b32.xlu0 %v4665_v39, %s3789_s26 }
 0x25f   : > { %1687 = vrot.lane.b32.xlu1 %v4669_v4, %s3789_s26 }
 0x261   : > { %1848 = vrot.lane.b32.xlu0 %v4665_v39, %s3790_s12 }
 0x263   : > { %1850 = vrot.lane.b32.xlu1 %v4669_v4, %s3790_s12 }
 0x265   : > { %1697 = vrot.lane.b32.xlu0 %v4677_v36, %s3789_s26 }
 0x267   : > { %v1642_v60 = vpop.permute.xlu0 %1641  ;;  %1699 = vrot.lane.b32.xlu1 %v4681_v17, %s3789_s26 }
 0x268   : > { %1736 = vst.msk [vmem:[#allocation3 + $0x20] sm:$0xff] %vm1733_vm13, %v1642_v60 }
 0x269   : > { %v1644_v61 = vpop.permute.xlu1 %1643  ;;  %1693 = vrot.lane.b32.xlu0 %v4685_v38, %s3789_s26 }
 0x26a   : > { %1737 = vst.msk [vmem:[#allocation3 + $0x28] sm:$0xff] %vm1733_vm13, %v1644_v61 }
 0x26b   : > { %1770 = vst.msk [vmem:[#allocation3 + $0x21] sm:$0xff] %vm1766_vm14, %v4455_v19  ;;  %v1805_v9 = vpop.permute.xlu0 %1804  ;;  %1695 = vrot.lane.b32.xlu1 %v4690_v40, %s3789_s26 }
 0x26c   : > { %1771 = vst.msk [vmem:[#allocation3 + $0x29] sm:$0x7f] %vm1768_vm15, %v4458_v44 }
 0x26d   : > { %1900 = vst.msk [vmem:[#allocation3 + $0x1f] sm:$0xfe] %vm1896_vm0, %v1805_v9  ;;  %v1807_v12 = vpop.permute.xlu1 %1806  ;;  %1856 = vrot.lane.b32.xlu0 %v4685_v38, %s3790_s12 }
 0x26e   : > { %1901 = vst.msk [vmem:[#allocation3 + $0x27] sm:$0xff] %vm1898_vm1, %v1807_v12 }
 0x26f   : > { %v1638_v41 = vpop.permute.xlu0 %1637  ;;  %1858 = vrot.lane.b32.xlu1 %v4690_v40, %s3790_s12 }
 0x270   : > { %1734 = vst.msk [vmem:[#allocation3 + $0x10] sm:$0xff] %vm1733_vm13, %v1638_v41 }
 0x271   : > { %v1640_v19 = vpop.permute.xlu1 %1639  ;;  %1860 = vrot.lane.b32.xlu0 %v4677_v36, %s3790_s12 }
 0x272   : > { %1735 = vst.msk [vmem:[#allocation3 + $0x18] sm:$0xff] %vm1733_vm13, %v1640_v19 }
 0x273   : > { %1767 = vst.msk [vmem:[#allocation3 + $0x11] sm:$0xff] %vm1766_vm14, %v4471_v7  ;;  %v1801_v44 = vpop.permute.xlu0 %1800  ;;  %1862 = vrot.lane.b32.xlu1 %v4681_v17, %s3790_s12 }
 0x274   : > { %1769 = vst.msk [vmem:[#allocation3 + $0x19] sm:$0x7f] %vm1768_vm15, %v4478_v27 }
 0x275   : > { %1897 = vst.msk [vmem:[#allocation3 + $0xf] sm:$0xfe] %vm1896_vm0, %v1801_v44  ;;  %v1803_v15 = vpop.permute.xlu1 %1802  ;;  %v1984_v27 = vld [vmem:[#allocation3 + $0x20] sm:$0xff]  ;;  %v1985_v23 = vld [vmem:[#allocation3 + $0x28] sm:$0xff] }
 0x276   : > { %1899 = vst.msk [vmem:[#allocation3 + $0x17] sm:$0xff] %vm1898_vm1, %v1803_v15  ;;  %v4729_v59 = vpack.c.bf16 %v1985_v23, %v1984_v27 }
 0x277   : > { %v1650_v16 = vpop.permute.xlu0 %1649 }
 0x278   : > { %1740 = vst.msk [vmem:[#allocation3 + $0x40] sm:$0xff] %vm1733_vm13, %v1650_v16 }
 0x279   : > { %v1652_v21 = vpop.permute.xlu1 %1651 }
 0x27a   : > { %1741 = vst.msk [vmem:[#allocation3 + $0x48] sm:$0xff] %vm1733_vm13, %v1652_v21 }
 0x27b   : > { %1774 = vst.msk [vmem:[#allocation3 + $0x41] sm:$0xff] %vm1766_vm14, %v4498_v42  ;;  %v1813_v7 = vpop.permute.xlu0 %1812  ;;  %v3776_v42 = vld [vmem:[%s5069_s3 + $0x8] ss:$0 sps:$4 sm:$0xff]  }
 0x27c   : > { %1775 = vst.msk [vmem:[#allocation3 + $0x49] sm:$0x7f] %vm1768_vm15, %v4502_v43  ;;  %v2314_v28 = vsel %vm2091_vm11, %v3776_v42, 0 }
 0x27d   : > { %1904 = vst.msk [vmem:[#allocation3 + $0x3f] sm:$0xfe] %vm1896_vm0, %v1813_v7  ;;  %v1815_v5 = vpop.permute.xlu1 %1814  ;;  %v1982_v6 = vld [vmem:[#allocation3 + $0x10] sm:$0xff]  ;;  %v1983_v26 = vld [vmem:[#allocation3 + $0x18] sm:$0xff] }
 0x27e   : > { %1905 = vst.msk [vmem:[#allocation3 + $0x47] sm:$0xff] %vm1898_vm1, %v1815_v5  ;;  %v4727_v35 = vpack.c.bf16 %v1983_v26, %v1982_v6 }
 0x27f   : > { %v1646_v51 = vpop.permute.xlu0 %1645 }
 0x280   : > { %1738 = vst.msk [vmem:[#allocation3 + $0x30] sm:$0xff] %vm1733_vm13, %v1646_v51  ;;  %3360 = vmatprep.mubr.msk.bf16.mxu1 %vm267_vm12, %v4727_v35 }
 0x281   : > { %3361 = vmatmul.mubr.msk.bf16.vlgmr.msra.gmra.mrb[0].mxu1 %vm267_vm12, %v4729_v59  ;;  %v1648_v43 = vpop.permute.xlu1 %1647 }
 0x282   : > { %1739 = vst.msk [vmem:[#allocation3 + $0x38] sm:$0xff] %vm1733_vm13, %v1648_v43  ;;  %3393 = vmatpush3.bf16.msra.mxu1 %v4609_v18 }
 0x283   : > { %1772 = vst.msk [vmem:[#allocation3 + $0x31] sm:$0xff] %vm1766_vm14, %v4512_v50  ;;  %v1809_v2 = vpop.permute.xlu0 %1808  ;;  %3596 = vmatprep.subr.msk.bf16.mxu1 %vm2091_vm11, %v3776_v42 }
 0x284   : > { %1773 = vst.msk [vmem:[#allocation3 + $0x39] sm:$0x7f] %vm1768_vm15, %v4516_v24 }
 0x285   : > { %1902 = vst.msk [vmem:[#allocation3 + $0x2f] sm:$0xfe] %vm1896_vm0, %v1809_v2  ;;  %v1811_v47 = vpop.permute.xlu1 %1810  ;;  %v1988_v34 = vld [vmem:[#allocation3 + $0x40] sm:$0xff]  ;;  %v1989_v45 = vld [vmem:[#allocation3 + $0x48] sm:$0xff] }
 0x286   : > { %1903 = vst.msk [vmem:[#allocation3 + $0x37] sm:$0xff] %vm1898_vm1, %v1811_v47  ;;  %3395 = vmatpush3.bf16.msra.mxu1 %v2314_v28  ;;  %v4765_v10 = vpack.c.bf16 %v1989_v45, %v1988_v34 }
 0x287   : > { %v1658_v50 = vpop.permute.xlu0 %1657  ;;  %3428 = vmatprep.subr.bf16.mxu1 %v4750_v14 }
 0x288   : > { %1744 = vst.msk [vmem:[#allocation3 + $0x60] sm:$0xff] %vm1733_vm13, %v1658_v50 }
 0x289   : > { %v1660_v24 = vpop.permute.xlu1 %1659 }
 0x28a   : > { %1745 = vst.msk [vmem:[#allocation3 + $0x68] sm:$0xff] %vm1733_vm13, %v1660_v24 }
 0x28b   : > { %1778 = vst.msk [vmem:[#allocation3 + $0x61] sm:$0xff] %vm1766_vm14, %v4530_v63  ;;  %v1821_v29 = vpop.permute.xlu0 %1820 }
 0x28c   : > { %1779 = vst.msk [vmem:[#allocation3 + $0x69] sm:$0x7f] %vm1768_vm15, %v4536_v62 }
 0x28d   : > { %1908 = vst.msk [vmem:[#allocation3 + $0x5f] sm:$0xfe] %vm1896_vm0, %v1821_v29  ;;  %v1823_v48 = vpop.permute.xlu1 %1822  ;;  %v1986_v49 = vld [vmem:[#allocation3 + $0x30] sm:$0xff]  ;;  %v1987_v11 = vld [vmem:[#allocation3 + $0x38] sm:$0xff] }
 0x28e   : > { %1909 = vst.msk [vmem:[#allocation3 + $0x67] sm:$0xff] %vm1898_vm1, %v1823_v48  ;;  %v4763_v31 = vpack.c.bf16 %v1987_v11, %v1986_v49 }
 0x28f   : > { %v1654_v8 = vpop.permute.xlu0 %1653 }
 0x290   : > { %1742 = vst.msk [vmem:[#allocation3 + $0x50] sm:$0xff] %vm1733_vm13, %v1654_v8  ;;  %3364 = vmatprep.mubr.msk.bf16.mxu1 %vm267_vm12, %v4763_v31 }
 0x291   : > { %3365 = vmatmul.mubr.msk.bf16.gmra.mrb[4].mxu1 %vm267_vm12, %v4765_v10  ;;  %v1656_v63 = vpop.permute.xlu1 %1655 }
 0x292   : > { %1743 = vst.msk [vmem:[#allocation3 + $0x58] sm:$0xff] %vm1733_vm13, %v1656_v63 }
 0x293   : > { %1776 = vst.msk [vmem:[#allocation3 + $0x51] sm:$0xff] %vm1766_vm14, %v4548_v22  ;;  %v1817_v62 = vpop.permute.xlu0 %1816 }
 0x294   : > { %1777 = vst.msk [vmem:[#allocation3 + $0x59] sm:$0x7f] %vm1768_vm15, %v4554_v25 }
 0x295   : > { %1906 = vst.msk [vmem:[#allocation3 + $0x4f] sm:$0xfe] %vm1896_vm0, %v1817_v62  ;;  %v1819_v32 = vpop.permute.xlu1 %1818  ;;  %v1992_v25 = vld [vmem:[#allocation3 + $0x60] sm:$0xff]  ;;  %v1993_v18 = vld [vmem:[#allocation3 + $0x68] sm:$0xff] }
 0x296   : > { %1907 = vst.msk [vmem:[#allocation3 + $0x57] sm:$0xff] %vm1898_vm1, %v1819_v32  ;;  %v4789_v19 = vpack.c.bf16 %v1993_v18, %v1992_v25 }
 0x297   : > { %v1666_v33 = vpop.permute.xlu0 %1665 }
 0x298   : > { %1748 = vst.msk [vmem:[#allocation3 + $0x80] sm:$0xff] %vm1733_vm13, %v1666_v33 }
 0x299   : > { %v1668_v13 = vpop.permute.xlu1 %1667 }
 0x29a   : > { %1749 = vst.msk [vmem:[#allocation3 + $0x88] sm:$0xff] %vm1733_vm13, %v1668_v13 }
 0x29b   : > { %1782 = vst.msk [vmem:[#allocation3 + $0x81] sm:$0xff] %vm1766_vm14, %v4566_v37  ;;  %v1829_v22 = vpop.permute.xlu0 %1828 }
 0x29c   : > { %1783 = vst.msk [vmem:[#allocation3 + $0x89] sm:$0x7f] %vm1768_vm15, %v4572_v46 }
 0x29d   : > { %1912 = vst.msk [vmem:[#allocation3 + $0x7f] sm:$0xfe] %vm1896_vm0, %v1829_v22  ;;  %v1831_v60 = vpop.permute.xlu1 %1830  ;;  %v1990_v61 = vld [vmem:[#allocation3 + $0x50] sm:$0xff]  ;;  %v1991_v9 = vld [vmem:[#allocation3 + $0x58] sm:$0xff] }
 0x29e   : > { %1913 = vst.msk [vmem:[#allocation3 + $0x87] sm:$0xff] %vm1898_vm1, %v1831_v60  ;;  %v4787_v12 = vpack.c.bf16 %v1991_v9, %v1990_v61 }
 0x29f   : > { %v1662_v41 = vpop.permute.xlu0 %1661 }
 0x2a0   : > { %1746 = vst.msk [vmem:[#allocation3 + $0x70] sm:$0xff] %vm1733_vm13, %v1662_v41  ;;  %3368 = vmatprep.mubr.msk.bf16.mxu1 %vm267_vm12, %v4787_v12 }
 0x2a1   : > { %3369 = vmatmul.mubr.msk.bf16.gmra.mrb[8].mxu1 %vm267_vm12, %v4789_v19  ;;  %v1664_v37 = vpop.permute.xlu1 %1663 }
 0x2a2   : > { %1747 = vst.msk [vmem:[#allocation3 + $0x78] sm:$0xff] %vm1733_vm13, %v1664_v37 }
 0x2a3   : > { %1780 = vst.msk [vmem:[#allocation3 + $0x71] sm:$0xff] %vm1766_vm14, %v4584_v30  ;;  %v1825_v46 = vpop.permute.xlu0 %1824 }
 0x2a4   : > { %1781 = vst.msk [vmem:[#allocation3 + $0x79] sm:$0x7f] %vm1768_vm15, %v4590_v55 }
 0x2a5   : > { %1910 = vst.msk [vmem:[#allocation3 + $0x6f] sm:$0xfe] %vm1896_vm0, %v1825_v46  ;;  %v1827_v44 = vpop.permute.xlu1 %1826  ;;  %v1996_v55 = vld [vmem:[#allocation3 + $0x80] sm:$0xff]  ;;  %v1997_v21 = vld [vmem:[#allocation3 + $0x88] sm:$0xff] }
 0x2a6   : > { %1911 = vst.msk [vmem:[#allocation3 + $0x77] sm:$0xff] %vm1898_vm1, %v1827_v44  ;;  %v4813_v26 = vpack.c.bf16 %v1997_v21, %v1996_v55  ;;  %v1932_v55 = vld [vmem:[#allocation3 + $0x8] sm:$0xff] }
 0x2a7   : > { %v1674_v15 = vpop.permute.xlu0 %1673 }
 0x2a8   : > { %1752 = vst.msk [vmem:[#allocation3 + $0xa0] sm:$0xff] %vm1733_vm13, %v1674_v15 }
 0x2a9   : > { %v1676_v16 = vpop.permute.xlu1 %1675 }
 0x2aa   : > { %1753 = vst.msk [vmem:[#allocation3 + $0xa8] sm:$0xff] %vm1733_vm13, %v1676_v16 }
 0x2ab   : > { %1786 = vst.msk [vmem:[#allocation3 + $0xa1] sm:$0xff] %vm1766_vm14, %v4598_v52  ;;  %v1837_v30 = vpop.permute.xlu0 %1836 }
 0x2ac   : > { %1787 = vst.msk [vmem:[#allocation3 + $0xa9] sm:$0x7f] %vm1768_vm15, %v4602_v0 }
 0x2ad   : > { %1916 = vst.msk [vmem:[#allocation3 + $0x9f] sm:$0xfe] %vm1896_vm0, %v1837_v30  ;;  %v1839_v7 = vpop.permute.xlu1 %1838  ;;  %v1994_v27 = vld [vmem:[#allocation3 + $0x70] sm:$0xff]  ;;  %v1995_v23 = vld [vmem:[#allocation3 + $0x78] sm:$0xff]  ;;  %v1931_v30 = vld [vmem:[#allocation3] sm:$0xff] }
 0x2ae   : > { %1917 = vst.msk [vmem:[#allocation3 + $0xa7] sm:$0xff] %vm1898_vm1, %v1839_v7  ;;  %v4811_v5 = vpack.c.bf16 %v1995_v23, %v1994_v27  ;;  %v1963_v27 = vpack.c.bf16 %v1932_v55, %v1931_v30 }
 0x2af   : > { %v1670_v6 = vpop.permute.xlu0 %1669 }
 0x2b0   : > { %1750 = vst.msk [vmem:[#allocation3 + $0x90] sm:$0xff] %vm1733_vm13, %v1670_v6  ;;  %3372 = vmatprep.mubr.msk.bf16.mxu1 %vm267_vm12, %v4811_v5  ;;  %v3778_v6 = vld [vmem:[%s5069_s3 + $0x20] ss:$0 sps:$4 sm:$0xff]  }
 0x2b1   : > { %3373 = vmatmul.mubr.msk.bf16.gmra.mrb[12].mxu1 %vm267_vm12, %v4813_v26  ;;  %v1672_v52 = vpop.permute.xlu1 %1671 }
 0x2b2   : > { %1751 = vst.msk [vmem:[#allocation3 + $0x98] sm:$0xff] %vm1733_vm13, %v1672_v52  ;;  %v2588_v52 = vsel %vm2091_vm11, %v3778_v6, 0 }
 0x2b3   : > { %1784 = vst.msk [vmem:[#allocation3 + $0x91] sm:$0xff] %vm1766_vm14, %v4617_v54  ;;  %v1833_v0 = vpop.permute.xlu0 %1832 }
 0x2b4   : > { %1785 = vst.msk [vmem:[#allocation3 + $0x99] sm:$0x7f] %vm1768_vm15, %v4621_v53 }
 0x2b5   : > { %1914 = vst.msk [vmem:[#allocation3 + $0x8f] sm:$0xfe] %vm1896_vm0, %v1833_v0  ;;  %v1835_v51 = vpop.permute.xlu1 %1834  ;;  %v2000_v53 = vld [vmem:[#allocation3 + $0xa0] sm:$0xff]  ;;  %v2001_v2 = vld [vmem:[#allocation3 + $0xa8] sm:$0xff] }
 0x2b6   : > { %1915 = vst.msk [vmem:[#allocation3 + $0x97] sm:$0xff] %vm1898_vm1, %v1835_v51  ;;  %v4837_v34 = vpack.c.bf16 %v2001_v2, %v2000_v53 }
 0x2b7   : > { %v1682_v42 = vpop.permute.xlu0 %1681 }
 0x2b8   : > { %1756 = vst.msk [vmem:[#allocation3 + $0xc0] sm:$0xff] %vm1733_vm13, %v1682_v42 }
 0x2b9   : > { %v1684_v43 = vpop.permute.xlu1 %1683 }
 0x2ba   : > { %1757 = vst.msk [vmem:[#allocation3 + $0xc8] sm:$0xff] %vm1733_vm13, %v1684_v43 }
 0x2bb   : > { %1790 = vst.msk [vmem:[#allocation3 + $0xc1] sm:$0xff] %vm1766_vm14, %v4629_v56  ;;  %v1845_v54 = vpop.permute.xlu0 %1844 }
 0x2bc   : > { %1791 = vst.msk [vmem:[#allocation3 + $0xc9] sm:$0x7f] %vm1768_vm15, %v4633_v57 }
 0x2bd   : > { %1920 = vst.msk [vmem:[#allocation3 + $0xbf] sm:$0xfe] %vm1896_vm0, %v1845_v54  ;;  %v1847_v28 = vpop.permute.xlu1 %1846  ;;  %v1998_v47 = vld [vmem:[#allocation3 + $0x90] sm:$0xff]  ;;  %v1999_v50 = vld [vmem:[#allocation3 + $0x98] sm:$0xff] }
 0x2be   : > { %1921 = vst.msk [vmem:[#allocation3 + $0xc7] sm:$0xff] %vm1898_vm1, %v1847_v28  ;;  %v4835_v24 = vpack.c.bf16 %v1999_v50, %v1998_v47 }
 0x2bf   : > { %v1678_v29 = vpop.permute.xlu0 %1677 }
 0x2c0   : > { %1754 = vst.msk [vmem:[#allocation3 + $0xb0] sm:$0xff] %vm1733_vm13, %v1678_v29  ;;  %3376 = vmatprep.mubr.msk.bf16.mxu1 %vm267_vm12, %v4835_v24 }
 0x2c1   : > { %3377 = vmatmul.mubr.msk.bf16.gmra.mrb[16].mxu1 %vm267_vm12, %v4837_v34  ;;  %v1680_v56 = vpop.permute.xlu1 %1679 }
 0x2c2   : > { %1755 = vst.msk [vmem:[#allocation3 + $0xb8] sm:$0xff] %vm1733_vm13, %v1680_v56 }
 0x2c3   : > { %1788 = vst.msk [vmem:[#allocation3 + $0xb1] sm:$0xff] %vm1766_vm14, %v4641_v58  ;;  %v1841_v57 = vpop.permute.xlu0 %1840 }
 0x2c4   : > { %1789 = vst.msk [vmem:[#allocation3 + $0xb9] sm:$0x7f] %vm1768_vm15, %v4645_v1 }
 0x2c5   : > { %1918 = vst.msk [vmem:[#allocation3 + $0xaf] sm:$0xfe] %vm1896_vm0, %v1841_v57  ;;  %v1843_v45 = vpop.permute.xlu1 %1842  ;;  %v2004_v1 = vld [vmem:[#allocation3 + $0xc0] sm:$0xff]  ;;  %v2005_v11 = vld [vmem:[#allocation3 + $0xc8] sm:$0xff] }
 0x2c6   : > { %1919 = vst.msk [vmem:[#allocation3 + $0xb7] sm:$0xff] %vm1898_vm1, %v1843_v45  ;;  %v4861_v13 = vpack.c.bf16 %v2005_v11, %v2004_v1 }
 0x2c7   : > { %v1690_v48 = vpop.permute.xlu0 %1689 }
 0x2c8   : > { %1760 = vst.msk [vmem:[#allocation3 + $0xe0] sm:$0xff] %vm1733_vm13, %v1690_v48 }
 0x2c9   : > { %v1692_v49 = vpop.permute.xlu1 %1691 }
 0x2ca   : > { %1761 = vst.msk [vmem:[#allocation3 + $0xe8] sm:$0xff] %vm1733_vm13, %v1692_v49 }
 0x2cb   : > { %1794 = vst.msk [vmem:[#allocation3 + $0xe1] sm:$0xff] %vm1766_vm14, %v4653_v3  ;;  %v1853_v58 = vpop.permute.xlu0 %1852 }
 0x2cc   : > { %1795 = vst.msk [vmem:[#allocation3 + $0xe9] sm:$0x7f] %vm1768_vm15, %v4657_v20 }
 0x2cd   : > { %1924 = vst.msk [vmem:[#allocation3 + $0xdf] sm:$0xfe] %vm1896_vm0, %v1853_v58  ;;  %v1855_v8 = vpop.permute.xlu1 %1854  ;;  %v2002_v63 = vld [vmem:[#allocation3 + $0xb0] sm:$0xff]  ;;  %v2003_v62 = vld [vmem:[#allocation3 + $0xb8] sm:$0xff] }
 0x2ce   : > { %1925 = vst.msk [vmem:[#allocation3 + $0xe7] sm:$0xff] %vm1898_vm1, %v1855_v8  ;;  %v4859_v32 = vpack.c.bf16 %v2003_v62, %v2002_v63 }
 0x2cf   : > { %v1686_v33 = vpop.permute.xlu0 %1685 }
 0x2d0   : > { %1758 = vst.msk [vmem:[#allocation3 + $0xd0] sm:$0xff] %vm1733_vm13, %v1686_v33  ;;  %3380 = vmatprep.mubr.msk.bf16.mxu1 %vm267_vm12, %v4859_v32 }
 0x2d1   : > { %3381 = vmatmul.mubr.msk.bf16.gmra.mrb[20].mxu1 %vm267_vm12, %v4861_v13  ;;  %v1688_v3 = vpop.permute.xlu1 %1687 }
 0x2d2   : > { %1759 = vst.msk [vmem:[#allocation3 + $0xd8] sm:$0xff] %vm1733_vm13, %v1688_v3 }
 0x2d3   : > { %1792 = vst.msk [vmem:[#allocation3 + $0xd1] sm:$0xff] %vm1766_vm14, %v4665_v39  ;;  %v1849_v20 = vpop.permute.xlu0 %1848 }
 0x2d4   : > { %1793 = vst.msk [vmem:[#allocation3 + $0xd9] sm:$0x7f] %vm1768_vm15, %v4669_v4 }
 0x2d5   : > { %1922 = vst.msk [vmem:[#allocation3 + $0xcf] sm:$0xfe] %vm1896_vm0, %v1849_v20  ;;  %v1851_v22 = vpop.permute.xlu1 %1850  ;;  %v2008_v4 = vld [vmem:[#allocation3 + $0xe0] sm:$0xff]  ;;  %v2009_v60 = vld [vmem:[#allocation3 + $0xe8] sm:$0xff] }
 0x2d6   : > { %1923 = vst.msk [vmem:[#allocation3 + $0xd7] sm:$0xff] %vm1898_vm1, %v1851_v22  ;;  %v2027_v46 = vpack.c.bf16 %v2009_v60, %v2008_v4 }
 0x2d7   : > { %v1698_v25 = vpop.permute.xlu0 %1697 }
 0x2d8   : > { %1764 = vst.msk [vmem:[#allocation3 + $0x100] sm:$0xff] %vm1733_vm13, %v1698_v25 }
 0x2d9   : > { %v1700_v18 = vpop.permute.xlu1 %1699 }
 0x2da   : > { %1765 = vst.msk [vmem:[#allocation3 + $0x108] sm:$0xff] %vm1733_vm13, %v1700_v18 }
 0x2db   : > { %1798 = vst.msk [vmem:[#allocation3 + $0x101] sm:$0xff] %vm1766_vm14, %v4677_v36  ;;  %v1694_v39 = vpop.permute.xlu0 %1693 }
 0x2dc   : > { %1799 = vst.msk [vmem:[#allocation3 + $0x109] sm:$0x7f] %vm1768_vm15, %v4681_v17 }
 0x2dd   : > { %1762 = vst.msk [vmem:[#allocation3 + $0xf0] sm:$0xff] %vm1733_vm13, %v1694_v39  ;;  %v1696_v61 = vpop.permute.xlu1 %1695  ;;  %v2006_v9 = vld [vmem:[#allocation3 + $0xd0] sm:$0xff]  ;;  %v2007_v41 = vld [vmem:[#allocation3 + $0xd8] sm:$0xff] }
 0x2de   : > { %1763 = vst.msk [vmem:[#allocation3 + $0xf8] sm:$0xff] %vm1733_vm13, %v1696_v61  ;;  %v2026_v37 = vpack.c.bf16 %v2007_v41, %v2006_v9 }
 0x2df   : > { %1796 = vst.msk [vmem:[#allocation3 + $0xf1] sm:$0xff] %vm1766_vm14, %v4685_v38  ;;  %v1857_v36 = vpop.permute.xlu0 %1856 }
 0x2e0   : > { %1797 = vst.msk [vmem:[#allocation3 + $0xf9] sm:$0x7f] %vm1768_vm15, %v4690_v40  ;;  %3384 = vmatprep.mubr.msk.bf16.mxu1 %vm267_vm12, %v2026_v37 }
 0x2e1   : > { %1926 = vst.msk [vmem:[#allocation3 + $0xef] sm:$0xfe] %vm1896_vm0, %v1857_v36  ;;  %3385 = vmatmul.mubr.msk.bf16.gmra.mrb[24].mxu1 %vm267_vm12, %v2027_v46  ;;  %v1859_v17 = vpop.permute.xlu1 %1858 }
 0x2e2   : > { %1927 = vst.msk [vmem:[#allocation3 + $0xf7] sm:$0xff] %vm1898_vm1, %v1859_v17 }
 0x2e3   : > { %v1861_v44 = vpop.permute.xlu0 %1860 }
 0x2e4   : > { %1928 = vst.msk [vmem:[#allocation3 + $0xff] sm:$0xfe] %vm1896_vm0, %v1861_v44 }
 0x2e5   : > { %v1863_v15 = vpop.permute.xlu1 %1862 }
 0x2e6   : > { %1929 = vst.msk [vmem:[#allocation3 + $0x107] sm:$0xff] %vm1898_vm1, %v1863_v15 }
 0x2e9   : > { %v2010_v38 = vld [vmem:[#allocation3 + $0xf0] sm:$0xff]  ;;  %v2011_v16 = vld [vmem:[#allocation3 + $0xf8] sm:$0xff] }
 0x2ea   : > { %v2028_v40 = vpack.c.bf16 %v2011_v16, %v2010_v38 }
 0x2ec   : > { %3388 = vmatprep.mubr.msk.bf16.mxu1 %vm267_vm12, %v2028_v40 }
 0x2ed   : > { %v2012_v21 = vld [vmem:[#allocation3 + $0x100] sm:$0xff]  ;;  %v2013_v7 = vld [vmem:[#allocation3 + $0x108] sm:$0xff] }
 0x2ee   : > { %v2029_v23 = vpack.c.bf16 %v2013_v7, %v2012_v21 }
 0x2f0   : > { %3389 = vmatmul.mubr.msk.bf16.gmra.mrb[28].mxu1 %vm267_vm12, %v2029_v23 }
 0x2f1   : > { %3396 = vmatprep.mubr.msk.bf16.mxu1 %vm267_vm12, %v1963_v27 }
 0x2f8   : > { %3397 = vmatmul.mubr.msk.bf16.vlgmr.msra.gmra.mrb[0].mxu1 %vm267_vm12, %v4727_v35  ;;  %v2508_v35 = vld [vmem:[#allocation3 + $0x110] sm:$0xff] }
 0x2f9   : > { %3429 = vmatpush3.bf16.msra.mxu1 %v4750_v14  ;;  %3400 = vmatprep.mubr.msk.bf16.mxu1 %vm267_vm12, %v4729_v59 }
 0x2fa   : > { %3597 = vmatprep.subr.msk.bf16.mxu1 %vm2091_vm11, %v3778_v6 }
 0x2fd   : > { %3431 = vmatpush3.bf16.msra.mxu1 %v2588_v52 }
 0x300   : > { %3401 = vmatmul.mubr.msk.bf16.gmra.mrb[4].mxu1 %vm267_vm12, %v4763_v31 }
 0x301   : > { %3404 = vmatprep.mubr.msk.bf16.mxu1 %vm267_vm12, %v4765_v10 }
 0x308   : > { %3405 = vmatmul.mubr.msk.bf16.gmra.mrb[8].mxu1 %vm267_vm12, %v4787_v12 }
 0x309   : > { %3408 = vmatprep.mubr.msk.bf16.mxu1 %vm267_vm12, %v4789_v19 }
 0x310   : > { %3409 = vmatmul.mubr.msk.bf16.gmra.mrb[12].mxu1 %vm267_vm12, %v4811_v5 }
 0x311   : > { %3412 = vmatprep.mubr.msk.bf16.mxu1 %vm267_vm12, %v4813_v26 }
 0x318   : > { %3413 = vmatmul.mubr.msk.bf16.gmra.mrb[16].mxu1 %vm267_vm12, %v4835_v24 }
 0x319   : > { %3416 = vmatprep.mubr.msk.bf16.mxu1 %vm267_vm12, %v4837_v34 }
 0x320   : > { %3417 = vmatmul.mubr.msk.bf16.gmra.mrb[20].mxu1 %vm267_vm12, %v4859_v32 }
 0x321   : > { %3420 = vmatprep.mubr.msk.bf16.mxu1 %vm267_vm12, %v4861_v13 }
 0x328   : > { %3421 = vmatmul.mubr.msk.bf16.gmra.mrb[24].mxu1 %vm267_vm12, %v2026_v37 }
 0x329   : > { %3424 = vmatprep.mubr.msk.bf16.mxu1 %vm267_vm12, %v2027_v46 }
 0x330   : > { %3425 = vmatmul.mubr.msk.bf16.gmra.mrb[28].mxu1 %vm267_vm12, %v2028_v40 }
 0x331   : > { %3432 = vmatprep.mubr.msk.bf16.mxu1 %vm267_vm12, %v4729_v59  ;;  %v2509_v59 = vld [vmem:[#allocation3 + $0x118] sm:$0xff] }
 0x332   : > { %v2525_v14 = vpack.c.bf16 %v2509_v59, %v2508_v35 }
 0x338   : > { %3433 = vmatmul.mubr.msk.bf16.vlgmr.msra.gmra.mrb[0].mxu1 %vm267_vm12, %v4763_v31  ;;  %v4959_v31 = vld [vmem:[%s5070_s4] ss:$0 sm:$0xff] }
 0x339   : > { %3436 = vmatprep.mubr.msk.bf16.mxu1 %vm267_vm12, %v4765_v10 }
 0x340   : > { %3437 = vmatmul.mubr.msk.bf16.gmra.mrb[4].mxu1 %vm267_vm12, %v4787_v12 }
 0x341   : > { %3440 = vmatprep.mubr.msk.bf16.mxu1 %vm267_vm12, %v4789_v19 }
 0x348   : > { %3441 = vmatmul.mubr.msk.bf16.gmra.mrb[8].mxu1 %vm267_vm12, %v4811_v5 }
 0x349   : > { %3444 = vmatprep.mubr.msk.bf16.mxu1 %vm267_vm12, %v4813_v26 }
 0x350   : > { %3445 = vmatmul.mubr.msk.bf16.gmra.mrb[12].mxu1 %vm267_vm12, %v4835_v24 }
 0x351   : > { %3448 = vmatprep.mubr.msk.bf16.mxu1 %vm267_vm12, %v4837_v34 }
 0x358   : > { %3449 = vmatmul.mubr.msk.bf16.gmra.mrb[16].mxu1 %vm267_vm12, %v4859_v32 }
 0x359   : > { %3452 = vmatprep.mubr.msk.bf16.mxu1 %vm267_vm12, %v4861_v13 }
 0x360   : > { %3453 = vmatmul.mubr.msk.bf16.gmra.mrb[20].mxu1 %vm267_vm12, %v2026_v37 }
 0x361   : > { %3456 = vmatprep.mubr.msk.bf16.mxu1 %vm267_vm12, %v2027_v46 }
 0x368   : > { %3457 = vmatmul.mubr.msk.bf16.gmra.mrb[24].mxu1 %vm267_vm12, %v2028_v40 }
 0x369   : > { %3460 = vmatprep.mubr.msk.bf16.mxu1 %vm267_vm12, %v2029_v23 }
 0x370   : > { %3461 = vmatmul.mubr.msk.bf16.gmra.mrb[28].mxu1 %vm267_vm12, %v2525_v14 }
 0x40b   : > { %v3434_v10 = vpop.f32.mrb[0].mxu1 }
 0x40c   : > { %v2791_v12 = vadd.f32 %v3434_v10, %v4959_v31  ;;  %v2624_v19 = vpop.f32.mrb[1].mxu1 }
 0x40d   : > { %v2789_v5 = vadd.f32 %v4959_v31, %v2624_v19  ;;  %v3435_v26 = vpop.f32.mrb[2].mxu1 }
 0x40e   : > { %v2823_v0 = vmax.f32 %v2791_v12, 0.0  ;;  %v2792_v51 = vadd.f32 %v3435_v26, %v4959_v31  ;;  %v2627_v42 = vpop.f32.mrb[3].mxu1 }
 0x40f   : > { %v2821_v43 = vmax.f32 %v2789_v5, 0.0  ;;  %v2790_v54 = vadd.f32 %v4959_v31, %v2627_v42 }
 0x410   : > { %2855 = vst.msk [vmem:[%s4966_s30 + $0x10] sm:$0xff] %vm1766_vm14, %v2823_v0  ;;  %v2824_v53 = vmax.f32 %v2792_v51, 0.0 }
 0x411   : > { %2853 = vst.msk [vmem:[%s4966_s30] sm:$0xff] %vm1766_vm14, %v2821_v43  ;;  %v2822_v2 = vmax.f32 %v2790_v54, 0.0 }
 0x412   : > { %2856 = vst.msk [vmem:[%s4966_s30 + $0x18] sm:$0xff] %vm1766_vm14, %v2824_v53 }
 0x413   : > { %2854 = vst.msk [vmem:[%s4966_s30 + $0x8] sm:$0xff] %vm1766_vm14, %v2822_v2  ;;  %v3438_v28 = vpop.f32.mrb[4].mxu1 }
 0x414   : > { %v2795_v47 = vadd.f32 %v3438_v28, %v4959_v31  ;;  %v2640_v50 = vpop.f32.mrb[5].mxu1 }
 0x415   : > { %v2793_v24 = vadd.f32 %v4959_v31, %v2640_v50  ;;  %v3439_v29 = vpop.f32.mrb[6].mxu1 }
 0x416   : > { %v2827_v34 = vmax.f32 %v2795_v47, 0.0  ;;  %v2796_v56 = vadd.f32 %v3439_v29, %v4959_v31  ;;  %v2643_v57 = vpop.f32.mrb[7].mxu1 }
 0x417   : > { %v2825_v45 = vmax.f32 %v2793_v24, 0.0  ;;  %v2794_v48 = vadd.f32 %v4959_v31, %v2643_v57 }
 0x418   : > { %2859 = vst.msk [vmem:[%s4966_s30 + $0x30] sm:$0xff] %vm1766_vm14, %v2827_v34  ;;  %v2828_v49 = vmax.f32 %v2796_v56, 0.0 }
 0x419   : > { %2857 = vst.msk [vmem:[%s4966_s30 + $0x20] sm:$0xff] %vm1766_vm14, %v2825_v45  ;;  %v2826_v58 = vmax.f32 %v2794_v48, 0.0 }
 0x41a   : > { %2860 = vst.msk [vmem:[%s4966_s30 + $0x38] sm:$0xff] %vm1766_vm14, %v2828_v49 }
 0x41b   : > { %2858 = vst.msk [vmem:[%s4966_s30 + $0x28] sm:$0xff] %vm1766_vm14, %v2826_v58  ;;  %v3442_v1 = vpop.f32.mrb[8].mxu1 }
 0x41c   : > { %v2799_v11 = vadd.f32 %v3442_v1, %v4959_v31  ;;  %v2656_v8 = vpop.f32.mrb[9].mxu1 }
 0x41d   : > { %v2797_v63 = vadd.f32 %v4959_v31, %v2656_v8  ;;  %v3443_v62 = vpop.f32.mrb[10].mxu1 }
 0x41e   : > { %v2831_v32 = vmax.f32 %v2799_v11, 0.0  ;;  %v2800_v33 = vadd.f32 %v3443_v62, %v4959_v31  ;;  %v2659_v13 = vpop.f32.mrb[11].mxu1 }
 0x41f   : > { %v2829_v3 = vmax.f32 %v2797_v63, 0.0  ;;  %v2798_v20 = vadd.f32 %v4959_v31, %v2659_v13 }
 0x420   : > { %2863 = vst.msk [vmem:[%s4966_s30 + $0x50] sm:$0xff] %vm1766_vm14, %v2831_v32  ;;  %v2832_v22 = vmax.f32 %v2800_v33, 0.0 }
 0x421   : > { %2861 = vst.msk [vmem:[%s4966_s30 + $0x40] sm:$0xff] %vm1766_vm14, %v2829_v3  ;;  %v2830_v25 = vmax.f32 %v2798_v20, 0.0 }
 0x422   : > { %2864 = vst.msk [vmem:[%s4966_s30 + $0x58] sm:$0xff] %vm1766_vm14, %v2832_v22 }
 0x423   : > { %2862 = vst.msk [vmem:[%s4966_s30 + $0x48] sm:$0xff] %vm1766_vm14, %v2830_v25  ;;  %v3446_v18 = vpop.f32.mrb[12].mxu1 }
 0x424   : > { %v2803_v39 = vadd.f32 %v3446_v18, %v4959_v31  ;;  %v2672_v4 = vpop.f32.mrb[13].mxu1 }
 0x425   : > { %v2801_v60 = vadd.f32 %v4959_v31, %v2672_v4  ;;  %v3447_v61 = vpop.f32.mrb[14].mxu1 }
 0x426   : > { %v2835_v9 = vmax.f32 %v2803_v39, 0.0  ;;  %v2804_v41 = vadd.f32 %v3447_v61, %v4959_v31  ;;  %v2675_v37 = vpop.f32.mrb[15].mxu1 }
 0x427   : > { %v2833_v36 = vmax.f32 %v2801_v60, 0.0  ;;  %v2802_v46 = vadd.f32 %v4959_v31, %v2675_v37 }
 0x428   : > { %2867 = vst.msk [vmem:[%s4966_s30 + $0x70] sm:$0xff] %vm1766_vm14, %v2835_v9  ;;  %v2836_v17 = vmax.f32 %v2804_v41, 0.0 }
 0x429   : > { %2865 = vst.msk [vmem:[%s4966_s30 + $0x60] sm:$0xff] %vm1766_vm14, %v2833_v36  ;;  %v2834_v44 = vmax.f32 %v2802_v46, 0.0 }
 0x42a   : > { %2868 = vst.msk [vmem:[%s4966_s30 + $0x78] sm:$0xff] %vm1766_vm14, %v2836_v17 }
 0x42b   : > { %2866 = vst.msk [vmem:[%s4966_s30 + $0x68] sm:$0xff] %vm1766_vm14, %v2834_v44  ;;  %v3450_v15 = vpop.f32.mrb[16].mxu1 }
 0x42c   : > { %v2807_v38 = vadd.f32 %v3450_v15, %v4959_v31  ;;  %v2688_v16 = vpop.f32.mrb[17].mxu1 }
 0x42d   : > { %v2805_v40 = vadd.f32 %v4959_v31, %v2688_v16  ;;  %v3451_v30 = vpop.f32.mrb[18].mxu1 }
 0x42e   : > { %v2839_v55 = vmax.f32 %v2807_v38, 0.0  ;;  %v2808_v21 = vadd.f32 %v3451_v30, %v4959_v31  ;;  %v2691_v7 = vpop.f32.mrb[19].mxu1 }
 0x42f   : > { %v2837_v27 = vmax.f32 %v2805_v40, 0.0  ;;  %v2806_v23 = vadd.f32 %v4959_v31, %v2691_v7 }
 0x430   : > { %2871 = vst.msk [vmem:[%s4966_s30 + $0x90] sm:$0xff] %vm1766_vm14, %v2839_v55  ;;  %v2840_v6 = vmax.f32 %v2808_v21, 0.0 }
 0x431   : > { %2869 = vst.msk [vmem:[%s4966_s30 + $0x80] sm:$0xff] %vm1766_vm14, %v2837_v27  ;;  %v2838_v52 = vmax.f32 %v2806_v23, 0.0 }
 0x432   : > { %2872 = vst.msk [vmem:[%s4966_s30 + $0x98] sm:$0xff] %vm1766_vm14, %v2840_v6 }
 0x433   : > { %2870 = vst.msk [vmem:[%s4966_s30 + $0x88] sm:$0xff] %vm1766_vm14, %v2838_v52  ;;  %v3454_v35 = vpop.f32.mrb[20].mxu1 }
 0x434   : > { %v2811_v59 = vadd.f32 %v3454_v35, %v4959_v31  ;;  %v2704_v14 = vpop.f32.mrb[21].mxu1 }
 0x435   : > { %v2809_v10 = vadd.f32 %v4959_v31, %v2704_v14  ;;  %v3455_v12 = vpop.f32.mrb[22].mxu1 }
 0x436   : > { %v2843_v19 = vmax.f32 %v2811_v59, 0.0  ;;  %v2812_v5 = vadd.f32 %v3455_v12, %v4959_v31  ;;  %v2707_v26 = vpop.f32.mrb[23].mxu1 }
 0x437   : > { %v2841_v0 = vmax.f32 %v2809_v10, 0.0  ;;  %v2810_v51 = vadd.f32 %v4959_v31, %v2707_v26 }
 0x438   : > { %2875 = vst.msk [vmem:[%s4966_s30 + $0xb0] sm:$0xff] %vm1766_vm14, %v2843_v19  ;;  %v2844_v42 = vmax.f32 %v2812_v5, 0.0 }
 0x439   : > { %2873 = vst.msk [vmem:[%s4966_s30 + $0xa0] sm:$0xff] %vm1766_vm14, %v2841_v0  ;;  %v2842_v43 = vmax.f32 %v2810_v51, 0.0 }
 0x43a   : > { %2876 = vst.msk [vmem:[%s4966_s30 + $0xb8] sm:$0xff] %vm1766_vm14, %v2844_v42 }
 0x43b   : > { %2874 = vst.msk [vmem:[%s4966_s30 + $0xa8] sm:$0xff] %vm1766_vm14, %v2842_v43  ;;  %v3458_v54 = vpop.f32.mrb[24].mxu1 }
 0x43c   : > { %v2815_v53 = vadd.f32 %v3458_v54, %v4959_v31  ;;  %v2720_v2 = vpop.f32.mrb[25].mxu1 }
 0x43d   : > { %v2813_v28 = vadd.f32 %v4959_v31, %v2720_v2  ;;  %v3459_v47 = vpop.f32.mrb[26].mxu1 }
 0x43e   : > { %v2847_v50 = vmax.f32 %v2815_v53, 0.0  ;;  %v2816_v24 = vadd.f32 %v3459_v47, %v4959_v31  ;;  %v2723_v29 = vpop.f32.mrb[27].mxu1 }
 0x43f   : > { %v2845_v34 = vmax.f32 %v2813_v28, 0.0  ;;  %v2814_v56 = vadd.f32 %v4959_v31, %v2723_v29 }
 0x440   : > { %2879 = vst.msk [vmem:[%s4966_s30 + $0xd0] sm:$0xff] %vm1766_vm14, %v2847_v50  ;;  %v2848_v57 = vmax.f32 %v2816_v24, 0.0 }
 0x441   : > { %2877 = vst.msk [vmem:[%s4966_s30 + $0xc0] sm:$0xff] %vm1766_vm14, %v2845_v34  ;;  %v2846_v45 = vmax.f32 %v2814_v56, 0.0 }
 0x442   : > { %2880 = vst.msk [vmem:[%s4966_s30 + $0xd8] sm:$0xff] %vm1766_vm14, %v2848_v57 }
 0x443   : > { %2878 = vst.msk [vmem:[%s4966_s30 + $0xc8] sm:$0xff] %vm1766_vm14, %v2846_v45  ;;  %v3462_v48 = vpop.f32.mrb[28].mxu1 }
 0x444   : > { %v2819_v49 = vadd.f32 %v3462_v48, %v4959_v31  ;;  %v2736_v58 = vpop.f32.mrb[29].mxu1 }
 0x445   : > { %v2817_v1 = vadd.f32 %v4959_v31, %v2736_v58  ;;  %v3463_v11 = vpop.f32.mrb[30].mxu1 }
 0x446   : > { %v2851_v8 = vmax.f32 %v2819_v49, 0.0  ;;  %v2820_v63 = vadd.f32 %v3463_v11, %v4959_v31  ;;  %v2739_v62 = vpop.f32.mrb[31].mxu1 }
 0x447   : > { %v2849_v32 = vmax.f32 %v2817_v1, 0.0  ;;  %v2818_v33 = vadd.f32 %v4959_v31, %v2739_v62 }
 0x448   : > { %2883 = vst.msk [vmem:[%s4966_s30 + $0xf0] sm:$0xff] %vm1766_vm14, %v2851_v8  ;;  %v2852_v13 = vmax.f32 %v2820_v63, 0.0 }
 0x449   : > { %2881 = vst.msk [vmem:[%s4966_s30 + $0xe0] sm:$0xff] %vm1766_vm14, %v2849_v32  ;;  %v2850_v3 = vmax.f32 %v2818_v33, 0.0 }
 0x44a   : > { %2884 = vst.msk [vmem:[%s4966_s30 + $0xf8] sm:$0xff] %vm1766_vm14, %v2852_v13 }
 0x44b   : > { %2882 = vst.msk [vmem:[%s4966_s30 + $0xe8] sm:$0xff] %vm1766_vm14, %v2850_v3 }
 0x44c PF: > { %s15_s18 = sadd.s32 1, %s3785_s18  }
 0x44d   : > { %p12_p4 = scmp.ge.s32.totalorder %s15_s18, 4  }
 0x44f   :  { %14 = sbr.rel (!%p12_p4) target bundleno = 1 (0x1), region = 80 }

// kernel: unet_forward.13
= control target key start
LH: loop header
LB: loop body
LE: loop exit
PB: predicated region body
PF: predicated region fallthrough
CT: control target
= control target key end

     0   :  { %s435_s12 = smov 0   ;;  %s466_s0 = inlined_call_operand.vmem [shape: bf16[2,64,8], index: 0, kind: input, shape index: {}]   ;;  %s467_s1 = inlined_call_operand.vmem [shape: bf16[8,32], index: 1, kind: input, shape index: {}]   ;;  %s468_s2 = inlined_call_operand.vmem [shape: f32[1,32], index: 2, kind: input, shape index: {}]   ;;  %s469_s3 = inlined_call_operand.vmem [shape: f32[2,64,32], index: 3, kind: output, shape index: {}]  }
   0x1 LB: > { %s354_s13 = sadd.s32 4294967295, %s413_s12   ;;  %p358_p0 = scmp.ge.s32.totalorder %s413_s12, 1  ;;  %s413_s12 = sphi %s435_s12, %s13_s12  }
   0x2   : > { %p137_p1 = scmp.lt.s32.totalorder %s413_s12, 3 }
   0x4   : > { %p138_p2 = pnand %p358_p0, %p137_p1 }
   0x5   : > { %v173_v0 = vld [vmem:[%s467_s1] sm:$0xf] (!%p138_p2)  ;;  %vm221_vm0 = vcmask (!%p138_p2), 1043456   ;;  %p161_p3 = scmp.lt.s32.totalorder (!%p138_p2), %s354_s13, 1  ;;  %vm208_vm1 = vcmask (!%p138_p2), 64512   ;;  %vm290_vm2 = vcmask (!%p138_p2), 261120  }
   0x6   : > { %141 = sbr.rel (%p138_p2) target bundleno = 236 (0xec), region = 32  ;;  %393 = vmatprep.subr.msk.bf16.mxu0 (!%p138_p2), %vm221_vm0, %v173_v0  ;;  %394 = vmatprep.subr.msk.bf16.mxu1 (!%p138_p2), %vm221_vm0, %v173_v0  ;;  %v223_v1 = vsel (!%p138_p2), %vm221_vm0, %v173_v0, 0  ;;  %v363_v6 = vld [vmem:[%s468_s2] ss:$0 sm:$0xff] (!%p138_p2) }
   0x7   : > { %382 = vmatpush3.bf16.msra.mxu0 (!%p138_p2), %v223_v1  ;;  %392 = vmatpush3.bf16.msra.mxu1 (!%p138_p2), %v223_v1 }
   0xd   : > { %s471_s13 = smov (!%p161_p3, %s354_s13), 1 }
   0xe   : > { %s374_s16 = sshll.u32 %s471_s13, 5  ;;  %s375_s20 = sshll.u32 %s471_s13, 6 }
   0xf   : > { %s165_s19 = scalar_lea.vmem %s466_s0, %s374_s16  ;;  %s170_s25 = scalar_lea.vmem %s469_s3, %s375_s20 }
  0x10   : > { %v403_v2 = vld [vmem:[%s165_s19] sm:$0xff]   ;;  %v404_v3 = vld [vmem:[%s165_s19 + $0x10] sm:$0xff]   ;;  %v405_v4 = vld [vmem:[%s165_s19 + $0x8] sm:$0xff]  }
  0x11   : > { %383 = vmatprep.mubr.msk.bf16.mxu0 %vm208_vm1, %v403_v2  ;;  %387 = vmatprep.mubr.msk.bf16.mxu1 %vm208_vm1, %v404_v3  ;;  %v406_v5 = vld [vmem:[%s165_s19 + $0x18] sm:$0xff]  }
  0x12   : > { %384 = vmatmul.mubr.msk.bf16.vlgmr.msra.gmra.mrb[0].mxu0 %vm208_vm1, %v405_v4  ;;  %388 = vmatmul.mubr.msk.bf16.vlgmr.msra.gmra.mrb[0].mxu1 %vm208_vm1, %v406_v5 }
  0xe5   : > { %v385_v7 = vpop.f32.mrb[0].mxu0  ;;  %v389_v9 = vpop.f32.mrb[0].mxu1 }
  0xe6   : > { %v268_v8 = vadd.f32 %v385_v7, %v363_v6  ;;  %v259_v10 = vpop.f32.mrb[1].mxu0  ;;  %v284_v11 = vadd.f32 %v389_v9, %v363_v6  ;;  %v275_v13 = vpop.f32.mrb[1].mxu1 }
  0xe7   : > { %v260_v12 = vadd.f32 %v363_v6, %v259_v10  ;;  %v386_v14 = vpop.f32.mrb[2].mxu0  ;;  %v276_v15 = vadd.f32 %v363_v6, %v275_v13  ;;  %v390_v17 = vpop.f32.mrb[2].mxu1 }
  0xe8   : > { %293 = vst.msk [vmem:[%s170_s25 + $0x10] sm:$0xff] %vm290_vm2, %v268_v8  ;;  %v271_v16 = vadd.f32 %v386_v14, %v363_v6  ;;  %v262_v18 = vpop.f32.mrb[3].mxu0  ;;  %297 = vst.msk [vmem:[%s170_s25 + $0x30] sm:$0xff] %vm290_vm2, %v284_v11  ;;  %v287_v19 = vadd.f32 %v390_v17, %v363_v6  ;;  %v278_v21 = vpop.f32.mrb[3].mxu1 }
  0xe9   : > { %291 = vst.msk [vmem:[%s170_s25] sm:$0xff] %vm290_vm2, %v260_v12  ;;  %v263_v20 = vadd.f32 %v363_v6, %v262_v18  ;;  %295 = vst.msk [vmem:[%s170_s25 + $0x20] sm:$0xff] %vm290_vm2, %v276_v15  ;;  %v279_v22 = vadd.f32 %v363_v6, %v278_v21 }
  0xea   : > { %294 = vst.msk [vmem:[%s170_s25 + $0x18] sm:$0xff] %vm290_vm2, %v271_v16  ;;  %298 = vst.msk [vmem:[%s170_s25 + $0x38] sm:$0xff] %vm290_vm2, %v287_v19 }
  0xeb   : > { %292 = vst.msk [vmem:[%s170_s25 + $0x8] sm:$0xff] %vm290_vm2, %v263_v20  ;;  %296 = vst.msk [vmem:[%s170_s25 + $0x28] sm:$0xff] %vm290_vm2, %v279_v22 }
  0xec PF: > { %s13_s12 = sadd.s32 1, %s413_s12  }
  0xed   : > { %p10_p4 = scmp.ge.s32.totalorder %s13_s12, 4  }
  0xef   :  { %12 = sbr.rel (!%p10_p4) target bundleno = 1 (0x1), region = 62 }

// kernel: unet_forward.12
= control target key start
LH: loop header
LB: loop body
LE: loop exit
PB: predicated region body
PF: predicated region fallthrough
CT: control target
= control target key end

     0   :  { %s1733_s18 = smov 0   ;;  %s2074_s0 = inlined_call_operand.vmem [shape: bf16[2,8,8,32], index: 0, kind: input, shape index: {}]   ;;  %s2075_s1 = inlined_call_operand.vmem [shape: bf16[3,96,8], index: 1, kind: input, shape index: {}]   ;;  %s2076_s2 = inlined_call_operand.vmem [shape: f32[1,8], index: 2, kind: input, shape index: {}]   ;;  %s2077_s3 = inlined_call_operand.vmem [shape: bf16[3,24,8], index: 3, kind: input, shape index: {}]   ;;  %s2078_s4 = inlined_call_operand.vmem [shape: f32[1,8], index: 4, kind: input, shape index: {}]   ;;  %s2079_s5 = inlined_call_operand.vmem [shape: f32[2,64,8], index: 5, kind: output, shape index: {}]  }
   0x1 LB: > { %s1310_s19 = sadd.s32 4294967295, %s1696_s18   ;;  %p1314_p0 = scmp.ge.s32.totalorder %s1696_s18, 1  ;;  %s1696_s18 = sphi %s1733_s18, %s15_s18  }
   0x2   : > { %p187_p1 = scmp.lt.s32.totalorder %s1696_s18, 3 }
   0x4   : > { %p188_p2 = pnand %p1314_p0, %p187_p1 }
   0x5   : > { %p215_p3 = scmp.lt.s32.totalorder (!%p188_p2), %s1310_s19, 1  ;;  %v1666_v0 = vld [vmem:[%s2075_s1 + $0x30] sm:$0xff] (!%p188_p2)   ;;  %v1667_v1 = vld [vmem:[%s2075_s1 + $0x38] sm:$0xff] (!%p188_p2)   ;;  %vm231_vm0 = vcmask (!%p188_p2), 253952   ;;  %vm240_vm1 = vcmask (!%p188_p2), 778752   ;;  %v1698_v2 = vmov (!%p188_p2), 0.0  }
   0x6   : > { %191 = sbr.rel (%p188_p2) target bundleno = 821 (0x335), region = 40  ;;  %1470 = vmatprep.subr.bf16.mxu0 (!%p188_p2), %v1666_v0  ;;  %232 = vst.msk [vmem:[#allocation2 + $0x8] sm:$0x1] (!%p188_p2), %vm231_vm0, %v1698_v2  ;;  %233 = vst.msk [vmem:[#allocation2 + $0x10] sm:$0x1] (!%p188_p2), %vm231_vm0, %v1698_v2  ;;  %v1668_v3 = vld [vmem:[%s2075_s1 + $0x40] sm:$0xff] (!%p188_p2)  }
   0x7   : > { %241 = vst.msk [vmem:[#allocation2 + $0xf] sm:$0x1] (!%p188_p2), %vm240_vm1, %v1698_v2  ;;  %242 = vst.msk [vmem:[#allocation2 + $0x17] sm:$0x1] (!%p188_p2), %vm240_vm1, %v1698_v2  ;;  %1471 = vmatpush3.bf16.msra.mxu0 (!%p188_p2), %v1666_v0  ;;  %vm226_vm2 = vcmask (!%p188_p2), 785408   ;;  %v1669_v11 = vld [vmem:[%s2075_s1 + $0x48] sm:$0xff] (!%p188_p2)  }
   0x8   : > { %234 = vst.msk [vmem:[#allocation2 + $0x18] sm:$0x1] (!%p188_p2), %vm231_vm0, %v1698_v2  ;;  %235 = vst.msk [vmem:[#allocation2 + $0x20] sm:$0x1] (!%p188_p2), %vm231_vm0, %v1698_v2  ;;  %1472 = vmatprep.subr.bf16.mxu0 (!%p188_p2), %v1667_v1  ;;  %v1796_v12 = vld [vmem:[%s2075_s1 + $0x60] sm:$0xff] (!%p188_p2)   ;;  %v1811_v15 = vld [vmem:[%s2075_s1 + $0x68] sm:$0xff] (!%p188_p2)  }
   0x9   : > { %236 = vst.msk [vmem:[#allocation2 + $0x28] sm:$0x1] (!%p188_p2), %vm231_vm0, %v1698_v2  ;;  %237 = vst.msk [vmem:[#allocation2 + $0x30] sm:$0x1] (!%p188_p2), %vm231_vm0, %v1698_v2  ;;  %1566 = vmatprep.subr.bf16.mxu1 (!%p188_p2), %v1796_v12  ;;  %s1699_s11 = smov (!%p188_p2), 32   ;;  %s1700_s12 = smov (!%p188_p2), 64  }
   0xa   : > { %238 = vst.msk [vmem:[#allocation2 + $0x38] sm:$0x1] (!%p188_p2), %vm231_vm0, %v1698_v2  ;;  %239 = vst.msk [vmem:[#allocation2 + $0x40] sm:$0x1] (!%p188_p2), %vm231_vm0, %v1698_v2  ;;  %1572 = vmatpush3.bf16.msra.mxu1 (!%p188_p2), %v1796_v12  ;;  %v1671_v21 = vld [vmem:[%s2075_s1 + $0x50] sm:$0xff] (!%p188_p2)   ;;  %v1673_v25 = vld [vmem:[%s2075_s1 + $0x58] sm:$0xff] (!%p188_p2)  }
   0xb   : > { %243 = vst.msk [vmem:[#allocation2 + $0x1f] sm:$0x1] (!%p188_p2), %vm240_vm1, %v1698_v2  ;;  %244 = vst.msk [vmem:[#allocation2 + $0x27] sm:$0x1] (!%p188_p2), %vm240_vm1, %v1698_v2  ;;  %1473 = vmatpush3.bf16.msra.mxu0 (!%p188_p2), %v1667_v1  ;;  %1567 = vmatprep.subr.bf16.mxu1 (!%p188_p2), %v1811_v15  ;;  %v1830_v22 = vld [vmem:[%s2075_s1 + $0x70] sm:$0xff] (!%p188_p2)   ;;  %v1848_v26 = vld [vmem:[%s2075_s1 + $0x78] sm:$0xff] (!%p188_p2)  }
   0xc   : > { %245 = vst.msk [vmem:[#allocation2 + $0x2f] sm:$0x1] (!%p188_p2), %vm240_vm1, %v1698_v2  ;;  %246 = vst.msk [vmem:[#allocation2 + $0x37] sm:$0x1] (!%p188_p2), %vm240_vm1, %v1698_v2  ;;  %1474 = vmatprep.subr.bf16.mxu0 (!%p188_p2), %v1668_v3  ;;  %v1853_v27 = vld [vmem:[%s2075_s1] sm:$0xff] (!%p188_p2)   ;;  %v1868_v29 = vld [vmem:[%s2075_s1 + $0x88] sm:$0xff] (!%p188_p2)  }
   0xd   : > { %s2081_s19 = smov (!%p215_p3, %s1310_s19), 1  ;;  %247 = vst.msk [vmem:[#allocation2 + $0x3f] sm:$0x1] %vm240_vm1, %v1698_v2  ;;  %248 = vst.msk [vmem:[#allocation2 + $0x47] sm:$0x1] %vm240_vm1, %v1698_v2  ;;  %v1859_v28 = vld [vmem:[%s2075_s1 + $0x80] sm:$0xff]  }
   0xe   : > { %s1401_s24 = sshll.u32 %s2081_s19, 5  ;;  %227 = vst.msk [vmem:[#allocation2] sm:$0xff] %vm226_vm2, %v1698_v2  ;;  %229 = vst.msk [vmem:[#allocation2 + $0x48] sm:$0xff] %vm226_vm2, %v1698_v2  ;;  %1573 = vmatpush3.bf16.msra.mxu1 %v1811_v15  ;;  %vm320_vm3 = vcmask 523520   ;;  %vm329_vm4 = vcmask 260096   ;;  %vm362_vm5 = vcmask 785921  }
   0xf   : > { %s219_s29 = scalar_lea.vmem %s2074_s0, %s1401_s24  ;;  %1475 = vmatpush3.bf16.msra.mxu0 %v1668_v3  ;;  %1568 = vmatprep.subr.bf16.mxu1 %v1830_v22  ;;  %v1677_v60 = vld [vmem:[%s2075_s1 + $0x8] sm:$0xff]   ;;  %v1679_v61 = vld [vmem:[%s2075_s1 + $0x10] sm:$0xff]   ;;  %vm254_vm6 = vcmask 57344   ;;  %vm263_vm7 = vcmask 188544   ;;  %s1701_s16 = smov 8   ;;  %vm249_vm8 = vcmask 195584  }
  0x10   : > { %v1780_v4 = vld [vmem:[%s219_s29] sm:$0xff]   ;;  %v1782_v5 = vld [vmem:[%s219_s29 + $0x8] sm:$0xff]   ;;  %v1788_v10 = vld [vmem:[%s219_s29 + $0x10] sm:$0xff]   ;;  %1476 = vmatprep.subr.bf16.mxu0 %v1669_v11  ;;  %259 = vst.msk [vmem:[#allocation3 + $0x28] sm:$0x1] %vm254_vm6, %v1698_v2  ;;  %s1702_s21 = smov 16  }
  0x11   : > { %v1405_v6 = vunpack.c.l.bf16 %v1780_v4  ;;  %v1406_v7 = vunpack.c.h.bf16 %v1780_v4  ;;  %v1409_v8 = vunpack.c.l.bf16 %v1782_v5  ;;  %v1410_v9 = vunpack.c.h.bf16 %v1782_v5  ;;  %v1802_v13 = vld [vmem:[%s219_s29 + $0x18] sm:$0xff]   ;;  %268 = vst.msk [vmem:[#allocation3 + $0x2f] sm:$0x1] %vm263_vm7, %v1698_v2  ;;  %264 = vst.msk [vmem:[#allocation3 + $0xf] sm:$0x1] %vm263_vm7, %v1698_v2  ;;  %s1402_s9 = sshll.u32 %s2081_s19, 6 }
  0x12   : > { %v1413_v16 = vunpack.c.l.bf16 %v1788_v10  ;;  %v1414_v17 = vunpack.c.h.bf16 %v1788_v10  ;;  %v1417_v19 = vunpack.c.l.bf16 %v1802_v13  ;;  %v1418_v20 = vunpack.c.h.bf16 %v1802_v13  ;;  %1574 = vmatpush3.bf16.msra.mxu1 %v1830_v22  ;;  %v1683_v13 = vld [vmem:[%s2075_s1 + $0x28] sm:$0xff]   ;;  %255 = vst.msk [vmem:[#allocation3 + $0x8] sm:$0x1] %vm254_vm6, %v1698_v2  ;;  %256 = vst.msk [vmem:[#allocation3 + $0x10] sm:$0x1] %vm254_vm6, %v1698_v2 }
  0x13   : > { %v1626_v14 = vpack.i.bf16 %v1406_v7, %v1405_v6  ;;  %v1631_v18 = vpack.i.bf16 %v1410_v9, %v1409_v8  ;;  %1477 = vmatpush3.bf16.msra.mxu0 %v1669_v11  ;;  %1569 = vmatprep.subr.bf16.mxu1 %v1848_v26  ;;  %v1682_v11 = vld [vmem:[%s2075_s1 + $0x20] sm:$0xff]   ;;  %257 = vst.msk [vmem:[#allocation3 + $0x18] sm:$0x1] %vm254_vm6, %v1698_v2  ;;  %258 = vst.msk [vmem:[#allocation3 + $0x20] sm:$0x1] %vm254_vm6, %v1698_v2  ;;  %vm952_vm9 = vcmask 1043456  }
  0x14   : > { %v1646_v23 = vpack.i.bf16 %v1414_v17, %v1413_v16  ;;  %v1651_v24 = vpack.i.bf16 %v1418_v20, %v1417_v19  ;;  %1478 = vmatprep.subr.bf16.mxu0 %v1671_v21  ;;  %260 = vst.msk [vmem:[#allocation3 + $0x30] sm:$0x1] %vm254_vm6, %v1698_v2  ;;  %261 = vst.msk [vmem:[#allocation3 + $0x38] sm:$0x1] %vm254_vm6, %v1698_v2  ;;  %vm848_vm10 = vcmask 130112   ;;  %vm857_vm11 = vcmask 63488  }
  0x15   : > { %1627 = vrot.lane.b32.xlu0 %v1626_v14, %s1699_s11  ;;  %1637 = vrot.lane.b32.xlu1 %v1626_v14, %s1700_s12  ;;  %v655_v62 = vld [vmem:[#allocation2 + $0x48] sm:$0xff]  ;;  %v372_v5 = vld [vmem:[#allocation2] sm:$0xff]  ;;  %262 = vst.msk [vmem:[#allocation3 + $0x40] sm:$0x1] %vm254_vm6, %v1698_v2  ;;  %vm890_vm12 = vcmask 195713   ;;  %vm1246_vm13 = vcmask 64512  }
  0x16   : > { %1575 = vmatpush3.bf16.msra.mxu1 %v1848_v26  ;;  %265 = vst.msk [vmem:[#allocation3 + $0x17] sm:$0x1] %vm263_vm7, %v1698_v2  ;;  %266 = vst.msk [vmem:[#allocation3 + $0x1f] sm:$0x1] %vm263_vm7, %v1698_v2 }
  0x17   : > { %1479 = vmatpush3.bf16.msra.mxu0 %v1671_v21  ;;  %1570 = vmatprep.subr.bf16.mxu1 %v1859_v28  ;;  %267 = vst.msk [vmem:[#allocation3 + $0x27] sm:$0x1] %vm263_vm7, %v1698_v2  ;;  %269 = vst.msk [vmem:[#allocation3 + $0x37] sm:$0x1] %vm263_vm7, %v1698_v2 }
  0x18   : > { %1480 = vmatprep.subr.bf16.mxu0 %v1673_v25  ;;  %270 = vst.msk [vmem:[#allocation3 + $0x3f] sm:$0x1] %vm263_vm7, %v1698_v2  ;;  %271 = vst.msk [vmem:[#allocation3 + $0x47] sm:$0x1] %vm263_vm7, %v1698_v2 }
  0x19   : > { %1632 = vrot.lane.b32.xlu0 %v1631_v18, %s1699_s11  ;;  %1642 = vrot.lane.b32.xlu1 %v1631_v18, %s1700_s12  ;;  %250 = vst.msk [vmem:[#allocation3] sm:$0xff] %vm249_vm8, %v1698_v2  ;;  %252 = vst.msk [vmem:[#allocation3 + $0x48] sm:$0xff] %vm249_vm8, %v1698_v2  ;;  %v1685_v2 = vld [vmem:[%s2077_s3 + $0x14] ss:$0 sps:$4 sm:$0xff]  }
  0x1a   : > { %1576 = vmatpush3.bf16.msra.mxu1 %v1859_v28 }
  0x1b   : > { %1481 = vmatpush3.bf16.msra.mxu0 %v1673_v25  ;;  %1571 = vmatprep.subr.bf16.mxu1 %v1868_v29 }
  0x1c   : > { %1490 = vmatprep.subr.bf16.mxu0 %v1853_v27 }
  0x1d   : > { %1647 = vrot.lane.b32.xlu0 %v1646_v23, %s1699_s11  ;;  %1652 = vrot.lane.b32.xlu1 %v1651_v24, %s1699_s11 }
  0x1e   : > { %1577 = vmatpush3.bf16.msra.mxu1 %v1868_v29 }
  0x21   : > { %1657 = vrot.lane.b32.xlu0 %v1646_v23, %s1700_s12  ;;  %1662 = vrot.lane.b32.xlu1 %v1651_v24, %s1700_s12  ;;  %s224_s12 = scalar_lea.vmem %s2079_s5, %s1402_s9 }
  0x87   : > { %v1628_v30 = vpop.permute.xlu0 %1627  ;;  %v1638_v31 = vpop.permute.xlu1 %1637 }
  0x88   : > { %v1630_v32 = vunpack.i.h.bf16 %v1628_v30  ;;  %v1629_v33 = vunpack.i.l.bf16 %v1628_v30  ;;  %v1640_v34 = vunpack.i.h.bf16 %v1638_v31  ;;  %v1639_v35 = vunpack.i.l.bf16 %v1638_v31 }
  0x8a   : > { %322 = vst.msk [vmem:[#allocation2 + $0x10] sm:$0xff] %vm320_vm3, %v1630_v32  ;;  %321 = vst.msk [vmem:[#allocation2 + $0x8] sm:$0xff] %vm320_vm3, %v1629_v33 }
  0x8b   : > { %331 = vst.msk [vmem:[#allocation2 + $0x11] sm:$0x7f] %vm329_vm4, %v1406_v7  ;;  %330 = vst.msk [vmem:[#allocation2 + $0x9] sm:$0x7f] %vm329_vm4, %v1405_v6  ;;  %v1633_v36 = vpop.permute.xlu0 %1632  ;;  %v1643_v37 = vpop.permute.xlu1 %1642 }
  0x8c   : > { %363 = vst.msk [vmem:[#allocation2 + $0x7] sm:$0xfe] %vm362_vm5, %v1639_v35  ;;  %364 = vst.msk [vmem:[#allocation2 + $0xf] sm:$0xfe] %vm362_vm5, %v1640_v34  ;;  %v1635_v38 = vunpack.i.h.bf16 %v1633_v36  ;;  %v1634_v39 = vunpack.i.l.bf16 %v1633_v36  ;;  %v1645_v40 = vunpack.i.h.bf16 %v1643_v37  ;;  %v1644_v41 = vunpack.i.l.bf16 %v1643_v37 }
  0x8e   : > { %324 = vst.msk [vmem:[#allocation2 + $0x20] sm:$0xff] %vm320_vm3, %v1635_v38  ;;  %323 = vst.msk [vmem:[#allocation2 + $0x18] sm:$0xff] %vm320_vm3, %v1634_v39 }
  0x8f   : > { %333 = vst.msk [vmem:[#allocation2 + $0x21] sm:$0x7f] %vm329_vm4, %v1410_v9  ;;  %332 = vst.msk [vmem:[#allocation2 + $0x19] sm:$0x7f] %vm329_vm4, %v1409_v8  ;;  %v1648_v42 = vpop.permute.xlu0 %1647  ;;  %v1653_v43 = vpop.permute.xlu1 %1652  ;;  %v1681_v9 = vld [vmem:[%s2075_s1 + $0x18] sm:$0xff]  }
  0x90   : > { %365 = vst.msk [vmem:[#allocation2 + $0x17] sm:$0xfe] %vm362_vm5, %v1644_v41  ;;  %366 = vst.msk [vmem:[#allocation2 + $0x1f] sm:$0xfe] %vm362_vm5, %v1645_v40  ;;  %v1650_v44 = vunpack.i.h.bf16 %v1648_v42  ;;  %v1649_v45 = vunpack.i.l.bf16 %v1648_v42  ;;  %v1655_v46 = vunpack.i.h.bf16 %v1653_v43  ;;  %v1654_v47 = vunpack.i.l.bf16 %v1653_v43  ;;  %v1684_v41 = vld [vmem:[%s2077_s3 + $0xc] sm:$0xff]  }
  0x91   : > { %1530 = vmatprep.subr.bf16.mxu1 %v1684_v41 }
  0x92   : > { %326 = vst.msk [vmem:[#allocation2 + $0x30] sm:$0xff] %vm320_vm3, %v1650_v44  ;;  %325 = vst.msk [vmem:[#allocation2 + $0x28] sm:$0xff] %vm320_vm3, %v1649_v45  ;;  %v954_v45 = vsel %vm952_vm9, %v1685_v2, 0 }
  0x93   : > { %328 = vst.msk [vmem:[#allocation2 + $0x40] sm:$0xff] %vm320_vm3, %v1655_v46  ;;  %327 = vst.msk [vmem:[#allocation2 + $0x38] sm:$0xff] %vm320_vm3, %v1654_v47  ;;  %v1658_v48 = vpop.permute.xlu0 %1657  ;;  %v1663_v49 = vpop.permute.xlu1 %1662  ;;  %v396_v50 = vld [vmem:[#allocation2 + $0x8] sm:$0xff]  ;;  %v397_v51 = vld [vmem:[#allocation2 + $0x10] sm:$0xff] }
  0x94   : > { %335 = vst.msk [vmem:[#allocation2 + $0x31] sm:$0x7f] %vm329_vm4, %v1414_v17  ;;  %334 = vst.msk [vmem:[#allocation2 + $0x29] sm:$0x7f] %vm329_vm4, %v1413_v16  ;;  %v1660_v52 = vunpack.i.h.bf16 %v1658_v48  ;;  %v1659_v53 = vunpack.i.l.bf16 %v1658_v48  ;;  %v1665_v54 = vunpack.i.h.bf16 %v1663_v49  ;;  %v1664_v55 = vunpack.i.l.bf16 %v1663_v49  ;;  %v2001_v48 = vld [vmem:[%s2077_s3] sm:$0xff]  }
  0x95   : > { %337 = vst.msk [vmem:[#allocation2 + $0x41] sm:$0x7f] %vm329_vm4, %v1418_v20  ;;  %336 = vst.msk [vmem:[#allocation2 + $0x39] sm:$0x7f] %vm329_vm4, %v1417_v19  ;;  %v404_v56 = vpack.c.bf16 %v397_v51, %v396_v50  ;;  %v380_v10 = vpack.c.bf16 %v396_v50, %v372_v5  ;;  %v1373_v20 = vld [vmem:[%s2076_s2] ss:$0 sm:$0xff] }
  0x96   : > { %367 = vst.msk [vmem:[#allocation2 + $0x27] sm:$0xfe] %vm362_vm5, %v1659_v53  ;;  %368 = vst.msk [vmem:[#allocation2 + $0x2f] sm:$0xfe] %vm362_vm5, %v1660_v52 }
  0x97   : > { %369 = vst.msk [vmem:[#allocation2 + $0x37] sm:$0xfe] %vm362_vm5, %v1664_v55  ;;  %370 = vst.msk [vmem:[#allocation2 + $0x3f] sm:$0xfe] %vm362_vm5, %v1665_v54  ;;  %1482 = vmatprep.mubr.msk.bf16.mxu0 %vm226_vm2, %v404_v56  ;;  %v398_v57 = vld [vmem:[#allocation2 + $0x18] sm:$0xff]  ;;  %v399_v58 = vld [vmem:[#allocation2 + $0x20] sm:$0xff] }
  0x98   : > { %v405_v59 = vpack.c.bf16 %v399_v58, %v398_v57  ;;  %v381_v14 = vpack.c.bf16 %v398_v57, %v397_v51 }
  0x9a   : > { %1483 = vmatmul.mubr.msk.bf16.vlgmr.msra.gmra.mrb[0].mxu0 %vm226_vm2, %v405_v59 }
  0x9b   : > { %1491 = vmatpush3.bf16.msra.mxu0 %v1853_v27 }
  0x9c   : > { %1492 = vmatprep.subr.bf16.mxu0 %v1677_v60 }
  0x9d   : > { %v400_v63 = vld [vmem:[#allocation2 + $0x28] sm:$0xff]  ;;  %v401_v0 = vld [vmem:[#allocation2 + $0x30] sm:$0xff] }
  0x9e   : > { %v402_v1 = vld [vmem:[#allocation2 + $0x38] sm:$0xff]  ;;  %v406_v3 = vpack.c.bf16 %v401_v0, %v400_v63  ;;  %v403_v4 = vld [vmem:[#allocation2 + $0x40] sm:$0xff]  ;;  %v382_v16 = vpack.c.bf16 %v400_v63, %v399_v58 }
  0x9f   : > { %v658_v6 = vpack.c.bf16 %v402_v1, %v401_v0  ;;  %1493 = vmatpush3.bf16.msra.mxu0 %v1677_v60  ;;  %v407_v7 = vpack.c.bf16 %v403_v4, %v402_v1  ;;  %v659_v8 = vpack.c.bf16 %v655_v62, %v403_v4 }
  0xa0   : > { %1486 = vmatprep.mubr.msk.bf16.mxu0 %vm226_vm2, %v406_v3  ;;  %1494 = vmatprep.subr.bf16.mxu0 %v1679_v61 }
  0xa1   : > { %1526 = vmatprep.mubr.msk.bf16.mxu1 %vm226_vm2, %v658_v6 }
  0xa2   : > { %1487 = vmatmul.mubr.msk.bf16.gmra.mrb[4].mxu0 %vm226_vm2, %v407_v7  ;;  %1527 = vmatmul.mubr.msk.bf16.vlgmr.msra.gmra.mrb[0].mxu1 %vm226_vm2, %v659_v8 }
  0xa3   : > { %1495 = vmatpush3.bf16.msra.mxu0 %v1679_v61  ;;  %1502 = vmatprep.mubr.msk.bf16.mxu0 %vm226_vm2, %v380_v10 }
  0xa4   : > { %1496 = vmatprep.subr.bf16.mxu0 %v1681_v9  ;;  %1531 = vmatpush3.bf16.msra.mxu1 %v1684_v41 }
  0xa5   : > { %1610 = vmatprep.subr.msk.bf16.mxu1 %vm952_vm9, %v1685_v2 }
  0xa7   : > { %1497 = vmatpush3.bf16.msra.mxu0 %v1681_v9  ;;  %v1687_v9 = vld [vmem:[%s2077_s3 + $0x8] ss:$0 sps:$4 sm:$0xff]  }
  0xa8   : > { %1498 = vmatprep.subr.bf16.mxu0 %v1682_v11  ;;  %1533 = vmatpush3.bf16.msra.mxu1 %v954_v45 }
  0xa9   : > { %1542 = vmatprep.subr.bf16.mxu1 %v2001_v48 }
  0xab   : > { %1499 = vmatpush3.bf16.msra.mxu0 %v1682_v11  ;;  %v1043_v11 = vsel %vm952_vm9, %v1687_v9, 0 }
  0xac   : > { %1500 = vmatprep.subr.bf16.mxu0 %v1683_v13 }
  0xaf   : > { %1501 = vmatpush3.bf16.msra.mxu0 %v1683_v13  ;;  %v1688_v13 = vld [vmem:[%s2077_s3 + $0x18] sm:$0xff]  }
  0xb0   : > { %1510 = vmatprep.subr.bf16.mxu0 %v1796_v12 }
  0xb2   : > { %1503 = vmatmul.mubr.msk.bf16.vlgmr.msra.gmra.mrb[0].mxu0 %vm226_vm2, %v381_v14 }
  0xb3   : > { %1506 = vmatprep.mubr.msk.bf16.mxu0 %vm226_vm2, %v382_v16  ;;  %1511 = vmatpush3.bf16.msra.mxu0 %v1796_v12 }
  0xb4   : > { %1512 = vmatprep.subr.bf16.mxu0 %v1811_v15 }
  0xb7   : > { %1513 = vmatpush3.bf16.msra.mxu0 %v1811_v15 }
  0xb8   : > { %1514 = vmatprep.subr.bf16.mxu0 %v1830_v22 }
  0xba   : > { %1507 = vmatmul.mubr.msk.bf16.gmra.mrb[4].mxu0 %vm226_vm2, %v658_v6 }
  0xbb   : > { %1515 = vmatpush3.bf16.msra.mxu0 %v1830_v22  ;;  %1522 = vmatprep.mubr.msk.bf16.mxu0 %vm226_vm2, %v381_v14 }
  0xbc   : > { %1516 = vmatprep.subr.bf16.mxu0 %v1848_v26 }
  0xbf   : > { %1517 = vmatpush3.bf16.msra.mxu0 %v1848_v26 }
  0xc0   : > { %1518 = vmatprep.subr.bf16.mxu0 %v1859_v28 }
  0xc3   : > { %1519 = vmatpush3.bf16.msra.mxu0 %v1859_v28 }
  0xc4   : > { %1520 = vmatprep.subr.bf16.mxu0 %v1868_v29 }
  0xc7   : > { %1521 = vmatpush3.bf16.msra.mxu0 %v1868_v29 }
  0xca   : > { %1523 = vmatmul.mubr.msk.bf16.vlgmr.msra.gmra.mrb[0].mxu0 %vm226_vm2, %v382_v16 }
 0x175   : > { %v1528_v12 = vpop.f32.mrb[0].mxu1 }
 0x176   : > { %v771_v15 = vpop.f32.mrb[1].mxu1 }
 0x177   : > { %v1529_v17 = vpop.f32.mrb[2].mxu1 }
 0x178   : > { %v774_v18 = vpop.f32.mrb[3].mxu1 }
 0x18d   : > { %v1508_v19 = vpop.f32.mrb[4].mxu0 }
 0x18e   : > { %v1578_v21 = vadd.f32 %v1528_v12, %v1508_v19  ;;  %v632_v22 = vpop.f32.mrb[5].mxu0 }
 0x18f   : > { %v1579_v23 = vadd.f32 %v771_v15, %v632_v22  ;;  %v1509_v24 = vpop.f32.mrb[6].mxu0  ;;  %v900_v15 = vld [vmem:[#allocation3] sm:$0xff]  ;;  %v1689_v22 = vld [vmem:[%s2077_s3 + $0x20] ss:$0 sps:$4 sm:$0xff]  }
 0x190   : > { %v1580_v25 = vadd.f32 %v1529_v17, %v1509_v24  ;;  %v635_v26 = vpop.f32.mrb[7].mxu0  ;;  %v806_v46 = vadd.f32 %v1578_v21, %v1373_v20  ;;  %v1149_v24 = vsel %vm952_vm9, %v1689_v22, 0 }
 0x191   : > { %v804_v27 = vadd.f32 %v1579_v23, %v1373_v20  ;;  %v1581_v28 = vadd.f32 %v774_v18, %v635_v26  ;;  %v1118_v26 = vld [vmem:[#allocation3 + $0x48] sm:$0xff] }
 0x192   : > { %v807_v47 = vadd.f32 %v1580_v25, %v1373_v20  ;;  %v814_v49 = vmax.f32 %v806_v46, 0.0 }
 0x193   : > { %v812_v29 = vmax.f32 %v804_v27, 0.0  ;;  %v805_v30 = vadd.f32 %v1581_v28, %v1373_v20  ;;  %v1398_v28 = vld [vmem:[%s2078_s4] ss:$0 sm:$0xff] }
 0x194   : > { %v815_v50 = vmax.f32 %v807_v47, 0.0 }
 0x195   : > { %v813_v31 = vmax.f32 %v805_v30, 0.0  ;;  %832 = vrot.lane.b32.xlu0 %v812_v29, %s1701_s16 }
 0x197   : > { %834 = vrot.lane.b32.xlu1 %v813_v31, %s1701_s16 }
 0x19d   : > { %v1524_v32 = vpop.f32.mrb[0].mxu0 }
 0x19e   : > { %v802_v33 = vadd.f32 %v1524_v32, %v1373_v20  ;;  %v755_v34 = vpop.f32.mrb[1].mxu0 }
 0x19f   : > { %v1525_v35 = vpop.f32.mrb[2].mxu0  ;;  %v800_v40 = vadd.f32 %v1373_v20, %v755_v34 }
 0x1a0   : > { %v810_v36 = vmax.f32 %v802_v33, 0.0  ;;  %v803_v37 = vadd.f32 %v1525_v35, %v1373_v20  ;;  %v758_v38 = vpop.f32.mrb[3].mxu0 }
 0x1a1   : > { %v801_v42 = vadd.f32 %v1373_v20, %v758_v38  ;;  %v808_v43 = vmax.f32 %v800_v40, 0.0 }
 0x1a2   : > { %v811_v39 = vmax.f32 %v803_v37, 0.0  ;;  %828 = vrot.lane.b32.xlu0 %v810_v36, %s1701_s16 }
 0x1a3   : > { %v809_v44 = vmax.f32 %v801_v42, 0.0 }
 0x1a4   : > { %830 = vrot.lane.b32.xlu1 %v811_v39, %s1701_s16 }
 0x1a6   : > { %870 = vrot.lane.b32.xlu0 %v810_v36, %s1702_s21 }
 0x1a8   : > { %872 = vrot.lane.b32.xlu1 %v811_v39, %s1702_s21 }
 0x1aa   : > { %824 = vrot.lane.b32.xlu0 %v808_v43, %s1701_s16 }
 0x1ac   : > { %826 = vrot.lane.b32.xlu1 %v809_v44, %s1701_s16 }
 0x1ae   : > { %866 = vrot.lane.b32.xlu0 %v808_v43, %s1702_s21 }
 0x1b0   : > { %868 = vrot.lane.b32.xlu1 %v809_v44, %s1702_s21 }
 0x1b2   : > { %836 = vrot.lane.b32.xlu0 %v814_v49, %s1701_s16 }
 0x1b4   : > { %838 = vrot.lane.b32.xlu1 %v815_v50, %s1701_s16 }
 0x1b6   : > { %874 = vrot.lane.b32.xlu0 %v812_v29, %s1702_s21 }
 0x1b8   : > { %876 = vrot.lane.b32.xlu1 %v813_v31, %s1702_s21 }
 0x1ba   : > { %878 = vrot.lane.b32.xlu0 %v814_v49, %s1702_s21 }
 0x1bc   : > { %880 = vrot.lane.b32.xlu1 %v815_v50, %s1702_s21 }
 0x207   : > { %v833_v51 = vpop.permute.xlu0 %832 }
 0x208   : > { %853 = vst.msk [vmem:[#allocation3 + $0x28] sm:$0xff] %vm848_vm10, %v833_v51 }
 0x209   : > { %862 = vst.msk [vmem:[#allocation3 + $0x29] sm:$0x7f] %vm857_vm11, %v812_v29  ;;  %v835_v52 = vpop.permute.xlu1 %834 }
 0x20a   : > { %854 = vst.msk [vmem:[#allocation3 + $0x30] sm:$0xff] %vm848_vm10, %v835_v52 }
 0x20b   : > { %863 = vst.msk [vmem:[#allocation3 + $0x31] sm:$0x7f] %vm857_vm11, %v813_v31 }
 0x214   : > { %v829_v53 = vpop.permute.xlu0 %828 }
 0x215   : > { %851 = vst.msk [vmem:[#allocation3 + $0x18] sm:$0xff] %vm848_vm10, %v829_v53 }
 0x216   : > { %860 = vst.msk [vmem:[#allocation3 + $0x19] sm:$0x7f] %vm857_vm11, %v810_v36  ;;  %v831_v54 = vpop.permute.xlu1 %830 }
 0x217   : > { %852 = vst.msk [vmem:[#allocation3 + $0x20] sm:$0xff] %vm848_vm10, %v831_v54 }
 0x218   : > { %861 = vst.msk [vmem:[#allocation3 + $0x21] sm:$0x7f] %vm857_vm11, %v811_v39  ;;  %v871_v55 = vpop.permute.xlu0 %870 }
 0x219   : > { %893 = vst.msk [vmem:[#allocation3 + $0x17] sm:$0xfe] %vm890_vm12, %v871_v55 }
 0x21a   : > { %v873_v56 = vpop.permute.xlu1 %872 }
 0x21b   : > { %894 = vst.msk [vmem:[#allocation3 + $0x1f] sm:$0xfe] %vm890_vm12, %v873_v56 }
 0x21c   : > { %v825_v57 = vpop.permute.xlu0 %824 }
 0x21d   : > { %849 = vst.msk [vmem:[#allocation3 + $0x8] sm:$0xff] %vm848_vm10, %v825_v57 }
 0x21e   : > { %858 = vst.msk [vmem:[#allocation3 + $0x9] sm:$0x7f] %vm857_vm11, %v808_v43  ;;  %v827_v58 = vpop.permute.xlu1 %826 }
 0x21f   : > { %850 = vst.msk [vmem:[#allocation3 + $0x10] sm:$0xff] %vm848_vm10, %v827_v58 }
 0x220   : > { %859 = vst.msk [vmem:[#allocation3 + $0x11] sm:$0x7f] %vm857_vm11, %v809_v44  ;;  %v867_v59 = vpop.permute.xlu0 %866  ;;  %v917_v6 = vld [vmem:[#allocation3 + $0x18] sm:$0xff] }
 0x221   : > { %891 = vst.msk [vmem:[#allocation3 + $0x7] sm:$0xfe] %vm890_vm12, %v867_v59 }
 0x222   : > { %v869_v60 = vpop.permute.xlu1 %868  ;;  %v918_v0 = vld [vmem:[#allocation3 + $0x20] sm:$0xff] }
 0x223   : > { %892 = vst.msk [vmem:[#allocation3 + $0xf] sm:$0xfe] %vm890_vm12, %v869_v60  ;;  %v924_v8 = vpack.c.bf16 %v918_v0, %v917_v6 }
 0x224   : > { %v837_v61 = vpop.permute.xlu0 %836 }
 0x225   : > { %855 = vst.msk [vmem:[#allocation3 + $0x38] sm:$0xff] %vm848_vm10, %v837_v61 }
 0x226   : > { %864 = vst.msk [vmem:[#allocation3 + $0x39] sm:$0x7f] %vm857_vm11, %v814_v49  ;;  %v839_v62 = vpop.permute.xlu1 %838 }
 0x227   : > { %856 = vst.msk [vmem:[#allocation3 + $0x40] sm:$0xff] %vm848_vm10, %v839_v62 }
 0x228   : > { %865 = vst.msk [vmem:[#allocation3 + $0x41] sm:$0x7f] %vm857_vm11, %v815_v50  ;;  %v875_v63 = vpop.permute.xlu0 %874  ;;  %v915_v3 = vld [vmem:[#allocation3 + $0x8] sm:$0xff] }
 0x229   : > { %895 = vst.msk [vmem:[#allocation3 + $0x27] sm:$0xfe] %vm890_vm12, %v875_v63  ;;  %v908_v20 = vpack.c.bf16 %v915_v3, %v900_v15 }
 0x22a   : > { %v877_v1 = vpop.permute.xlu1 %876  ;;  %v916_v4 = vld [vmem:[#allocation3 + $0x10] sm:$0xff] }
 0x22b   : > { %896 = vst.msk [vmem:[#allocation3 + $0x2f] sm:$0xfe] %vm890_vm12, %v877_v1  ;;  %v923_v5 = vpack.c.bf16 %v916_v4, %v915_v3  ;;  %v909_v21 = vpack.c.bf16 %v917_v6, %v916_v4 }
 0x22c   : > { %v879_v7 = vpop.permute.xlu0 %878 }
 0x22d   : > { %897 = vst.msk [vmem:[#allocation3 + $0x37] sm:$0xfe] %vm890_vm12, %v879_v7  ;;  %1534 = vmatprep.mubr.msk.bf16.mxu1 %vm249_vm8, %v923_v5 }
 0x22e   : > { %1535 = vmatmul.mubr.msk.bf16.vlgmr.msra.gmra.mrb[4].mxu1 %vm249_vm8, %v924_v8  ;;  %v881_v10 = vpop.permute.xlu1 %880 }
 0x22f   : > { %898 = vst.msk [vmem:[#allocation3 + $0x3f] sm:$0xfe] %vm890_vm12, %v881_v10  ;;  %1543 = vmatpush3.bf16.msra.mxu1 %v2001_v48 }
 0x230   : > { %1611 = vmatprep.subr.msk.bf16.mxu1 %vm952_vm9, %v1687_v9  ;;  %v919_v14 = vld [vmem:[#allocation3 + $0x28] sm:$0xff] }
 0x231   : > { %v910_v23 = vpack.c.bf16 %v919_v14, %v918_v0 }
 0x232   : > { %v920_v16 = vld [vmem:[#allocation3 + $0x30] sm:$0xff] }
 0x233   : > { %v925_v12 = vpack.c.bf16 %v920_v16, %v919_v14  ;;  %1545 = vmatpush3.bf16.msra.mxu1 %v1043_v11 }
 0x234   : > { %1554 = vmatprep.subr.bf16.mxu1 %v1688_v13  ;;  %v921_v17 = vld [vmem:[#allocation3 + $0x38] sm:$0xff] }
 0x235   : > { %1538 = vmatprep.mubr.msk.bf16.mxu1 %vm249_vm8, %v925_v12  ;;  %v911_v25 = vpack.c.bf16 %v921_v17, %v920_v16 }
 0x236   : > { %v922_v18 = vld [vmem:[#allocation3 + $0x40] sm:$0xff] }
 0x237   : > { %v926_v19 = vpack.c.bf16 %v922_v18, %v921_v17  ;;  %v1122_v27 = vpack.c.bf16 %v1118_v26, %v922_v18 }
 0x239   : > { %1539 = vmatmul.mubr.msk.bf16.gmra.mrb[8].mxu1 %vm249_vm8, %v926_v19 }
 0x23a   : > { %1546 = vmatprep.mubr.msk.bf16.mxu1 %vm249_vm8, %v908_v20 }
 0x241   : > { %1547 = vmatmul.mubr.msk.bf16.vlgmr.msra.gmra.mrb[4].mxu1 %vm249_vm8, %v909_v21 }
 0x242   : > { %1555 = vmatpush3.bf16.msra.mxu1 %v1688_v13  ;;  %1550 = vmatprep.mubr.msk.bf16.mxu1 %vm249_vm8, %v910_v23 }
 0x243   : > { %1612 = vmatprep.subr.msk.bf16.mxu1 %vm952_vm9, %v1689_v22 }
 0x246   : > { %1557 = vmatpush3.bf16.msra.mxu1 %v1149_v24 }
 0x249   : > { %1551 = vmatmul.mubr.msk.bf16.gmra.mrb[8].mxu1 %vm249_vm8, %v911_v25 }
 0x24a   : > { %1558 = vmatprep.mubr.msk.bf16.mxu1 %vm249_vm8, %v909_v21 }
 0x251   : > { %1559 = vmatmul.mubr.msk.bf16.vlgmr.msra.gmra.mrb[4].mxu1 %vm249_vm8, %v910_v23 }
 0x252   : > { %1562 = vmatprep.mubr.msk.bf16.mxu1 %vm249_vm8, %v911_v25 }
 0x259   : > { %1563 = vmatmul.mubr.msk.bf16.gmra.mrb[8].mxu1 %vm249_vm8, %v1122_v27 }
 0x324   : > { %v1560_v29 = vpop.f32.mrb[4].mxu1 }
 0x325   : > { %v1232_v30 = vadd.f32 %v1560_v29, %v1398_v28  ;;  %v1185_v31 = vpop.f32.mrb[5].mxu1 }
 0x326   : > { %v1230_v32 = vadd.f32 %v1398_v28, %v1185_v31  ;;  %v1561_v33 = vpop.f32.mrb[6].mxu1 }
 0x327   : > { %v1240_v34 = vmax.f32 %v1232_v30, 0.0  ;;  %v1233_v35 = vadd.f32 %v1561_v33, %v1398_v28  ;;  %v1188_v36 = vpop.f32.mrb[7].mxu1 }
 0x328   : > { %v1238_v37 = vmax.f32 %v1230_v32, 0.0  ;;  %v1231_v38 = vadd.f32 %v1398_v28, %v1188_v36 }
 0x329   : > { %1249 = vst.msk [vmem:[%s224_s12 + $0x10] sm:$0xff] %vm1246_vm13, %v1240_v34  ;;  %v1241_v39 = vmax.f32 %v1233_v35, 0.0 }
 0x32a   : > { %1247 = vst.msk [vmem:[%s224_s12] sm:$0xff] %vm1246_vm13, %v1238_v37  ;;  %v1239_v40 = vmax.f32 %v1231_v38, 0.0 }
 0x32b   : > { %1250 = vst.msk [vmem:[%s224_s12 + $0x18] sm:$0xff] %vm1246_vm13, %v1241_v39 }
 0x32c   : > { %1248 = vst.msk [vmem:[%s224_s12 + $0x8] sm:$0xff] %vm1246_vm13, %v1239_v40  ;;  %v1564_v41 = vpop.f32.mrb[8].mxu1 }
 0x32d   : > { %v1236_v42 = vadd.f32 %v1564_v41, %v1398_v28  ;;  %v1201_v43 = vpop.f32.mrb[9].mxu1 }
 0x32e   : > { %v1234_v2 = vadd.f32 %v1398_v28, %v1201_v43  ;;  %v1565_v44 = vpop.f32.mrb[10].mxu1 }
 0x32f   : > { %v1244_v45 = vmax.f32 %v1236_v42, 0.0  ;;  %v1237_v46 = vadd.f32 %v1565_v44, %v1398_v28  ;;  %v1204_v47 = vpop.f32.mrb[11].mxu1 }
 0x330   : > { %v1242_v48 = vmax.f32 %v1234_v2, 0.0  ;;  %v1235_v49 = vadd.f32 %v1398_v28, %v1204_v47 }
 0x331   : > { %1253 = vst.msk [vmem:[%s224_s12 + $0x30] sm:$0xff] %vm1246_vm13, %v1244_v45  ;;  %v1245_v50 = vmax.f32 %v1237_v46, 0.0 }
 0x332   : > { %1251 = vst.msk [vmem:[%s224_s12 + $0x20] sm:$0xff] %vm1246_vm13, %v1242_v48  ;;  %v1243_v51 = vmax.f32 %v1235_v49, 0.0 }
 0x333   : > { %1254 = vst.msk [vmem:[%s224_s12 + $0x38] sm:$0xff] %vm1246_vm13, %v1245_v50 }
 0x334   : > { %1252 = vst.msk [vmem:[%s224_s12 + $0x28] sm:$0xff] %vm1246_vm13, %v1243_v51 }
 0x335 PF: > { %s15_s18 = sadd.s32 1, %s1696_s18  }
 0x336   : > { %p12_p4 = scmp.ge.s32.totalorder %s15_s18, 4  }
 0x338   :  { %14 = sbr.rel (!%p12_p4) target bundleno = 1 (0x1), region = 80 }

// kernel: unet_forward.15
= control target key start
LH: loop header
LB: loop body
LE: loop exit
PB: predicated region body
PF: predicated region fallthrough
CT: control target
= control target key end

     0   :  { %s747_s12 = smov 0   ;;  %s908_s0 = inlined_call_operand.vmem [shape: bf16[2,256,8], index: 0, kind: input, shape index: {}]   ;;  %s909_s1 = inlined_call_operand.vmem [shape: bf16[8,2], index: 1, kind: input, shape index: {}]   ;;  %s910_s2 = inlined_call_operand.vmem [shape: f32[1,2], index: 2, kind: input, shape index: {}]   ;;  %s911_s3 = inlined_call_operand.vmem [shape: f32[2,256,2], index: 3, kind: output, shape index: {}]  }
   0x1 LB: > { %s594_s13 = sadd.s32 4294967295, %s725_s12   ;;  %p598_p0 = scmp.ge.s32.totalorder %s725_s12, 1  ;;  %s725_s12 = sphi %s747_s12, %s13_s12  }
   0x2   : > { %p137_p1 = scmp.lt.s32.totalorder %s725_s12, 3 }
   0x4   : > { %p138_p2 = pnand %p598_p0, %p137_p1 }
   0x5   : > { %v173_v0 = vld [vmem:[%s909_s1] sm:$0xf] (!%p138_p2)  ;;  %vm341_vm0 = vcmask (!%p138_p2), 1043456   ;;  %p161_p3 = scmp.lt.s32.totalorder (!%p138_p2), %s594_s13, 1  ;;  %vm292_vm1 = vcmask (!%p138_p2), 64512   ;;  %vm506_vm2 = vcmask (!%p138_p2), 15360  }
   0x6   : > { %141 = sbr.rel (%p138_p2) target bundleno = 261 (0x105), region = 32  ;;  %693 = vmatprep.subr.msk.bf16.mxu0 (!%p138_p2), %vm341_vm0, %v173_v0  ;;  %694 = vmatprep.subr.msk.bf16.mxu1 (!%p138_p2), %vm341_vm0, %v173_v0  ;;  %v343_v1 = vsel (!%p138_p2), %vm341_vm0, %v173_v0, 0  ;;  %v802_v18 = vld [vmem:[%s910_s2] ss:$0 sm:$0xff] (!%p138_p2) }
   0x7   : > { %658 = vmatpush3.bf16.msra.mxu0 (!%p138_p2), %v343_v1  ;;  %692 = vmatpush3.bf16.msra.mxu1 (!%p138_p2), %v343_v1 }
   0xd   : > { %s913_s13 = smov (!%p161_p3, %s594_s13), 1 }
   0xe   : > { %s638_s16 = sshll.u32 %s913_s13, 7  ;;  %s639_s20 = sshll.u32 %s913_s13, 8 }
   0xf   : > { %s764_s19 = scalar_lea.vmem %s908_s0, %s638_s16  ;;  %s807_s25 = scalar_lea.vmem %s911_s3, %s639_s20 }
  0x10   : > { %v703_v2 = vld [vmem:[%s764_s19] sm:$0xff]   ;;  %v705_v4 = vld [vmem:[%s764_s19 + $0x8] sm:$0xff]   ;;  %v707_v6 = vld [vmem:[%s764_s19 + $0x10] sm:$0xff]  }
  0x11   : > { %v704_v3 = vld [vmem:[%s764_s19 + $0x40] sm:$0xff]   ;;  %659 = vmatprep.mubr.msk.bf16.mxu0 %vm292_vm1, %v703_v2  ;;  %v706_v5 = vld [vmem:[%s764_s19 + $0x48] sm:$0xff]   ;;  %v708_v7 = vld [vmem:[%s764_s19 + $0x50] sm:$0xff]  }
  0x12   : > { %675 = vmatprep.mubr.msk.bf16.mxu1 %vm292_vm1, %v704_v3  ;;  %660 = vmatmul.mubr.msk.bf16.vlgmr.msra.gmra.mrb[0].mxu0 %vm292_vm1, %v705_v4  ;;  %v709_v8 = vld [vmem:[%s764_s19 + $0x18] sm:$0xff]   ;;  %v711_v10 = vld [vmem:[%s764_s19 + $0x20] sm:$0xff]   ;;  %v713_v12 = vld [vmem:[%s764_s19 + $0x28] sm:$0xff]  }
  0x13   : > { %676 = vmatmul.mubr.msk.bf16.vlgmr.msra.gmra.mrb[0].mxu1 %vm292_vm1, %v706_v5  ;;  %663 = vmatprep.mubr.msk.bf16.mxu0 %vm292_vm1, %v707_v6  ;;  %v710_v9 = vld [vmem:[%s764_s19 + $0x58] sm:$0xff]   ;;  %v712_v11 = vld [vmem:[%s764_s19 + $0x60] sm:$0xff]   ;;  %v714_v13 = vld [vmem:[%s764_s19 + $0x68] sm:$0xff]  }
  0x14   : > { %679 = vmatprep.mubr.msk.bf16.mxu1 %vm292_vm1, %v708_v7  ;;  %v715_v14 = vld [vmem:[%s764_s19 + $0x30] sm:$0xff]   ;;  %v717_v16 = vld [vmem:[%s764_s19 + $0x38] sm:$0xff]  }
  0x15   : > { %v716_v15 = vld [vmem:[%s764_s19 + $0x70] sm:$0xff]   ;;  %v718_v17 = vld [vmem:[%s764_s19 + $0x78] sm:$0xff]  }
  0x1a   : > { %664 = vmatmul.mubr.msk.bf16.gmra.mrb[4].mxu0 %vm292_vm1, %v709_v8 }
  0x1b   : > { %680 = vmatmul.mubr.msk.bf16.gmra.mrb[4].mxu1 %vm292_vm1, %v710_v9  ;;  %667 = vmatprep.mubr.msk.bf16.mxu0 %vm292_vm1, %v711_v10 }
  0x1c   : > { %683 = vmatprep.mubr.msk.bf16.mxu1 %vm292_vm1, %v712_v11 }
  0x22   : > { %668 = vmatmul.mubr.msk.bf16.gmra.mrb[8].mxu0 %vm292_vm1, %v713_v12 }
  0x23   : > { %684 = vmatmul.mubr.msk.bf16.gmra.mrb[8].mxu1 %vm292_vm1, %v714_v13  ;;  %671 = vmatprep.mubr.msk.bf16.mxu0 %vm292_vm1, %v715_v14 }
  0x24   : > { %687 = vmatprep.mubr.msk.bf16.mxu1 %vm292_vm1, %v716_v15 }
  0x2a   : > { %672 = vmatmul.mubr.msk.bf16.gmra.mrb[12].mxu0 %vm292_vm1, %v717_v16 }
  0x2b   : > { %688 = vmatmul.mubr.msk.bf16.gmra.mrb[12].mxu1 %vm292_vm1, %v718_v17 }
  0xe5   : > { %v661_v19 = vpop.f32.mrb[0].mxu0 }
  0xe6   : > { %v388_v20 = vadd.f32 %v661_v19, %v802_v18  ;;  %v677_v21 = vpop.f32.mrb[0].mxu1  ;;  %v379_v22 = vpop.f32.mrb[1].mxu0 }
  0xe7   : > { %v452_v23 = vadd.f32 %v677_v21, %v802_v18  ;;  %v380_v24 = vadd.f32 %v802_v18, %v379_v22  ;;  %v443_v25 = vpop.f32.mrb[1].mxu1  ;;  %v662_v26 = vpop.f32.mrb[2].mxu0 }
  0xe8   : > { %509 = vst.msk [vmem:[%s807_s25 + $0x10] sm:$0xff] %vm506_vm2, %v388_v20  ;;  %v444_v27 = vadd.f32 %v802_v18, %v443_v25  ;;  %v391_v28 = vadd.f32 %v662_v26, %v802_v18  ;;  %v678_v29 = vpop.f32.mrb[2].mxu1  ;;  %v382_v30 = vpop.f32.mrb[3].mxu0 }
  0xe9   : > { %525 = vst.msk [vmem:[%s807_s25 + $0x90] sm:$0xff] %vm506_vm2, %v452_v23  ;;  %507 = vst.msk [vmem:[%s807_s25] sm:$0xff] %vm506_vm2, %v380_v24  ;;  %v455_v31 = vadd.f32 %v678_v29, %v802_v18  ;;  %v383_v32 = vadd.f32 %v802_v18, %v382_v30  ;;  %v446_v33 = vpop.f32.mrb[3].mxu1 }
  0xea   : > { %523 = vst.msk [vmem:[%s807_s25 + $0x80] sm:$0xff] %vm506_vm2, %v444_v27  ;;  %510 = vst.msk [vmem:[%s807_s25 + $0x18] sm:$0xff] %vm506_vm2, %v391_v28  ;;  %v447_v34 = vadd.f32 %v802_v18, %v446_v33 }
  0xeb   : > { %526 = vst.msk [vmem:[%s807_s25 + $0x98] sm:$0xff] %vm506_vm2, %v455_v31  ;;  %508 = vst.msk [vmem:[%s807_s25 + $0x8] sm:$0xff] %vm506_vm2, %v383_v32 }
  0xec   : > { %524 = vst.msk [vmem:[%s807_s25 + $0x88] sm:$0xff] %vm506_vm2, %v447_v34 }
  0xed   : > { %v665_v35 = vpop.f32.mrb[4].mxu0 }
  0xee   : > { %v404_v36 = vadd.f32 %v665_v35, %v802_v18  ;;  %v681_v37 = vpop.f32.mrb[4].mxu1  ;;  %v395_v38 = vpop.f32.mrb[5].mxu0 }
  0xef   : > { %v468_v39 = vadd.f32 %v681_v37, %v802_v18  ;;  %v396_v40 = vadd.f32 %v802_v18, %v395_v38  ;;  %v459_v41 = vpop.f32.mrb[5].mxu1  ;;  %v666_v42 = vpop.f32.mrb[6].mxu0 }
  0xf0   : > { %513 = vst.msk [vmem:[%s807_s25 + $0x30] sm:$0xff] %vm506_vm2, %v404_v36  ;;  %v460_v43 = vadd.f32 %v802_v18, %v459_v41  ;;  %v407_v44 = vadd.f32 %v666_v42, %v802_v18  ;;  %v682_v45 = vpop.f32.mrb[6].mxu1  ;;  %v398_v46 = vpop.f32.mrb[7].mxu0 }
  0xf1   : > { %529 = vst.msk [vmem:[%s807_s25 + $0xb0] sm:$0xff] %vm506_vm2, %v468_v39  ;;  %511 = vst.msk [vmem:[%s807_s25 + $0x20] sm:$0xff] %vm506_vm2, %v396_v40  ;;  %v471_v47 = vadd.f32 %v682_v45, %v802_v18  ;;  %v399_v48 = vadd.f32 %v802_v18, %v398_v46  ;;  %v462_v49 = vpop.f32.mrb[7].mxu1 }
  0xf2   : > { %527 = vst.msk [vmem:[%s807_s25 + $0xa0] sm:$0xff] %vm506_vm2, %v460_v43  ;;  %514 = vst.msk [vmem:[%s807_s25 + $0x38] sm:$0xff] %vm506_vm2, %v407_v44  ;;  %v463_v50 = vadd.f32 %v802_v18, %v462_v49 }
  0xf3   : > { %530 = vst.msk [vmem:[%s807_s25 + $0xb8] sm:$0xff] %vm506_vm2, %v471_v47  ;;  %512 = vst.msk [vmem:[%s807_s25 + $0x28] sm:$0xff] %vm506_vm2, %v399_v48 }
  0xf4   : > { %528 = vst.msk [vmem:[%s807_s25 + $0xa8] sm:$0xff] %vm506_vm2, %v463_v50 }
  0xf5   : > { %v669_v51 = vpop.f32.mrb[8].mxu0 }
  0xf6   : > { %v420_v52 = vadd.f32 %v669_v51, %v802_v18  ;;  %v685_v53 = vpop.f32.mrb[8].mxu1  ;;  %v411_v54 = vpop.f32.mrb[9].mxu0 }
  0xf7   : > { %v484_v55 = vadd.f32 %v685_v53, %v802_v18  ;;  %v412_v56 = vadd.f32 %v802_v18, %v411_v54  ;;  %v475_v57 = vpop.f32.mrb[9].mxu1  ;;  %v670_v58 = vpop.f32.mrb[10].mxu0 }
  0xf8   : > { %517 = vst.msk [vmem:[%s807_s25 + $0x50] sm:$0xff] %vm506_vm2, %v420_v52  ;;  %v476_v59 = vadd.f32 %v802_v18, %v475_v57  ;;  %v423_v60 = vadd.f32 %v670_v58, %v802_v18  ;;  %v686_v61 = vpop.f32.mrb[10].mxu1  ;;  %v414_v62 = vpop.f32.mrb[11].mxu0 }
  0xf9   : > { %533 = vst.msk [vmem:[%s807_s25 + $0xd0] sm:$0xff] %vm506_vm2, %v484_v55  ;;  %515 = vst.msk [vmem:[%s807_s25 + $0x40] sm:$0xff] %vm506_vm2, %v412_v56  ;;  %v487_v63 = vadd.f32 %v686_v61, %v802_v18  ;;  %v415_v0 = vadd.f32 %v802_v18, %v414_v62  ;;  %v478_v1 = vpop.f32.mrb[11].mxu1 }
  0xfa   : > { %531 = vst.msk [vmem:[%s807_s25 + $0xc0] sm:$0xff] %vm506_vm2, %v476_v59  ;;  %518 = vst.msk [vmem:[%s807_s25 + $0x58] sm:$0xff] %vm506_vm2, %v423_v60  ;;  %v479_v2 = vadd.f32 %v802_v18, %v478_v1 }
  0xfb   : > { %534 = vst.msk [vmem:[%s807_s25 + $0xd8] sm:$0xff] %vm506_vm2, %v487_v63  ;;  %516 = vst.msk [vmem:[%s807_s25 + $0x48] sm:$0xff] %vm506_vm2, %v415_v0 }
  0xfc   : > { %532 = vst.msk [vmem:[%s807_s25 + $0xc8] sm:$0xff] %vm506_vm2, %v479_v2 }
  0xfd   : > { %v673_v3 = vpop.f32.mrb[12].mxu0 }
  0xfe   : > { %v436_v4 = vadd.f32 %v673_v3, %v802_v18  ;;  %v689_v5 = vpop.f32.mrb[12].mxu1  ;;  %v427_v6 = vpop.f32.mrb[13].mxu0 }
  0xff   : > { %v500_v7 = vadd.f32 %v689_v5, %v802_v18  ;;  %v428_v8 = vadd.f32 %v802_v18, %v427_v6  ;;  %v491_v9 = vpop.f32.mrb[13].mxu1  ;;  %v674_v10 = vpop.f32.mrb[14].mxu0 }
 0x100   : > { %521 = vst.msk [vmem:[%s807_s25 + $0x70] sm:$0xff] %vm506_vm2, %v436_v4  ;;  %v492_v11 = vadd.f32 %v802_v18, %v491_v9  ;;  %v439_v12 = vadd.f32 %v674_v10, %v802_v18  ;;  %v690_v13 = vpop.f32.mrb[14].mxu1  ;;  %v430_v14 = vpop.f32.mrb[15].mxu0 }
 0x101   : > { %537 = vst.msk [vmem:[%s807_s25 + $0xf0] sm:$0xff] %vm506_vm2, %v500_v7  ;;  %519 = vst.msk [vmem:[%s807_s25 + $0x60] sm:$0xff] %vm506_vm2, %v428_v8  ;;  %v503_v15 = vadd.f32 %v690_v13, %v802_v18  ;;  %v431_v16 = vadd.f32 %v802_v18, %v430_v14  ;;  %v494_v17 = vpop.f32.mrb[15].mxu1 }
 0x102   : > { %535 = vst.msk [vmem:[%s807_s25 + $0xe0] sm:$0xff] %vm506_vm2, %v492_v11  ;;  %522 = vst.msk [vmem:[%s807_s25 + $0x78] sm:$0xff] %vm506_vm2, %v439_v12  ;;  %v495_v19 = vadd.f32 %v802_v18, %v494_v17 }
 0x103   : > { %538 = vst.msk [vmem:[%s807_s25 + $0xf8] sm:$0xff] %vm506_vm2, %v503_v15  ;;  %520 = vst.msk [vmem:[%s807_s25 + $0x68] sm:$0xff] %vm506_vm2, %v431_v16 }
 0x104   : > { %536 = vst.msk [vmem:[%s807_s25 + $0xe8] sm:$0xff] %vm506_vm2, %v495_v19 }
 0x105 PF: > { %s13_s12 = sadd.s32 1, %s725_s12  }
 0x106   : > { %p10_p4 = scmp.ge.s32.totalorder %s13_s12, 4  }
 0x108   :  { %12 = sbr.rel (!%p10_p4) target bundleno = 1 (0x1), region = 62 }

// kernel: unet_forward.14
= control target key start
LH: loop header
LB: loop body
LE: loop exit
PB: predicated region body
PF: predicated region fallthrough
CT: control target
= control target key end

     0   :  { %s3897_s18 = smov 0   ;;  %s5154_s0 = inlined_call_operand.vmem [shape: bf16[2,16,16,16], index: 0, kind: input, shape index: {}]   ;;  %s5155_s1 = inlined_call_operand.vmem [shape: bf16[3,48,8], index: 1, kind: input, shape index: {}]   ;;  %s5156_s2 = inlined_call_operand.vmem [shape: f32[1,8], index: 2, kind: input, shape index: {}]   ;;  %s5157_s3 = inlined_call_operand.vmem [shape: bf16[3,24,8], index: 3, kind: input, shape index: {}]   ;;  %s5158_s4 = inlined_call_operand.vmem [shape: f32[1,8], index: 4, kind: input, shape index: {}]   ;;  %s5159_s5 = inlined_call_operand.vmem [shape: f32[2,256,8], index: 5, kind: output, shape index: {}]  }
   0x1 LB: > { %s2981_s19 = sadd.s32 4294967295, %s3861_s18   ;;  %p2985_p0 = scmp.ge.s32.totalorder %s3861_s18, 1  ;;  %s3861_s18 = sphi %s3897_s18, %s15_s18  }
   0x2   : > { %p187_p1 = scmp.lt.s32.totalorder %s3861_s18, 3 }
   0x4   : > { %p188_p2 = pnand %p2985_p0, %p187_p1 }
   0x5   : > { %p3907_p3 = scmp.lt.s32.totalorder (!%p188_p2), %s2981_s19, 1  ;;  %vm233_vm0 = vcmask (!%p188_p2), 122880   ;;  %vm250_vm1 = vcmask (!%p188_p2), 385280   ;;  %v3863_v0 = vmov (!%p188_p2), 0.0   ;;  %v3840_v1 = vld [vmem:[%s5155_s1 + $0x18] sm:$0xff] (!%p188_p2)   ;;  %s3864_s27 = smov (!%p188_p2), 16  }
   0x6   : > { %191 = sbr.rel (%p188_p2) target bundleno = 1100 (0x44c), region = 40  ;;  %234 = vst.msk [vmem:[#allocation2 + $0x10] sm:$0x1] (!%p188_p2), %vm233_vm0, %v3863_v0  ;;  %235 = vst.msk [vmem:[#allocation2 + $0x20] sm:$0x1] (!%p188_p2), %vm233_vm0, %v3863_v0  ;;  %3315 = vmatprep.subr.bf16.mxu0 (!%p188_p2), %v3840_v1  ;;  %s3865_s28 = smov (!%p188_p2), 32  }
   0x7   : > { %251 = vst.msk [vmem:[#allocation2 + $0x1f] sm:$0x1] (!%p188_p2), %vm250_vm1, %v3863_v0  ;;  %252 = vst.msk [vmem:[#allocation2 + $0x2f] sm:$0x1] (!%p188_p2), %vm250_vm1, %v3863_v0  ;;  %3316 = vmatpush3.bf16.msra.mxu0 (!%p188_p2), %v3840_v1  ;;  %v3841_v16 = vld [vmem:[%s5155_s1 + $0x20] sm:$0xff] (!%p188_p2)   ;;  %v3842_v17 = vld [vmem:[%s5155_s1 + $0x28] sm:$0xff] (!%p188_p2)  }
   0x8   : > { %236 = vst.msk [vmem:[#allocation2 + $0x30] sm:$0x1] (!%p188_p2), %vm233_vm0, %v3863_v0  ;;  %237 = vst.msk [vmem:[#allocation2 + $0x40] sm:$0x1] (!%p188_p2), %vm233_vm0, %v3863_v0  ;;  %3317 = vmatprep.subr.bf16.mxu0 (!%p188_p2), %v3841_v16  ;;  %v4045_v22 = vld [vmem:[%s5155_s1] sm:$0xff] (!%p188_p2)   ;;  %vm226_vm2 = vcmask (!%p188_p2), 392192  }
   0x9   : > { %238 = vst.msk [vmem:[#allocation2 + $0x50] sm:$0x1] (!%p188_p2), %vm233_vm0, %v3863_v0  ;;  %239 = vst.msk [vmem:[#allocation2 + $0x60] sm:$0x1] (!%p188_p2), %vm233_vm0, %v3863_v0  ;;  %vm500_vm3 = vcmask (!%p188_p2), 261248   ;;  %vm533_vm4 = vcmask (!%p188_p2), 130048  }
   0xa   : > { %240 = vst.msk [vmem:[#allocation2 + $0x70] sm:$0x1] (!%p188_p2), %vm233_vm0, %v3863_v0  ;;  %241 = vst.msk [vmem:[#allocation2 + $0x80] sm:$0x1] (!%p188_p2), %vm233_vm0, %v3863_v0  ;;  %vm535_vm5 = vcmask (!%p188_p2), 129024   ;;  %vm663_vm6 = vcmask (!%p188_p2), 392449  }
   0xb   : > { %242 = vst.msk [vmem:[#allocation2 + $0x90] sm:$0x1] (!%p188_p2), %vm233_vm0, %v3863_v0  ;;  %243 = vst.msk [vmem:[#allocation2 + $0xa0] sm:$0x1] (!%p188_p2), %vm233_vm0, %v3863_v0  ;;  %3318 = vmatpush3.bf16.msra.mxu0 (!%p188_p2), %v3841_v16  ;;  %vm665_vm7 = vcmask (!%p188_p2), 392448   ;;  %vm274_vm8 = vcmask (!%p188_p2), 57344  }
   0xc   : > { %244 = vst.msk [vmem:[#allocation2 + $0xb0] sm:$0x1] (!%p188_p2), %vm233_vm0, %v3863_v0  ;;  %245 = vst.msk [vmem:[#allocation2 + $0xc0] sm:$0x1] (!%p188_p2), %vm233_vm0, %v3863_v0  ;;  %3319 = vmatprep.subr.bf16.mxu0 (!%p188_p2), %v3842_v17  ;;  %vm291_vm9 = vcmask (!%p188_p2), 188544   ;;  %s3866_s24 = smov (!%p188_p2), 8  }
   0xd   : > { %246 = vst.msk [vmem:[#allocation2 + $0xd0] sm:$0x1] %vm233_vm0, %v3863_v0  ;;  %247 = vst.msk [vmem:[#allocation2 + $0xe0] sm:$0x1] %vm233_vm0, %v3863_v0  ;;  %s5162_s19 = smov (!%p3907_p3, %s2981_s19), 1  ;;  %vm2132_vm10 = vcmask 1043456  }
   0xe   : > { %248 = vst.msk [vmem:[#allocation2 + $0xf0] sm:$0x1] %vm233_vm0, %v3863_v0  ;;  %249 = vst.msk [vmem:[#allocation2 + $0x100] sm:$0x1] %vm233_vm0, %v3863_v0  ;;  %s3123_s23 = sshll.u32 %s5162_s19, 7  ;;  %vm267_vm11 = vcmask 195584  }
   0xf   : > { %253 = vst.msk [vmem:[#allocation2 + $0x3f] sm:$0x1] %vm250_vm1, %v3863_v0  ;;  %254 = vst.msk [vmem:[#allocation2 + $0x4f] sm:$0x1] %vm250_vm1, %v3863_v0  ;;  %s3988_s26 = scalar_lea.vmem %s5154_s0, %s3123_s23  ;;  %3320 = vmatpush3.bf16.msra.mxu0 %v3842_v17  ;;  %vm1774_vm12 = vcmask 130112   ;;  %vm1807_vm13 = vcmask 64512  }
  0x10   : > { %255 = vst.msk [vmem:[#allocation2 + $0x5f] sm:$0x1] %vm250_vm1, %v3863_v0  ;;  %256 = vst.msk [vmem:[#allocation2 + $0x6f] sm:$0x1] %vm250_vm1, %v3863_v0  ;;  %v3991_v2 = vld [vmem:[%s3988_s26] sm:$0xff]   ;;  %v3994_v3 = vld [vmem:[%s3988_s26 + $0x8] sm:$0xff]   ;;  %3353 = vmatprep.subr.bf16.mxu0 %v4045_v22 }
  0x11   : > { %257 = vst.msk [vmem:[#allocation2 + $0x7f] sm:$0x1] %vm250_vm1, %v3863_v0  ;;  %258 = vst.msk [vmem:[#allocation2 + $0x8f] sm:$0x1] %vm250_vm1, %v3863_v0  ;;  %v3127_v4 = vunpack.c.l.bf16 %v3991_v2  ;;  %v3128_v5 = vunpack.c.h.bf16 %v3991_v2  ;;  %v3131_v6 = vunpack.c.l.bf16 %v3994_v3  ;;  %v3132_v7 = vunpack.c.h.bf16 %v3994_v3  ;;  %v4001_v8 = vld [vmem:[%s3988_s26 + $0x10] sm:$0xff]   ;;  %v4004_v9 = vld [vmem:[%s3988_s26 + $0x18] sm:$0xff]  }
  0x12   : > { %259 = vst.msk [vmem:[#allocation2 + $0x9f] sm:$0x1] %vm250_vm1, %v3863_v0  ;;  %260 = vst.msk [vmem:[#allocation2 + $0xaf] sm:$0x1] %vm250_vm1, %v3863_v0  ;;  %v3135_v11 = vunpack.c.l.bf16 %v4001_v8  ;;  %v3136_v12 = vunpack.c.h.bf16 %v4001_v8  ;;  %v3139_v14 = vunpack.c.l.bf16 %v4004_v9  ;;  %v3140_v15 = vunpack.c.h.bf16 %v4004_v9  ;;  %v4027_v18 = vld [vmem:[%s3988_s26 + $0x20] sm:$0xff]   ;;  %v4030_v19 = vld [vmem:[%s3988_s26 + $0x28] sm:$0xff]  }
  0x13   : > { %261 = vst.msk [vmem:[#allocation2 + $0xbf] sm:$0x1] %vm250_vm1, %v3863_v0  ;;  %262 = vst.msk [vmem:[#allocation2 + $0xcf] sm:$0x1] %vm250_vm1, %v3863_v0  ;;  %v3680_v10 = vpack.i.bf16 %v3128_v5, %v3127_v4  ;;  %v3685_v13 = vpack.i.bf16 %v3132_v7, %v3131_v6  ;;  %v3143_v23 = vunpack.c.l.bf16 %v4027_v18  ;;  %v3144_v24 = vunpack.c.h.bf16 %v4027_v18  ;;  %v4065_v29 = vld [vmem:[%s3988_s26 + $0x30] sm:$0xff]   ;;  %v4068_v30 = vld [vmem:[%s3988_s26 + $0x38] sm:$0xff]  }
  0x14   : > { %263 = vst.msk [vmem:[#allocation2 + $0xdf] sm:$0x1] %vm250_vm1, %v3863_v0  ;;  %264 = vst.msk [vmem:[#allocation2 + $0xef] sm:$0x1] %vm250_vm1, %v3863_v0  ;;  %v3700_v20 = vpack.i.bf16 %v3136_v12, %v3135_v11  ;;  %v3705_v21 = vpack.i.bf16 %v3140_v15, %v3139_v14  ;;  %v3147_v25 = vunpack.c.l.bf16 %v4030_v19  ;;  %v3148_v26 = vunpack.c.h.bf16 %v4030_v19  ;;  %v4095_v37 = vld [vmem:[%s3988_s26 + $0x40] sm:$0xff]   ;;  %v4098_v38 = vld [vmem:[%s3988_s26 + $0x48] sm:$0xff]  }
  0x15   : > { %265 = vst.msk [vmem:[#allocation2 + $0xff] sm:$0x1] %vm250_vm1, %v3863_v0  ;;  %266 = vst.msk [vmem:[#allocation2 + $0x10f] sm:$0x1] %vm250_vm1, %v3863_v0  ;;  %3681 = vrot.lane.b32.xlu0 %v3680_v10, %s3864_s27  ;;  %3691 = vrot.lane.b32.xlu1 %v3680_v10, %s3865_s28  ;;  %v3720_v27 = vpack.i.bf16 %v3144_v24, %v3143_v23  ;;  %v3151_v31 = vunpack.c.l.bf16 %v4065_v29  ;;  %v3152_v32 = vunpack.c.h.bf16 %v4065_v29  ;;  %v3155_v33 = vunpack.c.l.bf16 %v4068_v30  ;;  %v4117_v45 = vld [vmem:[%s3988_s26 + $0x50] sm:$0xff]   ;;  %v4120_v46 = vld [vmem:[%s3988_s26 + $0x58] sm:$0xff]  }
  0x16   : > { %v3725_v28 = vpack.i.bf16 %v3148_v26, %v3147_v25  ;;  %227 = vst.msk [vmem:[#allocation2] sm:$0xff] %vm226_vm2, %v3863_v0  ;;  %228 = vst.msk [vmem:[#allocation2 + $0x8] sm:$0xff] %vm226_vm2, %v3863_v0  ;;  %v3156_v34 = vunpack.c.h.bf16 %v4068_v30  ;;  %v3159_v39 = vunpack.c.l.bf16 %v4095_v37  ;;  %v3160_v40 = vunpack.c.h.bf16 %v4095_v37  ;;  %v4139_v53 = vld [vmem:[%s3988_s26 + $0x60] sm:$0xff]   ;;  %v4142_v54 = vld [vmem:[%s3988_s26 + $0x68] sm:$0xff]   ;;  %s3124_s14 = sshll.u32 %s5162_s19, 8 }
  0x17   : > { %230 = vst.msk [vmem:[#allocation2 + $0x110] sm:$0xff] %vm226_vm2, %v3863_v0  ;;  %231 = vst.msk [vmem:[#allocation2 + $0x118] sm:$0xff] %vm226_vm2, %v3863_v0  ;;  %v3740_v35 = vpack.i.bf16 %v3152_v32, %v3151_v31  ;;  %v3163_v41 = vunpack.c.l.bf16 %v4098_v38  ;;  %v3164_v42 = vunpack.c.h.bf16 %v4098_v38  ;;  %v3167_v47 = vunpack.c.l.bf16 %v4117_v45  ;;  %v4161_v61 = vld [vmem:[%s3988_s26 + $0x70] sm:$0xff]   ;;  %v4164_v62 = vld [vmem:[%s3988_s26 + $0x78] sm:$0xff]   ;;  %s5054_s17 = scalar_lea.vmem %s5159_s5, %s3124_s14 }
  0x18   : > { %v3745_v36 = vpack.i.bf16 %v3156_v34, %v3155_v33  ;;  %v3760_v43 = vpack.i.bf16 %v3160_v40, %v3159_v39  ;;  %v3168_v48 = vunpack.c.h.bf16 %v4117_v45  ;;  %v3171_v49 = vunpack.c.l.bf16 %v4120_v46  ;;  %276 = vst.msk [vmem:[#allocation3 + $0x20] sm:$0x1] %vm274_vm8, %v3863_v0  ;;  %275 = vst.msk [vmem:[#allocation3 + $0x10] sm:$0x1] %vm274_vm8, %v3863_v0 }
  0x19   : > { %3686 = vrot.lane.b32.xlu0 %v3685_v13, %s3864_s27  ;;  %3696 = vrot.lane.b32.xlu1 %v3685_v13, %s3865_s28  ;;  %v3765_v44 = vpack.i.bf16 %v3164_v42, %v3163_v41  ;;  %v3172_v50 = vunpack.c.h.bf16 %v4120_v46  ;;  %v3175_v55 = vunpack.c.l.bf16 %v4139_v53  ;;  %v3176_v56 = vunpack.c.h.bf16 %v4139_v53  ;;  %277 = vst.msk [vmem:[#allocation3 + $0x30] sm:$0x1] %vm274_vm8, %v3863_v0  ;;  %278 = vst.msk [vmem:[#allocation3 + $0x40] sm:$0x1] %vm274_vm8, %v3863_v0 }
  0x1a   : > { %v3780_v51 = vpack.i.bf16 %v3168_v48, %v3167_v47  ;;  %v3179_v57 = vunpack.c.l.bf16 %v4142_v54  ;;  %v3180_v58 = vunpack.c.h.bf16 %v4142_v54  ;;  %v3183_v63 = vunpack.c.l.bf16 %v4161_v61  ;;  %279 = vst.msk [vmem:[#allocation3 + $0x50] sm:$0x1] %vm274_vm8, %v3863_v0  ;;  %280 = vst.msk [vmem:[#allocation3 + $0x60] sm:$0x1] %vm274_vm8, %v3863_v0 }
  0x1b   : > { %v3785_v52 = vpack.i.bf16 %v3172_v50, %v3171_v49  ;;  %v3800_v59 = vpack.i.bf16 %v3176_v56, %v3175_v55  ;;  %v3184_v1 = vunpack.c.h.bf16 %v4161_v61  ;;  %v3187_v10 = vunpack.c.l.bf16 %v4164_v62  ;;  %281 = vst.msk [vmem:[#allocation3 + $0x70] sm:$0x1] %vm274_vm8, %v3863_v0  ;;  %282 = vst.msk [vmem:[#allocation3 + $0x80] sm:$0x1] %vm274_vm8, %v3863_v0 }
  0x1c   : > { %v3805_v60 = vpack.i.bf16 %v3180_v58, %v3179_v57  ;;  %v3188_v13 = vunpack.c.h.bf16 %v4164_v62  ;;  %283 = vst.msk [vmem:[#allocation3 + $0x90] sm:$0x1] %vm274_vm8, %v3863_v0  ;;  %284 = vst.msk [vmem:[#allocation3 + $0xa0] sm:$0x1] %vm274_vm8, %v3863_v0  ;;  %vm1809_vm14 = vcmask 63488   ;;  %vm1937_vm15 = vcmask 195713  }
  0x1d   : > { %3701 = vrot.lane.b32.xlu0 %v3700_v20, %s3864_s27  ;;  %3706 = vrot.lane.b32.xlu1 %v3705_v21, %s3864_s27  ;;  %v3820_v16 = vpack.i.bf16 %v3184_v1, %v3183_v63  ;;  %285 = vst.msk [vmem:[#allocation3 + $0xb0] sm:$0x1] %vm274_vm8, %v3863_v0  ;;  %286 = vst.msk [vmem:[#allocation3 + $0xc0] sm:$0x1] %vm274_vm8, %v3863_v0  ;;  %vm1939_vm0 = vcmask 195712  }
  0x1e   : > { %v3825_v17 = vpack.i.bf16 %v3188_v13, %v3187_v10  ;;  %287 = vst.msk [vmem:[#allocation3 + $0xd0] sm:$0x1] %vm274_vm8, %v3863_v0  ;;  %288 = vst.msk [vmem:[#allocation3 + $0xe0] sm:$0x1] %vm274_vm8, %v3863_v0 }
  0x1f   : > { %289 = vst.msk [vmem:[#allocation3 + $0xf0] sm:$0x1] %vm274_vm8, %v3863_v0  ;;  %290 = vst.msk [vmem:[#allocation3 + $0x100] sm:$0x1] %vm274_vm8, %v3863_v0 }
  0x20   : > { %293 = vst.msk [vmem:[#allocation3 + $0x2f] sm:$0x1] %vm291_vm9, %v3863_v0  ;;  %292 = vst.msk [vmem:[#allocation3 + $0x1f] sm:$0x1] %vm291_vm9, %v3863_v0 }
  0x21   : > { %3711 = vrot.lane.b32.xlu0 %v3700_v20, %s3865_s28  ;;  %3716 = vrot.lane.b32.xlu1 %v3705_v21, %s3865_s28  ;;  %294 = vst.msk [vmem:[#allocation3 + $0x3f] sm:$0x1] %vm291_vm9, %v3863_v0  ;;  %295 = vst.msk [vmem:[#allocation3 + $0x4f] sm:$0x1] %vm291_vm9, %v3863_v0 }
  0x22   : > { %296 = vst.msk [vmem:[#allocation3 + $0x5f] sm:$0x1] %vm291_vm9, %v3863_v0  ;;  %297 = vst.msk [vmem:[#allocation3 + $0x6f] sm:$0x1] %vm291_vm9, %v3863_v0 }
  0x23   : > { %298 = vst.msk [vmem:[#allocation3 + $0x7f] sm:$0x1] %vm291_vm9, %v3863_v0  ;;  %299 = vst.msk [vmem:[#allocation3 + $0x8f] sm:$0x1] %vm291_vm9, %v3863_v0 }
  0x24   : > { %300 = vst.msk [vmem:[#allocation3 + $0x9f] sm:$0x1] %vm291_vm9, %v3863_v0  ;;  %301 = vst.msk [vmem:[#allocation3 + $0xaf] sm:$0x1] %vm291_vm9, %v3863_v0 }
  0x25   : > { %3721 = vrot.lane.b32.xlu0 %v3720_v27, %s3864_s27  ;;  %3726 = vrot.lane.b32.xlu1 %v3725_v28, %s3864_s27  ;;  %302 = vst.msk [vmem:[#allocation3 + $0xbf] sm:$0x1] %vm291_vm9, %v3863_v0  ;;  %303 = vst.msk [vmem:[#allocation3 + $0xcf] sm:$0x1] %vm291_vm9, %v3863_v0 }
  0x26   : > { %304 = vst.msk [vmem:[#allocation3 + $0xdf] sm:$0x1] %vm291_vm9, %v3863_v0  ;;  %305 = vst.msk [vmem:[#allocation3 + $0xef] sm:$0x1] %vm291_vm9, %v3863_v0 }
  0x27   : > { %306 = vst.msk [vmem:[#allocation3 + $0xff] sm:$0x1] %vm291_vm9, %v3863_v0  ;;  %307 = vst.msk [vmem:[#allocation3 + $0x10f] sm:$0x1] %vm291_vm9, %v3863_v0 }
  0x28   : > { %268 = vst.msk [vmem:[#allocation3] sm:$0xff] %vm267_vm11, %v3863_v0  ;;  %269 = vst.msk [vmem:[#allocation3 + $0x8] sm:$0xff] %vm267_vm11, %v3863_v0 }
  0x29   : > { %3731 = vrot.lane.b32.xlu0 %v3720_v27, %s3865_s28  ;;  %3736 = vrot.lane.b32.xlu1 %v3725_v28, %s3865_s28  ;;  %271 = vst.msk [vmem:[#allocation3 + $0x110] sm:$0xff] %vm267_vm11, %v3863_v0  ;;  %272 = vst.msk [vmem:[#allocation3 + $0x118] sm:$0xff] %vm267_vm11, %v3863_v0 }
  0x2d   : > { %3741 = vrot.lane.b32.xlu0 %v3740_v35, %s3864_s27  ;;  %3746 = vrot.lane.b32.xlu1 %v3745_v36, %s3864_s27 }
  0x31   : > { %3751 = vrot.lane.b32.xlu0 %v3740_v35, %s3865_s28  ;;  %3756 = vrot.lane.b32.xlu1 %v3745_v36, %s3865_s28 }
  0x35   : > { %3761 = vrot.lane.b32.xlu0 %v3760_v43, %s3864_s27  ;;  %3766 = vrot.lane.b32.xlu1 %v3765_v44, %s3864_s27 }
  0x39   : > { %3771 = vrot.lane.b32.xlu0 %v3760_v43, %s3865_s28  ;;  %3776 = vrot.lane.b32.xlu1 %v3765_v44, %s3865_s28 }
  0x3d   : > { %3781 = vrot.lane.b32.xlu0 %v3780_v51, %s3864_s27  ;;  %3786 = vrot.lane.b32.xlu1 %v3785_v52, %s3864_s27 }
  0x41   : > { %3791 = vrot.lane.b32.xlu0 %v3780_v51, %s3865_s28  ;;  %3796 = vrot.lane.b32.xlu1 %v3785_v52, %s3865_s28 }
  0x45   : > { %3801 = vrot.lane.b32.xlu0 %v3800_v59, %s3864_s27  ;;  %3806 = vrot.lane.b32.xlu1 %v3805_v60, %s3864_s27 }
  0x49   : > { %3811 = vrot.lane.b32.xlu0 %v3800_v59, %s3865_s28  ;;  %3816 = vrot.lane.b32.xlu1 %v3805_v60, %s3865_s28 }
  0x4d   : > { %3821 = vrot.lane.b32.xlu0 %v3820_v16, %s3864_s27  ;;  %3826 = vrot.lane.b32.xlu1 %v3825_v17, %s3864_s27 }
  0x51   : > { %3831 = vrot.lane.b32.xlu0 %v3820_v16, %s3865_s28  ;;  %3836 = vrot.lane.b32.xlu1 %v3825_v17, %s3865_s28 }
  0x87   : > { %v3682_v20 = vpop.permute.xlu0 %3681  ;;  %v3692_v21 = vpop.permute.xlu1 %3691 }
  0x88   : > { %v3684_v27 = vunpack.i.h.bf16 %v3682_v20  ;;  %v3683_v28 = vunpack.i.l.bf16 %v3682_v20  ;;  %v3694_v35 = vunpack.i.h.bf16 %v3692_v21  ;;  %v3693_v36 = vunpack.i.l.bf16 %v3692_v21 }
  0x8a   : > { %502 = vst.msk [vmem:[#allocation2 + $0x18] sm:$0xff] %vm500_vm3, %v3684_v27  ;;  %501 = vst.msk [vmem:[#allocation2 + $0x10] sm:$0xff] %vm500_vm3, %v3683_v28 }
  0x8b   : > { %536 = vst.msk [vmem:[#allocation2 + $0x19] sm:$0x7f] %vm535_vm5, %v3128_v5  ;;  %v3687_v43 = vpop.permute.xlu0 %3686  ;;  %v3697_v44 = vpop.permute.xlu1 %3696 }
  0x8c   : > { %534 = vst.msk [vmem:[#allocation2 + $0x11] sm:$0xff] %vm533_vm4, %v3127_v4  ;;  %v3689_v51 = vunpack.i.h.bf16 %v3687_v43  ;;  %v3688_v52 = vunpack.i.l.bf16 %v3687_v43  ;;  %v3699_v59 = vunpack.i.h.bf16 %v3697_v44  ;;  %v3698_v60 = vunpack.i.l.bf16 %v3697_v44 }
  0x8d   : > { %664 = vst.msk [vmem:[#allocation2 + $0xf] sm:$0xfe] %vm663_vm6, %v3693_v36 }
  0x8e   : > { %666 = vst.msk [vmem:[#allocation2 + $0x17] sm:$0xff] %vm665_vm7, %v3694_v35 }
  0x8f   : > { %504 = vst.msk [vmem:[#allocation2 + $0x28] sm:$0xff] %vm500_vm3, %v3689_v51  ;;  %503 = vst.msk [vmem:[#allocation2 + $0x20] sm:$0xff] %vm500_vm3, %v3688_v52  ;;  %v3702_v2 = vpop.permute.xlu0 %3701  ;;  %v3707_v4 = vpop.permute.xlu1 %3706 }
  0x90   : > { %538 = vst.msk [vmem:[#allocation2 + $0x29] sm:$0x7f] %vm535_vm5, %v3132_v7  ;;  %v3704_v5 = vunpack.i.h.bf16 %v3702_v2  ;;  %v3703_v16 = vunpack.i.l.bf16 %v3702_v2  ;;  %v3709_v17 = vunpack.i.h.bf16 %v3707_v4  ;;  %v3708_v20 = vunpack.i.l.bf16 %v3707_v4 }
  0x91   : > { %537 = vst.msk [vmem:[#allocation2 + $0x21] sm:$0xff] %vm533_vm4, %v3131_v6 }
  0x92   : > { %667 = vst.msk [vmem:[#allocation2 + $0x1f] sm:$0xfe] %vm663_vm6, %v3698_v60 }
  0x93   : > { %668 = vst.msk [vmem:[#allocation2 + $0x27] sm:$0xff] %vm665_vm7, %v3699_v59  ;;  %v3712_v3 = vpop.permute.xlu0 %3711  ;;  %v3717_v6 = vpop.permute.xlu1 %3716  ;;  %v3844_v59 = vld [vmem:[%s5155_s1 + $0x8] sm:$0xff]  }
  0x94   : > { %506 = vst.msk [vmem:[#allocation2 + $0x38] sm:$0xff] %vm500_vm3, %v3704_v5  ;;  %505 = vst.msk [vmem:[#allocation2 + $0x30] sm:$0xff] %vm500_vm3, %v3703_v16  ;;  %v3714_v27 = vunpack.i.h.bf16 %v3712_v3  ;;  %v3713_v28 = vunpack.i.l.bf16 %v3712_v3  ;;  %v3719_v35 = vunpack.i.h.bf16 %v3717_v6 }
  0x95   : > { %508 = vst.msk [vmem:[#allocation2 + $0x48] sm:$0xff] %vm500_vm3, %v3709_v17  ;;  %507 = vst.msk [vmem:[#allocation2 + $0x40] sm:$0xff] %vm500_vm3, %v3708_v20  ;;  %v752_v7 = vld [vmem:[#allocation2 + $0x10] sm:$0xff]  ;;  %v753_v21 = vld [vmem:[#allocation2 + $0x18] sm:$0xff] }
  0x96   : > { %540 = vst.msk [vmem:[#allocation2 + $0x39] sm:$0x7f] %vm535_vm5, %v3136_v12  ;;  %542 = vst.msk [vmem:[#allocation2 + $0x49] sm:$0x7f] %vm535_vm5, %v3140_v15  ;;  %v3718_v12 = vunpack.i.l.bf16 %v3717_v6  ;;  %v4222_v36 = vpack.c.bf16 %v753_v21, %v752_v7 }
  0x97   : > { %539 = vst.msk [vmem:[#allocation2 + $0x31] sm:$0xff] %vm533_vm4, %v3135_v11  ;;  %541 = vst.msk [vmem:[#allocation2 + $0x41] sm:$0xff] %vm533_vm4, %v3139_v14  ;;  %v3722_v8 = vpop.permute.xlu0 %3721  ;;  %v3727_v9 = vpop.permute.xlu1 %3726 }
  0x98   : > { %669 = vst.msk [vmem:[#allocation2 + $0x2f] sm:$0xfe] %vm663_vm6, %v3713_v28  ;;  %671 = vst.msk [vmem:[#allocation2 + $0x3f] sm:$0xfe] %vm663_vm6, %v3718_v12  ;;  %3321 = vmatprep.mubr.msk.bf16.mxu0 %vm226_vm2, %v4222_v36  ;;  %v3724_v15 = vunpack.i.h.bf16 %v3722_v8  ;;  %v3723_v43 = vunpack.i.l.bf16 %v3722_v8  ;;  %v3729_v44 = vunpack.i.h.bf16 %v3727_v9  ;;  %v3728_v51 = vunpack.i.l.bf16 %v3727_v9  ;;  %v4270_v28 = vld [vmem:[%s5155_s1 + $0x30] sm:$0xff]  }
  0x99   : > { %670 = vst.msk [vmem:[#allocation2 + $0x37] sm:$0xff] %vm665_vm7, %v3714_v27  ;;  %672 = vst.msk [vmem:[#allocation2 + $0x47] sm:$0xff] %vm665_vm7, %v3719_v35 }
  0x9a   : > { %v754_v11 = vld [vmem:[#allocation2 + $0x20] sm:$0xff]  ;;  %v755_v14 = vld [vmem:[#allocation2 + $0x28] sm:$0xff]  ;;  %510 = vst.msk [vmem:[#allocation2 + $0x58] sm:$0xff] %vm500_vm3, %v3724_v15  ;;  %509 = vst.msk [vmem:[#allocation2 + $0x50] sm:$0xff] %vm500_vm3, %v3723_v43 }
  0x9b   : > { %v4230_v52 = vpack.c.bf16 %v755_v14, %v754_v11  ;;  %512 = vst.msk [vmem:[#allocation2 + $0x68] sm:$0xff] %vm500_vm3, %v3729_v44  ;;  %511 = vst.msk [vmem:[#allocation2 + $0x60] sm:$0xff] %vm500_vm3, %v3728_v51  ;;  %v3732_v60 = vpop.permute.xlu0 %3731  ;;  %v3737_v2 = vpop.permute.xlu1 %3736 }
  0x9c   : > { %544 = vst.msk [vmem:[#allocation2 + $0x59] sm:$0x7f] %vm535_vm5, %v3144_v24  ;;  %546 = vst.msk [vmem:[#allocation2 + $0x69] sm:$0x7f] %vm535_vm5, %v3148_v26  ;;  %v3734_v24 = vunpack.i.h.bf16 %v3732_v60  ;;  %v3733_v4 = vunpack.i.l.bf16 %v3732_v60  ;;  %v3739_v18 = vunpack.i.h.bf16 %v3737_v2  ;;  %v3738_v5 = vunpack.i.l.bf16 %v3737_v2 }
  0x9d   : > { %543 = vst.msk [vmem:[#allocation2 + $0x51] sm:$0xff] %vm533_vm4, %v3143_v23  ;;  %545 = vst.msk [vmem:[#allocation2 + $0x61] sm:$0xff] %vm533_vm4, %v3147_v25  ;;  %3322 = vmatmul.mubr.msk.bf16.vlgmr.msra.gmra.mrb[0].mxu0 %vm226_vm2, %v4230_v52  ;;  %v3845_v23 = vld [vmem:[%s5155_s1 + $0x10] sm:$0xff]  }
  0x9e   : > { %3354 = vmatpush3.bf16.msra.mxu0 %v4045_v22  ;;  %673 = vst.msk [vmem:[#allocation2 + $0x4f] sm:$0xfe] %vm663_vm6, %v3733_v4  ;;  %675 = vst.msk [vmem:[#allocation2 + $0x5f] sm:$0xfe] %vm663_vm6, %v3738_v5 }
  0x9f   : > { %3355 = vmatprep.subr.bf16.mxu0 %v3844_v59  ;;  %674 = vst.msk [vmem:[#allocation2 + $0x57] sm:$0xff] %vm665_vm7, %v3734_v24  ;;  %676 = vst.msk [vmem:[#allocation2 + $0x67] sm:$0xff] %vm665_vm7, %v3739_v18  ;;  %v3742_v17 = vpop.permute.xlu0 %3741  ;;  %v3747_v20 = vpop.permute.xlu1 %3746 }
  0xa0   : > { %v756_v26 = vld [vmem:[#allocation2 + $0x30] sm:$0xff]  ;;  %v757_v16 = vld [vmem:[#allocation2 + $0x38] sm:$0xff]  ;;  %v758_v19 = vld [vmem:[#allocation2 + $0x40] sm:$0xff]  ;;  %v3744_v6 = vunpack.i.h.bf16 %v3742_v17  ;;  %v3743_v7 = vunpack.i.l.bf16 %v3742_v17  ;;  %v3749_v21 = vunpack.i.h.bf16 %v3747_v20  ;;  %v3748_v27 = vunpack.i.l.bf16 %v3747_v20 }
  0xa1   : > { %v4261_v22 = vpack.c.bf16 %v757_v16, %v756_v26  ;;  %v759_v25 = vld [vmem:[#allocation2 + $0x48] sm:$0xff] }
  0xa2   : > { %v4263_v3 = vpack.c.bf16 %v759_v25, %v758_v19  ;;  %3356 = vmatpush3.bf16.msra.mxu0 %v3844_v59  ;;  %514 = vst.msk [vmem:[#allocation2 + $0x78] sm:$0xff] %vm500_vm3, %v3744_v6  ;;  %513 = vst.msk [vmem:[#allocation2 + $0x70] sm:$0xff] %vm500_vm3, %v3743_v7 }
  0xa3   : > { %3325 = vmatprep.mubr.msk.bf16.mxu0 %vm226_vm2, %v4261_v22  ;;  %3357 = vmatprep.subr.bf16.mxu0 %v3845_v23  ;;  %516 = vst.msk [vmem:[#allocation2 + $0x88] sm:$0xff] %vm500_vm3, %v3749_v21  ;;  %515 = vst.msk [vmem:[#allocation2 + $0x80] sm:$0xff] %vm500_vm3, %v3748_v27  ;;  %v3752_v35 = vpop.permute.xlu0 %3751  ;;  %v3757_v12 = vpop.permute.xlu1 %3756 }
  0xa4   : > { %548 = vst.msk [vmem:[#allocation2 + $0x79] sm:$0x7f] %vm535_vm5, %v3152_v32  ;;  %550 = vst.msk [vmem:[#allocation2 + $0x89] sm:$0x7f] %vm535_vm5, %v3156_v34  ;;  %v3754_v8 = vunpack.i.h.bf16 %v3752_v35  ;;  %v3753_v9 = vunpack.i.l.bf16 %v3752_v35  ;;  %v3759_v32 = vunpack.i.h.bf16 %v3757_v12  ;;  %v3758_v11 = vunpack.i.l.bf16 %v3757_v12 }
  0xa5   : > { %547 = vst.msk [vmem:[#allocation2 + $0x71] sm:$0xff] %vm533_vm4, %v3151_v31  ;;  %549 = vst.msk [vmem:[#allocation2 + $0x81] sm:$0xff] %vm533_vm4, %v3155_v33  ;;  %3326 = vmatmul.mubr.msk.bf16.gmra.mrb[4].mxu0 %vm226_vm2, %v4263_v3 }
  0xa6   : > { %3358 = vmatpush3.bf16.msra.mxu0 %v3845_v23  ;;  %v760_v29 = vld [vmem:[#allocation2 + $0x50] sm:$0xff]  ;;  %v761_v31 = vld [vmem:[#allocation2 + $0x58] sm:$0xff]  ;;  %v762_v14 = vld [vmem:[#allocation2 + $0x60] sm:$0xff]  ;;  %677 = vst.msk [vmem:[#allocation2 + $0x6f] sm:$0xfe] %vm663_vm6, %v3753_v9 }
  0xa7   : > { %3391 = vmatprep.subr.bf16.mxu0 %v4270_v28  ;;  %678 = vst.msk [vmem:[#allocation2 + $0x77] sm:$0xff] %vm665_vm7, %v3754_v8  ;;  %680 = vst.msk [vmem:[#allocation2 + $0x87] sm:$0xff] %vm665_vm7, %v3759_v32  ;;  %v4295_v30 = vpack.c.bf16 %v761_v31, %v760_v29  ;;  %v763_v33 = vld [vmem:[#allocation2 + $0x68] sm:$0xff]  ;;  %v3762_v34 = vpop.permute.xlu0 %3761  ;;  %v3767_v15 = vpop.permute.xlu1 %3766 }
  0xa8   : > { %679 = vst.msk [vmem:[#allocation2 + $0x7f] sm:$0xfe] %vm663_vm6, %v3758_v11  ;;  %v4297_v43 = vpack.c.bf16 %v763_v33, %v762_v14  ;;  %v3764_v44 = vunpack.i.h.bf16 %v3762_v34  ;;  %v3763_v51 = vunpack.i.l.bf16 %v3762_v34  ;;  %v3769_v59 = vunpack.i.h.bf16 %v3767_v15 }
  0xa9   : > { %v3768_v60 = vunpack.i.l.bf16 %v3767_v15  ;;  %3329 = vmatprep.mubr.msk.bf16.mxu0 %vm226_vm2, %v4295_v30 }
  0xaa   : > { %518 = vst.msk [vmem:[#allocation2 + $0x98] sm:$0xff] %vm500_vm3, %v3764_v44  ;;  %517 = vst.msk [vmem:[#allocation2 + $0x90] sm:$0xff] %vm500_vm3, %v3763_v51 }
  0xab   : > { %520 = vst.msk [vmem:[#allocation2 + $0xa8] sm:$0xff] %vm500_vm3, %v3769_v59  ;;  %519 = vst.msk [vmem:[#allocation2 + $0xa0] sm:$0xff] %vm500_vm3, %v3768_v60  ;;  %v3772_v2 = vpop.permute.xlu0 %3771  ;;  %v3777_v24 = vpop.permute.xlu1 %3776 }
  0xac   : > { %552 = vst.msk [vmem:[#allocation2 + $0x99] sm:$0x7f] %vm535_vm5, %v3160_v40  ;;  %554 = vst.msk [vmem:[#allocation2 + $0xa9] sm:$0x7f] %vm535_vm5, %v3164_v42  ;;  %v3774_v4 = vunpack.i.h.bf16 %v3772_v2  ;;  %v3773_v18 = vunpack.i.l.bf16 %v3772_v2  ;;  %v3779_v40 = vunpack.i.h.bf16 %v3777_v24  ;;  %v3778_v5 = vunpack.i.l.bf16 %v3777_v24 }
  0xad   : > { %551 = vst.msk [vmem:[#allocation2 + $0x91] sm:$0xff] %vm533_vm4, %v3159_v39  ;;  %553 = vst.msk [vmem:[#allocation2 + $0xa1] sm:$0xff] %vm533_vm4, %v3163_v41  ;;  %3330 = vmatmul.mubr.msk.bf16.gmra.mrb[8].mxu0 %vm226_vm2, %v4297_v43 }
  0xae   : > { %v764_v37 = vld [vmem:[#allocation2 + $0x70] sm:$0xff]  ;;  %v765_v23 = vld [vmem:[#allocation2 + $0x78] sm:$0xff]  ;;  %681 = vst.msk [vmem:[#allocation2 + $0x8f] sm:$0xfe] %vm663_vm6, %v3773_v18  ;;  %683 = vst.msk [vmem:[#allocation2 + $0x9f] sm:$0xfe] %vm663_vm6, %v3778_v5 }
  0xaf   : > { %v766_v39 = vld [vmem:[#allocation2 + $0x80] sm:$0xff]  ;;  %682 = vst.msk [vmem:[#allocation2 + $0x97] sm:$0xff] %vm665_vm7, %v3774_v4  ;;  %684 = vst.msk [vmem:[#allocation2 + $0xa7] sm:$0xff] %vm665_vm7, %v3779_v40  ;;  %v4323_v38 = vpack.c.bf16 %v765_v23, %v764_v37  ;;  %v767_v41 = vld [vmem:[#allocation2 + $0x88] sm:$0xff]  ;;  %v3782_v42 = vpop.permute.xlu0 %3781  ;;  %v3787_v26 = vpop.permute.xlu1 %3786 }
  0xb0   : > { %v4325_v16 = vpack.c.bf16 %v767_v41, %v766_v39  ;;  %v3784_v19 = vunpack.i.h.bf16 %v3782_v42  ;;  %v3783_v25 = vunpack.i.l.bf16 %v3782_v42  ;;  %v3789_v17 = vunpack.i.h.bf16 %v3787_v26  ;;  %v698_v42 = vld [vmem:[#allocation2] sm:$0xff] }
  0xb1   : > { %v3788_v20 = vunpack.i.l.bf16 %v3787_v26  ;;  %3333 = vmatprep.mubr.msk.bf16.mxu0 %vm226_vm2, %v4323_v38  ;;  %v699_v26 = vld [vmem:[#allocation2 + $0x8] sm:$0xff] }
  0xb2   : > { %522 = vst.msk [vmem:[#allocation2 + $0xb8] sm:$0xff] %vm500_vm3, %v3784_v19  ;;  %521 = vst.msk [vmem:[#allocation2 + $0xb0] sm:$0xff] %vm500_vm3, %v3783_v25 }
  0xb3   : > { %524 = vst.msk [vmem:[#allocation2 + $0xc8] sm:$0xff] %vm500_vm3, %v3789_v17  ;;  %523 = vst.msk [vmem:[#allocation2 + $0xc0] sm:$0xff] %vm500_vm3, %v3788_v20  ;;  %v3792_v6 = vpop.permute.xlu0 %3791  ;;  %v3797_v7 = vpop.permute.xlu1 %3796 }
  0xb4   : > { %556 = vst.msk [vmem:[#allocation2 + $0xb9] sm:$0x7f] %vm535_vm5, %v3168_v48  ;;  %558 = vst.msk [vmem:[#allocation2 + $0xc9] sm:$0x7f] %vm535_vm5, %v3172_v50  ;;  %v3794_v21 = vunpack.i.h.bf16 %v3792_v6  ;;  %v3793_v27 = vunpack.i.l.bf16 %v3792_v6  ;;  %v3799_v48 = vunpack.i.h.bf16 %v3797_v7  ;;  %v3798_v35 = vunpack.i.l.bf16 %v3797_v7 }
  0xb5   : > { %555 = vst.msk [vmem:[#allocation2 + $0xb1] sm:$0xff] %vm533_vm4, %v3167_v47  ;;  %557 = vst.msk [vmem:[#allocation2 + $0xc1] sm:$0xff] %vm533_vm4, %v3171_v49  ;;  %3334 = vmatmul.mubr.msk.bf16.gmra.mrb[12].mxu0 %vm226_vm2, %v4325_v16 }
  0xb6   : > { %v768_v45 = vld [vmem:[#allocation2 + $0x90] sm:$0xff]  ;;  %v769_v12 = vld [vmem:[#allocation2 + $0x98] sm:$0xff]  ;;  %v770_v47 = vld [vmem:[#allocation2 + $0xa0] sm:$0xff]  ;;  %685 = vst.msk [vmem:[#allocation2 + $0xaf] sm:$0xfe] %vm663_vm6, %v3793_v27 }
  0xb7   : > { %686 = vst.msk [vmem:[#allocation2 + $0xb7] sm:$0xff] %vm665_vm7, %v3794_v21  ;;  %688 = vst.msk [vmem:[#allocation2 + $0xc7] sm:$0xff] %vm665_vm7, %v3799_v48  ;;  %v4351_v46 = vpack.c.bf16 %v769_v12, %v768_v45  ;;  %v771_v49 = vld [vmem:[#allocation2 + $0xa8] sm:$0xff]  ;;  %v3802_v50 = vpop.permute.xlu0 %3801  ;;  %v3807_v8 = vpop.permute.xlu1 %3806  ;;  %v730_v21 = vpack.c.bf16 %v699_v26, %v698_v42  ;;  %v3847_v27 = vld [vmem:[%s5155_s1 + $0x38] sm:$0xff]  }
  0xb8   : > { %687 = vst.msk [vmem:[#allocation2 + $0xbf] sm:$0xfe] %vm663_vm6, %v3798_v35  ;;  %v4353_v9 = vpack.c.bf16 %v771_v49, %v770_v47  ;;  %v3804_v32 = vunpack.i.h.bf16 %v3802_v50  ;;  %v3803_v11 = vunpack.i.l.bf16 %v3802_v50  ;;  %v3809_v29 = vunpack.i.h.bf16 %v3807_v8  ;;  %v3848_v48 = vld [vmem:[%s5155_s1 + $0x40] sm:$0xff]  }
  0xb9   : > { %v3808_v31 = vunpack.i.l.bf16 %v3807_v8  ;;  %3337 = vmatprep.mubr.msk.bf16.mxu0 %vm226_vm2, %v4351_v46 }
  0xba   : > { %526 = vst.msk [vmem:[#allocation2 + $0xd8] sm:$0xff] %vm500_vm3, %v3804_v32  ;;  %525 = vst.msk [vmem:[#allocation2 + $0xd0] sm:$0xff] %vm500_vm3, %v3803_v11 }
  0xbb   : > { %528 = vst.msk [vmem:[#allocation2 + $0xe8] sm:$0xff] %vm500_vm3, %v3809_v29  ;;  %527 = vst.msk [vmem:[#allocation2 + $0xe0] sm:$0xff] %vm500_vm3, %v3808_v31  ;;  %v3812_v14 = vpop.permute.xlu0 %3811  ;;  %v3817_v33 = vpop.permute.xlu1 %3816  ;;  %v3850_v29 = vld [vmem:[%s5157_s3 + $0x14] ss:$0 sps:$4 sm:$0xff]  }
  0xbc   : > { %560 = vst.msk [vmem:[#allocation2 + $0xd9] sm:$0x7f] %vm535_vm5, %v3176_v56  ;;  %562 = vst.msk [vmem:[#allocation2 + $0xe9] sm:$0x7f] %vm535_vm5, %v3180_v58  ;;  %v3814_v34 = vunpack.i.h.bf16 %v3812_v14  ;;  %v3813_v15 = vunpack.i.l.bf16 %v3812_v14  ;;  %v3819_v56 = vunpack.i.h.bf16 %v3817_v33  ;;  %v3818_v44 = vunpack.i.l.bf16 %v3817_v33 }
  0xbd   : > { %559 = vst.msk [vmem:[#allocation2 + $0xd1] sm:$0xff] %vm533_vm4, %v3175_v55  ;;  %561 = vst.msk [vmem:[#allocation2 + $0xe1] sm:$0xff] %vm533_vm4, %v3179_v57  ;;  %3338 = vmatmul.mubr.msk.bf16.gmra.mrb[16].mxu0 %vm226_vm2, %v4353_v9  ;;  %v2134_v14 = vsel %vm2132_vm10, %v3850_v29, 0 }
  0xbe   : > { %v772_v53 = vld [vmem:[#allocation2 + $0xb0] sm:$0xff]  ;;  %v773_v51 = vld [vmem:[#allocation2 + $0xb8] sm:$0xff]  ;;  %689 = vst.msk [vmem:[#allocation2 + $0xcf] sm:$0xfe] %vm663_vm6, %v3813_v15  ;;  %691 = vst.msk [vmem:[#allocation2 + $0xdf] sm:$0xfe] %vm663_vm6, %v3818_v44 }
  0xbf   : > { %v774_v55 = vld [vmem:[#allocation2 + $0xc0] sm:$0xff]  ;;  %690 = vst.msk [vmem:[#allocation2 + $0xd7] sm:$0xff] %vm665_vm7, %v3814_v34  ;;  %692 = vst.msk [vmem:[#allocation2 + $0xe7] sm:$0xff] %vm665_vm7, %v3819_v56  ;;  %v4379_v54 = vpack.c.bf16 %v773_v51, %v772_v53  ;;  %v775_v57 = vld [vmem:[#allocation2 + $0xc8] sm:$0xff]  ;;  %v3822_v58 = vpop.permute.xlu0 %3821  ;;  %v3827_v59 = vpop.permute.xlu1 %3826 }
  0xc0   : > { %v4381_v60 = vpack.c.bf16 %v775_v57, %v774_v55  ;;  %v3824_v2 = vunpack.i.h.bf16 %v3822_v58  ;;  %v3823_v24 = vunpack.i.l.bf16 %v3822_v58  ;;  %v3829_v4 = vunpack.i.h.bf16 %v3827_v59 }
  0xc1   : > { %v3828_v18 = vunpack.i.l.bf16 %v3827_v59  ;;  %3341 = vmatprep.mubr.msk.bf16.mxu0 %vm226_vm2, %v4379_v54 }
  0xc2   : > { %530 = vst.msk [vmem:[#allocation2 + $0xf8] sm:$0xff] %vm500_vm3, %v3824_v2  ;;  %529 = vst.msk [vmem:[#allocation2 + $0xf0] sm:$0xff] %vm500_vm3, %v3823_v24 }
  0xc3   : > { %532 = vst.msk [vmem:[#allocation2 + $0x108] sm:$0xff] %vm500_vm3, %v3829_v4  ;;  %531 = vst.msk [vmem:[#allocation2 + $0x100] sm:$0xff] %vm500_vm3, %v3828_v18  ;;  %v3832_v40 = vpop.permute.xlu0 %3831  ;;  %v3837_v5 = vpop.permute.xlu1 %3836 }
  0xc4   : > { %564 = vst.msk [vmem:[#allocation2 + $0xf9] sm:$0x7f] %vm535_vm5, %v3184_v1  ;;  %566 = vst.msk [vmem:[#allocation2 + $0x109] sm:$0x7f] %vm535_vm5, %v3188_v13  ;;  %v3834_v37 = vunpack.i.h.bf16 %v3832_v40  ;;  %v3833_v23 = vunpack.i.l.bf16 %v3832_v40  ;;  %v3839_v1 = vunpack.i.h.bf16 %v3837_v5  ;;  %v3838_v39 = vunpack.i.l.bf16 %v3837_v5 }
  0xc5   : > { %563 = vst.msk [vmem:[#allocation2 + $0xf1] sm:$0xff] %vm533_vm4, %v3183_v63  ;;  %565 = vst.msk [vmem:[#allocation2 + $0x101] sm:$0xff] %vm533_vm4, %v3187_v10  ;;  %3342 = vmatmul.mubr.msk.bf16.gmra.mrb[20].mxu0 %vm226_vm2, %v4381_v60 }
  0xc6   : > { %v776_v61 = vld [vmem:[#allocation2 + $0xd0] sm:$0xff]  ;;  %v777_v41 = vld [vmem:[#allocation2 + $0xd8] sm:$0xff]  ;;  %v778_v63 = vld [vmem:[#allocation2 + $0xe0] sm:$0xff]  ;;  %693 = vst.msk [vmem:[#allocation2 + $0xef] sm:$0xfe] %vm663_vm6, %v3833_v23 }
  0xc7   : > { %694 = vst.msk [vmem:[#allocation2 + $0xf7] sm:$0xff] %vm665_vm7, %v3834_v37  ;;  %696 = vst.msk [vmem:[#allocation2 + $0x107] sm:$0xff] %vm665_vm7, %v3839_v1  ;;  %v796_v62 = vpack.c.bf16 %v777_v41, %v776_v61  ;;  %v779_v10 = vld [vmem:[#allocation2 + $0xe8] sm:$0xff] }
  0xc8   : > { %695 = vst.msk [vmem:[#allocation2 + $0xff] sm:$0xfe] %vm663_vm6, %v3838_v39  ;;  %v797_v13 = vpack.c.bf16 %v779_v10, %v778_v63 }
  0xc9   : > { %3345 = vmatprep.mubr.msk.bf16.mxu0 %vm226_vm2, %v796_v62 }
  0xcd   : > { %3346 = vmatmul.mubr.msk.bf16.gmra.mrb[24].mxu0 %vm226_vm2, %v797_v13 }
  0xce   : > { %v780_v19 = vld [vmem:[#allocation2 + $0xf0] sm:$0xff]  ;;  %v781_v25 = vld [vmem:[#allocation2 + $0xf8] sm:$0xff]  ;;  %v783_v6 = vld [vmem:[#allocation2 + $0x108] sm:$0xff] }
  0xcf   : > { %v782_v17 = vld [vmem:[#allocation2 + $0x100] sm:$0xff]  ;;  %v798_v20 = vpack.c.bf16 %v781_v25, %v780_v19 }
  0xd0   : > { %v799_v7 = vpack.c.bf16 %v783_v6, %v782_v17 }
  0xd1   : > { %3349 = vmatprep.mubr.msk.bf16.mxu0 %vm226_vm2, %v798_v20 }
  0xd5   : > { %3350 = vmatmul.mubr.msk.bf16.gmra.mrb[28].mxu0 %vm226_vm2, %v799_v7 }
  0xd6   : > { %3359 = vmatprep.mubr.msk.bf16.mxu0 %vm226_vm2, %v730_v21 }
  0xdd   : > { %3360 = vmatmul.mubr.msk.bf16.vlgmr.msra.gmra.mrb[0].mxu0 %vm226_vm2, %v4222_v36  ;;  %v1292_v36 = vld [vmem:[#allocation2 + $0x110] sm:$0xff] }
  0xde   : > { %3392 = vmatpush3.bf16.msra.mxu0 %v4270_v28  ;;  %3363 = vmatprep.mubr.msk.bf16.mxu0 %vm226_vm2, %v4230_v52 }
  0xdf   : > { %3393 = vmatprep.subr.bf16.mxu0 %v3847_v27 }
  0xe2   : > { %3394 = vmatpush3.bf16.msra.mxu0 %v3847_v27 }
  0xe3   : > { %3395 = vmatprep.subr.bf16.mxu0 %v3848_v48 }
  0xe5   : > { %3364 = vmatmul.mubr.msk.bf16.gmra.mrb[4].mxu0 %vm226_vm2, %v4261_v22 }
  0xe6   : > { %3367 = vmatprep.mubr.msk.bf16.mxu0 %vm226_vm2, %v4263_v3  ;;  %3396 = vmatpush3.bf16.msra.mxu0 %v3848_v48 }
  0xed   : > { %3368 = vmatmul.mubr.msk.bf16.gmra.mrb[8].mxu0 %vm226_vm2, %v4295_v30 }
  0xee   : > { %3371 = vmatprep.mubr.msk.bf16.mxu0 %vm226_vm2, %v4297_v43 }
  0xf5   : > { %3372 = vmatmul.mubr.msk.bf16.gmra.mrb[12].mxu0 %vm226_vm2, %v4323_v38 }
  0xf6   : > { %3375 = vmatprep.mubr.msk.bf16.mxu0 %vm226_vm2, %v4325_v16 }
  0xfd   : > { %3376 = vmatmul.mubr.msk.bf16.gmra.mrb[16].mxu0 %vm226_vm2, %v4351_v46 }
  0xfe   : > { %3379 = vmatprep.mubr.msk.bf16.mxu0 %vm226_vm2, %v4353_v9 }
 0x105   : > { %3380 = vmatmul.mubr.msk.bf16.gmra.mrb[20].mxu0 %vm226_vm2, %v4379_v54 }
 0x106   : > { %3383 = vmatprep.mubr.msk.bf16.mxu0 %vm226_vm2, %v4381_v60 }
 0x10d   : > { %3384 = vmatmul.mubr.msk.bf16.gmra.mrb[24].mxu0 %vm226_vm2, %v796_v62 }
 0x10e   : > { %3387 = vmatprep.mubr.msk.bf16.mxu0 %vm226_vm2, %v797_v13 }
 0x115   : > { %3388 = vmatmul.mubr.msk.bf16.gmra.mrb[28].mxu0 %vm226_vm2, %v798_v20 }
 0x116   : > { %3397 = vmatprep.mubr.msk.bf16.mxu0 %vm226_vm2, %v4230_v52  ;;  %v1293_v52 = vld [vmem:[#allocation2 + $0x118] sm:$0xff] }
 0x11d   : > { %3398 = vmatmul.mubr.msk.bf16.vlgmr.msra.gmra.mrb[0].mxu0 %vm226_vm2, %v4261_v22  ;;  %v1309_v22 = vpack.c.bf16 %v1293_v52, %v1292_v36 }
 0x11e   : > { %3401 = vmatprep.mubr.msk.bf16.mxu0 %vm226_vm2, %v4263_v3  ;;  %v4540_v3 = vld [vmem:[%s5156_s2] ss:$0 sm:$0xff] }
 0x125   : > { %3402 = vmatmul.mubr.msk.bf16.gmra.mrb[4].mxu0 %vm226_vm2, %v4295_v30 }
 0x126   : > { %3405 = vmatprep.mubr.msk.bf16.mxu0 %vm226_vm2, %v4297_v43 }
 0x12d   : > { %3406 = vmatmul.mubr.msk.bf16.gmra.mrb[8].mxu0 %vm226_vm2, %v4323_v38 }
 0x12e   : > { %3409 = vmatprep.mubr.msk.bf16.mxu0 %vm226_vm2, %v4325_v16 }
 0x135   : > { %3410 = vmatmul.mubr.msk.bf16.gmra.mrb[12].mxu0 %vm226_vm2, %v4351_v46  ;;  %v3849_v46 = vld [vmem:[%s5157_s3 + $0xc] sm:$0xff]  }
 0x136   : > { %3413 = vmatprep.mubr.msk.bf16.mxu0 %vm226_vm2, %v4353_v9  ;;  %3429 = vmatprep.subr.bf16.mxu1 %v3849_v46 }
 0x137   : > { %3430 = vmatpush3.bf16.msra.mxu1 %v3849_v46 }
 0x138   : > { %3665 = vmatprep.subr.msk.bf16.mxu1 %vm2132_vm10, %v3850_v29 }
 0x13b   : > { %3432 = vmatpush3.bf16.msra.mxu1 %v2134_v14 }
 0x13d   : > { %3414 = vmatmul.mubr.msk.bf16.gmra.mrb[16].mxu0 %vm226_vm2, %v4379_v54 }
 0x13e   : > { %3417 = vmatprep.mubr.msk.bf16.mxu0 %vm226_vm2, %v4381_v60 }
 0x145   : > { %3418 = vmatmul.mubr.msk.bf16.gmra.mrb[20].mxu0 %vm226_vm2, %v796_v62 }
 0x146   : > { %3421 = vmatprep.mubr.msk.bf16.mxu0 %vm226_vm2, %v797_v13 }
 0x14d   : > { %3422 = vmatmul.mubr.msk.bf16.gmra.mrb[24].mxu0 %vm226_vm2, %v798_v20 }
 0x14e   : > { %3425 = vmatprep.mubr.msk.bf16.mxu0 %vm226_vm2, %v799_v7 }
 0x155   : > { %3426 = vmatmul.mubr.msk.bf16.gmra.mrb[28].mxu0 %vm226_vm2, %v1309_v22 }
 0x1f0   : > { %v3399_v28 = vpop.f32.mrb[0].mxu0 }
 0x1f1   : > { %v1584_v30 = vadd.f32 %v3399_v28, %v4540_v3  ;;  %v1417_v43 = vpop.f32.mrb[1].mxu0 }
 0x1f2   : > { %v3400_v38 = vpop.f32.mrb[2].mxu0  ;;  %v1582_v47 = vadd.f32 %v4540_v3, %v1417_v43 }
 0x1f3   : > { %v4543_v16 = vmax.f32 %v1584_v30, 0.0  ;;  %v1585_v35 = vadd.f32 %v3400_v38, %v4540_v3  ;;  %v1420_v45 = vpop.f32.mrb[3].mxu0 }
 0x1f4   : > { %v1583_v50 = vadd.f32 %v4540_v3, %v1420_v45  ;;  %v4559_v32 = vmax.f32 %v1582_v47, 0.0 }
 0x1f5   : > { %v4546_v12 = vmax.f32 %v1585_v35, 0.0  ;;  %1682 = vrot.lane.b32.xlu0 %v4543_v16, %s3866_s24 }
 0x1f6   : > { %v4566_v31 = vmax.f32 %v1583_v50, 0.0 }
 0x1f7   : > { %1684 = vrot.lane.b32.xlu1 %v4546_v12, %s3866_s24 }
 0x1f8   : > { %v3403_v49 = vpop.f32.mrb[4].mxu0 }
 0x1f9   : > { %1845 = vrot.lane.b32.xlu0 %v4543_v16, %s3864_s27  ;;  %v1433_v8 = vpop.f32.mrb[5].mxu0  ;;  %v1588_v33 = vadd.f32 %v3403_v49, %v4540_v3 }
 0x1fa   : > { %v3404_v9 = vpop.f32.mrb[6].mxu0  ;;  %v1586_v0 = vadd.f32 %v4540_v3, %v1433_v8 }
 0x1fb   : > { %1847 = vrot.lane.b32.xlu1 %v4546_v12, %s3864_s27  ;;  %v1436_v11 = vpop.f32.mrb[7].mxu0  ;;  %v1589_v15 = vadd.f32 %v3404_v9, %v4540_v3  ;;  %v4586_v53 = vmax.f32 %v1588_v33, 0.0 }
 0x1fc   : > { %v1587_v57 = vadd.f32 %v4540_v3, %v1436_v11  ;;  %v4600_v60 = vmax.f32 %v1586_v0, 0.0 }
 0x1fd   : > { %1678 = vrot.lane.b32.xlu0 %v4559_v32, %s3866_s24  ;;  %v4590_v55 = vmax.f32 %v1589_v15, 0.0 }
 0x1fe   : > { %v4604_v24 = vmax.f32 %v1587_v57, 0.0 }
 0x1ff   : > { %1680 = vrot.lane.b32.xlu1 %v4566_v31, %s3866_s24 }
 0x200   : > { %v3407_v34 = vpop.f32.mrb[8].mxu0 }
 0x201   : > { %1841 = vrot.lane.b32.xlu0 %v4559_v32, %s3864_s27  ;;  %v1449_v56 = vpop.f32.mrb[9].mxu0  ;;  %v1592_v4 = vadd.f32 %v3407_v34, %v4540_v3 }
 0x202   : > { %v3408_v44 = vpop.f32.mrb[10].mxu0  ;;  %v1590_v10 = vadd.f32 %v4540_v3, %v1449_v56 }
 0x203   : > { %1843 = vrot.lane.b32.xlu1 %v4566_v31, %s3864_s27  ;;  %v1452_v51 = vpop.f32.mrb[11].mxu0  ;;  %v1593_v40 = vadd.f32 %v3408_v44, %v4540_v3  ;;  %v4618_v39 = vmax.f32 %v1592_v4, 0.0 }
 0x204   : > { %v1591_v42 = vadd.f32 %v4540_v3, %v1452_v51  ;;  %v4636_v20 = vmax.f32 %v1590_v10, 0.0 }
 0x205   : > { %1690 = vrot.lane.b32.xlu0 %v4586_v53, %s3866_s24  ;;  %v4624_v62 = vmax.f32 %v1593_v40, 0.0 }
 0x206   : > { %v4642_v27 = vmax.f32 %v1591_v42, 0.0 }
 0x207   : > { %1692 = vrot.lane.b32.xlu1 %v4590_v55, %s3866_s24 }
 0x208   : > { %v3411_v54 = vpop.f32.mrb[12].mxu0 }
 0x209   : > { %1853 = vrot.lane.b32.xlu0 %v4586_v53, %s3864_s27  ;;  %v1465_v58 = vpop.f32.mrb[13].mxu0  ;;  %v1596_v48 = vadd.f32 %v3411_v54, %v4540_v3 }
 0x20a   : > { %v3412_v59 = vpop.f32.mrb[14].mxu0  ;;  %v1594_v49 = vadd.f32 %v4540_v3, %v1465_v58 }
 0x20b   : > { %1855 = vrot.lane.b32.xlu1 %v4590_v55, %s3864_s27  ;;  %v1468_v2 = vpop.f32.mrb[15].mxu0  ;;  %v1597_v52 = vadd.f32 %v3412_v59, %v4540_v3  ;;  %v4654_v38 = vmax.f32 %v1596_v48, 0.0 }
 0x20c   : > { %v1595_v8 = vadd.f32 %v4540_v3, %v1468_v2  ;;  %v4672_v33 = vmax.f32 %v1594_v49, 0.0 }
 0x20d   : > { %1686 = vrot.lane.b32.xlu0 %v4600_v60, %s3866_s24  ;;  %v4660_v46 = vmax.f32 %v1597_v52, 0.0 }
 0x20e   : > { %v4678_v44 = vmax.f32 %v1595_v8, 0.0 }
 0x20f   : > { %1688 = vrot.lane.b32.xlu1 %v4604_v24, %s3866_s24 }
 0x210   : > { %v3415_v18 = vpop.f32.mrb[16].mxu0 }
 0x211   : > { %v1600_v5 = vadd.f32 %v3415_v18, %v4540_v3  ;;  %1849 = vrot.lane.b32.xlu0 %v4600_v60, %s3864_s27  ;;  %v1481_v37 = vpop.f32.mrb[17].mxu0 }
 0x212   : > { %v4616_v23 = vadd.f32 %v4540_v3, %v1481_v37  ;;  %v3416_v1 = vpop.f32.mrb[18].mxu0 }
 0x213   : > { %v1601_v61 = vadd.f32 %v3416_v1, %v4540_v3  ;;  %1851 = vrot.lane.b32.xlu1 %v4604_v24, %s3864_s27  ;;  %v1484_v41 = vpop.f32.mrb[19].mxu0  ;;  %v4686_v51 = vmax.f32 %v1600_v5, 0.0 }
 0x214   : > { %v1599_v63 = vadd.f32 %v4540_v3, %v1484_v41  ;;  %v4705_v54 = vmax.f32 %v4616_v23, 0.0 }
 0x215   : > { %1698 = vrot.lane.b32.xlu0 %v4618_v39, %s3866_s24  ;;  %v4690_v0 = vmax.f32 %v1601_v61, 0.0 }
 0x216   : > { %v4709_v57 = vmax.f32 %v1599_v63, 0.0 }
 0x217   : > { %1700 = vrot.lane.b32.xlu1 %v4624_v62, %s3866_s24 }
 0x218   : > { %v3419_v13 = vpop.f32.mrb[20].mxu0 }
 0x219   : > { %v1604_v26 = vadd.f32 %v3419_v13, %v4540_v3  ;;  %1861 = vrot.lane.b32.xlu0 %v4618_v39, %s3864_s27  ;;  %v1497_v19 = vpop.f32.mrb[21].mxu0 }
 0x21a   : > { %v1602_v25 = vadd.f32 %v4540_v3, %v1497_v19  ;;  %v3420_v17 = vpop.f32.mrb[22].mxu0 }
 0x21b   : > { %v1605_v6 = vadd.f32 %v3420_v17, %v4540_v3  ;;  %1863 = vrot.lane.b32.xlu1 %v4624_v62, %s3864_s27  ;;  %v1500_v7 = vpop.f32.mrb[23].mxu0  ;;  %v4717_v58 = vmax.f32 %v1604_v26, 0.0 }
 0x21c   : > { %v1603_v21 = vadd.f32 %v4540_v3, %v1500_v7  ;;  %v4729_v2 = vmax.f32 %v1602_v25, 0.0 }
 0x21d   : > { %1694 = vrot.lane.b32.xlu0 %v4636_v20, %s3866_s24  ;;  %v4721_v59 = vmax.f32 %v1605_v6, 0.0 }
 0x21e   : > { %v4733_v4 = vmax.f32 %v1603_v21, 0.0 }
 0x21f   : > { %1696 = vrot.lane.b32.xlu1 %v4642_v27, %s3866_s24 }
 0x220   : > { %v3423_v36 = vpop.f32.mrb[24].mxu0 }
 0x221   : > { %v1608_v22 = vadd.f32 %v3423_v36, %v4540_v3  ;;  %1857 = vrot.lane.b32.xlu0 %v4636_v20, %s3864_s27  ;;  %v1513_v28 = vpop.f32.mrb[25].mxu0 }
 0x222   : > { %v1606_v30 = vadd.f32 %v4540_v3, %v1513_v28  ;;  %v3424_v43 = vpop.f32.mrb[26].mxu0 }
 0x223   : > { %v1609_v35 = vadd.f32 %v3424_v43, %v4540_v3  ;;  %1859 = vrot.lane.b32.xlu1 %v4642_v27, %s3864_s27  ;;  %v1516_v45 = vpop.f32.mrb[27].mxu0  ;;  %v4741_v18 = vmax.f32 %v1608_v22, 0.0  ;;  %v4838_v43 = vld [vmem:[%s5157_s3 + $0x18] sm:$0xff]  }
 0x224   : > { %v1607_v47 = vadd.f32 %v4540_v3, %v1516_v45  ;;  %v4753_v5 = vmax.f32 %v1606_v30, 0.0 }
 0x225   : > { %1706 = vrot.lane.b32.xlu0 %v4654_v38, %s3866_s24  ;;  %v4745_v40 = vmax.f32 %v1609_v35, 0.0 }
 0x226   : > { %v4757_v37 = vmax.f32 %v1607_v47, 0.0 }
 0x227   : > { %1708 = vrot.lane.b32.xlu1 %v4660_v46, %s3866_s24 }
 0x228   : > { %v3427_v50 = vpop.f32.mrb[28].mxu0 }
 0x229   : > { %v1612_v9 = vadd.f32 %v3427_v50, %v4540_v3  ;;  %1869 = vrot.lane.b32.xlu0 %v4654_v38, %s3864_s27  ;;  %v1529_v11 = vpop.f32.mrb[29].mxu0 }
 0x22a   : > { %v1610_v29 = vadd.f32 %v4540_v3, %v1529_v11  ;;  %v3428_v14 = vpop.f32.mrb[30].mxu0 }
 0x22b   : > { %v1613_v34 = vadd.f32 %v3428_v14, %v4540_v3  ;;  %1871 = vrot.lane.b32.xlu1 %v4660_v46, %s3864_s27  ;;  %v1532_v15 = vpop.f32.mrb[31].mxu0  ;;  %v4765_v23 = vmax.f32 %v1612_v9, 0.0 }
 0x22c   : > { %v1611_v56 = vadd.f32 %v4540_v3, %v1532_v15  ;;  %v4697_v3 = vld [vmem:[%s5157_s3] sm:$0xff]   ;;  %v4773_v61 = vmax.f32 %v1610_v29, 0.0 }
 0x22d   : > { %1702 = vrot.lane.b32.xlu0 %v4672_v33, %s3866_s24  ;;  %3465 = vmatprep.subr.bf16.mxu1 %v4697_v3  ;;  %v4769_v1 = vmax.f32 %v1613_v34, 0.0 }
 0x22e   : > { %v4778_v63 = vmax.f32 %v1611_v56, 0.0 }
 0x22f   : > { %1704 = vrot.lane.b32.xlu1 %v4678_v44, %s3866_s24 }
 0x231   : > { %1865 = vrot.lane.b32.xlu0 %v4672_v33, %s3864_s27 }
 0x233   : > { %1867 = vrot.lane.b32.xlu1 %v4678_v44, %s3864_s27 }
 0x235   : > { %1714 = vrot.lane.b32.xlu0 %v4686_v51, %s3866_s24 }
 0x237   : > { %1716 = vrot.lane.b32.xlu1 %v4690_v0, %s3866_s24 }
 0x239   : > { %1877 = vrot.lane.b32.xlu0 %v4686_v51, %s3864_s27 }
 0x23b   : > { %1879 = vrot.lane.b32.xlu1 %v4690_v0, %s3864_s27 }
 0x23d   : > { %1710 = vrot.lane.b32.xlu0 %v4705_v54, %s3866_s24 }
 0x23f   : > { %1712 = vrot.lane.b32.xlu1 %v4709_v57, %s3866_s24 }
 0x241   : > { %1873 = vrot.lane.b32.xlu0 %v4705_v54, %s3864_s27 }
 0x243   : > { %1875 = vrot.lane.b32.xlu1 %v4709_v57, %s3864_s27 }
 0x245   : > { %1722 = vrot.lane.b32.xlu0 %v4717_v58, %s3866_s24 }
 0x247   : > { %1724 = vrot.lane.b32.xlu1 %v4721_v59, %s3866_s24 }
 0x249   : > { %1885 = vrot.lane.b32.xlu0 %v4717_v58, %s3864_s27 }
 0x24b   : > { %1887 = vrot.lane.b32.xlu1 %v4721_v59, %s3864_s27 }
 0x24d   : > { %1718 = vrot.lane.b32.xlu0 %v4729_v2, %s3866_s24 }
 0x24f   : > { %1720 = vrot.lane.b32.xlu1 %v4733_v4, %s3866_s24 }
 0x251   : > { %1881 = vrot.lane.b32.xlu0 %v4729_v2, %s3864_s27 }
 0x253   : > { %1883 = vrot.lane.b32.xlu1 %v4733_v4, %s3864_s27 }
 0x255   : > { %1730 = vrot.lane.b32.xlu0 %v4741_v18, %s3866_s24 }
 0x257   : > { %1732 = vrot.lane.b32.xlu1 %v4745_v40, %s3866_s24 }
 0x259   : > { %1893 = vrot.lane.b32.xlu0 %v4741_v18, %s3864_s27 }
 0x25b   : > { %1895 = vrot.lane.b32.xlu1 %v4745_v40, %s3864_s27 }
 0x25d   : > { %1726 = vrot.lane.b32.xlu0 %v4753_v5, %s3866_s24 }
 0x25f   : > { %1728 = vrot.lane.b32.xlu1 %v4757_v37, %s3866_s24 }
 0x261   : > { %1889 = vrot.lane.b32.xlu0 %v4753_v5, %s3864_s27 }
 0x263   : > { %1891 = vrot.lane.b32.xlu1 %v4757_v37, %s3864_s27 }
 0x265   : > { %1738 = vrot.lane.b32.xlu0 %v4765_v23, %s3866_s24 }
 0x267   : > { %v1683_v41 = vpop.permute.xlu0 %1682  ;;  %1740 = vrot.lane.b32.xlu1 %v4769_v1, %s3866_s24 }
 0x268   : > { %1777 = vst.msk [vmem:[#allocation3 + $0x20] sm:$0xff] %vm1774_vm12, %v1683_v41 }
 0x269   : > { %v1685_v10 = vpop.permute.xlu1 %1684  ;;  %1734 = vrot.lane.b32.xlu0 %v4773_v61, %s3866_s24 }
 0x26a   : > { %1778 = vst.msk [vmem:[#allocation3 + $0x28] sm:$0xff] %vm1774_vm12, %v1685_v10 }
 0x26b   : > { %1811 = vst.msk [vmem:[#allocation3 + $0x21] sm:$0xff] %vm1807_vm13, %v4543_v16  ;;  %v1846_v13 = vpop.permute.xlu0 %1845  ;;  %1736 = vrot.lane.b32.xlu1 %v4778_v63, %s3866_s24 }
 0x26c   : > { %1812 = vst.msk [vmem:[#allocation3 + $0x29] sm:$0x7f] %vm1809_vm14, %v4546_v12 }
 0x26d   : > { %1941 = vst.msk [vmem:[#allocation3 + $0x1f] sm:$0xfe] %vm1937_vm15, %v1846_v13  ;;  %v1848_v42 = vpop.permute.xlu1 %1847  ;;  %1897 = vrot.lane.b32.xlu0 %v4773_v61, %s3864_s27 }
 0x26e   : > { %1942 = vst.msk [vmem:[#allocation3 + $0x27] sm:$0xff] %vm1939_vm0, %v1848_v42 }
 0x26f   : > { %v1679_v26 = vpop.permute.xlu0 %1678  ;;  %1899 = vrot.lane.b32.xlu1 %v4778_v63, %s3864_s27 }
 0x270   : > { %1775 = vst.msk [vmem:[#allocation3 + $0x10] sm:$0xff] %vm1774_vm12, %v1679_v26 }
 0x271   : > { %v1681_v16 = vpop.permute.xlu1 %1680  ;;  %1901 = vrot.lane.b32.xlu0 %v4765_v23, %s3864_s27 }
 0x272   : > { %1776 = vst.msk [vmem:[#allocation3 + $0x18] sm:$0xff] %vm1774_vm12, %v1681_v16 }
 0x273   : > { %1808 = vst.msk [vmem:[#allocation3 + $0x11] sm:$0xff] %vm1807_vm13, %v4559_v32  ;;  %v1842_v12 = vpop.permute.xlu0 %1841  ;;  %1903 = vrot.lane.b32.xlu1 %v4769_v1, %s3864_s27 }
 0x274   : > { %1810 = vst.msk [vmem:[#allocation3 + $0x19] sm:$0x7f] %vm1809_vm14, %v4566_v31 }
 0x275   : > { %1938 = vst.msk [vmem:[#allocation3 + $0xf] sm:$0xfe] %vm1937_vm15, %v1842_v12  ;;  %v1844_v19 = vpop.permute.xlu1 %1843  ;;  %v2025_v31 = vld [vmem:[#allocation3 + $0x20] sm:$0xff]  ;;  %v2026_v6 = vld [vmem:[#allocation3 + $0x28] sm:$0xff] }
 0x276   : > { %1940 = vst.msk [vmem:[#allocation3 + $0x17] sm:$0xff] %vm1939_vm0, %v1844_v19  ;;  %v4817_v22 = vpack.c.bf16 %v2026_v6, %v2025_v31 }
 0x277   : > { %v1691_v25 = vpop.permute.xlu0 %1690 }
 0x278   : > { %1781 = vst.msk [vmem:[#allocation3 + $0x40] sm:$0xff] %vm1774_vm12, %v1691_v25 }
 0x279   : > { %v1693_v17 = vpop.permute.xlu1 %1692 }
 0x27a   : > { %1782 = vst.msk [vmem:[#allocation3 + $0x48] sm:$0xff] %vm1774_vm12, %v1693_v17 }
 0x27b   : > { %1815 = vst.msk [vmem:[#allocation3 + $0x41] sm:$0xff] %vm1807_vm13, %v4586_v53  ;;  %v1854_v32 = vpop.permute.xlu0 %1853  ;;  %v3852_v53 = vld [vmem:[%s5157_s3 + $0x8] ss:$0 sps:$4 sm:$0xff]  }
 0x27c   : > { %1816 = vst.msk [vmem:[#allocation3 + $0x49] sm:$0x7f] %vm1809_vm14, %v4590_v55  ;;  %v2355_v30 = vsel %vm2132_vm10, %v3852_v53, 0 }
 0x27d   : > { %1945 = vst.msk [vmem:[#allocation3 + $0x3f] sm:$0xfe] %vm1937_vm15, %v1854_v32  ;;  %v1856_v7 = vpop.permute.xlu1 %1855  ;;  %v2023_v21 = vld [vmem:[#allocation3 + $0x10] sm:$0xff]  ;;  %v2024_v48 = vld [vmem:[#allocation3 + $0x18] sm:$0xff] }
 0x27e   : > { %1946 = vst.msk [vmem:[#allocation3 + $0x47] sm:$0xff] %vm1939_vm0, %v1856_v7  ;;  %v4815_v36 = vpack.c.bf16 %v2024_v48, %v2023_v21 }
 0x27f   : > { %v1687_v52 = vpop.permute.xlu0 %1686 }
 0x280   : > { %1779 = vst.msk [vmem:[#allocation3 + $0x30] sm:$0xff] %vm1774_vm12, %v1687_v52  ;;  %3433 = vmatprep.mubr.msk.bf16.mxu1 %vm267_vm11, %v4815_v36 }
 0x281   : > { %3434 = vmatmul.mubr.msk.bf16.vlgmr.msra.gmra.mrb[0].mxu1 %vm267_vm11, %v4817_v22  ;;  %v1689_v55 = vpop.permute.xlu1 %1688 }
 0x282   : > { %1780 = vst.msk [vmem:[#allocation3 + $0x38] sm:$0xff] %vm1774_vm12, %v1689_v55  ;;  %3466 = vmatpush3.bf16.msra.mxu1 %v4697_v3 }
 0x283   : > { %1813 = vst.msk [vmem:[#allocation3 + $0x31] sm:$0xff] %vm1807_vm13, %v4600_v60  ;;  %v1850_v28 = vpop.permute.xlu0 %1849  ;;  %3666 = vmatprep.subr.msk.bf16.mxu1 %vm2132_vm10, %v3852_v53 }
 0x284   : > { %1814 = vst.msk [vmem:[#allocation3 + $0x39] sm:$0x7f] %vm1809_vm14, %v4604_v24 }
 0x285   : > { %1943 = vst.msk [vmem:[#allocation3 + $0x2f] sm:$0xfe] %vm1937_vm15, %v1850_v28  ;;  %v1852_v35 = vpop.permute.xlu1 %1851  ;;  %v2029_v47 = vld [vmem:[#allocation3 + $0x40] sm:$0xff]  ;;  %v2030_v49 = vld [vmem:[#allocation3 + $0x48] sm:$0xff] }
 0x286   : > { %1944 = vst.msk [vmem:[#allocation3 + $0x37] sm:$0xff] %vm1939_vm0, %v1852_v35  ;;  %3468 = vmatpush3.bf16.msra.mxu1 %v2355_v30  ;;  %v4853_v14 = vpack.c.bf16 %v2030_v49, %v2029_v47 }
 0x287   : > { %v1699_v60 = vpop.permute.xlu0 %1698  ;;  %3501 = vmatprep.subr.bf16.mxu1 %v4838_v43 }
 0x288   : > { %1785 = vst.msk [vmem:[#allocation3 + $0x60] sm:$0xff] %vm1774_vm12, %v1699_v60 }
 0x289   : > { %v1701_v24 = vpop.permute.xlu1 %1700 }
 0x28a   : > { %1786 = vst.msk [vmem:[#allocation3 + $0x68] sm:$0xff] %vm1774_vm12, %v1701_v24 }
 0x28b   : > { %1819 = vst.msk [vmem:[#allocation3 + $0x61] sm:$0xff] %vm1807_vm13, %v4618_v39  ;;  %v1862_v45 = vpop.permute.xlu0 %1861 }
 0x28c   : > { %1820 = vst.msk [vmem:[#allocation3 + $0x69] sm:$0x7f] %vm1809_vm14, %v4624_v62 }
 0x28d   : > { %1949 = vst.msk [vmem:[#allocation3 + $0x5f] sm:$0xfe] %vm1937_vm15, %v1862_v45  ;;  %v1864_v50 = vpop.permute.xlu1 %1863  ;;  %v2027_v8 = vld [vmem:[#allocation3 + $0x30] sm:$0xff]  ;;  %v2028_v9 = vld [vmem:[#allocation3 + $0x38] sm:$0xff] }
 0x28e   : > { %1950 = vst.msk [vmem:[#allocation3 + $0x67] sm:$0xff] %vm1939_vm0, %v1864_v50  ;;  %v4851_v11 = vpack.c.bf16 %v2028_v9, %v2027_v8 }
 0x28f   : > { %v1695_v29 = vpop.permute.xlu0 %1694 }
 0x290   : > { %1783 = vst.msk [vmem:[#allocation3 + $0x50] sm:$0xff] %vm1774_vm12, %v1695_v29  ;;  %3437 = vmatprep.mubr.msk.bf16.mxu1 %vm267_vm11, %v4851_v11 }
 0x291   : > { %3438 = vmatmul.mubr.msk.bf16.gmra.mrb[4].mxu1 %vm267_vm11, %v4853_v14  ;;  %v1697_v39 = vpop.permute.xlu1 %1696 }
 0x292   : > { %1784 = vst.msk [vmem:[#allocation3 + $0x58] sm:$0xff] %vm1774_vm12, %v1697_v39 }
 0x293   : > { %1817 = vst.msk [vmem:[#allocation3 + $0x51] sm:$0xff] %vm1807_vm13, %v4636_v20  ;;  %v1858_v62 = vpop.permute.xlu0 %1857 }
 0x294   : > { %1818 = vst.msk [vmem:[#allocation3 + $0x59] sm:$0x7f] %vm1809_vm14, %v4642_v27 }
 0x295   : > { %1947 = vst.msk [vmem:[#allocation3 + $0x4f] sm:$0xfe] %vm1937_vm15, %v1858_v62  ;;  %v1860_v34 = vpop.permute.xlu1 %1859  ;;  %v2033_v27 = vld [vmem:[#allocation3 + $0x60] sm:$0xff]  ;;  %v2034_v3 = vld [vmem:[#allocation3 + $0x68] sm:$0xff] }
 0x296   : > { %1948 = vst.msk [vmem:[#allocation3 + $0x57] sm:$0xff] %vm1939_vm0, %v1860_v34  ;;  %v4877_v16 = vpack.c.bf16 %v2034_v3, %v2033_v27 }
 0x297   : > { %v1707_v15 = vpop.permute.xlu0 %1706 }
 0x298   : > { %1789 = vst.msk [vmem:[#allocation3 + $0x80] sm:$0xff] %vm1774_vm12, %v1707_v15 }
 0x299   : > { %v1709_v56 = vpop.permute.xlu1 %1708 }
 0x29a   : > { %1790 = vst.msk [vmem:[#allocation3 + $0x88] sm:$0xff] %vm1774_vm12, %v1709_v56 }
 0x29b   : > { %1823 = vst.msk [vmem:[#allocation3 + $0x81] sm:$0xff] %vm1807_vm13, %v4654_v38  ;;  %v1870_v20 = vpop.permute.xlu0 %1869 }
 0x29c   : > { %1824 = vst.msk [vmem:[#allocation3 + $0x89] sm:$0x7f] %vm1809_vm14, %v4660_v46 }
 0x29d   : > { %1953 = vst.msk [vmem:[#allocation3 + $0x7f] sm:$0xfe] %vm1937_vm15, %v1870_v20  ;;  %v1872_v41 = vpop.permute.xlu1 %1871  ;;  %v2031_v10 = vld [vmem:[#allocation3 + $0x50] sm:$0xff]  ;;  %v2032_v13 = vld [vmem:[#allocation3 + $0x58] sm:$0xff] }
 0x29e   : > { %1954 = vst.msk [vmem:[#allocation3 + $0x87] sm:$0xff] %vm1939_vm0, %v1872_v41  ;;  %v4875_v42 = vpack.c.bf16 %v2032_v13, %v2031_v10 }
 0x29f   : > { %v1703_v26 = vpop.permute.xlu0 %1702 }
 0x2a0   : > { %1787 = vst.msk [vmem:[#allocation3 + $0x70] sm:$0xff] %vm1774_vm12, %v1703_v26  ;;  %3441 = vmatprep.mubr.msk.bf16.mxu1 %vm267_vm11, %v4875_v42 }
 0x2a1   : > { %3442 = vmatmul.mubr.msk.bf16.gmra.mrb[8].mxu1 %vm267_vm11, %v4877_v16  ;;  %v1705_v38 = vpop.permute.xlu1 %1704 }
 0x2a2   : > { %1788 = vst.msk [vmem:[#allocation3 + $0x78] sm:$0xff] %vm1774_vm12, %v1705_v38 }
 0x2a3   : > { %1821 = vst.msk [vmem:[#allocation3 + $0x71] sm:$0xff] %vm1807_vm13, %v4672_v33  ;;  %v1866_v46 = vpop.permute.xlu0 %1865 }
 0x2a4   : > { %1822 = vst.msk [vmem:[#allocation3 + $0x79] sm:$0x7f] %vm1809_vm14, %v4678_v44 }
 0x2a5   : > { %1951 = vst.msk [vmem:[#allocation3 + $0x6f] sm:$0xfe] %vm1937_vm15, %v1866_v46  ;;  %v1868_v12 = vpop.permute.xlu1 %1867  ;;  %v2037_v44 = vld [vmem:[#allocation3 + $0x80] sm:$0xff]  ;;  %v2038_v17 = vld [vmem:[#allocation3 + $0x88] sm:$0xff] }
 0x2a6   : > { %1952 = vst.msk [vmem:[#allocation3 + $0x77] sm:$0xff] %vm1939_vm0, %v1868_v12  ;;  %v4901_v48 = vpack.c.bf16 %v2038_v17, %v2037_v44  ;;  %v1973_v44 = vld [vmem:[#allocation3 + $0x8] sm:$0xff] }
 0x2a7   : > { %v1715_v19 = vpop.permute.xlu0 %1714 }
 0x2a8   : > { %1793 = vst.msk [vmem:[#allocation3 + $0xa0] sm:$0xff] %vm1774_vm12, %v1715_v19 }
 0x2a9   : > { %v1717_v25 = vpop.permute.xlu1 %1716 }
 0x2aa   : > { %1794 = vst.msk [vmem:[#allocation3 + $0xa8] sm:$0xff] %vm1774_vm12, %v1717_v25 }
 0x2ab   : > { %1827 = vst.msk [vmem:[#allocation3 + $0xa1] sm:$0xff] %vm1807_vm13, %v4686_v51  ;;  %v1878_v33 = vpop.permute.xlu0 %1877 }
 0x2ac   : > { %1828 = vst.msk [vmem:[#allocation3 + $0xa9] sm:$0x7f] %vm1809_vm14, %v4690_v0 }
 0x2ad   : > { %1957 = vst.msk [vmem:[#allocation3 + $0x9f] sm:$0xfe] %vm1937_vm15, %v1878_v33  ;;  %v1880_v32 = vpop.permute.xlu1 %1879  ;;  %v2035_v31 = vld [vmem:[#allocation3 + $0x70] sm:$0xff]  ;;  %v2036_v6 = vld [vmem:[#allocation3 + $0x78] sm:$0xff]  ;;  %v1972_v33 = vld [vmem:[#allocation3] sm:$0xff] }
 0x2ae   : > { %1958 = vst.msk [vmem:[#allocation3 + $0xa7] sm:$0xff] %vm1939_vm0, %v1880_v32  ;;  %v4899_v7 = vpack.c.bf16 %v2036_v6, %v2035_v31  ;;  %v2004_v31 = vpack.c.bf16 %v1973_v44, %v1972_v33 }
 0x2af   : > { %v1711_v21 = vpop.permute.xlu0 %1710 }
 0x2b0   : > { %1791 = vst.msk [vmem:[#allocation3 + $0x90] sm:$0xff] %vm1774_vm12, %v1711_v21  ;;  %3445 = vmatprep.mubr.msk.bf16.mxu1 %vm267_vm11, %v4899_v7  ;;  %v3854_v21 = vld [vmem:[%s5157_s3 + $0x20] ss:$0 sps:$4 sm:$0xff]  }
 0x2b1   : > { %3446 = vmatmul.mubr.msk.bf16.gmra.mrb[12].mxu1 %vm267_vm11, %v4901_v48  ;;  %v1713_v51 = vpop.permute.xlu1 %1712 }
 0x2b2   : > { %1792 = vst.msk [vmem:[#allocation3 + $0x98] sm:$0xff] %vm1774_vm12, %v1713_v51  ;;  %v2629_v51 = vsel %vm2132_vm10, %v3854_v21, 0 }
 0x2b3   : > { %1825 = vst.msk [vmem:[#allocation3 + $0x91] sm:$0xff] %vm1807_vm13, %v4705_v54  ;;  %v1874_v0 = vpop.permute.xlu0 %1873 }
 0x2b4   : > { %1826 = vst.msk [vmem:[#allocation3 + $0x99] sm:$0x7f] %vm1809_vm14, %v4709_v57 }
 0x2b5   : > { %1955 = vst.msk [vmem:[#allocation3 + $0x8f] sm:$0xfe] %vm1937_vm15, %v1874_v0  ;;  %v1876_v52 = vpop.permute.xlu1 %1875  ;;  %v2041_v57 = vld [vmem:[#allocation3 + $0xa0] sm:$0xff]  ;;  %v2042_v28 = vld [vmem:[#allocation3 + $0xa8] sm:$0xff] }
 0x2b6   : > { %1956 = vst.msk [vmem:[#allocation3 + $0x97] sm:$0xff] %vm1939_vm0, %v1876_v52  ;;  %v4925_v47 = vpack.c.bf16 %v2042_v28, %v2041_v57 }
 0x2b7   : > { %v1723_v53 = vpop.permute.xlu0 %1722 }
 0x2b8   : > { %1797 = vst.msk [vmem:[#allocation3 + $0xc0] sm:$0xff] %vm1774_vm12, %v1723_v53 }
 0x2b9   : > { %v1725_v55 = vpop.permute.xlu1 %1724 }
 0x2ba   : > { %1798 = vst.msk [vmem:[#allocation3 + $0xc8] sm:$0xff] %vm1774_vm12, %v1725_v55 }
 0x2bb   : > { %1831 = vst.msk [vmem:[#allocation3 + $0xc1] sm:$0xff] %vm1807_vm13, %v4717_v58  ;;  %v1886_v54 = vpop.permute.xlu0 %1885 }
 0x2bc   : > { %1832 = vst.msk [vmem:[#allocation3 + $0xc9] sm:$0x7f] %vm1809_vm14, %v4721_v59 }
 0x2bd   : > { %1961 = vst.msk [vmem:[#allocation3 + $0xbf] sm:$0xfe] %vm1937_vm15, %v1886_v54  ;;  %v1888_v30 = vpop.permute.xlu1 %1887  ;;  %v2039_v35 = vld [vmem:[#allocation3 + $0x90] sm:$0xff]  ;;  %v2040_v60 = vld [vmem:[#allocation3 + $0x98] sm:$0xff] }
 0x2be   : > { %1962 = vst.msk [vmem:[#allocation3 + $0xc7] sm:$0xff] %vm1939_vm0, %v1888_v30  ;;  %v4923_v24 = vpack.c.bf16 %v2040_v60, %v2039_v35 }
 0x2bf   : > { %v1719_v45 = vpop.permute.xlu0 %1718 }
 0x2c0   : > { %1795 = vst.msk [vmem:[#allocation3 + $0xb0] sm:$0xff] %vm1774_vm12, %v1719_v45  ;;  %3449 = vmatprep.mubr.msk.bf16.mxu1 %vm267_vm11, %v4923_v24 }
 0x2c1   : > { %3450 = vmatmul.mubr.msk.bf16.gmra.mrb[16].mxu1 %vm267_vm11, %v4925_v47  ;;  %v1721_v58 = vpop.permute.xlu1 %1720 }
 0x2c2   : > { %1796 = vst.msk [vmem:[#allocation3 + $0xb8] sm:$0xff] %vm1774_vm12, %v1721_v58 }
 0x2c3   : > { %1829 = vst.msk [vmem:[#allocation3 + $0xb1] sm:$0xff] %vm1807_vm13, %v4729_v2  ;;  %v1882_v59 = vpop.permute.xlu0 %1881 }
 0x2c4   : > { %1830 = vst.msk [vmem:[#allocation3 + $0xb9] sm:$0x7f] %vm1809_vm14, %v4733_v4 }
 0x2c5   : > { %1959 = vst.msk [vmem:[#allocation3 + $0xaf] sm:$0xfe] %vm1937_vm15, %v1882_v59  ;;  %v1884_v49 = vpop.permute.xlu1 %1883  ;;  %v2045_v4 = vld [vmem:[#allocation3 + $0xc0] sm:$0xff]  ;;  %v2046_v9 = vld [vmem:[#allocation3 + $0xc8] sm:$0xff] }
 0x2c6   : > { %1960 = vst.msk [vmem:[#allocation3 + $0xb7] sm:$0xff] %vm1939_vm0, %v1884_v49  ;;  %v4949_v56 = vpack.c.bf16 %v2046_v9, %v2045_v4 }
 0x2c7   : > { %v1731_v50 = vpop.permute.xlu0 %1730 }
 0x2c8   : > { %1801 = vst.msk [vmem:[#allocation3 + $0xe0] sm:$0xff] %vm1774_vm12, %v1731_v50 }
 0x2c9   : > { %v1733_v8 = vpop.permute.xlu1 %1732 }
 0x2ca   : > { %1802 = vst.msk [vmem:[#allocation3 + $0xe8] sm:$0xff] %vm1774_vm12, %v1733_v8 }
 0x2cb   : > { %1835 = vst.msk [vmem:[#allocation3 + $0xe1] sm:$0xff] %vm1807_vm13, %v4741_v18  ;;  %v1894_v2 = vpop.permute.xlu0 %1893 }
 0x2cc   : > { %1836 = vst.msk [vmem:[#allocation3 + $0xe9] sm:$0x7f] %vm1809_vm14, %v4745_v40 }
 0x2cd   : > { %1965 = vst.msk [vmem:[#allocation3 + $0xdf] sm:$0xfe] %vm1937_vm15, %v1894_v2  ;;  %v1896_v29 = vpop.permute.xlu1 %1895  ;;  %v2043_v39 = vld [vmem:[#allocation3 + $0xb0] sm:$0xff]  ;;  %v2044_v62 = vld [vmem:[#allocation3 + $0xb8] sm:$0xff] }
 0x2ce   : > { %1966 = vst.msk [vmem:[#allocation3 + $0xe7] sm:$0xff] %vm1939_vm0, %v1896_v29  ;;  %v4947_v34 = vpack.c.bf16 %v2044_v62, %v2043_v39 }
 0x2cf   : > { %v1727_v15 = vpop.permute.xlu0 %1726 }
 0x2d0   : > { %1799 = vst.msk [vmem:[#allocation3 + $0xd0] sm:$0xff] %vm1774_vm12, %v1727_v15  ;;  %3453 = vmatprep.mubr.msk.bf16.mxu1 %vm267_vm11, %v4947_v34 }
 0x2d1   : > { %3454 = vmatmul.mubr.msk.bf16.gmra.mrb[20].mxu1 %vm267_vm11, %v4949_v56  ;;  %v1729_v18 = vpop.permute.xlu1 %1728 }
 0x2d2   : > { %1800 = vst.msk [vmem:[#allocation3 + $0xd8] sm:$0xff] %vm1774_vm12, %v1729_v18 }
 0x2d3   : > { %1833 = vst.msk [vmem:[#allocation3 + $0xd1] sm:$0xff] %vm1807_vm13, %v4753_v5  ;;  %v1890_v40 = vpop.permute.xlu0 %1889 }
 0x2d4   : > { %1834 = vst.msk [vmem:[#allocation3 + $0xd9] sm:$0x7f] %vm1809_vm14, %v4757_v37 }
 0x2d5   : > { %1963 = vst.msk [vmem:[#allocation3 + $0xcf] sm:$0xfe] %vm1937_vm15, %v1890_v40  ;;  %v1892_v20 = vpop.permute.xlu1 %1891  ;;  %v2049_v37 = vld [vmem:[#allocation3 + $0xe0] sm:$0xff]  ;;  %v2050_v41 = vld [vmem:[#allocation3 + $0xe8] sm:$0xff] }
 0x2d6   : > { %1964 = vst.msk [vmem:[#allocation3 + $0xd7] sm:$0xff] %vm1939_vm0, %v1892_v20  ;;  %v2068_v46 = vpack.c.bf16 %v2050_v41, %v2049_v37 }
 0x2d7   : > { %v1739_v27 = vpop.permute.xlu0 %1738 }
 0x2d8   : > { %1805 = vst.msk [vmem:[#allocation3 + $0x100] sm:$0xff] %vm1774_vm12, %v1739_v27 }
 0x2d9   : > { %v1741_v3 = vpop.permute.xlu1 %1740 }
 0x2da   : > { %1806 = vst.msk [vmem:[#allocation3 + $0x108] sm:$0xff] %vm1774_vm12, %v1741_v3 }
 0x2db   : > { %1839 = vst.msk [vmem:[#allocation3 + $0x101] sm:$0xff] %vm1807_vm13, %v4765_v23  ;;  %v1735_v5 = vpop.permute.xlu0 %1734 }
 0x2dc   : > { %1840 = vst.msk [vmem:[#allocation3 + $0x109] sm:$0x7f] %vm1809_vm14, %v4769_v1 }
 0x2dd   : > { %1803 = vst.msk [vmem:[#allocation3 + $0xf0] sm:$0xff] %vm1774_vm12, %v1735_v5  ;;  %v1737_v10 = vpop.permute.xlu1 %1736  ;;  %v2047_v13 = vld [vmem:[#allocation3 + $0xd0] sm:$0xff]  ;;  %v2048_v26 = vld [vmem:[#allocation3 + $0xd8] sm:$0xff] }
 0x2de   : > { %1804 = vst.msk [vmem:[#allocation3 + $0xf8] sm:$0xff] %vm1774_vm12, %v1737_v10  ;;  %v2067_v38 = vpack.c.bf16 %v2048_v26, %v2047_v13 }
 0x2df   : > { %1837 = vst.msk [vmem:[#allocation3 + $0xf1] sm:$0xff] %vm1807_vm13, %v4773_v61  ;;  %v1898_v23 = vpop.permute.xlu0 %1897 }
 0x2e0   : > { %1838 = vst.msk [vmem:[#allocation3 + $0xf9] sm:$0x7f] %vm1809_vm14, %v4778_v63  ;;  %3457 = vmatprep.mubr.msk.bf16.mxu1 %vm267_vm11, %v2067_v38 }
 0x2e1   : > { %1967 = vst.msk [vmem:[#allocation3 + $0xef] sm:$0xfe] %vm1937_vm15, %v1898_v23  ;;  %3458 = vmatmul.mubr.msk.bf16.gmra.mrb[24].mxu1 %vm267_vm11, %v2068_v46  ;;  %v1900_v1 = vpop.permute.xlu1 %1899 }
 0x2e2   : > { %1968 = vst.msk [vmem:[#allocation3 + $0xf7] sm:$0xff] %vm1939_vm0, %v1900_v1 }
 0x2e3   : > { %v1902_v12 = vpop.permute.xlu0 %1901 }
 0x2e4   : > { %1969 = vst.msk [vmem:[#allocation3 + $0xff] sm:$0xfe] %vm1937_vm15, %v1902_v12 }
 0x2e5   : > { %v1904_v19 = vpop.permute.xlu1 %1903 }
 0x2e6   : > { %1970 = vst.msk [vmem:[#allocation3 + $0x107] sm:$0xff] %vm1939_vm0, %v1904_v19 }
 0x2e9   : > { %v2051_v61 = vld [vmem:[#allocation3 + $0xf0] sm:$0xff]  ;;  %v2052_v25 = vld [vmem:[#allocation3 + $0xf8] sm:$0xff] }
 0x2ea   : > { %v2069_v63 = vpack.c.bf16 %v2052_v25, %v2051_v61 }
 0x2ec   : > { %3461 = vmatprep.mubr.msk.bf16.mxu1 %vm267_vm11, %v2069_v63 }
 0x2ed   : > { %v2053_v17 = vld [vmem:[#allocation3 + $0x100] sm:$0xff]  ;;  %v2054_v32 = vld [vmem:[#allocation3 + $0x108] sm:$0xff] }
 0x2ee   : > { %v2070_v6 = vpack.c.bf16 %v2054_v32, %v2053_v17 }
 0x2f0   : > { %3462 = vmatmul.mubr.msk.bf16.gmra.mrb[28].mxu1 %vm267_vm11, %v2070_v6 }
 0x2f1   : > { %3469 = vmatprep.mubr.msk.bf16.mxu1 %vm267_vm11, %v2004_v31 }
 0x2f8   : > { %3470 = vmatmul.mubr.msk.bf16.vlgmr.msra.gmra.mrb[0].mxu1 %vm267_vm11, %v4815_v36  ;;  %v2549_v36 = vld [vmem:[#allocation3 + $0x110] sm:$0xff] }
 0x2f9   : > { %3502 = vmatpush3.bf16.msra.mxu1 %v4838_v43  ;;  %3473 = vmatprep.mubr.msk.bf16.mxu1 %vm267_vm11, %v4817_v22 }
 0x2fa   : > { %3667 = vmatprep.subr.msk.bf16.mxu1 %vm2132_vm10, %v3854_v21 }
 0x2fd   : > { %3504 = vmatpush3.bf16.msra.mxu1 %v2629_v51 }
 0x300   : > { %3474 = vmatmul.mubr.msk.bf16.gmra.mrb[4].mxu1 %vm267_vm11, %v4851_v11 }
 0x301   : > { %3477 = vmatprep.mubr.msk.bf16.mxu1 %vm267_vm11, %v4853_v14 }
 0x308   : > { %3478 = vmatmul.mubr.msk.bf16.gmra.mrb[8].mxu1 %vm267_vm11, %v4875_v42 }
 0x309   : > { %3481 = vmatprep.mubr.msk.bf16.mxu1 %vm267_vm11, %v4877_v16 }
 0x310   : > { %3482 = vmatmul.mubr.msk.bf16.gmra.mrb[12].mxu1 %vm267_vm11, %v4899_v7 }
 0x311   : > { %3485 = vmatprep.mubr.msk.bf16.mxu1 %vm267_vm11, %v4901_v48 }
 0x318   : > { %3486 = vmatmul.mubr.msk.bf16.gmra.mrb[16].mxu1 %vm267_vm11, %v4923_v24 }
 0x319   : > { %3489 = vmatprep.mubr.msk.bf16.mxu1 %vm267_vm11, %v4925_v47 }
 0x320   : > { %3490 = vmatmul.mubr.msk.bf16.gmra.mrb[20].mxu1 %vm267_vm11, %v4947_v34 }
 0x321   : > { %3493 = vmatprep.mubr.msk.bf16.mxu1 %vm267_vm11, %v4949_v56 }
 0x328   : > { %3494 = vmatmul.mubr.msk.bf16.gmra.mrb[24].mxu1 %vm267_vm11, %v2067_v38 }
 0x329   : > { %3497 = vmatprep.mubr.msk.bf16.mxu1 %vm267_vm11, %v2068_v46 }
 0x330   : > { %3498 = vmatmul.mubr.msk.bf16.gmra.mrb[28].mxu1 %vm267_vm11, %v2069_v63 }
 0x331   : > { %3505 = vmatprep.mubr.msk.bf16.mxu1 %vm267_vm11, %v4817_v22  ;;  %v2550_v22 = vld [vmem:[#allocation3 + $0x118] sm:$0xff] }
 0x332   : > { %v2566_v43 = vpack.c.bf16 %v2550_v22, %v2549_v36 }
 0x338   : > { %3506 = vmatmul.mubr.msk.bf16.vlgmr.msra.gmra.mrb[0].mxu1 %vm267_vm11, %v4851_v11  ;;  %v5047_v11 = vld [vmem:[%s5158_s4] ss:$0 sm:$0xff] }
 0x339   : > { %3509 = vmatprep.mubr.msk.bf16.mxu1 %vm267_vm11, %v4853_v14 }
 0x340   : > { %3510 = vmatmul.mubr.msk.bf16.gmra.mrb[4].mxu1 %vm267_vm11, %v4875_v42 }
 0x341   : > { %3513 = vmatprep.mubr.msk.bf16.mxu1 %vm267_vm11, %v4877_v16 }
 0x348   : > { %3514 = vmatmul.mubr.msk.bf16.gmra.mrb[8].mxu1 %vm267_vm11, %v4899_v7 }
 0x349   : > { %3517 = vmatprep.mubr.msk.bf16.mxu1 %vm267_vm11, %v4901_v48 }
 0x350   : > { %3518 = vmatmul.mubr.msk.bf16.gmra.mrb[12].mxu1 %vm267_vm11, %v4923_v24 }
 0x351   : > { %3521 = vmatprep.mubr.msk.bf16.mxu1 %vm267_vm11, %v4925_v47 }
 0x358   : > { %3522 = vmatmul.mubr.msk.bf16.gmra.mrb[16].mxu1 %vm267_vm11, %v4947_v34 }
 0x359   : > { %3525 = vmatprep.mubr.msk.bf16.mxu1 %vm267_vm11, %v4949_v56 }
 0x360   : > { %3526 = vmatmul.mubr.msk.bf16.gmra.mrb[20].mxu1 %vm267_vm11, %v2067_v38 }
 0x361   : > { %3529 = vmatprep.mubr.msk.bf16.mxu1 %vm267_vm11, %v2068_v46 }
 0x368   : > { %3530 = vmatmul.mubr.msk.bf16.gmra.mrb[24].mxu1 %vm267_vm11, %v2069_v63 }
 0x369   : > { %3533 = vmatprep.mubr.msk.bf16.mxu1 %vm267_vm11, %v2070_v6 }
 0x370   : > { %3534 = vmatmul.mubr.msk.bf16.gmra.mrb[28].mxu1 %vm267_vm11, %v2566_v43 }
 0x40b   : > { %v3507_v14 = vpop.f32.mrb[0].mxu1 }
 0x40c   : > { %v2832_v42 = vadd.f32 %v3507_v14, %v5047_v11  ;;  %v2665_v16 = vpop.f32.mrb[1].mxu1 }
 0x40d   : > { %v2830_v7 = vadd.f32 %v5047_v11, %v2665_v16  ;;  %v3508_v48 = vpop.f32.mrb[2].mxu1 }
 0x40e   : > { %v2864_v0 = vmax.f32 %v2832_v42, 0.0  ;;  %v2833_v52 = vadd.f32 %v3508_v48, %v5047_v11  ;;  %v2668_v53 = vpop.f32.mrb[3].mxu1 }
 0x40f   : > { %v2862_v55 = vmax.f32 %v2830_v7, 0.0  ;;  %v2831_v54 = vadd.f32 %v5047_v11, %v2668_v53 }
 0x410   : > { %2896 = vst.msk [vmem:[%s5054_s17 + $0x10] sm:$0xff] %vm1807_vm13, %v2864_v0  ;;  %v2865_v57 = vmax.f32 %v2833_v52, 0.0 }
 0x411   : > { %2894 = vst.msk [vmem:[%s5054_s17] sm:$0xff] %vm1807_vm13, %v2862_v55  ;;  %v2863_v28 = vmax.f32 %v2831_v54, 0.0 }
 0x412   : > { %2897 = vst.msk [vmem:[%s5054_s17 + $0x18] sm:$0xff] %vm1807_vm13, %v2865_v57 }
 0x413   : > { %2895 = vst.msk [vmem:[%s5054_s17 + $0x8] sm:$0xff] %vm1807_vm13, %v2863_v28  ;;  %v3511_v30 = vpop.f32.mrb[4].mxu1 }
 0x414   : > { %v2836_v35 = vadd.f32 %v3511_v30, %v5047_v11  ;;  %v2681_v60 = vpop.f32.mrb[5].mxu1 }
 0x415   : > { %v2834_v24 = vadd.f32 %v5047_v11, %v2681_v60  ;;  %v3512_v45 = vpop.f32.mrb[6].mxu1 }
 0x416   : > { %v2868_v47 = vmax.f32 %v2836_v35, 0.0  ;;  %v2837_v58 = vadd.f32 %v3512_v45, %v5047_v11  ;;  %v2684_v59 = vpop.f32.mrb[7].mxu1 }
 0x417   : > { %v2866_v49 = vmax.f32 %v2834_v24, 0.0  ;;  %v2835_v50 = vadd.f32 %v5047_v11, %v2684_v59 }
 0x418   : > { %2900 = vst.msk [vmem:[%s5054_s17 + $0x30] sm:$0xff] %vm1807_vm13, %v2868_v47  ;;  %v2869_v8 = vmax.f32 %v2837_v58, 0.0 }
 0x419   : > { %2898 = vst.msk [vmem:[%s5054_s17 + $0x20] sm:$0xff] %vm1807_vm13, %v2866_v49  ;;  %v2867_v2 = vmax.f32 %v2835_v50, 0.0 }
 0x41a   : > { %2901 = vst.msk [vmem:[%s5054_s17 + $0x38] sm:$0xff] %vm1807_vm13, %v2869_v8 }
 0x41b   : > { %2899 = vst.msk [vmem:[%s5054_s17 + $0x28] sm:$0xff] %vm1807_vm13, %v2867_v2  ;;  %v3515_v4 = vpop.f32.mrb[8].mxu1 }
 0x41c   : > { %v2840_v9 = vadd.f32 %v3515_v4, %v5047_v11  ;;  %v2697_v29 = vpop.f32.mrb[9].mxu1 }
 0x41d   : > { %v2838_v39 = vadd.f32 %v5047_v11, %v2697_v29  ;;  %v3516_v62 = vpop.f32.mrb[10].mxu1 }
 0x41e   : > { %v2872_v34 = vmax.f32 %v2840_v9, 0.0  ;;  %v2841_v15 = vadd.f32 %v3516_v62, %v5047_v11  ;;  %v2700_v56 = vpop.f32.mrb[11].mxu1 }
 0x41f   : > { %v2870_v18 = vmax.f32 %v2838_v39, 0.0  ;;  %v2839_v40 = vadd.f32 %v5047_v11, %v2700_v56 }
 0x420   : > { %2904 = vst.msk [vmem:[%s5054_s17 + $0x50] sm:$0xff] %vm1807_vm13, %v2872_v34  ;;  %v2873_v20 = vmax.f32 %v2841_v15, 0.0 }
 0x421   : > { %2902 = vst.msk [vmem:[%s5054_s17 + $0x40] sm:$0xff] %vm1807_vm13, %v2870_v18  ;;  %v2871_v27 = vmax.f32 %v2839_v40, 0.0 }
 0x422   : > { %2905 = vst.msk [vmem:[%s5054_s17 + $0x58] sm:$0xff] %vm1807_vm13, %v2873_v20 }
 0x423   : > { %2903 = vst.msk [vmem:[%s5054_s17 + $0x48] sm:$0xff] %vm1807_vm13, %v2871_v27  ;;  %v3519_v3 = vpop.f32.mrb[12].mxu1 }
 0x424   : > { %v2844_v5 = vadd.f32 %v3519_v3, %v5047_v11  ;;  %v2713_v37 = vpop.f32.mrb[13].mxu1 }
 0x425   : > { %v2842_v41 = vadd.f32 %v5047_v11, %v2713_v37  ;;  %v3520_v10 = vpop.f32.mrb[14].mxu1 }
 0x426   : > { %v2876_v13 = vmax.f32 %v2844_v5, 0.0  ;;  %v2845_v26 = vadd.f32 %v3520_v10, %v5047_v11  ;;  %v2716_v38 = vpop.f32.mrb[15].mxu1 }
 0x427   : > { %v2874_v23 = vmax.f32 %v2842_v41, 0.0  ;;  %v2843_v46 = vadd.f32 %v5047_v11, %v2716_v38 }
 0x428   : > { %2908 = vst.msk [vmem:[%s5054_s17 + $0x70] sm:$0xff] %vm1807_vm13, %v2876_v13  ;;  %v2877_v1 = vmax.f32 %v2845_v26, 0.0 }
 0x429   : > { %2906 = vst.msk [vmem:[%s5054_s17 + $0x60] sm:$0xff] %vm1807_vm13, %v2874_v23  ;;  %v2875_v12 = vmax.f32 %v2843_v46, 0.0 }
 0x42a   : > { %2909 = vst.msk [vmem:[%s5054_s17 + $0x78] sm:$0xff] %vm1807_vm13, %v2877_v1 }
 0x42b   : > { %2907 = vst.msk [vmem:[%s5054_s17 + $0x68] sm:$0xff] %vm1807_vm13, %v2875_v12  ;;  %v3523_v19 = vpop.f32.mrb[16].mxu1 }
 0x42c   : > { %v2848_v61 = vadd.f32 %v3523_v19, %v5047_v11  ;;  %v2729_v25 = vpop.f32.mrb[17].mxu1 }
 0x42d   : > { %v2846_v63 = vadd.f32 %v5047_v11, %v2729_v25  ;;  %v3524_v33 = vpop.f32.mrb[18].mxu1 }
 0x42e   : > { %v2880_v44 = vmax.f32 %v2848_v61, 0.0  ;;  %v2849_v17 = vadd.f32 %v3524_v33, %v5047_v11  ;;  %v2732_v32 = vpop.f32.mrb[19].mxu1 }
 0x42f   : > { %v2878_v31 = vmax.f32 %v2846_v63, 0.0  ;;  %v2847_v6 = vadd.f32 %v5047_v11, %v2732_v32 }
 0x430   : > { %2912 = vst.msk [vmem:[%s5054_s17 + $0x90] sm:$0xff] %vm1807_vm13, %v2880_v44  ;;  %v2881_v21 = vmax.f32 %v2849_v17, 0.0 }
 0x431   : > { %2910 = vst.msk [vmem:[%s5054_s17 + $0x80] sm:$0xff] %vm1807_vm13, %v2878_v31  ;;  %v2879_v51 = vmax.f32 %v2847_v6, 0.0 }
 0x432   : > { %2913 = vst.msk [vmem:[%s5054_s17 + $0x98] sm:$0xff] %vm1807_vm13, %v2881_v21 }
 0x433   : > { %2911 = vst.msk [vmem:[%s5054_s17 + $0x88] sm:$0xff] %vm1807_vm13, %v2879_v51  ;;  %v3527_v36 = vpop.f32.mrb[20].mxu1 }
 0x434   : > { %v2852_v22 = vadd.f32 %v3527_v36, %v5047_v11  ;;  %v2745_v43 = vpop.f32.mrb[21].mxu1 }
 0x435   : > { %v2850_v14 = vadd.f32 %v5047_v11, %v2745_v43  ;;  %v3528_v42 = vpop.f32.mrb[22].mxu1 }
 0x436   : > { %v2884_v16 = vmax.f32 %v2852_v22, 0.0  ;;  %v2853_v7 = vadd.f32 %v3528_v42, %v5047_v11  ;;  %v2748_v48 = vpop.f32.mrb[23].mxu1 }
 0x437   : > { %v2882_v0 = vmax.f32 %v2850_v14, 0.0  ;;  %v2851_v52 = vadd.f32 %v5047_v11, %v2748_v48 }
 0x438   : > { %2916 = vst.msk [vmem:[%s5054_s17 + $0xb0] sm:$0xff] %vm1807_vm13, %v2884_v16  ;;  %v2885_v53 = vmax.f32 %v2853_v7, 0.0 }
 0x439   : > { %2914 = vst.msk [vmem:[%s5054_s17 + $0xa0] sm:$0xff] %vm1807_vm13, %v2882_v0  ;;  %v2883_v55 = vmax.f32 %v2851_v52, 0.0 }
 0x43a   : > { %2917 = vst.msk [vmem:[%s5054_s17 + $0xb8] sm:$0xff] %vm1807_vm13, %v2885_v53 }
 0x43b   : > { %2915 = vst.msk [vmem:[%s5054_s17 + $0xa8] sm:$0xff] %vm1807_vm13, %v2883_v55  ;;  %v3531_v54 = vpop.f32.mrb[24].mxu1 }
 0x43c   : > { %v2856_v57 = vadd.f32 %v3531_v54, %v5047_v11  ;;  %v2761_v28 = vpop.f32.mrb[25].mxu1 }
 0x43d   : > { %v2854_v30 = vadd.f32 %v5047_v11, %v2761_v28  ;;  %v3532_v35 = vpop.f32.mrb[26].mxu1 }
 0x43e   : > { %v2888_v60 = vmax.f32 %v2856_v57, 0.0  ;;  %v2857_v24 = vadd.f32 %v3532_v35, %v5047_v11  ;;  %v2764_v45 = vpop.f32.mrb[27].mxu1 }
 0x43f   : > { %v2886_v47 = vmax.f32 %v2854_v30, 0.0  ;;  %v2855_v58 = vadd.f32 %v5047_v11, %v2764_v45 }
 0x440   : > { %2920 = vst.msk [vmem:[%s5054_s17 + $0xd0] sm:$0xff] %vm1807_vm13, %v2888_v60  ;;  %v2889_v59 = vmax.f32 %v2857_v24, 0.0 }
 0x441   : > { %2918 = vst.msk [vmem:[%s5054_s17 + $0xc0] sm:$0xff] %vm1807_vm13, %v2886_v47  ;;  %v2887_v49 = vmax.f32 %v2855_v58, 0.0 }
 0x442   : > { %2921 = vst.msk [vmem:[%s5054_s17 + $0xd8] sm:$0xff] %vm1807_vm13, %v2889_v59 }
 0x443   : > { %2919 = vst.msk [vmem:[%s5054_s17 + $0xc8] sm:$0xff] %vm1807_vm13, %v2887_v49  ;;  %v3535_v50 = vpop.f32.mrb[28].mxu1 }
 0x444   : > { %v2860_v8 = vadd.f32 %v3535_v50, %v5047_v11  ;;  %v2777_v2 = vpop.f32.mrb[29].mxu1 }
 0x445   : > { %v2858_v4 = vadd.f32 %v5047_v11, %v2777_v2  ;;  %v3536_v9 = vpop.f32.mrb[30].mxu1 }
 0x446   : > { %v2892_v29 = vmax.f32 %v2860_v8, 0.0  ;;  %v2861_v39 = vadd.f32 %v3536_v9, %v5047_v11  ;;  %v2780_v62 = vpop.f32.mrb[31].mxu1 }
 0x447   : > { %v2890_v34 = vmax.f32 %v2858_v4, 0.0  ;;  %v2859_v15 = vadd.f32 %v5047_v11, %v2780_v62 }
 0x448   : > { %2924 = vst.msk [vmem:[%s5054_s17 + $0xf0] sm:$0xff] %vm1807_vm13, %v2892_v29  ;;  %v2893_v56 = vmax.f32 %v2861_v39, 0.0 }
 0x449   : > { %2922 = vst.msk [vmem:[%s5054_s17 + $0xe0] sm:$0xff] %vm1807_vm13, %v2890_v34  ;;  %v2891_v18 = vmax.f32 %v2859_v15, 0.0 }
 0x44a   : > { %2925 = vst.msk [vmem:[%s5054_s17 + $0xf8] sm:$0xff] %vm1807_vm13, %v2893_v56 }
 0x44b   : > { %2923 = vst.msk [vmem:[%s5054_s17 + $0xe8] sm:$0xff] %vm1807_vm13, %v2891_v18 }
 0x44c PF: > { %s15_s18 = sadd.s32 1, %s3861_s18  }
 0x44d   : > { %p12_p4 = scmp.ge.s32.totalorder %s15_s18, 4  }
 0x44f   :  { %14 = sbr.rel (!%p12_p4) target bundleno = 1 (0x1), region = 80 }

</bundles_post_ra>
